<compile_context>
chip_gen: v7x
topology: tpu7x:2x2x1
jax: 0.10.0
libtpu: 0.0.40
codegen_flags: <defaults>
</compile_context>

<pallas_src>
import jax
import jax.numpy as jnp
from jax import lax
from jax.experimental import pallas as pl
from jax.experimental.pallas import tpu as pltpu

EPS = 1e-5


def _vmem_limit_bytes():
    # Generation-aware scoped-VMEM limit: larger on v5e/v6e (128 MiB physical),
    # conservative on v7x (64 MiB physical per TensorCore).
    cap = 64 * 1024 * 1024
    try:
        info = pltpu.get_tpu_info()
        cap = int(getattr(info, "vmem_capacity_bytes", cap))
    except Exception:
        pass
    if cap >= 128 * 1024 * 1024:
        return 96 * 1024 * 1024
    return 44 * 1024 * 1024


_VMEM_LIMIT = _vmem_limit_bytes()


# --------------------------------------------------------------------------
# Kernel 1: K-way fused 1x1 conv (bf16 matmul, f32 acc) + bias + SiLU, row tiled.
# --------------------------------------------------------------------------

def _make_matmul_kernel(n_inputs, apply_silu):
    def kernel(*refs):
        x_refs = refs[:n_inputs]
        w_refs = refs[n_inputs:2 * n_inputs]
        b_ref = refs[2 * n_inputs]
        o_ref = refs[2 * n_inputs + 1]
        acc = jnp.dot(x_refs[0][...], w_refs[0][...],
                      preferred_element_type=jnp.float32)
        for i in range(1, n_inputs):
            acc = acc + jnp.dot(x_refs[i][...], w_refs[i][...],
                                preferred_element_type=jnp.float32)
        y = acc + b_ref[...]                    # f32 bias
        if apply_silu:
            y = y * jax.nn.sigmoid(y)           # f32 SiLU
        o_ref[...] = y.astype(o_ref.dtype)
    return kernel


def _pick_tm(M):
    # Biggest row tile that still guarantees >= 2 grid steps (v7x megacore sharding).
    tm = min(1024, M)
    if pl.cdiv(M, tm) < 2 and M >= 16:
        tm = max(8, (M // 2) // 8 * 8)
    return tm


def conv1x1_fused(inputs, weights, bias, *, out_dtype, apply_silu=True):
    """SiLU(sum_k inputs[k] @ weights[k] + bias); inputs[k]: (M, Ck) bf16 rows."""
    M = inputs[0].shape[0]
    Cout = weights[0].shape[-1]
    n = len(inputs)
    tm = _pick_tm(M)
    grid = (pl.cdiv(M, tm),)

    in_specs = []
    for x in inputs:
        in_specs.append(pl.BlockSpec((tm, x.shape[1]), lambda i: (i, 0)))
    for w in weights:
        in_specs.append(pl.BlockSpec(w.shape, lambda i: (0, 0)))      # resident
    in_specs.append(pl.BlockSpec((1, Cout), lambda i: (0, 0)))        # bias (f32)

    k_sum = sum(x.shape[1] for x in inputs)
    bytes_io = (sum(int(x.size) * x.dtype.itemsize for x in inputs)
                + sum(int(w.size) * w.dtype.itemsize for w in weights)
                + Cout * 4 + M * Cout * jnp.dtype(out_dtype).itemsize)
    cost = pl.CostEstimate(
        flops=2 * M * k_sum * Cout,
        transcendentals=(M * Cout) if apply_silu else 0,
        bytes_accessed=bytes_io)

    return pl.pallas_call(
        _make_matmul_kernel(n, apply_silu),
        out_shape=jax.ShapeDtypeStruct((M, Cout), out_dtype),
        grid=grid,
        in_specs=in_specs,
        out_specs=pl.BlockSpec((tm, Cout), lambda i: (i, 0)),
        compiler_params=pltpu.CompilerParams(
            dimension_semantics=("parallel",),
            vmem_limit_bytes=_VMEM_LIMIT),
        cost_estimate=cost,
    )(*inputs, *weights, bias.reshape(1, Cout))


# --------------------------------------------------------------------------
# Kernel 2: 3x3 SAME conv (BN scale folded) + bias + SiLU.
#   zero-pad in-kernel, 3 dx taps fused on the channel axis -> 3 matmuls total.
# --------------------------------------------------------------------------

def _conv3x3_kernel(x_ref, w_ref, b_ref, o_ref):
    # x_ref: (1, H, W, C) bf16 (one batch element, unpadded)
    # w_ref: (3, 3*C, Cout) bf16 — rows ordered [dx*C + c] per dy, BN scale folded
    # b_ref: (1, Cout) f32; o_ref: (H*W, Cout)
    x = x_ref[...]
    _, H, W, C = x.shape
    zr = jnp.zeros((1, 1, W, C), x.dtype)
    xr = jnp.concatenate([zr, x, zr], axis=1)             # (1, H+2, W, C)
    zc = jnp.zeros((1, H + 2, 1, C), x.dtype)
    xp = jnp.concatenate([zc, xr, zc], axis=2)            # (1, H+2, W+2, C)
    # Hoist the three dx (sublane) shifts once; fuse them along channels so each dy
    # tap is a single (H*W, 3C) x (3C, Cout) matmul: 3 accumulations instead of 9.
    xcat = jnp.concatenate([xp[:, :, dx:dx + W, :] for dx in range(3)], axis=-1)
    w = w_ref[...]
    acc = jnp.dot(xcat[:, 0:H].reshape(H * W, 3 * C), w[0],
                  preferred_element_type=jnp.float32)
    acc = acc + jnp.dot(xcat[:, 1:1 + H].reshape(H * W, 3 * C), w[1],
                        preferred_element_type=jnp.float32)
    acc = acc + jnp.dot(xcat[:, 2:2 + H].reshape(H * W, 3 * C), w[2],
                        preferred_element_type=jnp.float32)
    y = acc + b_ref[...]
    y = y * jax.nn.sigmoid(y)
    o_ref[...] = y.astype(o_ref.dtype)


def conv3x3_bn_silu(x_nhwc, w_folded_bf16, bias_f32):
    """Returns the result flattened to (N*H*W, Cout) bf16 rows."""
    N, H, W, C = x_nhwc.shape
    Cout = w_folded_bf16.shape[-1]
    return pl.pallas_call(
        _conv3x3_kernel,
        out_shape=jax.ShapeDtypeStruct((N * H * W, Cout), jnp.bfloat16),
        grid=(N,),
        in_specs=[
            pl.BlockSpec((1, H, W, C), lambda n: (n, 0, 0, 0)),
            pl.BlockSpec((3, 3 * C, Cout), lambda n: (0, 0, 0)),
            pl.BlockSpec((1, Cout), lambda n: (0, 0)),
        ],
        out_specs=pl.BlockSpec((H * W, Cout), lambda n: (n, 0)),
        compiler_params=pltpu.CompilerParams(
            dimension_semantics=("parallel",),
            vmem_limit_bytes=_VMEM_LIMIT),
    )(x_nhwc, w_folded_bf16, bias_f32.reshape(1, Cout))


# --------------------------------------------------------------------------
# Kernel 3: SPP maxpools (5/9/13, stride 1) fused with cv5 (4 accumulated matmuls).
#   -inf padding is done in-kernel; p5/p9/p13 never touch HBM.
# --------------------------------------------------------------------------

def _spp_cv5_kernel(x_ref, w_ref, b_ref, o_ref):
    # x_ref: (1, H, W, C) bf16 (x1, one batch element)
    # w_ref: (4, C, Cout) bf16 — cv5 weight split along the [x1|p5|p9|p13] concat
    # b_ref: (1, Cout) f32; o_ref: (H*W, Cout)
    x = x_ref[...]
    _, H, W, C = x.shape

    def pool5_same(a):
        # stride-1 k=5 SAME maxpool with -inf padding; separable row/col max.
        fr = jnp.full((1, 2, W, C), -jnp.inf, a.dtype)
        ap = jnp.concatenate([fr, a, fr], axis=1)          # (1, H+4, W, C)
        r = ap[:, 0:H]
        for d in range(1, 5):
            r = jnp.maximum(r, ap[:, d:d + H])
        fc = jnp.full((1, H, 2, C), -jnp.inf, a.dtype)
        rp = jnp.concatenate([fc, r, fc], axis=2)          # (1, H, W+4, C)
        c = rp[:, :, 0:W]
        for d in range(1, 5):
            c = jnp.maximum(c, rp[:, :, d:d + W])
        return c

    p5 = pool5_same(x)          # maxpool k=5
    p9 = pool5_same(p5)         # maxpool k=9  (pool5∘pool5)
    p13 = pool5_same(p9)        # maxpool k=13 (pool5∘pool5∘pool5)

    w = w_ref[...]
    acc = jnp.dot(x.reshape(H * W, C), w[0], preferred_element_type=jnp.float32)
    acc = acc + jnp.dot(p5.reshape(H * W, C), w[1], preferred_element_type=jnp.float32)
    acc = acc + jnp.dot(p9.reshape(H * W, C), w[2], preferred_element_type=jnp.float32)
    acc = acc + jnp.dot(p13.reshape(H * W, C), w[3], preferred_element_type=jnp.float32)
    y = acc + b_ref[...]
    y = y * jax.nn.sigmoid(y)
    o_ref[...] = y.astype(o_ref.dtype)


def spp_cv5(x1_nhwc, w5_parts_bf16, bias_f32):
    """cv5(cat([x1, pool5, pool9, pool13])) fused; returns (N*H*W, Cout) bf16."""
    N, H, W, C = x1_nhwc.shape
    Cout = w5_parts_bf16.shape[-1]
    return pl.pallas_call(
        _spp_cv5_kernel,
        out_shape=jax.ShapeDtypeStruct((N * H * W, Cout), jnp.bfloat16),
        grid=(N,),
        in_specs=[
            pl.BlockSpec((1, H, W, C), lambda n: (n, 0, 0, 0)),
            pl.BlockSpec((4, C, Cout), lambda n: (0, 0, 0)),
            pl.BlockSpec((1, Cout), lambda n: (0, 0)),
        ],
        out_specs=pl.BlockSpec((H * W, Cout), lambda n: (n, 0)),
        compiler_params=pltpu.CompilerParams(
            dimension_semantics=("parallel",),
            vmem_limit_bytes=_VMEM_LIMIT),
    )(x1_nhwc, w5_parts_bf16, bias_f32.reshape(1, Cout))


# --------------------------- parameter creation -----------------------------

def init_baseconv(key, cin, cout, k):
    """Conv2d(k,k,no-bias) + BatchNorm2d (eval) as raw weight + BN scale/bias."""
    kw, kg, kb, km, kv = jax.random.split(key, 5)
    w = 0.1 * jax.random.normal(kw, (k, k, cin, cout), jnp.float32)   # HWIO
    gamma = 1.0 + 0.1 * jax.random.normal(kg, (cout,), jnp.float32)
    beta = 0.1 * jax.random.normal(kb, (cout,), jnp.float32)
    mean = 0.1 * jax.random.normal(km, (cout,), jnp.float32)
    var = 1.0 + 0.1 * jnp.abs(jax.random.normal(kv, (cout,), jnp.float32))
    scale = gamma / jnp.sqrt(var + EPS)
    bias = beta - mean * scale
    return {"w": w, "scale": scale, "bias": bias}


def init_sppcsp(key, cin, cout):
    hidden = cin // 2
    keys = jax.random.split(key, 7)
    return {
        "cv1": init_baseconv(keys[0], cin, hidden, 1),
        # cv2 is a plain bias-free 1x1 Conv2d (no BN, no activation)
        "cv2": 0.1 * jax.random.normal(keys[1], (1, 1, cin, hidden), jnp.float32),
        "cv3": init_baseconv(keys[2], hidden, hidden, 3),
        "cv4": init_baseconv(keys[3], hidden, hidden, 1),
        "cv5": init_baseconv(keys[4], 4 * hidden, hidden, 1),
        "cv6": init_baseconv(keys[5], hidden, hidden, 3),
        "cv7": init_baseconv(keys[6], 2 * hidden, cout, 1),
        # NOTE: SPPCSP also defines self.bn / self.act, but the PyTorch forward
        # never uses them, so they are intentionally omitted.
    }


# ------------------------------ SPPCSP forward -------------------------------

def _fold1x1(p):
    # BN fold in f32, then cast the matmul weight to bf16; bias stays f32.
    w = p["w"][0, 0] * p["scale"][None, :]
    return w.astype(jnp.bfloat16), p["bias"]


def _fold3x3(p):
    w = p["w"] * p["scale"]                                   # (3,3,C,Cout) f32
    C, Cout = w.shape[2], w.shape[3]
    return w.reshape(3, 3 * C, Cout).astype(jnp.bfloat16), p["bias"]


def sppcsp_forward_nhwc(params, x_nhwc):
    """NHWC core (preferred entry point; avoids NCHW transpose round-trips)."""
    N, H, W, Cin = x_nhwc.shape
    M = N * H * W
    x_bf = x_nhwc.astype(jnp.bfloat16)
    x2d = x_bf.reshape(M, Cin)

    # x1 = cv4(cv3(cv1(x)))
    w1, b1 = _fold1x1(params["cv1"])
    t = conv1x1_fused([x2d], [w1], b1, out_dtype=jnp.bfloat16)        # (M, hidden)
    hidden = t.shape[-1]
    w3, b3 = _fold3x3(params["cv3"])
    t = conv3x3_bn_silu(t.reshape(N, H, W, hidden), w3, b3)
    w4, b4 = _fold1x1(params["cv4"])
    x1_2d = conv1x1_fused([t], [w4], b4, out_dtype=jnp.bfloat16)      # (M, hidden)

    # SPP (maxpool 5/9/13) fused with cv5's 4 accumulated matmuls, no HBM concat.
    w5, b5 = _fold1x1(params["cv5"])                                  # (4*hidden, hidden)
    w5_parts = w5.reshape(4, hidden, hidden)
    y = spp_cv5(x1_2d.reshape(N, H, W, hidden), w5_parts, b5)         # (M, hidden)

    # cv6 (3x3)
    w6, b6 = _fold3x3(params["cv6"])
    y1_2d = conv3x3_bn_silu(y.reshape(N, H, W, hidden), w6, b6)

    # cv7(cat(y1, cv2(x))) == SiLU(y1 @ W7a + x @ (W2 @ W7b) + b7)
    # (cv2 has no bias/BN/activation, so it folds exactly into cv7's weights; the
    #  fold itself is done in f32 before the bf16 cast.)
    w7f = params["cv7"]["w"][0, 0] * params["cv7"]["scale"][None, :]  # f32
    b7 = params["cv7"]["bias"]
    w7a = w7f[:hidden].astype(jnp.bfloat16)
    w27 = (params["cv2"][0, 0] @ w7f[hidden:]).astype(jnp.bfloat16)
    out2d = conv1x1_fused([y1_2d, x2d], [w7a, w27], b7, out_dtype=jnp.float32)

    cout = out2d.shape[-1]
    return out2d.reshape(N, H, W, cout)


def sppcsp_forward(params, x_nchw):
    # NCHW (PyTorch) convenience wrapper around the NHWC core.
    x = jnp.transpose(x_nchw, (0, 2, 3, 1))                   # NCHW -> NHWC
    y = sppcsp_forward_nhwc(params, x)
    return jnp.transpose(y, (0, 3, 1, 2))                     # NHWC -> NCHW


# ----------------------------- pure-JAX reference ---------------------------

def _ref_baseconv(x_nhwc, p):
    y = lax.conv_general_dilated(x_nhwc, p["w"], (1, 1), "SAME",
                                 dimension_numbers=("NHWC", "HWIO", "NHWC"))
    y = y * p["scale"] + p["bias"]
    return y * jax.nn.sigmoid(y)


def _ref_maxpool(x_nhwc, k):
    pad = k // 2
    return lax.reduce_window(x_nhwc, -jnp.inf, lax.max,
                             (1, k, k, 1), (1, 1, 1, 1),
                             ((0, 0), (pad, pad), (pad, pad), (0, 0)))


def ref_sppcsp(params, x_nchw):
    x = jnp.transpose(x_nchw, (0, 2, 3, 1))
    x1 = _ref_baseconv(
        _ref_baseconv(_ref_baseconv(x, params["cv1"]), params["cv3"]),
        params["cv4"])
    cat1 = jnp.concatenate([x1] + [_ref_maxpool(x1, k) for k in (5, 9, 13)],
                           axis=-1)
    y1 = _ref_baseconv(_ref_baseconv(cat1, params["cv5"]), params["cv6"])
    y2 = lax.conv_general_dilated(x, params["cv2"], (1, 1), "SAME",
                                  dimension_numbers=("NHWC", "HWIO", "NHWC"))
    out = _ref_baseconv(jnp.concatenate([y1, y2], axis=-1), params["cv7"])
    return jnp.transpose(out, (0, 3, 1, 2))


# ----------------------------------- main ------------------------------------

if __name__ == "__main__":
    key = jax.random.PRNGKey(0)
    kx, kp = jax.random.split(key)

    N, Cin, H, W = 2, 4, 16, 16          # hidden = Cin // 2 = 2
    Cout = 8

    x = jax.random.normal(kx, (N, Cin, H, W), jnp.float32)
    params = init_sppcsp(kp, Cin, Cout)

    out = jax.block_until_ready(jax.jit(sppcsp_forward)(params, x))
    ref = jax.block_until_ready(ref_sppcsp(params, x))

    assert out.shape == (N, Cout, H, W), out.shape
    err = float(jnp.max(jnp.abs(out.astype(jnp.float32) - ref)))
    # bf16 matmuls / bf16 intermediate activations -> bf16-level tolerance.
    assert jnp.allclose(out.astype(jnp.float32), ref, atol=5e-2, rtol=5e-2), err
    print("KERNEL_OK")
</pallas_src>

<mosaic_0001>
module attributes {stable_mosaic.version = 11 : i64} {
  func.func @kernel(%arg0: i32, %arg1: memref<256x2xbf16, #tpu.memory_space<vmem>>, %arg2: memref<2x2xbf16, #tpu.memory_space<vmem>>, %arg3: memref<1x2xf32, #tpu.memory_space<vmem>>, %arg4: memref<256x2xbf16, #tpu.memory_space<vmem>>) attributes {dimension_semantics = [#tpu.dimension_semantics<parallel>], iteration_bounds = array<i64: 2>, scalar_prefetch = 0 : i64, scratch_operands = 0 : i64, tpu.core_type = #tpu.core_type<tc>, window_params = [{transform_indices = @transform_0, window_bounds = array<i64: 256, 2>}, {pipeline_mode = #tpu.pipeline_mode<synchronous>, transform_indices = @transform_1, window_bounds = array<i64: 2, 2>}, {pipeline_mode = #tpu.pipeline_mode<synchronous>, transform_indices = @transform_2, window_bounds = array<i64: 1, 2>}, {transform_indices = @transform_3, window_bounds = array<i64: 256, 2>}]} {
    %c0 = arith.constant 0 : index
    %c0_0 = arith.constant 0 : index
    %0 = vector.load %arg1[%c0, %c0_0] : memref<256x2xbf16, #tpu.memory_space<vmem>>, vector<256x2xbf16>
    %c0_1 = arith.constant 0 : index
    %c0_2 = arith.constant 0 : index
    %1 = vector.load %arg2[%c0_1, %c0_2] : memref<2x2xbf16, #tpu.memory_space<vmem>>, vector<2x2xbf16>
    %cst = arith.constant dense<0.000000e+00> : vector<256x2xf32>
    %2 = tpu.matmul %0, %1, %cst {dimension_numbers = #tpu.dot_dimension_numbers<[1], [0], [0], [1], [0, 0, 1, 1], [], []>} : vector<256x2xbf16>, vector<2x2xbf16>, vector<256x2xf32> -> vector<256x2xf32>
    %c0_3 = arith.constant 0 : index
    %c0_4 = arith.constant 0 : index
    %3 = vector.load %arg3[%c0_3, %c0_4] : memref<1x2xf32, #tpu.memory_space<vmem>>, vector<1x2xf32>
    %4 = vector.broadcast %3 : vector<1x2xf32> to vector<256x2xf32>
    %5 = arith.addf %2, %4 : vector<256x2xf32>
    %6 = arith.negf %5 : vector<256x2xf32>
    %7 = math.exp %6 : vector<256x2xf32>
    %cst_5 = arith.constant 1.000000e+00 : f32
    %8 = vector.broadcast %cst_5 : f32 to vector<256x2xf32>
    %9 = arith.addf %8, %7 : vector<256x2xf32>
    %10 = arith.divf %8, %9 : vector<256x2xf32>
    %11 = arith.mulf %5, %10 : vector<256x2xf32>
    %12 = arith.truncf %11 : vector<256x2xf32> to vector<256x2xbf16>
    %c0_6 = arith.constant 0 : index
    %c0_7 = arith.constant 0 : index
    %13 = vector.load %arg4[%c0_6, %c0_7] : memref<256x2xbf16, #tpu.memory_space<vmem>>, vector<256x2xbf16>
    tpu.vector_store %arg4[%c0_6, %c0_7], %12 {strides = array<i32>} : memref<256x2xbf16, #tpu.memory_space<vmem>>, vector<256x2xbf16>,
    return
  }
  func.func @transform_0(%arg0: i32) -> (i32, i32) {
    %c0_i32 = arith.constant 0 : i32
    %c0_i32_0 = arith.constant 0 : i32
    return %arg0, %c0_i32 : i32, i32
  }
  func.func @transform_1(%arg0: i32) -> (i32, i32) {
    %c0_i32 = arith.constant 0 : i32
    %c0_i32_0 = arith.constant 0 : i32
    %c0_i32_1 = arith.constant 0 : i32
    return %c0_i32, %c0_i32_0 : i32, i32
  }
  func.func @transform_2(%arg0: i32) -> (i32, i32) {
    %c0_i32 = arith.constant 0 : i32
    %c0_i32_0 = arith.constant 0 : i32
    %c0_i32_1 = arith.constant 0 : i32
    return %c0_i32, %c0_i32_0 : i32, i32
  }
  func.func @transform_3(%arg0: i32) -> (i32, i32) {
    %c0_i32 = arith.constant 0 : i32
    %c0_i32_0 = arith.constant 0 : i32
    return %arg0, %c0_i32 : i32, i32
  }
}

module attributes {stable_mosaic.version = 11 : i64} {
  func.func @kernel(%arg0: i32, %arg1: memref<256x4xbf16, #tpu.memory_space<vmem>>, %arg2: memref<4x2xbf16, #tpu.memory_space<vmem>>, %arg3: memref<1x2xf32, #tpu.memory_space<vmem>>, %arg4: memref<256x2xbf16, #tpu.memory_space<vmem>>) attributes {dimension_semantics = [#tpu.dimension_semantics<parallel>], iteration_bounds = array<i64: 2>, scalar_prefetch = 0 : i64, scratch_operands = 0 : i64, tpu.core_type = #tpu.core_type<tc>, window_params = [{transform_indices = @transform_0, window_bounds = array<i64: 256, 4>}, {pipeline_mode = #tpu.pipeline_mode<synchronous>, transform_indices = @transform_1, window_bounds = array<i64: 4, 2>}, {pipeline_mode = #tpu.pipeline_mode<synchronous>, transform_indices = @transform_2, window_bounds = array<i64: 1, 2>}, {transform_indices = @transform_3, window_bounds = array<i64: 256, 2>}]} {
    %c0 = arith.constant 0 : index
    %c0_0 = arith.constant 0 : index
    %0 = vector.load %arg1[%c0, %c0_0] : memref<256x4xbf16, #tpu.memory_space<vmem>>, vector<256x4xbf16>
    %c0_1 = arith.constant 0 : index
    %c0_2 = arith.constant 0 : index
    %1 = vector.load %arg2[%c0_1, %c0_2] : memref<4x2xbf16, #tpu.memory_space<vmem>>, vector<4x2xbf16>
    %cst = arith.constant dense<0.000000e+00> : vector<256x2xf32>
    %2 = tpu.matmul %0, %1, %cst {dimension_numbers = #tpu.dot_dimension_numbers<[1], [0], [0], [1], [0, 0, 1, 1], [], []>} : vector<256x4xbf16>, vector<4x2xbf16>, vector<256x2xf32> -> vector<256x2xf32>
    %c0_3 = arith.constant 0 : index
    %c0_4 = arith.constant 0 : index
    %3 = vector.load %arg3[%c0_3, %c0_4] : memref<1x2xf32, #tpu.memory_space<vmem>>, vector<1x2xf32>
    %4 = vector.broadcast %3 : vector<1x2xf32> to vector<256x2xf32>
    %5 = arith.addf %2, %4 : vector<256x2xf32>
    %6 = arith.negf %5 : vector<256x2xf32>
    %7 = math.exp %6 : vector<256x2xf32>
    %cst_5 = arith.constant 1.000000e+00 : f32
    %8 = vector.broadcast %cst_5 : f32 to vector<256x2xf32>
    %9 = arith.addf %8, %7 : vector<256x2xf32>
    %10 = arith.divf %8, %9 : vector<256x2xf32>
    %11 = arith.mulf %5, %10 : vector<256x2xf32>
    %12 = arith.truncf %11 : vector<256x2xf32> to vector<256x2xbf16>
    %c0_6 = arith.constant 0 : index
    %c0_7 = arith.constant 0 : index
    %13 = vector.load %arg4[%c0_6, %c0_7] : memref<256x2xbf16, #tpu.memory_space<vmem>>, vector<256x2xbf16>
    tpu.vector_store %arg4[%c0_6, %c0_7], %12 {strides = array<i32>} : memref<256x2xbf16, #tpu.memory_space<vmem>>, vector<256x2xbf16>,
    return
  }
  func.func @transform_0(%arg0: i32) -> (i32, i32) {
    %c0_i32 = arith.constant 0 : i32
    %c0_i32_0 = arith.constant 0 : i32
    return %arg0, %c0_i32 : i32, i32
  }
  func.func @transform_1(%arg0: i32) -> (i32, i32) {
    %c0_i32 = arith.constant 0 : i32
    %c0_i32_0 = arith.constant 0 : i32
    %c0_i32_1 = arith.constant 0 : i32
    return %c0_i32, %c0_i32_0 : i32, i32
  }
  func.func @transform_2(%arg0: i32) -> (i32, i32) {
    %c0_i32 = arith.constant 0 : i32
    %c0_i32_0 = arith.constant 0 : i32
    %c0_i32_1 = arith.constant 0 : i32
    return %c0_i32, %c0_i32_0 : i32, i32
  }
  func.func @transform_3(%arg0: i32) -> (i32, i32) {
    %c0_i32 = arith.constant 0 : i32
    %c0_i32_0 = arith.constant 0 : i32
    return %arg0, %c0_i32 : i32, i32
  }
}

module attributes {stable_mosaic.version = 11 : i64} {
  func.func @_conv3x3_kernel(%arg0: i32, %arg1: memref<1x16x16x2xbf16, #tpu.memory_space<vmem>>, %arg2: memref<3x6x2xbf16, #tpu.memory_space<vmem>>, %arg3: memref<1x2xf32, #tpu.memory_space<vmem>>, %arg4: memref<256x2xbf16, #tpu.memory_space<vmem>>) attributes {dimension_semantics = [#tpu.dimension_semantics<parallel>], iteration_bounds = array<i64: 2>, scalar_prefetch = 0 : i64, scratch_operands = 0 : i64, tpu.core_type = #tpu.core_type<tc>, window_params = [{transform_indices = @transform_0, window_bounds = array<i64: 1, 16, 16, 2>}, {pipeline_mode = #tpu.pipeline_mode<synchronous>, transform_indices = @transform_1, window_bounds = array<i64: 3, 6, 2>}, {pipeline_mode = #tpu.pipeline_mode<synchronous>, transform_indices = @transform_2, window_bounds = array<i64: 1, 2>}, {transform_indices = @transform_3, window_bounds = array<i64: 256, 2>}]} {
    %c0 = arith.constant 0 : index
    %c0_0 = arith.constant 0 : index
    %c0_1 = arith.constant 0 : index
    %c0_2 = arith.constant 0 : index
    %0 = vector.load %arg1[%c0, %c0_0, %c0_1, %c0_2] : memref<1x16x16x2xbf16, #tpu.memory_space<vmem>>, vector<1x16x16x2xbf16>
    %cst = arith.constant 0.000000e+00 : bf16
    %1 = vector.broadcast %cst : bf16 to vector<1x1x16x2xbf16>
    %2 = tpu.concatenate %1, %0, %1 in 1 : vector<1x1x16x2xbf16>, vector<1x16x16x2xbf16>, vector<1x1x16x2xbf16> -> vector<1x18x16x2xbf16>
    %cst_3 = arith.constant 0.000000e+00 : bf16
    %3 = vector.broadcast %cst_3 : bf16 to vector<1x18x1x2xbf16>
    %4 = tpu.concatenate %3, %2, %3 in 2 : vector<1x18x1x2xbf16>, vector<1x18x16x2xbf16>, vector<1x18x1x2xbf16> -> vector<1x18x18x2xbf16>
    %5 = vector.extract_strided_slice %4 {offsets = [0, 0, 0, 0], sizes = [1, 18, 16, 2], strides = [1, 1, 1, 1]} : vector<1x18x18x2xbf16> to vector<1x18x16x2xbf16>
    %6 = vector.extract_strided_slice %4 {offsets = [0, 0, 1, 0], sizes = [1, 18, 16, 2], strides = [1, 1, 1, 1]} : vector<1x18x18x2xbf16> to vector<1x18x16x2xbf16>
    %7 = vector.extract_strided_slice %4 {offsets = [0, 0, 2, 0], sizes = [1, 18, 16, 2], strides = [1, 1, 1, 1]} : vector<1x18x18x2xbf16> to vector<1x18x16x2xbf16>
    %8 = tpu.concatenate %5, %6, %7 in 3 : vector<1x18x16x2xbf16>, vector<1x18x16x2xbf16>, vector<1x18x16x2xbf16> -> vector<1x18x16x6xbf16>
    %c0_4 = arith.constant 0 : index
    %c0_5 = arith.constant 0 : index
    %c0_6 = arith.constant 0 : index
    %9 = vector.load %arg2[%c0_4, %c0_5, %c0_6] : memref<3x6x2xbf16, #tpu.memory_space<vmem>>, vector<3x6x2xbf16>
    %10 = vector.extract_strided_slice %8 {offsets = [0, 0, 0, 0], sizes = [1, 16, 16, 6], strides = [1, 1, 1, 1]} : vector<1x18x16x6xbf16> to vector<1x16x16x6xbf16>
    %11 = vector.shape_cast %10 : vector<1x16x16x6xbf16> to vector<256x6xbf16>
    %12 = vector.extract_strided_slice %9 {offsets = [0, 0, 0], sizes = [1, 6, 2], strides = [1, 1, 1]} : vector<3x6x2xbf16> to vector<1x6x2xbf16>
    %13 = vector.shape_cast %12 : vector<1x6x2xbf16> to vector<6x2xbf16>
    %cst_7 = arith.constant dense<0.000000e+00> : vector<256x2xf32>
    %14 = tpu.matmul %11, %13, %cst_7 {dimension_numbers = #tpu.dot_dimension_numbers<[1], [0], [0], [1], [0, 0, 1, 1], [], []>} : vector<256x6xbf16>, vector<6x2xbf16>, vector<256x2xf32> -> vector<256x2xf32>
    %15 = vector.extract_strided_slice %8 {offsets = [0, 1, 0, 0], sizes = [1, 16, 16, 6], strides = [1, 1, 1, 1]} : vector<1x18x16x6xbf16> to vector<1x16x16x6xbf16>
    %16 = vector.shape_cast %15 : vector<1x16x16x6xbf16> to vector<256x6xbf16>
    %17 = vector.extract_strided_slice %9 {offsets = [1, 0, 0], sizes = [1, 6, 2], strides = [1, 1, 1]} : vector<3x6x2xbf16> to vector<1x6x2xbf16>
    %18 = vector.shape_cast %17 : vector<1x6x2xbf16> to vector<6x2xbf16>
    %cst_8 = arith.constant dense<0.000000e+00> : vector<256x2xf32>
    %19 = tpu.matmul %16, %18, %cst_8 {dimension_numbers = #tpu.dot_dimension_numbers<[1], [0], [0], [1], [0, 0, 1, 1], [], []>} : vector<256x6xbf16>, vector<6x2xbf16>, vector<256x2xf32> -> vector<256x2xf32>
    %20 = arith.addf %14, %19 : vector<256x2xf32>
    %21 = vector.extract_strided_slice %8 {offsets = [0, 2, 0, 0], sizes = [1, 16, 16, 6], strides = [1, 1, 1, 1]} : vector<1x18x16x6xbf16> to vector<1x16x16x6xbf16>
    %22 = vector.shape_cast %21 : vector<1x16x16x6xbf16> to vector<256x6xbf16>
    %23 = vector.extract_strided_slice %9 {offsets = [2, 0, 0], sizes = [1, 6, 2], strides = [1, 1, 1]} : vector<3x6x2xbf16> to vector<1x6x2xbf16>
    %24 = vector.shape_cast %23 : vector<1x6x2xbf16> to vector<6x2xbf16>
    %cst_9 = arith.constant dense<0.000000e+00> : vector<256x2xf32>
    %25 = tpu.matmul %22, %24, %cst_9 {dimension_numbers = #tpu.dot_dimension_numbers<[1], [0], [0], [1], [0, 0, 1, 1], [], []>} : vector<256x6xbf16>, vector<6x2xbf16>, vector<256x2xf32> -> vector<256x2xf32>
    %26 = arith.addf %20, %25 : vector<256x2xf32>
    %c0_10 = arith.constant 0 : index
    %c0_11 = arith.constant 0 : index
    %27 = vector.load %arg3[%c0_10, %c0_11] : memref<1x2xf32, #tpu.memory_space<vmem>>, vector<1x2xf32>
    %28 = vector.broadcast %27 : vector<1x2xf32> to vector<256x2xf32>
    %29 = arith.addf %26, %28 : vector<256x2xf32>
    %30 = arith.negf %29 : vector<256x2xf32>
    %31 = math.exp %30 : vector<256x2xf32>
    %cst_12 = arith.constant 1.000000e+00 : f32
    %32 = vector.broadcast %cst_12 : f32 to vector<256x2xf32>
    %33 = arith.addf %32, %31 : vector<256x2xf32>
    %34 = arith.divf %32, %33 : vector<256x2xf32>
    %35 = arith.mulf %29, %34 : vector<256x2xf32>
    %36 = arith.truncf %35 : vector<256x2xf32> to vector<256x2xbf16>
    %c0_13 = arith.constant 0 : index
    %c0_14 = arith.constant 0 : index
    %37 = vector.load %arg4[%c0_13, %c0_14] : memref<256x2xbf16, #tpu.memory_space<vmem>>, vector<256x2xbf16>
    tpu.vector_store %arg4[%c0_13, %c0_14], %36 {strides = array<i32>} : memref<256x2xbf16, #tpu.memory_space<vmem>>, vector<256x2xbf16>,
    return
  }
  func.func @transform_0(%arg0: i32) -> (i32, i32, i32, i32) {
    %c0_i32 = arith.constant 0 : i32
    %c0_i32_0 = arith.constant 0 : i32
    %c0_i32_1 = arith.constant 0 : i32
    %c0_i32_2 = arith.constant 0 : i32
    return %arg0, %c0_i32, %c0_i32_0, %c0_i32_1 : i32, i32, i32, i32
  }
  func.func @transform_1(%arg0: i32) -> (i32, i32, i32) {
    %c0_i32 = arith.constant 0 : i32
    %c0_i32_0 = arith.constant 0 : i32
    %c0_i32_1 = arith.constant 0 : i32
    %c0_i32_2 = arith.constant 0 : i32
    return %c0_i32, %c0_i32_0, %c0_i32_1 : i32, i32, i32
  }
  func.func @transform_2(%arg0: i32) -> (i32, i32) {
    %c0_i32 = arith.constant 0 : i32
    %c0_i32_0 = arith.constant 0 : i32
    %c0_i32_1 = arith.constant 0 : i32
    return %c0_i32, %c0_i32_0 : i32, i32
  }
  func.func @transform_3(%arg0: i32) -> (i32, i32) {
    %c0_i32 = arith.constant 0 : i32
    %c0_i32_0 = arith.constant 0 : i32
    return %arg0, %c0_i32 : i32, i32
  }
}

module attributes {stable_mosaic.version = 11 : i64} {
  func.func @_spp_cv5_kernel(%arg0: i32, %arg1: memref<1x16x16x2xbf16, #tpu.memory_space<vmem>>, %arg2: memref<4x2x2xbf16, #tpu.memory_space<vmem>>, %arg3: memref<1x2xf32, #tpu.memory_space<vmem>>, %arg4: memref<256x2xbf16, #tpu.memory_space<vmem>>) attributes {dimension_semantics = [#tpu.dimension_semantics<parallel>], iteration_bounds = array<i64: 2>, scalar_prefetch = 0 : i64, scratch_operands = 0 : i64, tpu.core_type = #tpu.core_type<tc>, window_params = [{transform_indices = @transform_0, window_bounds = array<i64: 1, 16, 16, 2>}, {pipeline_mode = #tpu.pipeline_mode<synchronous>, transform_indices = @transform_1, window_bounds = array<i64: 4, 2, 2>}, {pipeline_mode = #tpu.pipeline_mode<synchronous>, transform_indices = @transform_2, window_bounds = array<i64: 1, 2>}, {transform_indices = @transform_3, window_bounds = array<i64: 256, 2>}]} {
    %c0 = arith.constant 0 : index
    %c0_0 = arith.constant 0 : index
    %c0_1 = arith.constant 0 : index
    %c0_2 = arith.constant 0 : index
    %0 = vector.load %arg1[%c0, %c0_0, %c0_1, %c0_2] : memref<1x16x16x2xbf16, #tpu.memory_space<vmem>>, vector<1x16x16x2xbf16>
    %cst = arith.constant 0xFF80 : bf16
    %1 = vector.broadcast %cst : bf16 to vector<1x2x16x2xbf16>
    %2 = tpu.concatenate %1, %0, %1 in 1 : vector<1x2x16x2xbf16>, vector<1x16x16x2xbf16>, vector<1x2x16x2xbf16> -> vector<1x20x16x2xbf16>
    %3 = vector.extract_strided_slice %2 {offsets = [0, 0, 0, 0], sizes = [1, 16, 16, 2], strides = [1, 1, 1, 1]} : vector<1x20x16x2xbf16> to vector<1x16x16x2xbf16>
    %4 = vector.extract_strided_slice %2 {offsets = [0, 1, 0, 0], sizes = [1, 16, 16, 2], strides = [1, 1, 1, 1]} : vector<1x20x16x2xbf16> to vector<1x16x16x2xbf16>
    %5 = arith.maximumf %3, %4 : vector<1x16x16x2xbf16>
    %6 = vector.extract_strided_slice %2 {offsets = [0, 2, 0, 0], sizes = [1, 16, 16, 2], strides = [1, 1, 1, 1]} : vector<1x20x16x2xbf16> to vector<1x16x16x2xbf16>
    %7 = arith.maximumf %5, %6 : vector<1x16x16x2xbf16>
    %8 = vector.extract_strided_slice %2 {offsets = [0, 3, 0, 0], sizes = [1, 16, 16, 2], strides = [1, 1, 1, 1]} : vector<1x20x16x2xbf16> to vector<1x16x16x2xbf16>
    %9 = arith.maximumf %7, %8 : vector<1x16x16x2xbf16>
    %10 = vector.extract_strided_slice %2 {offsets = [0, 4, 0, 0], sizes = [1, 16, 16, 2], strides = [1, 1, 1, 1]} : vector<1x20x16x2xbf16> to vector<1x16x16x2xbf16>
    %11 = arith.maximumf %9, %10 : vector<1x16x16x2xbf16>
    %cst_3 = arith.constant 0xFF80 : bf16
    %12 = vector.broadcast %cst_3 : bf16 to vector<1x16x2x2xbf16>
    %13 = tpu.concatenate %12, %11, %12 in 2 : vector<1x16x2x2xbf16>, vector<1x16x16x2xbf16>, vector<1x16x2x2xbf16> -> vector<1x16x20x2xbf16>
    %14 = vector.extract_strided_slice %13 {offsets = [0, 0, 0, 0], sizes = [1, 16, 16, 2], strides = [1, 1, 1, 1]} : vector<1x16x20x2xbf16> to vector<1x16x16x2xbf16>
    %15 = vector.extract_strided_slice %13 {offsets = [0, 0, 1, 0], sizes = [1, 16, 16, 2], strides = [1, 1, 1, 1]} : vector<1x16x20x2xbf16> to vector<1x16x16x2xbf16>
    %16 = arith.maximumf %14, %15 : vector<1x16x16x2xbf16>
    %17 = vector.extract_strided_slice %13 {offsets = [0, 0, 2, 0], sizes = [1, 16, 16, 2], strides = [1, 1, 1, 1]} : vector<1x16x20x2xbf16> to vector<1x16x16x2xbf16>
    %18 = arith.maximumf %16, %17 : vector<1x16x16x2xbf16>
    %19 = vector.extract_strided_slice %13 {offsets = [0, 0, 3, 0], sizes = [1, 16, 16, 2], strides = [1, 1, 1, 1]} : vector<1x16x20x2xbf16> to vector<1x16x16x2xbf16>
    %20 = arith.maximumf %18, %19 : vector<1x16x16x2xbf16>
    %21 = vector.extract_strided_slice %13 {offsets = [0, 0, 4, 0], sizes = [1, 16, 16, 2], strides = [1, 1, 1, 1]} : vector<1x16x20x2xbf16> to vector<1x16x16x2xbf16>
    %22 = arith.maximumf %20, %21 : vector<1x16x16x2xbf16>
    %cst_4 = arith.constant 0xFF80 : bf16
    %23 = vector.broadcast %cst_4 : bf16 to vector<1x2x16x2xbf16>
    %24 = tpu.concatenate %23, %22, %23 in 1 : vector<1x2x16x2xbf16>, vector<1x16x16x2xbf16>, vector<1x2x16x2xbf16> -> vector<1x20x16x2xbf16>
    %25 = vector.extract_strided_slice %24 {offsets = [0, 0, 0, 0], sizes = [1, 16, 16, 2], strides = [1, 1, 1, 1]} : vector<1x20x16x2xbf16> to vector<1x16x16x2xbf16>
    %26 = vector.extract_strided_slice %24 {offsets = [0, 1, 0, 0], sizes = [1, 16, 16, 2], strides = [1, 1, 1, 1]} : vector<1x20x16x2xbf16> to vector<1x16x16x2xbf16>
    %27 = arith.maximumf %25, %26 : vector<1x16x16x2xbf16>
    %28 = vector.extract_strided_slice %24 {offsets = [0, 2, 0, 0], sizes = [1, 16, 16, 2], strides = [1, 1, 1, 1]} : vector<1x20x16x2xbf16> to vector<1x16x16x2xbf16>
    %29 = arith.maximumf %27, %28 : vector<1x16x16x2xbf16>
    %30 = vector.extract_strided_slice %24 {offsets = [0, 3, 0, 0], sizes = [1, 16, 16, 2], strides = [1, 1, 1, 1]} : vector<1x20x16x2xbf16> to vector<1x16x16x2xbf16>
    %31 = arith.maximumf %29, %30 : vector<1x16x16x2xbf16>
    %32 = vector.extract_strided_slice %24 {offsets = [0, 4, 0, 0], sizes = [1, 16, 16, 2], strides = [1, 1, 1, 1]} : vector<1x20x16x2xbf16> to vector<1x16x16x2xbf16>
    %33 = arith.maximumf %31, %32 : vector<1x16x16x2xbf16>
    %cst_5 = arith.constant 0xFF80 : bf16
    %34 = vector.broadcast %cst_5 : bf16 to vector<1x16x2x2xbf16>
    %35 = tpu.concatenate %34, %33, %34 in 2 : vector<1x16x2x2xbf16>, vector<1x16x16x2xbf16>, vector<1x16x2x2xbf16> -> vector<1x16x20x2xbf16>
    %36 = vector.extract_strided_slice %35 {offsets = [0, 0, 0, 0], sizes = [1, 16, 16, 2], strides = [1, 1, 1, 1]} : vector<1x16x20x2xbf16> to vector<1x16x16x2xbf16>
    %37 = vector.extract_strided_slice %35 {offsets = [0, 0, 1, 0], sizes = [1, 16, 16, 2], strides = [1, 1, 1, 1]} : vector<1x16x20x2xbf16> to vector<1x16x16x2xbf16>
    %38 = arith.maximumf %36, %37 : vector<1x16x16x2xbf16>
    %39 = vector.extract_strided_slice %35 {offsets = [0, 0, 2, 0], sizes = [1, 16, 16, 2], strides = [1, 1, 1, 1]} : vector<1x16x20x2xbf16> to vector<1x16x16x2xbf16>
    %40 = arith.maximumf %38, %39 : vector<1x16x16x2xbf16>
    %41 = vector.extract_strided_slice %35 {offsets = [0, 0, 3, 0], sizes = [1, 16, 16, 2], strides = [1, 1, 1, 1]} : vector<1x16x20x2xbf16> to vector<1x16x16x2xbf16>
    %42 = arith.maximumf %40, %41 : vector<1x16x16x2xbf16>
    %43 = vector.extract_strided_slice %35 {offsets = [0, 0, 4, 0], sizes = [1, 16, 16, 2], strides = [1, 1, 1, 1]} : vector<1x16x20x2xbf16> to vector<1x16x16x2xbf16>
    %44 = arith.maximumf %42, %43 : vector<1x16x16x2xbf16>
    %cst_6 = arith.constant 0xFF80 : bf16
    %45 = vector.broadcast %cst_6 : bf16 to vector<1x2x16x2xbf16>
    %46 = tpu.concatenate %45, %44, %45 in 1 : vector<1x2x16x2xbf16>, vector<1x16x16x2xbf16>, vector<1x2x16x2xbf16> -> vector<1x20x16x2xbf16>
    %47 = vector.extract_strided_slice %46 {offsets = [0, 0, 0, 0], sizes = [1, 16, 16, 2], strides = [1, 1, 1, 1]} : vector<1x20x16x2xbf16> to vector<1x16x16x2xbf16>
    %48 = vector.extract_strided_slice %46 {offsets = [0, 1, 0, 0], sizes = [1, 16, 16, 2], strides = [1, 1, 1, 1]} : vector<1x20x16x2xbf16> to vector<1x16x16x2xbf16>
    %49 = arith.maximumf %47, %48 : vector<1x16x16x2xbf16>
    %50 = vector.extract_strided_slice %46 {offsets = [0, 2, 0, 0], sizes = [1, 16, 16, 2], strides = [1, 1, 1, 1]} : vector<1x20x16x2xbf16> to vector<1x16x16x2xbf16>
    %51 = arith.maximumf %49, %50 : vector<1x16x16x2xbf16>
    %52 = vector.extract_strided_slice %46 {offsets = [0, 3, 0, 0], sizes = [1, 16, 16, 2], strides = [1, 1, 1, 1]} : vector<1x20x16x2xbf16> to vector<1x16x16x2xbf16>
    %53 = arith.maximumf %51, %52 : vector<1x16x16x2xbf16>
    %54 = vector.extract_strided_slice %46 {offsets = [0, 4, 0, 0], sizes = [1, 16, 16, 2], strides = [1, 1, 1, 1]} : vector<1x20x16x2xbf16> to vector<1x16x16x2xbf16>
    %55 = arith.maximumf %53, %54 : vector<1x16x16x2xbf16>
    %cst_7 = arith.constant 0xFF80 : bf16
    %56 = vector.broadcast %cst_7 : bf16 to vector<1x16x2x2xbf16>
    %57 = tpu.concatenate %56, %55, %56 in 2 : vector<1x16x2x2xbf16>, vector<1x16x16x2xbf16>, vector<1x16x2x2xbf16> -> vector<1x16x20x2xbf16>
    %58 = vector.extract_strided_slice %57 {offsets = [0, 0, 0, 0], sizes = [1, 16, 16, 2], strides = [1, 1, 1, 1]} : vector<1x16x20x2xbf16> to vector<1x16x16x2xbf16>
    %59 = vector.extract_strided_slice %57 {offsets = [0, 0, 1, 0], sizes = [1, 16, 16, 2], strides = [1, 1, 1, 1]} : vector<1x16x20x2xbf16> to vector<1x16x16x2xbf16>
    %60 = arith.maximumf %58, %59 : vector<1x16x16x2xbf16>
    %61 = vector.extract_strided_slice %57 {offsets = [0, 0, 2, 0], sizes = [1, 16, 16, 2], strides = [1, 1, 1, 1]} : vector<1x16x20x2xbf16> to vector<1x16x16x2xbf16>
    %62 = arith.maximumf %60, %61 : vector<1x16x16x2xbf16>
    %63 = vector.extract_strided_slice %57 {offsets = [0, 0, 3, 0], sizes = [1, 16, 16, 2], strides = [1, 1, 1, 1]} : vector<1x16x20x2xbf16> to vector<1x16x16x2xbf16>
    %64 = arith.maximumf %62, %63 : vector<1x16x16x2xbf16>
    %65 = vector.extract_strided_slice %57 {offsets = [0, 0, 4, 0], sizes = [1, 16, 16, 2], strides = [1, 1, 1, 1]} : vector<1x16x20x2xbf16> to vector<1x16x16x2xbf16>
    %66 = arith.maximumf %64, %65 : vector<1x16x16x2xbf16>
    %c0_8 = arith.constant 0 : index
    %c0_9 = arith.constant 0 : index
    %c0_10 = arith.constant 0 : index
    %67 = vector.load %arg2[%c0_8, %c0_9, %c0_10] : memref<4x2x2xbf16, #tpu.memory_space<vmem>>, vector<4x2x2xbf16>
    %68 = vector.shape_cast %0 : vector<1x16x16x2xbf16> to vector<256x2xbf16>
    %69 = vector.extract_strided_slice %67 {offsets = [0, 0, 0], sizes = [1, 2, 2], strides = [1, 1, 1]} : vector<4x2x2xbf16> to vector<1x2x2xbf16>
    %70 = vector.shape_cast %69 : vector<1x2x2xbf16> to vector<2x2xbf16>
    %cst_11 = arith.constant dense<0.000000e+00> : vector<256x2xf32>
    %71 = tpu.matmul %68, %70, %cst_11 {dimension_numbers = #tpu.dot_dimension_numbers<[1], [0], [0], [1], [0, 0, 1, 1], [], []>} : vector<256x2xbf16>, vector<2x2xbf16>, vector<256x2xf32> -> vector<256x2xf32>
    %72 = vector.shape_cast %22 : vector<1x16x16x2xbf16> to vector<256x2xbf16>
    %73 = vector.extract_strided_slice %67 {offsets = [1, 0, 0], sizes = [1, 2, 2], strides = [1, 1, 1]} : vector<4x2x2xbf16> to vector<1x2x2xbf16>
    %74 = vector.shape_cast %73 : vector<1x2x2xbf16> to vector<2x2xbf16>
    %cst_12 = arith.constant dense<0.000000e+00> : vector<256x2xf32>
    %75 = tpu.matmul %72, %74, %cst_12 {dimension_numbers = #tpu.dot_dimension_numbers<[1], [0], [0], [1], [0, 0, 1, 1], [], []>} : vector<256x2xbf16>, vector<2x2xbf16>, vector<256x2xf32> -> vector<256x2xf32>
    %76 = arith.addf %71, %75 : vector<256x2xf32>
    %77 = vector.shape_cast %44 : vector<1x16x16x2xbf16> to vector<256x2xbf16>
    %78 = vector.extract_strided_slice %67 {offsets = [2, 0, 0], sizes = [1, 2, 2], strides = [1, 1, 1]} : vector<4x2x2xbf16> to vector<1x2x2xbf16>
    %79 = vector.shape_cast %78 : vector<1x2x2xbf16> to vector<2x2xbf16>
    %cst_13 = arith.constant dense<0.000000e+00> : vector<256x2xf32>
    %80 = tpu.matmul %77, %79, %cst_13 {dimension_numbers = #tpu.dot_dimension_numbers<[1], [0], [0], [1], [0, 0, 1, 1], [], []>} : vector<256x2xbf16>, vector<2x2xbf16>, vector<256x2xf32> -> vector<256x2xf32>
    %81 = arith.addf %76, %80 : vector<256x2xf32>
    %82 = vector.shape_cast %66 : vector<1x16x16x2xbf16> to vector<256x2xbf16>
    %83 = vector.extract_strided_slice %67 {offsets = [3, 0, 0], sizes = [1, 2, 2], strides = [1, 1, 1]} : vector<4x2x2xbf16> to vector<1x2x2xbf16>
    %84 = vector.shape_cast %83 : vector<1x2x2xbf16> to vector<2x2xbf16>
    %cst_14 = arith.constant dense<0.000000e+00> : vector<256x2xf32>
    %85 = tpu.matmul %82, %84, %cst_14 {dimension_numbers = #tpu.dot_dimension_numbers<[1], [0], [0], [1], [0, 0, 1, 1], [], []>} : vector<256x2xbf16>, vector<2x2xbf16>, vector<256x2xf32> -> vector<256x2xf32>
    %86 = arith.addf %81, %85 : vector<256x2xf32>
    %c0_15 = arith.constant 0 : index
    %c0_16 = arith.constant 0 : index
    %87 = vector.load %arg3[%c0_15, %c0_16] : memref<1x2xf32, #tpu.memory_space<vmem>>, vector<1x2xf32>
    %88 = vector.broadcast %87 : vector<1x2xf32> to vector<256x2xf32>
    %89 = arith.addf %86, %88 : vector<256x2xf32>
    %90 = arith.negf %89 : vector<256x2xf32>
    %91 = math.exp %90 : vector<256x2xf32>
    %cst_17 = arith.constant 1.000000e+00 : f32
    %92 = vector.broadcast %cst_17 : f32 to vector<256x2xf32>
    %93 = arith.addf %92, %91 : vector<256x2xf32>
    %94 = arith.divf %92, %93 : vector<256x2xf32>
    %95 = arith.mulf %89, %94 : vector<256x2xf32>
    %96 = arith.truncf %95 : vector<256x2xf32> to vector<256x2xbf16>
    %c0_18 = arith.constant 0 : index
    %c0_19 = arith.constant 0 : index
    %97 = vector.load %arg4[%c0_18, %c0_19] : memref<256x2xbf16, #tpu.memory_space<vmem>>, vector<256x2xbf16>
    tpu.vector_store %arg4[%c0_18, %c0_19], %96 {strides = array<i32>} : memref<256x2xbf16, #tpu.memory_space<vmem>>, vector<256x2xbf16>,
    return
  }
  func.func @transform_0(%arg0: i32) -> (i32, i32, i32, i32) {
    %c0_i32 = arith.constant 0 : i32
    %c0_i32_0 = arith.constant 0 : i32
    %c0_i32_1 = arith.constant 0 : i32
    %c0_i32_2 = arith.constant 0 : i32
    return %arg0, %c0_i32, %c0_i32_0, %c0_i32_1 : i32, i32, i32, i32
  }
  func.func @transform_1(%arg0: i32) -> (i32, i32, i32) {
    %c0_i32 = arith.constant 0 : i32
    %c0_i32_0 = arith.constant 0 : i32
    %c0_i32_1 = arith.constant 0 : i32
    %c0_i32_2 = arith.constant 0 : i32
    return %c0_i32, %c0_i32_0, %c0_i32_1 : i32, i32, i32
  }
  func.func @transform_2(%arg0: i32) -> (i32, i32) {
    %c0_i32 = arith.constant 0 : i32
    %c0_i32_0 = arith.constant 0 : i32
    %c0_i32_1 = arith.constant 0 : i32
    return %c0_i32, %c0_i32_0 : i32, i32
  }
  func.func @transform_3(%arg0: i32) -> (i32, i32) {
    %c0_i32 = arith.constant 0 : i32
    %c0_i32_0 = arith.constant 0 : i32
    return %arg0, %c0_i32 : i32, i32
  }
}

module attributes {stable_mosaic.version = 11 : i64} {
  func.func @kernel(%arg0: i32, %arg1: memref<256x2xbf16, #tpu.memory_space<vmem>>, %arg2: memref<256x4xbf16, #tpu.memory_space<vmem>>, %arg3: memref<2x8xbf16, #tpu.memory_space<vmem>>, %arg4: memref<4x8xbf16, #tpu.memory_space<vmem>>, %arg5: memref<1x8xf32, #tpu.memory_space<vmem>>, %arg6: memref<256x8xf32, #tpu.memory_space<vmem>>) attributes {dimension_semantics = [#tpu.dimension_semantics<parallel>], iteration_bounds = array<i64: 2>, scalar_prefetch = 0 : i64, scratch_operands = 0 : i64, tpu.core_type = #tpu.core_type<tc>, window_params = [{transform_indices = @transform_0, window_bounds = array<i64: 256, 2>}, {transform_indices = @transform_1, window_bounds = array<i64: 256, 4>}, {pipeline_mode = #tpu.pipeline_mode<synchronous>, transform_indices = @transform_2, window_bounds = array<i64: 2, 8>}, {pipeline_mode = #tpu.pipeline_mode<synchronous>, transform_indices = @transform_3, window_bounds = array<i64: 4, 8>}, {pipeline_mode = #tpu.pipeline_mode<synchronous>, transform_indices = @transform_4, window_bounds = array<i64: 1, 8>}, {transform_indices = @transform_5, window_bounds = array<i64: 256, 8>}]} {
    %c0 = arith.constant 0 : index
    %c0_0 = arith.constant 0 : index
    %0 = vector.load %arg1[%c0, %c0_0] : memref<256x2xbf16, #tpu.memory_space<vmem>>, vector<256x2xbf16>
    %c0_1 = arith.constant 0 : index
    %c0_2 = arith.constant 0 : index
    %1 = vector.load %arg3[%c0_1, %c0_2] : memref<2x8xbf16, #tpu.memory_space<vmem>>, vector<2x8xbf16>
    %cst = arith.constant dense<0.000000e+00> : vector<256x8xf32>
    %2 = tpu.matmul %0, %1, %cst {dimension_numbers = #tpu.dot_dimension_numbers<[1], [0], [0], [1], [0, 0, 1, 1], [], []>} : vector<256x2xbf16>, vector<2x8xbf16>, vector<256x8xf32> -> vector<256x8xf32>
    %c0_3 = arith.constant 0 : index
    %c0_4 = arith.constant 0 : index
    %3 = vector.load %arg2[%c0_3, %c0_4] : memref<256x4xbf16, #tpu.memory_space<vmem>>, vector<256x4xbf16>
    %c0_5 = arith.constant 0 : index
    %c0_6 = arith.constant 0 : index
    %4 = vector.load %arg4[%c0_5, %c0_6] : memref<4x8xbf16, #tpu.memory_space<vmem>>, vector<4x8xbf16>
    %cst_7 = arith.constant dense<0.000000e+00> : vector<256x8xf32>
    %5 = tpu.matmul %3, %4, %cst_7 {dimension_numbers = #tpu.dot_dimension_numbers<[1], [0], [0], [1], [0, 0, 1, 1], [], []>} : vector<256x4xbf16>, vector<4x8xbf16>, vector<256x8xf32> -> vector<256x8xf32>
    %6 = arith.addf %2, %5 : vector<256x8xf32>
    %c0_8 = arith.constant 0 : index
    %c0_9 = arith.constant 0 : index
    %7 = vector.load %arg5[%c0_8, %c0_9] : memref<1x8xf32, #tpu.memory_space<vmem>>, vector<1x8xf32>
    %8 = vector.broadcast %7 : vector<1x8xf32> to vector<256x8xf32>
    %9 = arith.addf %6, %8 : vector<256x8xf32>
    %10 = arith.negf %9 : vector<256x8xf32>
    %11 = math.exp %10 : vector<256x8xf32>
    %cst_10 = arith.constant 1.000000e+00 : f32
    %12 = vector.broadcast %cst_10 : f32 to vector<256x8xf32>
    %13 = arith.addf %12, %11 : vector<256x8xf32>
    %14 = arith.divf %12, %13 : vector<256x8xf32>
    %15 = arith.mulf %9, %14 : vector<256x8xf32>
    %c0_11 = arith.constant 0 : index
    %c0_12 = arith.constant 0 : index
    %16 = vector.load %arg6[%c0_11, %c0_12] : memref<256x8xf32, #tpu.memory_space<vmem>>, vector<256x8xf32>
    tpu.vector_store %arg6[%c0_11, %c0_12], %15 {strides = array<i32>} : memref<256x8xf32, #tpu.memory_space<vmem>>, vector<256x8xf32>,
    return
  }
  func.func @transform_0(%arg0: i32) -> (i32, i32) {
    %c0_i32 = arith.constant 0 : i32
    %c0_i32_0 = arith.constant 0 : i32
    return %arg0, %c0_i32 : i32, i32
  }
  func.func @transform_1(%arg0: i32) -> (i32, i32) {
    %c0_i32 = arith.constant 0 : i32
    %c0_i32_0 = arith.constant 0 : i32
    return %arg0, %c0_i32 : i32, i32
  }
  func.func @transform_2(%arg0: i32) -> (i32, i32) {
    %c0_i32 = arith.constant 0 : i32
    %c0_i32_0 = arith.constant 0 : i32
    %c0_i32_1 = arith.constant 0 : i32
    return %c0_i32, %c0_i32_0 : i32, i32
  }
  func.func @transform_3(%arg0: i32) -> (i32, i32) {
    %c0_i32 = arith.constant 0 : i32
    %c0_i32_0 = arith.constant 0 : i32
    %c0_i32_1 = arith.constant 0 : i32
    return %c0_i32, %c0_i32_0 : i32, i32
  }
  func.func @transform_4(%arg0: i32) -> (i32, i32) {
    %c0_i32 = arith.constant 0 : i32
    %c0_i32_0 = arith.constant 0 : i32
    %c0_i32_1 = arith.constant 0 : i32
    return %c0_i32, %c0_i32_0 : i32, i32
  }
  func.func @transform_5(%arg0: i32) -> (i32, i32) {
    %c0_i32 = arith.constant 0 : i32
    %c0_i32_0 = arith.constant 0 : i32
    return %arg0, %c0_i32 : i32, i32
  }
}

</mosaic_0001>

<bundles_post_ra>
// kernel: sppcsp_forward.6
= control target key start
LH: loop header
LB: loop body
LE: loop exit
PB: predicated region body
PF: predicated region fallthrough
CT: control target
= control target key end

     0   :  { %s1325_s12 = smov 0   ;;  %s1638_s0 = inlined_call_operand.vmem [shape: bf16[512,4], index: 0, kind: input, shape index: {}]   ;;  %s1639_s1 = inlined_call_operand.vmem [shape: bf16[4,2], index: 1, kind: input, shape index: {}]   ;;  %s1640_s2 = inlined_call_operand.vmem [shape: f32[1,2], index: 2, kind: input, shape index: {}]   ;;  %s1641_s3 = inlined_call_operand.vmem [shape: bf16[512,2], index: 3, kind: output, shape index: {}]  }
   0x1 LB: > { %s950_s13 = sadd.s32 4294967295, %s1303_s12   ;;  %p954_p0 = scmp.ge.s32.totalorder %s1303_s12, 1  ;;  %s1303_s12 = sphi %s1325_s12, %s13_s12  }
   0x2   : > { %p138_p1 = scmp.lt.s32.totalorder %s1303_s12, 3 }
   0x4   : > { %p139_p2 = pnand %p954_p0, %p138_p1 }
   0x5   : > { %v207_v0 = vld [vmem:[%s1639_s1] sm:$0x3] (!%p139_p2)  ;;  %vm344_vm0 = vcmask (!%p139_p2), 1041408   ;;  %s955_s16 = sshll.u32 (!%p139_p2), %s950_s13, 5  ;;  %vm295_vm1 = vcmask (!%p139_p2), 31744   ;;  %vm861_vm2 = vcmask (!%p139_p2), 11264  }
   0x6   : > { %142 = sbr.rel (%p139_p2) target bundleno = 322 (0x142), region = 32  ;;  %1143 = vmatprep.subr.msk.bf16.mxu0 (!%p139_p2), %vm344_vm0, %v207_v0  ;;  %1144 = vmatprep.subr.msk.bf16.mxu1 (!%p139_p2), %vm344_vm0, %v207_v0  ;;  %v346_v1 = vsel (!%p139_p2), %vm344_vm0, %v207_v0, 0  ;;  %p163_p3 = scmp.lt.s32.totalorder (!%p139_p2), %s955_s16, 63  ;;  %v1381_v18 = vld [vmem:[%s1640_s2] ss:$0 sm:$0xff] (!%p139_p2) }
   0x7   : > { %1108 = vmatpush3.bf16.msra.mxu0 (!%p139_p2), %v346_v1  ;;  %1142 = vmatpush3.bf16.msra.mxu1 (!%p139_p2), %v346_v1 }
   0xd   : > { %s1643_s16 = smov (!%p163_p3, %s955_s16), 63 }
   0xe   : > { %s956_s17 = sshll.u32 %s1643_s16, 2 }
   0xf   : > { %s1344_s20 = scalar_lea.vmem %s1638_s0, %s956_s17  ;;  %s1488_s25 = scalar_lea.vmem %s1641_s3, %s956_s17 }
  0x10   : > { %v1153_v2 = vld [vmem:[%s1344_s20] sm:$0xff]   ;;  %v1155_v4 = vld [vmem:[%s1344_s20 + $0x8] sm:$0xff]   ;;  %v1157_v6 = vld [vmem:[%s1344_s20 + $0x10] sm:$0xff]  }
  0x11   : > { %v1154_v3 = vld [vmem:[%s1344_s20 + $0x40] sm:$0xff]   ;;  %1109 = vmatprep.mubr.msk.bf16.mxu0 %vm295_vm1, %v1153_v2  ;;  %v1156_v5 = vld [vmem:[%s1344_s20 + $0x48] sm:$0xff]   ;;  %v1158_v7 = vld [vmem:[%s1344_s20 + $0x50] sm:$0xff]  }
  0x12   : > { %1125 = vmatprep.mubr.msk.bf16.mxu1 %vm295_vm1, %v1154_v3  ;;  %1110 = vmatmul.mubr.msk.bf16.vlgmr.msra.gmra.mrb[0].mxu0 %vm295_vm1, %v1155_v4  ;;  %v1159_v8 = vld [vmem:[%s1344_s20 + $0x18] sm:$0xff]   ;;  %v1161_v10 = vld [vmem:[%s1344_s20 + $0x20] sm:$0xff]   ;;  %v1163_v12 = vld [vmem:[%s1344_s20 + $0x28] sm:$0xff]  }
  0x13   : > { %1126 = vmatmul.mubr.msk.bf16.vlgmr.msra.gmra.mrb[0].mxu1 %vm295_vm1, %v1156_v5  ;;  %1113 = vmatprep.mubr.msk.bf16.mxu0 %vm295_vm1, %v1157_v6  ;;  %v1160_v9 = vld [vmem:[%s1344_s20 + $0x58] sm:$0xff]   ;;  %v1162_v11 = vld [vmem:[%s1344_s20 + $0x60] sm:$0xff]   ;;  %v1164_v13 = vld [vmem:[%s1344_s20 + $0x68] sm:$0xff]  }
  0x14   : > { %1129 = vmatprep.mubr.msk.bf16.mxu1 %vm295_vm1, %v1158_v7  ;;  %v1165_v14 = vld [vmem:[%s1344_s20 + $0x30] sm:$0xff]   ;;  %v1167_v16 = vld [vmem:[%s1344_s20 + $0x38] sm:$0xff]  }
  0x15   : > { %v1166_v15 = vld [vmem:[%s1344_s20 + $0x70] sm:$0xff]   ;;  %v1168_v17 = vld [vmem:[%s1344_s20 + $0x78] sm:$0xff]  }
  0x1a   : > { %1114 = vmatmul.mubr.msk.bf16.gmra.mrb[4].mxu0 %vm295_vm1, %v1159_v8 }
  0x1b   : > { %1130 = vmatmul.mubr.msk.bf16.gmra.mrb[4].mxu1 %vm295_vm1, %v1160_v9  ;;  %1117 = vmatprep.mubr.msk.bf16.mxu0 %vm295_vm1, %v1161_v10 }
  0x1c   : > { %1133 = vmatprep.mubr.msk.bf16.mxu1 %vm295_vm1, %v1162_v11 }
  0x22   : > { %1118 = vmatmul.mubr.msk.bf16.gmra.mrb[8].mxu0 %vm295_vm1, %v1163_v12 }
  0x23   : > { %1134 = vmatmul.mubr.msk.bf16.gmra.mrb[8].mxu1 %vm295_vm1, %v1164_v13  ;;  %1121 = vmatprep.mubr.msk.bf16.mxu0 %vm295_vm1, %v1165_v14 }
  0x24   : > { %1137 = vmatprep.mubr.msk.bf16.mxu1 %vm295_vm1, %v1166_v15 }
  0x2a   : > { %1122 = vmatmul.mubr.msk.bf16.gmra.mrb[12].mxu0 %vm295_vm1, %v1167_v16 }
  0x2b   : > { %1138 = vmatmul.mubr.msk.bf16.gmra.mrb[12].mxu1 %vm295_vm1, %v1168_v17 }
  0xe5   : > { %v1111_v19 = vpop.f32.mrb[0].mxu0 }
  0xe6   : > { %v1384_v20 = vadd.f32 %v1111_v19, %v1381_v18  ;;  %v1127_v21 = vpop.f32.mrb[0].mxu1  ;;  %v382_v22 = vpop.f32.mrb[1].mxu0 }
  0xe7   : > { %v1387_v23 = vadd.f32 %v1127_v21, %v1381_v18  ;;  %v1390_v24 = vadd.f32 %v1381_v18, %v382_v22  ;;  %v446_v25 = vpop.f32.mrb[1].mxu1  ;;  %v1112_v26 = vpop.f32.mrb[2].mxu0 }
  0xe8   : > { %v994_v27 = vmul.f32 -1.442695, %v1384_v20  ;;  %v1394_v28 = vadd.f32 %v1381_v18, %v446_v25  ;;  %v1397_v29 = vadd.f32 %v1112_v26, %v1381_v18  ;;  %v1128_v30 = vpop.f32.mrb[2].mxu1  ;;  %v385_v31 = vpop.f32.mrb[3].mxu0 }
  0xe9   : > { %v1010_v32 = vmul.f32 -1.442695, %v1387_v23  ;;  %v992_v33 = vmul.f32 -1.442695, %v1390_v24  ;;  %v1402_v34 = vadd.f32 %v1128_v30, %v1381_v18  ;;  %v1405_v35 = vadd.f32 %v1381_v18, %v385_v31  ;;  %v449_v36 = vpop.f32.mrb[3].mxu1 }
  0xea   : > { %1169 = vpow2.f32 %v994_v27  ;;  %v1008_v37 = vmul.f32 -1.442695, %v1394_v28  ;;  %v995_v38 = vmul.f32 -1.442695, %v1397_v29  ;;  %v1410_v39 = vadd.f32 %v1381_v18, %v449_v36 }
  0xeb   : > { %1171 = vpow2.f32 %v1010_v32  ;;  %v1011_v40 = vmul.f32 -1.442695, %v1402_v34  ;;  %v993_v41 = vmul.f32 -1.442695, %v1405_v35 }
  0xec   : > { %1173 = vpow2.f32 %v992_v33  ;;  %v1009_v42 = vmul.f32 -1.442695, %v1410_v39 }
  0xed   : > { %1175 = vpow2.f32 %v1008_v37  ;;  %v1115_v43 = vpop.f32.mrb[4].mxu0 }
  0xee   : > { %1177 = vpow2.f32 %v995_v38  ;;  %v1416_v44 = vadd.f32 %v1115_v43, %v1381_v18  ;;  %v1131_v45 = vpop.f32.mrb[4].mxu1  ;;  %v398_v46 = vpop.f32.mrb[5].mxu0 }
  0xef   : > { %1179 = vpow2.f32 %v1011_v40  ;;  %v1419_v47 = vadd.f32 %v1131_v45, %v1381_v18  ;;  %v1422_v48 = vadd.f32 %v1381_v18, %v398_v46  ;;  %v462_v49 = vpop.f32.mrb[5].mxu1  ;;  %v1116_v50 = vpop.f32.mrb[6].mxu0 }
  0xf0   : > { %1181 = vpow2.f32 %v993_v41  ;;  %v998_v51 = vmul.f32 -1.442695, %v1416_v44  ;;  %v1426_v52 = vadd.f32 %v1381_v18, %v462_v49  ;;  %v1429_v53 = vadd.f32 %v1116_v50, %v1381_v18  ;;  %v1132_v54 = vpop.f32.mrb[6].mxu1  ;;  %v401_v55 = vpop.f32.mrb[7].mxu0 }
  0xf1   : > { %1183 = vpow2.f32 %v1009_v42  ;;  %v1014_v56 = vmul.f32 -1.442695, %v1419_v47  ;;  %v996_v57 = vmul.f32 -1.442695, %v1422_v48  ;;  %v465_v58 = vpop.f32.mrb[7].mxu1  ;;  %v1438_v19 = vadd.f32 %v1132_v54, %v1381_v18 }
  0xf2   : > { %1185 = vpow2.f32 %v998_v51  ;;  %v1012_v59 = vmul.f32 -1.442695, %v1426_v52  ;;  %v999_v60 = vmul.f32 -1.442695, %v1429_v53  ;;  %v1441_v25 = vadd.f32 %v1381_v18, %v401_v55 }
  0xf3   : > { %1187 = vpow2.f32 %v1014_v56  ;;  %v1444_v30 = vadd.f32 %v1381_v18, %v465_v58  ;;  %v1015_v41 = vmul.f32 -1.442695, %v1438_v19 }
  0xf4   : > { %v1170_v61 = vpop.eup %1169  ;;  %1189 = vpow2.f32 %v996_v57  ;;  %v997_v50 = vmul.f32 -1.442695, %v1441_v25 }
  0xf5   : > { %v1172_v62 = vpop.eup %1171  ;;  %v607_v63 = vadd.f32 1.0, %v1170_v61  ;;  %1191 = vpow2.f32 %v1012_v59  ;;  %v1119_v0 = vpop.f32.mrb[8].mxu0  ;;  %v1013_v58 = vmul.f32 -1.442695, %v1444_v30 }
  0xf6   : > { %v1174_v1 = vpop.eup %1173  ;;  %v623_v2 = vadd.f32 1.0, %v1172_v62  ;;  %1193 = vpow2.f32 %v999_v60  ;;  %v1135_v3 = vpop.f32.mrb[8].mxu1  ;;  %v1447_v33 = vadd.f32 %v1119_v0, %v1381_v18 }
  0xf7   : > { %v414_v4 = vpop.f32.mrb[9].mxu0  ;;  %v1176_v5 = vpop.eup %1175  ;;  %1195 = vrcp.f32 %v607_v63  ;;  %v605_v6 = vadd.f32 1.0, %v1174_v1  ;;  %v1450_v36 = vadd.f32 %v1135_v3, %v1381_v18 }
  0xf8   : > { %v478_v7 = vpop.f32.mrb[9].mxu1  ;;  %v1120_v8 = vpop.f32.mrb[10].mxu0  ;;  %1197 = vrcp.f32 %v623_v2  ;;  %v621_v10 = vadd.f32 1.0, %v1176_v5  ;;  %v1454_v42 = vadd.f32 %v1381_v18, %v414_v4  ;;  %v1002_v0 = vmul.f32 -1.442695, %v1447_v33 }
  0xf9   : > { %v1178_v9 = vpop.eup %1177  ;;  %v1136_v11 = vpop.f32.mrb[10].mxu1  ;;  %1199 = vrcp.f32 %v605_v6  ;;  %v1460_v51 = vadd.f32 %v1381_v18, %v478_v7  ;;  %v1468_v59 = vadd.f32 %v1120_v8, %v1381_v18  ;;  %v1018_v1 = vmul.f32 -1.442695, %v1450_v36 }
  0xfa   : > { %v417_v12 = vpop.f32.mrb[11].mxu0  ;;  %v1180_v13 = vpop.eup %1179  ;;  %v608_v14 = vadd.f32 1.0, %v1178_v9  ;;  %1201 = vrcp.f32 %v621_v10  ;;  %v1000_v5 = vmul.f32 -1.442695, %v1454_v42  ;;  %v1481_v6 = vadd.f32 %v1136_v11, %v1381_v18 }
  0xfb   : > { %v1435_v15 = vpop.f32.mrb[11].mxu1  ;;  %v1182_v16 = vpop.eup %1181  ;;  %v624_v17 = vadd.f32 1.0, %v1180_v13  ;;  %v1016_v9 = vmul.f32 -1.442695, %v1460_v51 }
  0xfc   : > { %v1184_v21 = vpop.eup %1183  ;;  %1203 = vrcp.f32 %v608_v14  ;;  %v606_v22 = vadd.f32 1.0, %v1182_v16  ;;  %v1003_v14 = vmul.f32 -1.442695, %v1468_v59 }
  0xfd   : > { %v1186_v26 = vpop.eup %1185  ;;  %1205 = vrcp.f32 %v624_v17  ;;  %v622_v27 = vadd.f32 1.0, %v1184_v21  ;;  %v1123_v37 = vpop.f32.mrb[12].mxu0 }
  0xfe   : > { %v1188_v31 = vpop.eup %1187  ;;  %1207 = vrcp.f32 %v606_v22  ;;  %v611_v32 = vadd.f32 1.0, %v1186_v26  ;;  %v1139_v43 = vpop.f32.mrb[12].mxu1 }
  0xff   : > { %v1190_v38 = vpop.eup %1189  ;;  %1209 = vrcp.f32 %v622_v27  ;;  %v627_v40 = vadd.f32 1.0, %v1188_v31  ;;  %v1456_v45 = vpop.f32.mrb[13].mxu0 }
 0x100   : > { %v1192_v46 = vpop.eup %1191  ;;  %1211 = vrcp.f32 %v611_v32  ;;  %v609_v49 = vadd.f32 1.0, %v1190_v38  ;;  %v1462_v54 = vpop.f32.mrb[13].mxu1 }
 0x101   : > { %v1464_v55 = vpop.f32.mrb[14].mxu0  ;;  %v1194_v56 = vpop.eup %1193  ;;  %1213 = vrcp.f32 %v627_v40  ;;  %v625_v57 = vadd.f32 1.0, %v1192_v46  ;;  %v1516_v40 = vadd.f32 %v1139_v43, %v1381_v18 }
 0x102   : > { %v1470_v60 = vpop.f32.mrb[14].mxu1  ;;  %v1472_v61 = vpop.f32.mrb[15].mxu0  ;;  %1215 = vrcp.f32 %v609_v49  ;;  %v612_v63 = vadd.f32 1.0, %v1194_v56 }
 0x103   : > { %v1196_v62 = vpop.eup %1195  ;;  %v1476_v2 = vpop.f32.mrb[15].mxu1  ;;  %1217 = vrcp.f32 %v625_v57 }
 0x104   : > { %v1198_v3 = vpop.eup %1197  ;;  %v703_v4 = vmul.f32 %v1196_v62, %v1384_v20  ;;  %1219 = vrcp.f32 %v612_v63  ;;  %v1493_v20 = vadd.f32 %v1381_v18, %v417_v12 }
 0x105   : > { %v1200_v7 = vpop.eup %1199  ;;  %v719_v8 = vmul.f32 %v1198_v3, %v1387_v23  ;;  %1221 = vpow2.f32 %v1015_v41  ;;  %v1500_v23 = vadd.f32 %v1381_v18, %v1435_v15  ;;  %v1510_v15 = vadd.f32 %v1123_v37, %v1381_v18 }
 0x106   : > { %v1202_v10 = vpop.eup %1201  ;;  %v1060_v13 = vpack.c.bf16 %v703_v4, %v703_v4  ;;  %v701_v11 = vmul.f32 %v1200_v7, %v1390_v24  ;;  %1223 = vpow2.f32 %v997_v50  ;;  %v1019_v24 = vmul.f32 -1.442695, %v1481_v6 }
 0x107   : > { %v1204_v16 = vpop.eup %1203  ;;  %v1076_v17 = vpack.c.bf16 %v719_v8, %v719_v8  ;;  %v717_v21 = vmul.f32 %v1202_v10, %v1394_v28  ;;  %1225 = vpow2.f32 %v1013_v58  ;;  %v1001_v37 = vmul.f32 -1.442695, %v1493_v20 }
 0x108   : > { %v1206_v12 = vpop.eup %1205  ;;  %864 = vst.msk [vmem:[%s1488_s25 + $0x8] sm:$0xf] %vm861_vm2, %v1060_v13  ;;  %v1058_v22 = vpack.c.bf16 %v701_v11, %v701_v11  ;;  %v704_v26 = vmul.f32 %v1204_v16, %v1397_v29  ;;  %1227 = vpow2.f32 %v1002_v0  ;;  %v1017_v43 = vmul.f32 -1.442695, %v1500_v23 }
 0x109   : > { %v1208_v27 = vpop.eup %1207  ;;  %880 = vst.msk [vmem:[%s1488_s25 + $0x48] sm:$0xf] %vm861_vm2, %v1076_v17  ;;  %v1074_v28 = vpack.c.bf16 %v717_v21, %v717_v21  ;;  %v720_v31 = vmul.f32 %v1206_v12, %v1402_v34  ;;  %1229 = vpow2.f32 %v1018_v1  ;;  %v1006_v58 = vmul.f32 -1.442695, %v1510_v15 }
 0x10a   : > { %v1210_v32 = vpop.eup %1209  ;;  %862 = vst.msk [vmem:[%s1488_s25] sm:$0xf] %vm861_vm2, %v1058_v22  ;;  %v1061_v38 = vpack.c.bf16 %v704_v26, %v704_v26  ;;  %v702_v29 = vmul.f32 %v1208_v27, %v1405_v35  ;;  %1231 = vpow2.f32 %v1000_v5  ;;  %v1022_v0 = vmul.f32 -1.442695, %v1516_v40 }
 0x10b   : > { %v1212_v41 = vpop.eup %1211  ;;  %878 = vst.msk [vmem:[%s1488_s25 + $0x40] sm:$0xf] %vm861_vm2, %v1074_v28  ;;  %v1077_v34 = vpack.c.bf16 %v720_v31, %v720_v31  ;;  %v718_v46 = vmul.f32 %v1210_v32, %v1410_v39  ;;  %1233 = vpow2.f32 %v1016_v9  ;;  %v1550_v31 = vadd.f32 %v1381_v18, %v1456_v45 }
 0x10c   : > { %v1214_v49 = vpop.eup %1213  ;;  %865 = vst.msk [vmem:[%s1488_s25 + $0xc] sm:$0xf] %vm861_vm2, %v1061_v38  ;;  %v1059_v50 = vpack.c.bf16 %v702_v29, %v702_v29  ;;  %v707_v35 = vmul.f32 %v1212_v41, %v1416_v44  ;;  %1235 = vpow2.f32 %v1003_v14  ;;  %v1554_v29 = vadd.f32 %v1381_v18, %v1462_v54 }
 0x10d   : > { %v1216_v56 = vpop.eup %1215  ;;  %881 = vst.msk [vmem:[%s1488_s25 + $0x4c] sm:$0xf] %vm861_vm2, %v1077_v34  ;;  %v1075_v57 = vpack.c.bf16 %v718_v46, %v718_v46  ;;  %v723_v39 = vmul.f32 %v1214_v49, %v1419_v47  ;;  %1237 = vpow2.f32 %v1019_v24  ;;  %v1558_v46 = vadd.f32 %v1464_v55, %v1381_v18 }
 0x10e   : > { %v1218_v62 = vpop.eup %1217  ;;  %863 = vst.msk [vmem:[%s1488_s25 + $0x4] sm:$0xf] %vm861_vm2, %v1059_v50  ;;  %v1064_v63 = vpack.c.bf16 %v707_v35, %v707_v35  ;;  %v705_v44 = vmul.f32 %v1216_v56, %v1422_v48  ;;  %1239 = vpow2.f32 %v1001_v37  ;;  %v1562_v45 = vadd.f32 %v1470_v60, %v1381_v18 }
 0x10f   : > { %v1220_v1 = vpop.eup %1219  ;;  %879 = vst.msk [vmem:[%s1488_s25 + $0x44] sm:$0xf] %vm861_vm2, %v1075_v57  ;;  %v1080_v3 = vpack.c.bf16 %v723_v39, %v723_v39  ;;  %v721_v47 = vmul.f32 %v1218_v62, %v1426_v52  ;;  %1241 = vpow2.f32 %v1017_v43  ;;  %v1004_v54 = vmul.f32 -1.442695, %v1550_v31 }
 0x110   : > { %v1222_v4 = vpop.eup %1221  ;;  %868 = vst.msk [vmem:[%s1488_s25 + $0x18] sm:$0xf] %vm861_vm2, %v1064_v63  ;;  %v1062_v5 = vpack.c.bf16 %v705_v44, %v705_v44  ;;  %v708_v7 = vmul.f32 %v1220_v1, %v1429_v53  ;;  %1243 = vpow2.f32 %v1006_v58  ;;  %v1567_v43 = vadd.f32 %v1381_v18, %v1472_v61 }
 0x111   : > { %v1224_v48 = vpop.eup %1223  ;;  %884 = vst.msk [vmem:[%s1488_s25 + $0x58] sm:$0xf] %vm861_vm2, %v1080_v3  ;;  %v1078_v8 = vpack.c.bf16 %v721_v47, %v721_v47  ;;  %v628_v9 = vadd.f32 1.0, %v1222_v4  ;;  %1245 = vpow2.f32 %v1022_v0  ;;  %v1020_v57 = vmul.f32 -1.442695, %v1554_v29 }
 0x112   : > { %v1226_v10 = vpop.eup %1225  ;;  %866 = vst.msk [vmem:[%s1488_s25 + $0x10] sm:$0xf] %vm861_vm2, %v1062_v5  ;;  %v1065_v52 = vpack.c.bf16 %v708_v7, %v708_v7  ;;  %v610_v13 = vadd.f32 1.0, %v1224_v48  ;;  %v1572_v39 = vadd.f32 %v1381_v18, %v1476_v2  ;;  %v1007_v62 = vmul.f32 -1.442695, %v1558_v46 }
 0x113   : > { %v1228_v11 = vpop.eup %1227  ;;  %882 = vst.msk [vmem:[%s1488_s25 + $0x50] sm:$0xf] %vm861_vm2, %v1078_v8  ;;  %1247 = vrcp.f32 %v628_v9  ;;  %v626_v14 = vadd.f32 1.0, %v1226_v10  ;;  %v1023_v44 = vmul.f32 -1.442695, %v1562_v45 }
 0x114   : > { %v1230_v53 = vpop.eup %1229  ;;  %869 = vst.msk [vmem:[%s1488_s25 + $0x1c] sm:$0xf] %vm861_vm2, %v1065_v52  ;;  %1249 = vrcp.f32 %v610_v13  ;;  %v615_v16 = vadd.f32 1.0, %v1228_v11  ;;  %v1005_v18 = vmul.f32 -1.442695, %v1567_v43 }
 0x115   : > { %v1232_v17 = vpop.eup %1231  ;;  %1251 = vrcp.f32 %v626_v14  ;;  %v631_v21 = vadd.f32 1.0, %v1230_v53  ;;  %v1021_v4 = vmul.f32 -1.442695, %v1572_v39 }
 0x116   : > { %v1234_v12 = vpop.eup %1233  ;;  %1253 = vrcp.f32 %v615_v16  ;;  %v613_v22 = vadd.f32 1.0, %v1232_v17 }
 0x117   : > { %v1236_v26 = vpop.eup %1235  ;;  %1255 = vrcp.f32 %v631_v21  ;;  %v629_v24 = vadd.f32 1.0, %v1234_v12 }
 0x118   : > { %v1238_v27 = vpop.eup %1237  ;;  %1257 = vrcp.f32 %v613_v22  ;;  %v616_v28 = vadd.f32 1.0, %v1236_v26 }
 0x119   : > { %v1240_v32 = vpop.eup %1239  ;;  %1259 = vrcp.f32 %v629_v24  ;;  %v632_v38 = vadd.f32 1.0, %v1238_v27 }
 0x11a   : > { %v1242_v41 = vpop.eup %1241  ;;  %1261 = vrcp.f32 %v616_v28  ;;  %v614_v34 = vadd.f32 1.0, %v1240_v32 }
 0x11b   : > { %v1244_v37 = vpop.eup %1243  ;;  %1263 = vrcp.f32 %v632_v38  ;;  %v630_v49 = vadd.f32 1.0, %v1242_v41 }
 0x11c   : > { %v1246_v50 = vpop.eup %1245  ;;  %1265 = vrcp.f32 %v614_v34  ;;  %v619_v35 = vadd.f32 1.0, %v1244_v37 }
 0x11d   : > { %v1248_v56 = vpop.eup %1247  ;;  %1267 = vrcp.f32 %v630_v49  ;;  %v635_v55 = vadd.f32 1.0, %v1246_v50 }
 0x11e   : > { %v1250_v60 = vpop.eup %1249  ;;  %v724_v58 = vmul.f32 %v1248_v56, %v1438_v19  ;;  %1269 = vrcp.f32 %v619_v35 }
 0x11f   : > { %v1252_v63 = vpop.eup %1251  ;;  %v706_v61 = vmul.f32 %v1250_v60, %v1441_v25  ;;  %1271 = vrcp.f32 %v635_v55 }
 0x120   : > { %v1254_v0 = vpop.eup %1253  ;;  %v1081_v1 = vpack.c.bf16 %v724_v58, %v724_v58  ;;  %v722_v3 = vmul.f32 %v1252_v63, %v1444_v30  ;;  %1273 = vpow2.f32 %v1004_v54 }
 0x121   : > { %v1256_v2 = vpop.eup %1255  ;;  %v1063_v19 = vpack.c.bf16 %v706_v61, %v706_v61  ;;  %v711_v47 = vmul.f32 %v1254_v0, %v1447_v33  ;;  %1275 = vpow2.f32 %v1020_v57 }
 0x122   : > { %v1258_v25 = vpop.eup %1257  ;;  %885 = vst.msk [vmem:[%s1488_s25 + $0x5c] sm:$0xf] %vm861_vm2, %v1081_v1  ;;  %v1079_v5 = vpack.c.bf16 %v722_v3, %v722_v3  ;;  %v727_v7 = vmul.f32 %v1256_v2, %v1450_v36  ;;  %1277 = vpow2.f32 %v1007_v62 }
 0x123   : > { %v1260_v30 = vpop.eup %1259  ;;  %867 = vst.msk [vmem:[%s1488_s25 + $0x14] sm:$0xf] %vm861_vm2, %v1063_v19  ;;  %v1068_v48 = vpack.c.bf16 %v711_v47, %v711_v47  ;;  %v709_v8 = vmul.f32 %v1258_v25, %v1454_v42  ;;  %1279 = vpow2.f32 %v1023_v44 }
 0x124   : > { %v1262_v33 = vpop.eup %1261  ;;  %883 = vst.msk [vmem:[%s1488_s25 + $0x54] sm:$0xf] %vm861_vm2, %v1079_v5  ;;  %v1084_v9 = vpack.c.bf16 %v727_v7, %v727_v7  ;;  %v725_v10 = vmul.f32 %v1260_v30, %v1460_v51  ;;  %1281 = vpow2.f32 %v1005_v18 }
 0x125   : > { %v1264_v52 = vpop.eup %1263  ;;  %872 = vst.msk [vmem:[%s1488_s25 + $0x28] sm:$0xf] %vm861_vm2, %v1068_v48  ;;  %v1066_v36 = vpack.c.bf16 %v709_v8, %v709_v8  ;;  %v712_v13 = vmul.f32 %v1262_v33, %v1468_v59  ;;  %1283 = vpow2.f32 %v1021_v4 }
 0x126   : > { %v1266_v11 = vpop.eup %1265  ;;  %888 = vst.msk [vmem:[%s1488_s25 + $0x68] sm:$0xf] %vm861_vm2, %v1084_v9  ;;  %v1082_v42 = vpack.c.bf16 %v725_v10, %v725_v10  ;;  %v728_v14 = vmul.f32 %v1264_v52, %v1481_v6 }
 0x127   : > { %v1268_v53 = vpop.eup %1267  ;;  %870 = vst.msk [vmem:[%s1488_s25 + $0x20] sm:$0xf] %vm861_vm2, %v1066_v36  ;;  %v1069_v51 = vpack.c.bf16 %v712_v13, %v712_v13  ;;  %v710_v16 = vmul.f32 %v1266_v11, %v1493_v20 }
 0x128   : > { %v1270_v17 = vpop.eup %1269  ;;  %886 = vst.msk [vmem:[%s1488_s25 + $0x60] sm:$0xf] %vm861_vm2, %v1082_v42  ;;  %v1085_v59 = vpack.c.bf16 %v728_v14, %v728_v14  ;;  %v726_v21 = vmul.f32 %v1268_v53, %v1500_v23 }
 0x129   : > { %v1272_v12 = vpop.eup %1271  ;;  %873 = vst.msk [vmem:[%s1488_s25 + $0x2c] sm:$0xf] %vm861_vm2, %v1069_v51  ;;  %v1067_v22 = vpack.c.bf16 %v710_v16, %v710_v16  ;;  %v715_v6 = vmul.f32 %v1270_v17, %v1510_v15 }
 0x12a   : > { %v1274_v26 = vpop.eup %1273  ;;  %889 = vst.msk [vmem:[%s1488_s25 + $0x6c] sm:$0xf] %vm861_vm2, %v1085_v59  ;;  %v1083_v24 = vpack.c.bf16 %v726_v21, %v726_v21  ;;  %v731_v20 = vmul.f32 %v1272_v12, %v1516_v40 }
 0x12b   : > { %v1276_v27 = vpop.eup %1275  ;;  %871 = vst.msk [vmem:[%s1488_s25 + $0x24] sm:$0xf] %vm861_vm2, %v1067_v22  ;;  %v1072_v28 = vpack.c.bf16 %v715_v6, %v715_v6  ;;  %v617_v32 = vadd.f32 1.0, %v1274_v26 }
 0x12c   : > { %v1278_v23 = vpop.eup %1277  ;;  %887 = vst.msk [vmem:[%s1488_s25 + $0x64] sm:$0xf] %vm861_vm2, %v1083_v24  ;;  %v1088_v38 = vpack.c.bf16 %v731_v20, %v731_v20  ;;  %v633_v41 = vadd.f32 1.0, %v1276_v27 }
 0x12d   : > { %v1280_v34 = vpop.eup %1279  ;;  %876 = vst.msk [vmem:[%s1488_s25 + $0x38] sm:$0xf] %vm861_vm2, %v1072_v28  ;;  %1285 = vrcp.f32 %v617_v32  ;;  %v620_v15 = vadd.f32 1.0, %v1278_v23 }
 0x12e   : > { %v1282_v37 = vpop.eup %1281  ;;  %892 = vst.msk [vmem:[%s1488_s25 + $0x78] sm:$0xf] %vm861_vm2, %v1088_v38  ;;  %1287 = vrcp.f32 %v633_v41  ;;  %v636_v40 = vadd.f32 1.0, %v1280_v34 }
 0x12f   : > { %v1284_v49 = vpop.eup %1283  ;;  %1289 = vrcp.f32 %v620_v15  ;;  %v618_v50 = vadd.f32 1.0, %v1282_v37 }
 0x130   : > { %1291 = vrcp.f32 %v636_v40  ;;  %v634_v35 = vadd.f32 1.0, %v1284_v49 }
 0x131   : > { %1293 = vrcp.f32 %v618_v50 }
 0x132   : > { %1295 = vrcp.f32 %v634_v35 }
 0x137   : > { %v1286_v54 = vpop.eup %1285 }
 0x138   : > { %v1288_v56 = vpop.eup %1287  ;;  %v713_v55 = vmul.f32 %v1286_v54, %v1550_v31 }
 0x139   : > { %v1290_v57 = vpop.eup %1289  ;;  %v729_v60 = vmul.f32 %v1288_v56, %v1554_v29 }
 0x13a   : > { %v1292_v58 = vpop.eup %1291  ;;  %v1070_v62 = vpack.c.bf16 %v713_v55, %v713_v55  ;;  %v716_v63 = vmul.f32 %v1290_v57, %v1558_v46 }
 0x13b   : > { %v1294_v61 = vpop.eup %1293  ;;  %v1086_v44 = vpack.c.bf16 %v729_v60, %v729_v60  ;;  %v732_v0 = vmul.f32 %v1292_v58, %v1562_v45 }
 0x13c   : > { %v1296_v1 = vpop.eup %1295  ;;  %874 = vst.msk [vmem:[%s1488_s25 + $0x30] sm:$0xf] %vm861_vm2, %v1070_v62  ;;  %v1073_v3 = vpack.c.bf16 %v716_v63, %v716_v63  ;;  %v714_v31 = vmul.f32 %v1294_v61, %v1567_v43 }
 0x13d   : > { %890 = vst.msk [vmem:[%s1488_s25 + $0x70] sm:$0xf] %vm861_vm2, %v1086_v44  ;;  %v1089_v29 = vpack.c.bf16 %v732_v0, %v732_v0  ;;  %v730_v18 = vmul.f32 %v1296_v1, %v1572_v39 }
 0x13e   : > { %877 = vst.msk [vmem:[%s1488_s25 + $0x3c] sm:$0xf] %vm861_vm2, %v1073_v3  ;;  %v1071_v2 = vpack.c.bf16 %v714_v31, %v714_v31 }
 0x13f   : > { %893 = vst.msk [vmem:[%s1488_s25 + $0x7c] sm:$0xf] %vm861_vm2, %v1089_v29  ;;  %v1087_v46 = vpack.c.bf16 %v730_v18, %v730_v18 }
 0x140   : > { %875 = vst.msk [vmem:[%s1488_s25 + $0x34] sm:$0xf] %vm861_vm2, %v1071_v2 }
 0x141   : > { %891 = vst.msk [vmem:[%s1488_s25 + $0x74] sm:$0xf] %vm861_vm2, %v1087_v46 }
 0x142 PF: > { %s13_s12 = sadd.s32 1, %s1303_s12  }
 0x143   : > { %p10_p4 = scmp.ge.s32.totalorder %s13_s12, 4  }
 0x145   :  { %12 = sbr.rel (!%p10_p4) target bundleno = 1 (0x1), region = 62 }

// kernel: sppcsp_forward.8
= control target key start
LH: loop header
LB: loop body
LE: loop exit
PB: predicated region body
PF: predicated region fallthrough
CT: control target
= control target key end

     0   :  { %s1325_s12 = smov 0   ;;  %s1638_s0 = inlined_call_operand.vmem [shape: bf16[512,2], index: 0, kind: input, shape index: {}]   ;;  %s1639_s1 = inlined_call_operand.vmem [shape: bf16[2,2], index: 1, kind: input, shape index: {}]   ;;  %s1640_s2 = inlined_call_operand.vmem [shape: f32[1,2], index: 2, kind: input, shape index: {}]   ;;  %s1641_s3 = inlined_call_operand.vmem [shape: bf16[512,2], index: 3, kind: output, shape index: {}]  }
   0x1 LB: > { %s950_s13 = sadd.s32 4294967295, %s1303_s12   ;;  %p954_p0 = scmp.ge.s32.totalorder %s1303_s12, 1  ;;  %s1303_s12 = sphi %s1325_s12, %s13_s12  }
   0x2   : > { %p138_p1 = scmp.lt.s32.totalorder %s1303_s12, 3 }
   0x4   : > { %p139_p2 = pnand %p954_p0, %p138_p1 }
   0x5   : > { %v207_v0 = vld [vmem:[%s1639_s1] sm:$0x1] (!%p139_p2)  ;;  %vm344_vm0 = vcmask (!%p139_p2), 1040384   ;;  %s955_s16 = sshll.u32 (!%p139_p2), %s950_s13, 5  ;;  %vm295_vm1 = vcmask (!%p139_p2), 15360   ;;  %vm861_vm2 = vcmask (!%p139_p2), 11264  }
   0x6   : > { %142 = sbr.rel (%p139_p2) target bundleno = 322 (0x142), region = 32  ;;  %1143 = vmatprep.subr.msk.bf16.mxu0 (!%p139_p2), %vm344_vm0, %v207_v0  ;;  %1144 = vmatprep.subr.msk.bf16.mxu1 (!%p139_p2), %vm344_vm0, %v207_v0  ;;  %v346_v1 = vsel (!%p139_p2), %vm344_vm0, %v207_v0, 0  ;;  %p163_p3 = scmp.lt.s32.totalorder (!%p139_p2), %s955_s16, 63  ;;  %v1381_v18 = vld [vmem:[%s1640_s2] ss:$0 sm:$0xff] (!%p139_p2) }
   0x7   : > { %1108 = vmatpush3.bf16.msra.mxu0 (!%p139_p2), %v346_v1  ;;  %1142 = vmatpush3.bf16.msra.mxu1 (!%p139_p2), %v346_v1 }
   0xd   : > { %s1643_s16 = smov (!%p163_p3, %s955_s16), 63 }
   0xe   : > { %s956_s17 = sshll.u32 %s1643_s16, 2 }
   0xf   : > { %s1344_s20 = scalar_lea.vmem %s1638_s0, %s956_s17  ;;  %s1488_s25 = scalar_lea.vmem %s1641_s3, %s956_s17 }
  0x10   : > { %v1153_v2 = vld [vmem:[%s1344_s20] sm:$0xff]   ;;  %v1155_v4 = vld [vmem:[%s1344_s20 + $0x8] sm:$0xff]   ;;  %v1157_v6 = vld [vmem:[%s1344_s20 + $0x10] sm:$0xff]  }
  0x11   : > { %v1154_v3 = vld [vmem:[%s1344_s20 + $0x40] sm:$0xff]   ;;  %1109 = vmatprep.mubr.msk.bf16.mxu0 %vm295_vm1, %v1153_v2  ;;  %v1156_v5 = vld [vmem:[%s1344_s20 + $0x48] sm:$0xff]   ;;  %v1158_v7 = vld [vmem:[%s1344_s20 + $0x50] sm:$0xff]  }
  0x12   : > { %1125 = vmatprep.mubr.msk.bf16.mxu1 %vm295_vm1, %v1154_v3  ;;  %1110 = vmatmul.mubr.msk.bf16.vlgmr.msra.gmra.mrb[0].mxu0 %vm295_vm1, %v1155_v4  ;;  %v1159_v8 = vld [vmem:[%s1344_s20 + $0x18] sm:$0xff]   ;;  %v1161_v10 = vld [vmem:[%s1344_s20 + $0x20] sm:$0xff]   ;;  %v1163_v12 = vld [vmem:[%s1344_s20 + $0x28] sm:$0xff]  }
  0x13   : > { %1126 = vmatmul.mubr.msk.bf16.vlgmr.msra.gmra.mrb[0].mxu1 %vm295_vm1, %v1156_v5  ;;  %1113 = vmatprep.mubr.msk.bf16.mxu0 %vm295_vm1, %v1157_v6  ;;  %v1160_v9 = vld [vmem:[%s1344_s20 + $0x58] sm:$0xff]   ;;  %v1162_v11 = vld [vmem:[%s1344_s20 + $0x60] sm:$0xff]   ;;  %v1164_v13 = vld [vmem:[%s1344_s20 + $0x68] sm:$0xff]  }
  0x14   : > { %1129 = vmatprep.mubr.msk.bf16.mxu1 %vm295_vm1, %v1158_v7  ;;  %v1165_v14 = vld [vmem:[%s1344_s20 + $0x30] sm:$0xff]   ;;  %v1167_v16 = vld [vmem:[%s1344_s20 + $0x38] sm:$0xff]  }
  0x15   : > { %v1166_v15 = vld [vmem:[%s1344_s20 + $0x70] sm:$0xff]   ;;  %v1168_v17 = vld [vmem:[%s1344_s20 + $0x78] sm:$0xff]  }
  0x1a   : > { %1114 = vmatmul.mubr.msk.bf16.gmra.mrb[4].mxu0 %vm295_vm1, %v1159_v8 }
  0x1b   : > { %1130 = vmatmul.mubr.msk.bf16.gmra.mrb[4].mxu1 %vm295_vm1, %v1160_v9  ;;  %1117 = vmatprep.mubr.msk.bf16.mxu0 %vm295_vm1, %v1161_v10 }
  0x1c   : > { %1133 = vmatprep.mubr.msk.bf16.mxu1 %vm295_vm1, %v1162_v11 }
  0x22   : > { %1118 = vmatmul.mubr.msk.bf16.gmra.mrb[8].mxu0 %vm295_vm1, %v1163_v12 }
  0x23   : > { %1134 = vmatmul.mubr.msk.bf16.gmra.mrb[8].mxu1 %vm295_vm1, %v1164_v13  ;;  %1121 = vmatprep.mubr.msk.bf16.mxu0 %vm295_vm1, %v1165_v14 }
  0x24   : > { %1137 = vmatprep.mubr.msk.bf16.mxu1 %vm295_vm1, %v1166_v15 }
  0x2a   : > { %1122 = vmatmul.mubr.msk.bf16.gmra.mrb[12].mxu0 %vm295_vm1, %v1167_v16 }
  0x2b   : > { %1138 = vmatmul.mubr.msk.bf16.gmra.mrb[12].mxu1 %vm295_vm1, %v1168_v17 }
  0xe5   : > { %v1111_v19 = vpop.f32.mrb[0].mxu0 }
  0xe6   : > { %v1384_v20 = vadd.f32 %v1111_v19, %v1381_v18  ;;  %v1127_v21 = vpop.f32.mrb[0].mxu1  ;;  %v382_v22 = vpop.f32.mrb[1].mxu0 }
  0xe7   : > { %v1387_v23 = vadd.f32 %v1127_v21, %v1381_v18  ;;  %v1390_v24 = vadd.f32 %v1381_v18, %v382_v22  ;;  %v446_v25 = vpop.f32.mrb[1].mxu1  ;;  %v1112_v26 = vpop.f32.mrb[2].mxu0 }
  0xe8   : > { %v994_v27 = vmul.f32 -1.442695, %v1384_v20  ;;  %v1394_v28 = vadd.f32 %v1381_v18, %v446_v25  ;;  %v1397_v29 = vadd.f32 %v1112_v26, %v1381_v18  ;;  %v1128_v30 = vpop.f32.mrb[2].mxu1  ;;  %v385_v31 = vpop.f32.mrb[3].mxu0 }
  0xe9   : > { %v1010_v32 = vmul.f32 -1.442695, %v1387_v23  ;;  %v992_v33 = vmul.f32 -1.442695, %v1390_v24  ;;  %v1402_v34 = vadd.f32 %v1128_v30, %v1381_v18  ;;  %v1405_v35 = vadd.f32 %v1381_v18, %v385_v31  ;;  %v449_v36 = vpop.f32.mrb[3].mxu1 }
  0xea   : > { %1169 = vpow2.f32 %v994_v27  ;;  %v1008_v37 = vmul.f32 -1.442695, %v1394_v28  ;;  %v995_v38 = vmul.f32 -1.442695, %v1397_v29  ;;  %v1410_v39 = vadd.f32 %v1381_v18, %v449_v36 }
  0xeb   : > { %1171 = vpow2.f32 %v1010_v32  ;;  %v1011_v40 = vmul.f32 -1.442695, %v1402_v34  ;;  %v993_v41 = vmul.f32 -1.442695, %v1405_v35 }
  0xec   : > { %1173 = vpow2.f32 %v992_v33  ;;  %v1009_v42 = vmul.f32 -1.442695, %v1410_v39 }
  0xed   : > { %1175 = vpow2.f32 %v1008_v37  ;;  %v1115_v43 = vpop.f32.mrb[4].mxu0 }
  0xee   : > { %1177 = vpow2.f32 %v995_v38  ;;  %v1416_v44 = vadd.f32 %v1115_v43, %v1381_v18  ;;  %v1131_v45 = vpop.f32.mrb[4].mxu1  ;;  %v398_v46 = vpop.f32.mrb[5].mxu0 }
  0xef   : > { %1179 = vpow2.f32 %v1011_v40  ;;  %v1419_v47 = vadd.f32 %v1131_v45, %v1381_v18  ;;  %v1422_v48 = vadd.f32 %v1381_v18, %v398_v46  ;;  %v462_v49 = vpop.f32.mrb[5].mxu1  ;;  %v1116_v50 = vpop.f32.mrb[6].mxu0 }
  0xf0   : > { %1181 = vpow2.f32 %v993_v41  ;;  %v998_v51 = vmul.f32 -1.442695, %v1416_v44  ;;  %v1426_v52 = vadd.f32 %v1381_v18, %v462_v49  ;;  %v1429_v53 = vadd.f32 %v1116_v50, %v1381_v18  ;;  %v1132_v54 = vpop.f32.mrb[6].mxu1  ;;  %v401_v55 = vpop.f32.mrb[7].mxu0 }
  0xf1   : > { %1183 = vpow2.f32 %v1009_v42  ;;  %v1014_v56 = vmul.f32 -1.442695, %v1419_v47  ;;  %v996_v57 = vmul.f32 -1.442695, %v1422_v48  ;;  %v465_v58 = vpop.f32.mrb[7].mxu1  ;;  %v1438_v19 = vadd.f32 %v1132_v54, %v1381_v18 }
  0xf2   : > { %1185 = vpow2.f32 %v998_v51  ;;  %v1012_v59 = vmul.f32 -1.442695, %v1426_v52  ;;  %v999_v60 = vmul.f32 -1.442695, %v1429_v53  ;;  %v1441_v25 = vadd.f32 %v1381_v18, %v401_v55 }
  0xf3   : > { %1187 = vpow2.f32 %v1014_v56  ;;  %v1444_v30 = vadd.f32 %v1381_v18, %v465_v58  ;;  %v1015_v41 = vmul.f32 -1.442695, %v1438_v19 }
  0xf4   : > { %v1170_v61 = vpop.eup %1169  ;;  %1189 = vpow2.f32 %v996_v57  ;;  %v997_v50 = vmul.f32 -1.442695, %v1441_v25 }
  0xf5   : > { %v1172_v62 = vpop.eup %1171  ;;  %v607_v63 = vadd.f32 1.0, %v1170_v61  ;;  %1191 = vpow2.f32 %v1012_v59  ;;  %v1119_v0 = vpop.f32.mrb[8].mxu0  ;;  %v1013_v58 = vmul.f32 -1.442695, %v1444_v30 }
  0xf6   : > { %v1174_v1 = vpop.eup %1173  ;;  %v623_v2 = vadd.f32 1.0, %v1172_v62  ;;  %1193 = vpow2.f32 %v999_v60  ;;  %v1135_v3 = vpop.f32.mrb[8].mxu1  ;;  %v1447_v33 = vadd.f32 %v1119_v0, %v1381_v18 }
  0xf7   : > { %v414_v4 = vpop.f32.mrb[9].mxu0  ;;  %v1176_v5 = vpop.eup %1175  ;;  %1195 = vrcp.f32 %v607_v63  ;;  %v605_v6 = vadd.f32 1.0, %v1174_v1  ;;  %v1450_v36 = vadd.f32 %v1135_v3, %v1381_v18 }
  0xf8   : > { %v478_v7 = vpop.f32.mrb[9].mxu1  ;;  %v1120_v8 = vpop.f32.mrb[10].mxu0  ;;  %1197 = vrcp.f32 %v623_v2  ;;  %v621_v10 = vadd.f32 1.0, %v1176_v5  ;;  %v1454_v42 = vadd.f32 %v1381_v18, %v414_v4  ;;  %v1002_v0 = vmul.f32 -1.442695, %v1447_v33 }
  0xf9   : > { %v1178_v9 = vpop.eup %1177  ;;  %v1136_v11 = vpop.f32.mrb[10].mxu1  ;;  %1199 = vrcp.f32 %v605_v6  ;;  %v1460_v51 = vadd.f32 %v1381_v18, %v478_v7  ;;  %v1468_v59 = vadd.f32 %v1120_v8, %v1381_v18  ;;  %v1018_v1 = vmul.f32 -1.442695, %v1450_v36 }
  0xfa   : > { %v417_v12 = vpop.f32.mrb[11].mxu0  ;;  %v1180_v13 = vpop.eup %1179  ;;  %v608_v14 = vadd.f32 1.0, %v1178_v9  ;;  %1201 = vrcp.f32 %v621_v10  ;;  %v1000_v5 = vmul.f32 -1.442695, %v1454_v42  ;;  %v1481_v6 = vadd.f32 %v1136_v11, %v1381_v18 }
  0xfb   : > { %v1435_v15 = vpop.f32.mrb[11].mxu1  ;;  %v1182_v16 = vpop.eup %1181  ;;  %v624_v17 = vadd.f32 1.0, %v1180_v13  ;;  %v1016_v9 = vmul.f32 -1.442695, %v1460_v51 }
  0xfc   : > { %v1184_v21 = vpop.eup %1183  ;;  %1203 = vrcp.f32 %v608_v14  ;;  %v606_v22 = vadd.f32 1.0, %v1182_v16  ;;  %v1003_v14 = vmul.f32 -1.442695, %v1468_v59 }
  0xfd   : > { %v1186_v26 = vpop.eup %1185  ;;  %1205 = vrcp.f32 %v624_v17  ;;  %v622_v27 = vadd.f32 1.0, %v1184_v21  ;;  %v1123_v37 = vpop.f32.mrb[12].mxu0 }
  0xfe   : > { %v1188_v31 = vpop.eup %1187  ;;  %1207 = vrcp.f32 %v606_v22  ;;  %v611_v32 = vadd.f32 1.0, %v1186_v26  ;;  %v1139_v43 = vpop.f32.mrb[12].mxu1 }
  0xff   : > { %v1190_v38 = vpop.eup %1189  ;;  %1209 = vrcp.f32 %v622_v27  ;;  %v627_v40 = vadd.f32 1.0, %v1188_v31  ;;  %v1456_v45 = vpop.f32.mrb[13].mxu0 }
 0x100   : > { %v1192_v46 = vpop.eup %1191  ;;  %1211 = vrcp.f32 %v611_v32  ;;  %v609_v49 = vadd.f32 1.0, %v1190_v38  ;;  %v1462_v54 = vpop.f32.mrb[13].mxu1 }
 0x101   : > { %v1464_v55 = vpop.f32.mrb[14].mxu0  ;;  %v1194_v56 = vpop.eup %1193  ;;  %1213 = vrcp.f32 %v627_v40  ;;  %v625_v57 = vadd.f32 1.0, %v1192_v46  ;;  %v1516_v40 = vadd.f32 %v1139_v43, %v1381_v18 }
 0x102   : > { %v1470_v60 = vpop.f32.mrb[14].mxu1  ;;  %v1472_v61 = vpop.f32.mrb[15].mxu0  ;;  %1215 = vrcp.f32 %v609_v49  ;;  %v612_v63 = vadd.f32 1.0, %v1194_v56 }
 0x103   : > { %v1196_v62 = vpop.eup %1195  ;;  %v1476_v2 = vpop.f32.mrb[15].mxu1  ;;  %1217 = vrcp.f32 %v625_v57 }
 0x104   : > { %v1198_v3 = vpop.eup %1197  ;;  %v703_v4 = vmul.f32 %v1196_v62, %v1384_v20  ;;  %1219 = vrcp.f32 %v612_v63  ;;  %v1493_v20 = vadd.f32 %v1381_v18, %v417_v12 }
 0x105   : > { %v1200_v7 = vpop.eup %1199  ;;  %v719_v8 = vmul.f32 %v1198_v3, %v1387_v23  ;;  %1221 = vpow2.f32 %v1015_v41  ;;  %v1500_v23 = vadd.f32 %v1381_v18, %v1435_v15  ;;  %v1510_v15 = vadd.f32 %v1123_v37, %v1381_v18 }
 0x106   : > { %v1202_v10 = vpop.eup %1201  ;;  %v1060_v13 = vpack.c.bf16 %v703_v4, %v703_v4  ;;  %v701_v11 = vmul.f32 %v1200_v7, %v1390_v24  ;;  %1223 = vpow2.f32 %v997_v50  ;;  %v1019_v24 = vmul.f32 -1.442695, %v1481_v6 }
 0x107   : > { %v1204_v16 = vpop.eup %1203  ;;  %v1076_v17 = vpack.c.bf16 %v719_v8, %v719_v8  ;;  %v717_v21 = vmul.f32 %v1202_v10, %v1394_v28  ;;  %1225 = vpow2.f32 %v1013_v58  ;;  %v1001_v37 = vmul.f32 -1.442695, %v1493_v20 }
 0x108   : > { %v1206_v12 = vpop.eup %1205  ;;  %864 = vst.msk [vmem:[%s1488_s25 + $0x8] sm:$0xf] %vm861_vm2, %v1060_v13  ;;  %v1058_v22 = vpack.c.bf16 %v701_v11, %v701_v11  ;;  %v704_v26 = vmul.f32 %v1204_v16, %v1397_v29  ;;  %1227 = vpow2.f32 %v1002_v0  ;;  %v1017_v43 = vmul.f32 -1.442695, %v1500_v23 }
 0x109   : > { %v1208_v27 = vpop.eup %1207  ;;  %880 = vst.msk [vmem:[%s1488_s25 + $0x48] sm:$0xf] %vm861_vm2, %v1076_v17  ;;  %v1074_v28 = vpack.c.bf16 %v717_v21, %v717_v21  ;;  %v720_v31 = vmul.f32 %v1206_v12, %v1402_v34  ;;  %1229 = vpow2.f32 %v1018_v1  ;;  %v1006_v58 = vmul.f32 -1.442695, %v1510_v15 }
 0x10a   : > { %v1210_v32 = vpop.eup %1209  ;;  %862 = vst.msk [vmem:[%s1488_s25] sm:$0xf] %vm861_vm2, %v1058_v22  ;;  %v1061_v38 = vpack.c.bf16 %v704_v26, %v704_v26  ;;  %v702_v29 = vmul.f32 %v1208_v27, %v1405_v35  ;;  %1231 = vpow2.f32 %v1000_v5  ;;  %v1022_v0 = vmul.f32 -1.442695, %v1516_v40 }
 0x10b   : > { %v1212_v41 = vpop.eup %1211  ;;  %878 = vst.msk [vmem:[%s1488_s25 + $0x40] sm:$0xf] %vm861_vm2, %v1074_v28  ;;  %v1077_v34 = vpack.c.bf16 %v720_v31, %v720_v31  ;;  %v718_v46 = vmul.f32 %v1210_v32, %v1410_v39  ;;  %1233 = vpow2.f32 %v1016_v9  ;;  %v1550_v31 = vadd.f32 %v1381_v18, %v1456_v45 }
 0x10c   : > { %v1214_v49 = vpop.eup %1213  ;;  %865 = vst.msk [vmem:[%s1488_s25 + $0xc] sm:$0xf] %vm861_vm2, %v1061_v38  ;;  %v1059_v50 = vpack.c.bf16 %v702_v29, %v702_v29  ;;  %v707_v35 = vmul.f32 %v1212_v41, %v1416_v44  ;;  %1235 = vpow2.f32 %v1003_v14  ;;  %v1554_v29 = vadd.f32 %v1381_v18, %v1462_v54 }
 0x10d   : > { %v1216_v56 = vpop.eup %1215  ;;  %881 = vst.msk [vmem:[%s1488_s25 + $0x4c] sm:$0xf] %vm861_vm2, %v1077_v34  ;;  %v1075_v57 = vpack.c.bf16 %v718_v46, %v718_v46  ;;  %v723_v39 = vmul.f32 %v1214_v49, %v1419_v47  ;;  %1237 = vpow2.f32 %v1019_v24  ;;  %v1558_v46 = vadd.f32 %v1464_v55, %v1381_v18 }
 0x10e   : > { %v1218_v62 = vpop.eup %1217  ;;  %863 = vst.msk [vmem:[%s1488_s25 + $0x4] sm:$0xf] %vm861_vm2, %v1059_v50  ;;  %v1064_v63 = vpack.c.bf16 %v707_v35, %v707_v35  ;;  %v705_v44 = vmul.f32 %v1216_v56, %v1422_v48  ;;  %1239 = vpow2.f32 %v1001_v37  ;;  %v1562_v45 = vadd.f32 %v1470_v60, %v1381_v18 }
 0x10f   : > { %v1220_v1 = vpop.eup %1219  ;;  %879 = vst.msk [vmem:[%s1488_s25 + $0x44] sm:$0xf] %vm861_vm2, %v1075_v57  ;;  %v1080_v3 = vpack.c.bf16 %v723_v39, %v723_v39  ;;  %v721_v47 = vmul.f32 %v1218_v62, %v1426_v52  ;;  %1241 = vpow2.f32 %v1017_v43  ;;  %v1004_v54 = vmul.f32 -1.442695, %v1550_v31 }
 0x110   : > { %v1222_v4 = vpop.eup %1221  ;;  %868 = vst.msk [vmem:[%s1488_s25 + $0x18] sm:$0xf] %vm861_vm2, %v1064_v63  ;;  %v1062_v5 = vpack.c.bf16 %v705_v44, %v705_v44  ;;  %v708_v7 = vmul.f32 %v1220_v1, %v1429_v53  ;;  %1243 = vpow2.f32 %v1006_v58  ;;  %v1567_v43 = vadd.f32 %v1381_v18, %v1472_v61 }
 0x111   : > { %v1224_v48 = vpop.eup %1223  ;;  %884 = vst.msk [vmem:[%s1488_s25 + $0x58] sm:$0xf] %vm861_vm2, %v1080_v3  ;;  %v1078_v8 = vpack.c.bf16 %v721_v47, %v721_v47  ;;  %v628_v9 = vadd.f32 1.0, %v1222_v4  ;;  %1245 = vpow2.f32 %v1022_v0  ;;  %v1020_v57 = vmul.f32 -1.442695, %v1554_v29 }
 0x112   : > { %v1226_v10 = vpop.eup %1225  ;;  %866 = vst.msk [vmem:[%s1488_s25 + $0x10] sm:$0xf] %vm861_vm2, %v1062_v5  ;;  %v1065_v52 = vpack.c.bf16 %v708_v7, %v708_v7  ;;  %v610_v13 = vadd.f32 1.0, %v1224_v48  ;;  %v1572_v39 = vadd.f32 %v1381_v18, %v1476_v2  ;;  %v1007_v62 = vmul.f32 -1.442695, %v1558_v46 }
 0x113   : > { %v1228_v11 = vpop.eup %1227  ;;  %882 = vst.msk [vmem:[%s1488_s25 + $0x50] sm:$0xf] %vm861_vm2, %v1078_v8  ;;  %1247 = vrcp.f32 %v628_v9  ;;  %v626_v14 = vadd.f32 1.0, %v1226_v10  ;;  %v1023_v44 = vmul.f32 -1.442695, %v1562_v45 }
 0x114   : > { %v1230_v53 = vpop.eup %1229  ;;  %869 = vst.msk [vmem:[%s1488_s25 + $0x1c] sm:$0xf] %vm861_vm2, %v1065_v52  ;;  %1249 = vrcp.f32 %v610_v13  ;;  %v615_v16 = vadd.f32 1.0, %v1228_v11  ;;  %v1005_v18 = vmul.f32 -1.442695, %v1567_v43 }
 0x115   : > { %v1232_v17 = vpop.eup %1231  ;;  %1251 = vrcp.f32 %v626_v14  ;;  %v631_v21 = vadd.f32 1.0, %v1230_v53  ;;  %v1021_v4 = vmul.f32 -1.442695, %v1572_v39 }
 0x116   : > { %v1234_v12 = vpop.eup %1233  ;;  %1253 = vrcp.f32 %v615_v16  ;;  %v613_v22 = vadd.f32 1.0, %v1232_v17 }
 0x117   : > { %v1236_v26 = vpop.eup %1235  ;;  %1255 = vrcp.f32 %v631_v21  ;;  %v629_v24 = vadd.f32 1.0, %v1234_v12 }
 0x118   : > { %v1238_v27 = vpop.eup %1237  ;;  %1257 = vrcp.f32 %v613_v22  ;;  %v616_v28 = vadd.f32 1.0, %v1236_v26 }
 0x119   : > { %v1240_v32 = vpop.eup %1239  ;;  %1259 = vrcp.f32 %v629_v24  ;;  %v632_v38 = vadd.f32 1.0, %v1238_v27 }
 0x11a   : > { %v1242_v41 = vpop.eup %1241  ;;  %1261 = vrcp.f32 %v616_v28  ;;  %v614_v34 = vadd.f32 1.0, %v1240_v32 }
 0x11b   : > { %v1244_v37 = vpop.eup %1243  ;;  %1263 = vrcp.f32 %v632_v38  ;;  %v630_v49 = vadd.f32 1.0, %v1242_v41 }
 0x11c   : > { %v1246_v50 = vpop.eup %1245  ;;  %1265 = vrcp.f32 %v614_v34  ;;  %v619_v35 = vadd.f32 1.0, %v1244_v37 }
 0x11d   : > { %v1248_v56 = vpop.eup %1247  ;;  %1267 = vrcp.f32 %v630_v49  ;;  %v635_v55 = vadd.f32 1.0, %v1246_v50 }
 0x11e   : > { %v1250_v60 = vpop.eup %1249  ;;  %v724_v58 = vmul.f32 %v1248_v56, %v1438_v19  ;;  %1269 = vrcp.f32 %v619_v35 }
 0x11f   : > { %v1252_v63 = vpop.eup %1251  ;;  %v706_v61 = vmul.f32 %v1250_v60, %v1441_v25  ;;  %1271 = vrcp.f32 %v635_v55 }
 0x120   : > { %v1254_v0 = vpop.eup %1253  ;;  %v1081_v1 = vpack.c.bf16 %v724_v58, %v724_v58  ;;  %v722_v3 = vmul.f32 %v1252_v63, %v1444_v30  ;;  %1273 = vpow2.f32 %v1004_v54 }
 0x121   : > { %v1256_v2 = vpop.eup %1255  ;;  %v1063_v19 = vpack.c.bf16 %v706_v61, %v706_v61  ;;  %v711_v47 = vmul.f32 %v1254_v0, %v1447_v33  ;;  %1275 = vpow2.f32 %v1020_v57 }
 0x122   : > { %v1258_v25 = vpop.eup %1257  ;;  %885 = vst.msk [vmem:[%s1488_s25 + $0x5c] sm:$0xf] %vm861_vm2, %v1081_v1  ;;  %v1079_v5 = vpack.c.bf16 %v722_v3, %v722_v3  ;;  %v727_v7 = vmul.f32 %v1256_v2, %v1450_v36  ;;  %1277 = vpow2.f32 %v1007_v62 }
 0x123   : > { %v1260_v30 = vpop.eup %1259  ;;  %867 = vst.msk [vmem:[%s1488_s25 + $0x14] sm:$0xf] %vm861_vm2, %v1063_v19  ;;  %v1068_v48 = vpack.c.bf16 %v711_v47, %v711_v47  ;;  %v709_v8 = vmul.f32 %v1258_v25, %v1454_v42  ;;  %1279 = vpow2.f32 %v1023_v44 }
 0x124   : > { %v1262_v33 = vpop.eup %1261  ;;  %883 = vst.msk [vmem:[%s1488_s25 + $0x54] sm:$0xf] %vm861_vm2, %v1079_v5  ;;  %v1084_v9 = vpack.c.bf16 %v727_v7, %v727_v7  ;;  %v725_v10 = vmul.f32 %v1260_v30, %v1460_v51  ;;  %1281 = vpow2.f32 %v1005_v18 }
 0x125   : > { %v1264_v52 = vpop.eup %1263  ;;  %872 = vst.msk [vmem:[%s1488_s25 + $0x28] sm:$0xf] %vm861_vm2, %v1068_v48  ;;  %v1066_v36 = vpack.c.bf16 %v709_v8, %v709_v8  ;;  %v712_v13 = vmul.f32 %v1262_v33, %v1468_v59  ;;  %1283 = vpow2.f32 %v1021_v4 }
 0x126   : > { %v1266_v11 = vpop.eup %1265  ;;  %888 = vst.msk [vmem:[%s1488_s25 + $0x68] sm:$0xf] %vm861_vm2, %v1084_v9  ;;  %v1082_v42 = vpack.c.bf16 %v725_v10, %v725_v10  ;;  %v728_v14 = vmul.f32 %v1264_v52, %v1481_v6 }
 0x127   : > { %v1268_v53 = vpop.eup %1267  ;;  %870 = vst.msk [vmem:[%s1488_s25 + $0x20] sm:$0xf] %vm861_vm2, %v1066_v36  ;;  %v1069_v51 = vpack.c.bf16 %v712_v13, %v712_v13  ;;  %v710_v16 = vmul.f32 %v1266_v11, %v1493_v20 }
 0x128   : > { %v1270_v17 = vpop.eup %1269  ;;  %886 = vst.msk [vmem:[%s1488_s25 + $0x60] sm:$0xf] %vm861_vm2, %v1082_v42  ;;  %v1085_v59 = vpack.c.bf16 %v728_v14, %v728_v14  ;;  %v726_v21 = vmul.f32 %v1268_v53, %v1500_v23 }
 0x129   : > { %v1272_v12 = vpop.eup %1271  ;;  %873 = vst.msk [vmem:[%s1488_s25 + $0x2c] sm:$0xf] %vm861_vm2, %v1069_v51  ;;  %v1067_v22 = vpack.c.bf16 %v710_v16, %v710_v16  ;;  %v715_v6 = vmul.f32 %v1270_v17, %v1510_v15 }
 0x12a   : > { %v1274_v26 = vpop.eup %1273  ;;  %889 = vst.msk [vmem:[%s1488_s25 + $0x6c] sm:$0xf] %vm861_vm2, %v1085_v59  ;;  %v1083_v24 = vpack.c.bf16 %v726_v21, %v726_v21  ;;  %v731_v20 = vmul.f32 %v1272_v12, %v1516_v40 }
 0x12b   : > { %v1276_v27 = vpop.eup %1275  ;;  %871 = vst.msk [vmem:[%s1488_s25 + $0x24] sm:$0xf] %vm861_vm2, %v1067_v22  ;;  %v1072_v28 = vpack.c.bf16 %v715_v6, %v715_v6  ;;  %v617_v32 = vadd.f32 1.0, %v1274_v26 }
 0x12c   : > { %v1278_v23 = vpop.eup %1277  ;;  %887 = vst.msk [vmem:[%s1488_s25 + $0x64] sm:$0xf] %vm861_vm2, %v1083_v24  ;;  %v1088_v38 = vpack.c.bf16 %v731_v20, %v731_v20  ;;  %v633_v41 = vadd.f32 1.0, %v1276_v27 }
 0x12d   : > { %v1280_v34 = vpop.eup %1279  ;;  %876 = vst.msk [vmem:[%s1488_s25 + $0x38] sm:$0xf] %vm861_vm2, %v1072_v28  ;;  %1285 = vrcp.f32 %v617_v32  ;;  %v620_v15 = vadd.f32 1.0, %v1278_v23 }
 0x12e   : > { %v1282_v37 = vpop.eup %1281  ;;  %892 = vst.msk [vmem:[%s1488_s25 + $0x78] sm:$0xf] %vm861_vm2, %v1088_v38  ;;  %1287 = vrcp.f32 %v633_v41  ;;  %v636_v40 = vadd.f32 1.0, %v1280_v34 }
 0x12f   : > { %v1284_v49 = vpop.eup %1283  ;;  %1289 = vrcp.f32 %v620_v15  ;;  %v618_v50 = vadd.f32 1.0, %v1282_v37 }
 0x130   : > { %1291 = vrcp.f32 %v636_v40  ;;  %v634_v35 = vadd.f32 1.0, %v1284_v49 }
 0x131   : > { %1293 = vrcp.f32 %v618_v50 }
 0x132   : > { %1295 = vrcp.f32 %v634_v35 }
 0x137   : > { %v1286_v54 = vpop.eup %1285 }
 0x138   : > { %v1288_v56 = vpop.eup %1287  ;;  %v713_v55 = vmul.f32 %v1286_v54, %v1550_v31 }
 0x139   : > { %v1290_v57 = vpop.eup %1289  ;;  %v729_v60 = vmul.f32 %v1288_v56, %v1554_v29 }
 0x13a   : > { %v1292_v58 = vpop.eup %1291  ;;  %v1070_v62 = vpack.c.bf16 %v713_v55, %v713_v55  ;;  %v716_v63 = vmul.f32 %v1290_v57, %v1558_v46 }
 0x13b   : > { %v1294_v61 = vpop.eup %1293  ;;  %v1086_v44 = vpack.c.bf16 %v729_v60, %v729_v60  ;;  %v732_v0 = vmul.f32 %v1292_v58, %v1562_v45 }
 0x13c   : > { %v1296_v1 = vpop.eup %1295  ;;  %874 = vst.msk [vmem:[%s1488_s25 + $0x30] sm:$0xf] %vm861_vm2, %v1070_v62  ;;  %v1073_v3 = vpack.c.bf16 %v716_v63, %v716_v63  ;;  %v714_v31 = vmul.f32 %v1294_v61, %v1567_v43 }
 0x13d   : > { %890 = vst.msk [vmem:[%s1488_s25 + $0x70] sm:$0xf] %vm861_vm2, %v1086_v44  ;;  %v1089_v29 = vpack.c.bf16 %v732_v0, %v732_v0  ;;  %v730_v18 = vmul.f32 %v1296_v1, %v1572_v39 }
 0x13e   : > { %877 = vst.msk [vmem:[%s1488_s25 + $0x3c] sm:$0xf] %vm861_vm2, %v1073_v3  ;;  %v1071_v2 = vpack.c.bf16 %v714_v31, %v714_v31 }
 0x13f   : > { %893 = vst.msk [vmem:[%s1488_s25 + $0x7c] sm:$0xf] %vm861_vm2, %v1089_v29  ;;  %v1087_v46 = vpack.c.bf16 %v730_v18, %v730_v18 }
 0x140   : > { %875 = vst.msk [vmem:[%s1488_s25 + $0x34] sm:$0xf] %vm861_vm2, %v1071_v2 }
 0x141   : > { %891 = vst.msk [vmem:[%s1488_s25 + $0x74] sm:$0xf] %vm861_vm2, %v1087_v46 }
 0x142 PF: > { %s13_s12 = sadd.s32 1, %s1303_s12  }
 0x143   : > { %p10_p4 = scmp.ge.s32.totalorder %s13_s12, 4  }
 0x145   :  { %12 = sbr.rel (!%p10_p4) target bundleno = 1 (0x1), region = 62 }

// kernel: sppcsp_forward.7
= control target key start
LH: loop header
LB: loop body
LE: loop exit
PB: predicated region body
PF: predicated region fallthrough
CT: control target
= control target key end

     0   :  { %s2529_s12 = smov 0   ;;  %s3168_s0 = inlined_call_operand.vmem [shape: bf16[2,16,16,2], index: 0, kind: input, shape index: {}]   ;;  %s3169_s1 = inlined_call_operand.vmem [shape: bf16[3,6,2], index: 1, kind: input, shape index: {}]   ;;  %s3170_s2 = inlined_call_operand.vmem [shape: f32[1,2], index: 2, kind: input, shape index: {}]   ;;  %s3171_s3 = inlined_call_operand.vmem [shape: bf16[512,2], index: 3, kind: output, shape index: {}]  }
   0x1 LB: > { %s2535_s13 = sadd.s32 4294967295, %s2504_s12   ;;  %p1951_p0 = scmp.ge.s32.totalorder %s2504_s12, 1  ;;  %s2504_s12 = sphi %s2529_s12, %s13_s12  }
   0x2   : > { %p137_p1 = scmp.lt.s32.totalorder %s2504_s12, 3 }
   0x4   : > { %p138_p2 = pnand %p1951_p0, %p137_p1 }
   0x5   : > { %vm438_vm0 = vcmask (!%p138_p2), 1040384   ;;  %vm439_vm1 = vsmask.f32 (!%p138_p2), 256  ;;  %v2506_v0 = vmov (!%p138_p2), 0   ;;  %p161_p3 = scmp.lt.s32.totalorder (!%p138_p2), %s2535_s13, 1  ;;  %vm748_vm3 = vcmask (!%p138_p2), 1046528  }
   0x6   : > { %141 = sbr.rel (%p138_p2) target bundleno = 496 (0x1f0), region = 32  ;;  %v288_v1 = vrot.slane (!%p138_p2), %v2506_v0, 7  ;;  %vm2539_vm2 = vmand (!%p138_p2), %vm438_vm0, %vm439_vm1  ;;  %vm475_vm4 = vsmask.f32 (!%p138_p2), 7424  ;;  %s2507_s19 = smov (!%p138_p2), 4   ;;  %vm940_vm5 = vcmask (!%p138_p2), 1042432  }
   0x7   : > { %s2508_s20 = smov (!%p138_p2), 2   ;;  %vm834_vm6 = vcmask (!%p138_p2), 15360   ;;  %vm869_vm7 = vcmask (!%p138_p2), 31744   ;;  %vm907_vm8 = vcmask (!%p138_p2), 48128   ;;  %s1954_s29 = sshll.u32 (!%p138_p2), %s2535_s13, 5  ;;  %vm1858_vm9 = vcmask (!%p138_p2), 11264  }
   0x8   : > { %v2546_v3 = vsel (!%p138_p2), %vm2539_vm2, 0, %v288_v1  ;;  %v458_v4 = vsel (!%p138_p2), %vm2539_vm2, %v288_v1, 0  ;;  %p2961_p4 = scmp.lt.s32.totalorder (!%p138_p2), %s1954_s29, 63 }
   0x9   : > { %v749_v5 = vrot.slane (!%p138_p2), %v2546_v3, 1  ;;  %v750_v6 = vrot.slane (!%p138_p2), %v458_v4, 1  ;;  %v477_v7 = vshrl.u32 (!%p138_p2), %v2546_v3, 16  ;;  %v479_v8 = vshll.u32 (!%p138_p2), %v2546_v3, 16 }
   0xa   : > { %v484_v9 = vshll.u32 (!%p138_p2), %v458_v4, 16 }
   0xb   : > { %v751_v10 = vsel (!%p138_p2), %vm748_vm3, %v749_v5, %v750_v6  ;;  %v481_v11 = vrot.slane (!%p138_p2), %v479_v8, 1 }
   0xc   : > { %800 = vrot.lane.b32.xlu1 (!%p138_p2), %v751_v10, %s2507_s19  ;;  %v486_v12 = vrot.slane (!%p138_p2), %v484_v9, 1 }
   0xd   : > { %s162_s14 = scalar_select %p161_p3, %s2535_s13, 1  ;;  %v482_v14 = vor.u32 %v481_v11, %v477_v7 }
   0xe   : > { %s3176_s29 = smov (!%p2961_p4, %s1954_s29), 63 }
   0xf   : > { %s2087_s15 = sshll.u32 %s162_s14, 7  ;;  %v487_v18 = vsel %vm475_vm4, %v482_v14, %v486_v12  ;;  %s1955_s4 = sshll.u32 %s3176_s29, 2 }
  0x10   : > { %s2558_s18 = scalar_lea.vmem %s3168_s0, %s2087_s15  ;;  %680 = vrot.lane.b32.xlu0 %v487_v18, %s2508_s20  ;;  %s3003_s7 = scalar_lea.vmem %s3171_s3, %s1955_s4 }
  0x11   : > { %v2354_v13 = vld [vmem:[%s2558_s18 + $0x8] sm:$0xff]   ;;  %v2355_v15 = vld [vmem:[%s2558_s18] sm:$0xff]   ;;  %v2356_v21 = vld [vmem:[%s2558_s18 + $0x18] sm:$0xff]  }
  0x12   : > { %v300_v16 = vshrl.u32 %v2354_v13, 16  ;;  %v303_v17 = vshll.u32 %v2354_v13, 16  ;;  %v293_v19 = vshrl.u32 %v2355_v15, 16  ;;  %v296_v20 = vshll.u32 %v2355_v15, 16  ;;  %v2357_v22 = vld [vmem:[%s2558_s18 + $0x10] sm:$0xff]   ;;  %v2358_v34 = vld [vmem:[%s2558_s18 + $0x28] sm:$0xff]  }
  0x13   : > { %v314_v25 = vshrl.u32 %v2356_v21, 16  ;;  %v317_v28 = vshll.u32 %v2356_v21, 16  ;;  %v307_v29 = vshrl.u32 %v2357_v22, 16  ;;  %v310_v33 = vshll.u32 %v2357_v22, 16  ;;  %v2359_v63 = vld [vmem:[%s2558_s18 + $0x20] sm:$0xff]   ;;  %v2360_v22 = vld [vmem:[%s2558_s18 + $0x38] sm:$0xff]  }
  0x14   : > { %v302_v23 = vrot.slane %v300_v16, 7  ;;  %v295_v24 = vrot.slane %v293_v19, 7  ;;  %v328_v58 = vshrl.u32 %v2358_v34, 16  ;;  %v331_v13 = vshll.u32 %v2358_v34, 16 }
  0x15   : > { %v316_v38 = vrot.slane %v314_v25, 7  ;;  %v309_v54 = vrot.slane %v307_v29, 7  ;;  %v321_v21 = vshrl.u32 %v2359_v63, 16 }
  0x16   : > { %v305_v26 = vor.u32 %v303_v17, %v302_v23  ;;  %v460_v27 = vsel %vm2539_vm2, %v302_v23, 0  ;;  %v298_v31 = vor.u32 %v296_v20, %v295_v24  ;;  %v459_v32 = vsel %vm2539_vm2, %v295_v24, 0 }
  0x17   : > { %v508_v30 = vshll.u32 %v460_v27, 16  ;;  %v496_v36 = vshll.u32 %v459_v32, 16  ;;  %v756_v37 = vrot.slane %v460_v27, 1  ;;  %v753_v42 = vrot.slane %v459_v32, 1 }
  0x18   : > { %v2574_v35 = vsel %vm2539_vm2, 0, %v305_v26  ;;  %v2580_v41 = vsel %vm2539_vm2, 0, %v298_v31  ;;  %v319_v49 = vor.u32 %v317_v28, %v316_v38  ;;  %v462_v50 = vsel %vm2539_vm2, %v316_v38, 0 }
  0x19   : > { %v501_v39 = vshrl.u32 %v2574_v35, 16  ;;  %v503_v40 = vshll.u32 %v2574_v35, 16  ;;  %v510_v43 = vrot.slane %v508_v30, 1  ;;  %v489_v44 = vshrl.u32 %v2580_v41, 16 }
  0x1a   : > { %v491_v45 = vshll.u32 %v2580_v41, 16  ;;  %v755_v46 = vrot.slane %v2574_v35, 1  ;;  %v752_v48 = vrot.slane %v2580_v41, 1  ;;  %v498_v52 = vrot.slane %v496_v36, 1 }
  0x1b   : > { %v505_v47 = vrot.slane %v503_v40, 1  ;;  %v532_v53 = vshll.u32 %v462_v50, 16  ;;  %v2591_v57 = vsel %vm2539_vm2, 0, %v319_v49  ;;  %v312_v1 = vor.u32 %v310_v33, %v309_v54  ;;  %v2361_v40 = vld [vmem:[%s2558_s18 + $0x30] sm:$0xff]  }
  0x1c   : > { %v493_v51 = vrot.slane %v491_v45, 1  ;;  %v757_v56 = vsel %vm748_vm3, %v755_v46, %v756_v37  ;;  %v754_v60 = vsel %vm748_vm3, %v752_v48, %v753_v42  ;;  %v525_v61 = vshrl.u32 %v2591_v57, 16 }
  0x1d   : > { %v506_v55 = vor.u32 %v505_v47, %v501_v39  ;;  %v527_v62 = vshll.u32 %v2591_v57, 16  ;;  %v461_v4 = vsel %vm2539_vm2, %v309_v54, 0  ;;  %v762_v5 = vrot.slane %v462_v50, 1 }
  0x1e   : > { %v494_v59 = vor.u32 %v493_v51, %v489_v44  ;;  %v534_v8 = vrot.slane %v532_v53, 1  ;;  %v520_v9 = vshll.u32 %v461_v4, 16  ;;  %v2605_v10 = vsel %vm2539_vm2, 0, %v312_v1 }
  0x1f   : > { %v511_v0 = vsel %vm475_vm4, %v506_v55, %v510_v43  ;;  %v529_v7 = vrot.slane %v527_v62, 1  ;;  %v761_v11 = vrot.slane %v2591_v57, 1  ;;  %v330_v12 = vrot.slane %v328_v58, 7 }
  0x20   : > { %684 = vrot.lane.b32.xlu1 %v511_v0, %s2508_s20  ;;  %v499_v6 = vsel %vm475_vm4, %v494_v59, %v498_v52  ;;  %v513_v15 = vshrl.u32 %v2605_v10, 16  ;;  %v515_v16 = vshll.u32 %v2605_v10, 16  ;;  %v759_v17 = vrot.slane %v461_v4, 1  ;;  %v2362_v59 = vld [vmem:[%s2558_s18 + $0x48] sm:$0xff]  }
  0x21   : > { %682 = vrot.lane.b32.xlu0 %v499_v6, %s2508_s20  ;;  %v530_v14 = vor.u32 %v529_v7, %v525_v61  ;;  %v758_v18 = vrot.slane %v2605_v10, 1  ;;  %v333_v19 = vor.u32 %v331_v13, %v330_v12  ;;  %v464_v20 = vsel %vm2539_vm2, %v330_v12, 0 }
  0x22   : > { %v517_v23 = vrot.slane %v515_v16, 1  ;;  %v522_v24 = vrot.slane %v520_v9, 1  ;;  %v556_v25 = vshll.u32 %v464_v20, 16  ;;  %v324_v26 = vshll.u32 %v2359_v63, 16 }
  0x23   : > { %v535_v27 = vsel %vm475_vm4, %v530_v14, %v534_v8  ;;  %v763_v28 = vsel %vm748_vm3, %v761_v11, %v762_v5  ;;  %v2620_v29 = vsel %vm2539_vm2, 0, %v333_v19  ;;  %v323_v30 = vrot.slane %v321_v21, 7 }
  0x24   : > { %804 = vrot.lane.b32.xlu1 %v757_v56, %s2507_s19  ;;  %v518_v31 = vor.u32 %v517_v23, %v513_v15  ;;  %v760_v32 = vsel %vm748_vm3, %v758_v18, %v759_v17  ;;  %v549_v33 = vshrl.u32 %v2620_v29, 16  ;;  %v551_v34 = vshll.u32 %v2620_v29, 16  ;;  %v2363_v15 = vld [vmem:[%s2558_s18 + $0x40] sm:$0xff]  }
  0x25   : > { %802 = vrot.lane.b32.xlu0 %v754_v60, %s2507_s19  ;;  %v326_v36 = vor.u32 %v324_v26, %v323_v30  ;;  %v463_v37 = vsel %vm2539_vm2, %v323_v30, 0  ;;  %v768_v38 = vrot.slane %v464_v20, 1  ;;  %v342_v39 = vshrl.u32 %v2360_v22, 16 }
  0x26   : > { %v523_v42 = vsel %vm475_vm4, %v518_v31, %v522_v24  ;;  %v553_v43 = vrot.slane %v551_v34, 1  ;;  %v558_v44 = vrot.slane %v556_v25, 1  ;;  %v544_v45 = vshll.u32 %v463_v37, 16 }
  0x27   : > { %v2633_v46 = vsel %vm2539_vm2, 0, %v326_v36  ;;  %v767_v47 = vrot.slane %v2620_v29, 1  ;;  %v344_v48 = vrot.slane %v342_v39, 7  ;;  %v345_v49 = vshll.u32 %v2360_v22, 16 }
  0x28   : > { %688 = vrot.lane.b32.xlu1 %v535_v27, %s2508_s20  ;;  %v554_v50 = vor.u32 %v553_v43, %v549_v33  ;;  %v537_v51 = vshrl.u32 %v2633_v46, 16  ;;  %v539_v52 = vshll.u32 %v2633_v46, 16  ;;  %v765_v53 = vrot.slane %v463_v37, 1  ;;  %v2364_v33 = vld [vmem:[%s2558_s18 + $0x58] sm:$0xff]  }
  0x29   : > { %686 = vrot.lane.b32.xlu0 %v523_v42, %s2508_s20  ;;  %v764_v54 = vrot.slane %v2633_v46, 1  ;;  %v347_v55 = vor.u32 %v345_v49, %v344_v48  ;;  %v466_v56 = vsel %vm2539_vm2, %v344_v48, 0  ;;  %v335_v58 = vshrl.u32 %v2361_v40, 16 }
  0x2a   : > { %v541_v60 = vrot.slane %v539_v52, 1  ;;  %v546_v61 = vrot.slane %v544_v45, 1  ;;  %v580_v62 = vshll.u32 %v466_v56, 16  ;;  %v338_v63 = vshll.u32 %v2361_v40, 16 }
  0x2b   : > { %v559_v0 = vsel %vm475_vm4, %v554_v50, %v558_v44  ;;  %v769_v1 = vsel %vm748_vm3, %v767_v47, %v768_v38  ;;  %v2648_v4 = vsel %vm2539_vm2, 0, %v347_v55  ;;  %v337_v5 = vrot.slane %v335_v58, 7 }
  0x2c   : > { %808 = vrot.lane.b32.xlu1 %v763_v28, %s2507_s19  ;;  %v542_v6 = vor.u32 %v541_v60, %v537_v51  ;;  %v766_v7 = vsel %vm748_vm3, %v764_v54, %v765_v53  ;;  %v573_v8 = vshrl.u32 %v2648_v4, 16  ;;  %v575_v9 = vshll.u32 %v2648_v4, 16  ;;  %v2365_v53 = vld [vmem:[%s2558_s18 + $0x50] sm:$0xff]  }
  0x2d   : > { %806 = vrot.lane.b32.xlu0 %v760_v32, %s2507_s19  ;;  %v340_v11 = vor.u32 %v338_v63, %v337_v5  ;;  %v465_v12 = vsel %vm2539_vm2, %v337_v5, 0  ;;  %v774_v13 = vrot.slane %v466_v56, 1  ;;  %v356_v14 = vshrl.u32 %v2362_v59, 16 }
  0x2e   : > { %v547_v16 = vsel %vm475_vm4, %v542_v6, %v546_v61  ;;  %v577_v17 = vrot.slane %v575_v9, 1  ;;  %v582_v18 = vrot.slane %v580_v62, 1  ;;  %v568_v19 = vshll.u32 %v465_v12, 16 }
  0x2f   : > { %v2661_v20 = vsel %vm2539_vm2, 0, %v340_v11  ;;  %v773_v21 = vrot.slane %v2648_v4, 1  ;;  %v358_v22 = vrot.slane %v356_v14, 7  ;;  %v359_v23 = vshll.u32 %v2362_v59, 16  ;;  %v2366_v11 = vld [vmem:[%s2558_s18 + $0x68] sm:$0xff]  }
  0x30   : > { %692 = vrot.lane.b32.xlu1 %v559_v0, %s2508_s20  ;;  %v578_v24 = vor.u32 %v577_v17, %v573_v8  ;;  %v561_v25 = vshrl.u32 %v2661_v20, 16  ;;  %v563_v26 = vshll.u32 %v2661_v20, 16  ;;  %v771_v27 = vrot.slane %v465_v12, 1 }
  0x31   : > { %690 = vrot.lane.b32.xlu0 %v547_v16, %s2508_s20  ;;  %v770_v28 = vrot.slane %v2661_v20, 1  ;;  %v361_v30 = vor.u32 %v359_v23, %v358_v22  ;;  %v468_v31 = vsel %vm2539_vm2, %v358_v22, 0  ;;  %v349_v32 = vshrl.u32 %v2363_v15, 16 }
  0x32   : > { %v565_v34 = vrot.slane %v563_v26, 1  ;;  %v570_v36 = vrot.slane %v568_v19, 1  ;;  %v604_v37 = vshll.u32 %v468_v31, 16  ;;  %v352_v38 = vshll.u32 %v2363_v15, 16 }
  0x33   : > { %v583_v39 = vsel %vm475_vm4, %v578_v24, %v582_v18  ;;  %v775_v40 = vsel %vm748_vm3, %v773_v21, %v774_v13  ;;  %v2676_v42 = vsel %vm2539_vm2, 0, %v361_v30  ;;  %v351_v43 = vrot.slane %v349_v32, 7 }
  0x34   : > { %812 = vrot.lane.b32.xlu1 %v769_v1, %s2507_s19  ;;  %v566_v44 = vor.u32 %v565_v34, %v561_v25  ;;  %v772_v45 = vsel %vm748_vm3, %v770_v28, %v771_v27  ;;  %v597_v47 = vshrl.u32 %v2676_v42, 16  ;;  %v599_v48 = vshll.u32 %v2676_v42, 16  ;;  %v2367_v28 = vld [vmem:[%s2558_s18 + $0x60] sm:$0xff]  }
  0x35   : > { %810 = vrot.lane.b32.xlu0 %v766_v7, %s2507_s19  ;;  %v354_v49 = vor.u32 %v352_v38, %v351_v43  ;;  %v467_v50 = vsel %vm2539_vm2, %v351_v43, 0  ;;  %v780_v51 = vrot.slane %v468_v31, 1  ;;  %v370_v52 = vshrl.u32 %v2364_v33, 16 }
  0x36   : > { %v571_v54 = vsel %vm475_vm4, %v566_v44, %v570_v36  ;;  %v601_v55 = vrot.slane %v599_v48, 1  ;;  %v606_v56 = vrot.slane %v604_v37, 1  ;;  %v592_v58 = vshll.u32 %v467_v50, 16 }
  0x37   : > { %v2689_v59 = vsel %vm2539_vm2, 0, %v354_v49  ;;  %v779_v60 = vrot.slane %v2676_v42, 1  ;;  %v372_v61 = vrot.slane %v370_v52, 7  ;;  %v373_v62 = vshll.u32 %v2364_v33, 16 }
  0x38   : > { %696 = vrot.lane.b32.xlu1 %v583_v39, %s2508_s20  ;;  %v602_v63 = vor.u32 %v601_v55, %v597_v47  ;;  %v585_v0 = vshrl.u32 %v2689_v59, 16  ;;  %v587_v1 = vshll.u32 %v2689_v59, 16  ;;  %v777_v5 = vrot.slane %v467_v50, 1  ;;  %v2368_v50 = vld [vmem:[%s2558_s18 + $0x78] sm:$0xff]  }
  0x39   : > { %694 = vrot.lane.b32.xlu0 %v571_v54, %s2508_s20  ;;  %v776_v6 = vrot.slane %v2689_v59, 1  ;;  %v375_v7 = vor.u32 %v373_v62, %v372_v61  ;;  %v470_v8 = vsel %vm2539_vm2, %v372_v61, 0  ;;  %v363_v9 = vshrl.u32 %v2365_v53, 16 }
  0x3a   : > { %v589_v12 = vrot.slane %v587_v1, 1  ;;  %v594_v13 = vrot.slane %v592_v58, 1  ;;  %v366_v14 = vshll.u32 %v2365_v53, 16  ;;  %v607_v15 = vsel %vm475_vm4, %v602_v63, %v606_v56 }
  0x3b   : > { %v2703_v16 = vsel %vm2539_vm2, 0, %v375_v7  ;;  %v628_v17 = vshll.u32 %v470_v8, 16  ;;  %v365_v18 = vrot.slane %v363_v9, 7  ;;  %v781_v21 = vsel %vm748_vm3, %v779_v60, %v780_v51  ;;  %v2369_v7 = vld [vmem:[%s2558_s18 + $0x70] sm:$0xff]  }
  0x3c   : > { %816 = vrot.lane.b32.xlu1 %v775_v40, %s2507_s19  ;;  %v590_v19 = vor.u32 %v589_v12, %v585_v0  ;;  %v621_v22 = vshrl.u32 %v2703_v16, 16  ;;  %v623_v23 = vshll.u32 %v2703_v16, 16  ;;  %v778_v24 = vsel %vm748_vm3, %v776_v6, %v777_v5 }
  0x3d   : > { %814 = vrot.lane.b32.xlu0 %v772_v45, %s2507_s19  ;;  %v368_v25 = vor.u32 %v366_v14, %v365_v18  ;;  %v469_v26 = vsel %vm2539_vm2, %v365_v18, 0  ;;  %v384_v27 = vshrl.u32 %v2366_v11, 16  ;;  %v786_v33 = vrot.slane %v470_v8, 1 }
  0x3e   : > { %v595_v30 = vsel %vm475_vm4, %v590_v19, %v594_v13  ;;  %v625_v31 = vrot.slane %v623_v23, 1  ;;  %v616_v32 = vshll.u32 %v469_v26, 16  ;;  %v630_v34 = vrot.slane %v628_v17, 1 }
  0x3f   : > { %v2717_v36 = vsel %vm2539_vm2, 0, %v368_v25  ;;  %v386_v37 = vrot.slane %v384_v27, 7  ;;  %v387_v38 = vshll.u32 %v2366_v11, 16  ;;  %v785_v44 = vrot.slane %v2703_v16, 1 }
  0x40   : > { %700 = vrot.lane.b32.xlu1 %v607_v15, %s2508_s20  ;;  %v626_v39 = vor.u32 %v625_v31, %v621_v22  ;;  %v609_v40 = vshrl.u32 %v2717_v36, 16  ;;  %v611_v43 = vshll.u32 %v2717_v36, 16  ;;  %v783_v45 = vrot.slane %v469_v26, 1 }
  0x41   : > { %698 = vrot.lane.b32.xlu0 %v595_v30, %s2508_s20  ;;  %v389_v47 = vor.u32 %v387_v38, %v386_v37  ;;  %v472_v48 = vsel %vm2539_vm2, %v386_v37, 0  ;;  %v377_v49 = vshrl.u32 %v2367_v28, 16  ;;  %v618_v52 = vrot.slane %v616_v32, 1  ;;  %v905_v38 = vld [vmem:[%s3169_s1 + $0x4] sm:$0x7] }
  0x42   : > { %v613_v51 = vrot.slane %v611_v43, 1  ;;  %v782_v53 = vrot.slane %v2717_v36, 1  ;;  %v380_v54 = vshll.u32 %v2367_v28, 16  ;;  %v631_v55 = vsel %vm475_vm4, %v626_v39, %v630_v34  ;;  %2339 = vmatprep.subr.msk.bf16.mxu1 %vm940_vm5, %v905_v38 }
  0x43   : > { %v2731_v56 = vsel %vm2539_vm2, 0, %v389_v47  ;;  %v652_v58 = vshll.u32 %v472_v48, 16  ;;  %v379_v60 = vrot.slane %v377_v49, 7  ;;  %v787_v0 = vsel %vm748_vm3, %v785_v44, %v786_v33 }
  0x44   : > { %820 = vrot.lane.b32.xlu1 %v781_v21, %s2507_s19  ;;  %v614_v61 = vor.u32 %v613_v51, %v609_v40  ;;  %v645_v62 = vshrl.u32 %v2731_v56, 16  ;;  %v647_v63 = vshll.u32 %v2731_v56, 16  ;;  %v398_v6 = vshrl.u32 %v2368_v50, 16 }
  0x45   : > { %818 = vrot.lane.b32.xlu0 %v778_v24, %s2507_s19  ;;  %v382_v1 = vor.u32 %v380_v54, %v379_v60  ;;  %v471_v5 = vsel %vm2539_vm2, %v379_v60, 0  ;;  %v784_v9 = vsel %vm748_vm3, %v782_v53, %v783_v45  ;;  %v654_v13 = vrot.slane %v652_v58, 1  ;;  %v904_v45 = vld [vmem:[%s3169_s1] sm:$0x7]  ;;  %v906_v53 = vld [vmem:[%s3169_s1 + $0x8] sm:$0x7] }
  0x46   : > { %v619_v8 = vsel %vm475_vm4, %v614_v61, %v618_v52  ;;  %v649_v11 = vrot.slane %v647_v63, 1  ;;  %v640_v12 = vshll.u32 %v471_v5, 16  ;;  %v400_v15 = vrot.slane %v398_v6, 7  ;;  %2340 = vmatprep.subr.msk.bf16.mxu0 %vm940_vm5, %v904_v45 }
  0x47   : > { %v2745_v14 = vsel %vm2539_vm2, 0, %v382_v1  ;;  %v401_v17 = vshll.u32 %v2368_v50, 16  ;;  %v792_v22 = vrot.slane %v472_v48, 1  ;;  %v791_v23 = vrot.slane %v2731_v56, 1 }
  0x48   : > { %704 = vrot.lane.b32.xlu1 %v631_v55, %s2508_s20  ;;  %v650_v18 = vor.u32 %v649_v11, %v645_v62  ;;  %v633_v19 = vshrl.u32 %v2745_v14, 16  ;;  %v635_v21 = vshll.u32 %v2745_v14, 16  ;;  %v474_v25 = vsel %vm2539_vm2, %v400_v15, 0 }
  0x49   : > { %702 = vrot.lane.b32.xlu0 %v619_v8, %s2508_s20  ;;  %v403_v24 = vor.u32 %v401_v17, %v400_v15  ;;  %v391_v26 = vshrl.u32 %v2369_v7, 16  ;;  %v642_v28 = vrot.slane %v640_v12, 1  ;;  %v789_v30 = vrot.slane %v471_v5, 1 }
  0x4a   : > { %v637_v27 = vrot.slane %v635_v21, 1  ;;  %v394_v31 = vshll.u32 %v2369_v7, 16  ;;  %v655_v32 = vsel %vm475_vm4, %v650_v18, %v654_v13  ;;  %v676_v34 = vshll.u32 %v474_v25, 16 }
  0x4b   : > { %v2757_v33 = vsel %vm2539_vm2, 0, %v403_v24  ;;  %v393_v37 = vrot.slane %v391_v26, 7  ;;  %v788_v40 = vrot.slane %v2745_v14, 1  ;;  %v793_v50 = vsel %vm748_vm3, %v791_v23, %v792_v22 }
  0x4c   : > { %824 = vrot.lane.b32.xlu1 %v787_v0, %s2507_s19  ;;  %v638_v39 = vor.u32 %v637_v27, %v633_v19  ;;  %v669_v43 = vshrl.u32 %v2757_v33, 16  ;;  %v671_v44 = vshll.u32 %v2757_v33, 16  ;;  %v678_v54 = vrot.slane %v676_v34, 1 }
  0x4d   : > { %822 = vrot.lane.b32.xlu0 %v784_v9, %s2507_s19  ;;  %v396_v47 = vor.u32 %v394_v31, %v393_v37  ;;  %v473_v48 = vsel %vm2539_vm2, %v393_v37, 0  ;;  %v942_v58 = vsel %vm940_vm5, %v905_v38, 0  ;;  %v1108_v60 = vsel %vm940_vm5, %v904_v45, 0 }
  0x4e   : > { %v643_v49 = vsel %vm475_vm4, %v638_v39, %v642_v28  ;;  %v673_v51 = vrot.slane %v671_v44, 1  ;;  %v664_v52 = vshll.u32 %v473_v48, 16  ;;  %v790_v61 = vsel %vm748_vm3, %v788_v40, %v789_v30  ;;  %2172 = vmatpush3.bf16.msra.mxu1 %v942_v58  ;;  %2206 = vmatpush3.bf16.msra.mxu0 %v1108_v60 }
  0x4f   : > { %v2780_v55 = vsel %vm2539_vm2, 0, %v396_v47  ;;  %2341 = vmatprep.subr.msk.bf16.mxu1 %vm940_vm5, %v904_v45  ;;  %2342 = vmatprep.subr.msk.bf16.mxu0 %vm940_vm5, %v906_v53  ;;  %v1272_v2 = vsel %vm940_vm5, %v906_v53, 0  ;;  %v797_v7 = vrot.slane %v2757_v33, 1  ;;  %v798_v8 = vrot.slane %v474_v25, 1 }
  0x50   : > { %708 = vrot.lane.b32.xlu1 %v655_v32, %s2508_s20  ;;  %v674_v62 = vor.u32 %v673_v51, %v669_v43  ;;  %v657_v63 = vshrl.u32 %v2780_v55, 16  ;;  %v659_v0 = vshll.u32 %v2780_v55, 16  ;;  %v666_v5 = vrot.slane %v664_v52, 1 }
  0x51   : > { %706 = vrot.lane.b32.xlu0 %v643_v49, %s2508_s20  ;;  %v794_v11 = vrot.slane %v2780_v55, 1  ;;  %v795_v12 = vrot.slane %v473_v48, 1  ;;  %v799_v15 = vsel %vm748_vm3, %v797_v7, %v798_v8 }
  0x52   : > { %v661_v1 = vrot.slane %v659_v0, 1  ;;  %v679_v6 = vsel %vm475_vm4, %v674_v62, %v678_v54 }
  0x53   : > { %v796_v17 = vsel %vm748_vm3, %v794_v11, %v795_v12 }
  0x54   : > { %828 = vrot.lane.b32.xlu1 %v793_v50, %s2507_s19  ;;  %v662_v9 = vor.u32 %v661_v1, %v657_v63 }
  0x55   : > { %826 = vrot.lane.b32.xlu0 %v790_v61, %s2507_s19 }
  0x56   : > { %v667_v13 = vsel %vm475_vm4, %v662_v9, %v666_v5 }
  0x58   : > { %712 = vrot.lane.b32.xlu1 %v679_v6, %s2508_s20 }
  0x59   : > { %710 = vrot.lane.b32.xlu0 %v667_v13, %s2508_s20 }
  0x5c   : > { %832 = vrot.lane.b32.xlu1 %v799_v15, %s2507_s19 }
  0x5d   : > { %830 = vrot.lane.b32.xlu0 %v796_v17, %s2507_s19 }
  0x7e   : > { %v801_v18 = vpop.permute.xlu1 %800 }
  0x82   : > { %v681_v19 = vpop.permute.xlu0 %680 }
  0x83   : > { %v836_v21 = vsel %vm834_vm6, %v2546_v3, %v681_v19 }
  0x84   : > { %v2806_v22 = vsel %vm869_vm7, %v836_v21, %v801_v18 }
  0x85   : > { %2207 = vmatprep.mubr.msk.bf16.mxu0 %vm907_vm8, %v2806_v22 }
  0x92   : > { %v685_v23 = vpop.permute.xlu1 %684 }
  0x93   : > { %v683_v24 = vpop.permute.xlu0 %682  ;;  %v840_v25 = vsel %vm834_vm6, %v2574_v35, %v685_v23 }
  0x94   : > { %v838_v27 = vsel %vm834_vm6, %v2580_v41, %v683_v24 }
  0x96   : > { %v805_v26 = vpop.permute.xlu1 %804 }
  0x97   : > { %v875_v28 = vsel %vm869_vm7, %v840_v25, %v805_v26  ;;  %v803_v30 = vpop.permute.xlu0 %802 }
  0x98   : > { %v873_v3 = vsel %vm869_vm7, %v838_v27, %v803_v30 }
  0x99   : > { %2173 = vmatprep.mubr.msk.bf16.mxu1 %vm907_vm8, %v873_v3  ;;  %2208 = vmatmul.mubr.msk.bf16.vlgmr.msra.gmra.mrb[0].mxu0 %vm907_vm8, %v873_v3 }
  0x9a   : > { %2174 = vmatmul.mubr.msk.bf16.vlgmr.msra.gmra.mrb[0].mxu1 %vm907_vm8, %v875_v28  ;;  %2211 = vmatprep.mubr.msk.bf16.mxu0 %vm907_vm8, %v875_v28  ;;  %v689_v31 = vpop.permute.xlu1 %688 }
  0x9b   : > { %2274 = vmatpush3.bf16.msra.mxu1 %v1108_v60  ;;  %2240 = vmatpush3.bf16.msra.mxu0 %v1272_v2  ;;  %v687_v35 = vpop.permute.xlu0 %686  ;;  %v844_v41 = vsel %vm834_vm6, %v2591_v57, %v689_v31 }
  0x9c   : > { %v842_v34 = vsel %vm834_vm6, %v2605_v10, %v687_v35 }
  0x9e   : > { %v809_v32 = vpop.permute.xlu1 %808 }
  0x9f   : > { %v879_v37 = vsel %vm869_vm7, %v844_v41, %v809_v32  ;;  %v807_v38 = vpop.permute.xlu0 %806 }
  0xa0   : > { %v877_v39 = vsel %vm869_vm7, %v842_v34, %v807_v38 }
  0xa1   : > { %2177 = vmatprep.mubr.msk.bf16.mxu1 %vm907_vm8, %v877_v39  ;;  %2212 = vmatmul.mubr.msk.bf16.gmra.mrb[4].mxu0 %vm907_vm8, %v877_v39 }
  0xa2   : > { %2178 = vmatmul.mubr.msk.bf16.gmra.mrb[4].mxu1 %vm907_vm8, %v879_v37  ;;  %2215 = vmatprep.mubr.msk.bf16.mxu0 %vm907_vm8, %v879_v37  ;;  %v693_v40 = vpop.permute.xlu1 %692 }
  0xa3   : > { %v691_v43 = vpop.permute.xlu0 %690  ;;  %v848_v57 = vsel %vm834_vm6, %v2620_v29, %v693_v40 }
  0xa4   : > { %v846_v10 = vsel %vm834_vm6, %v2633_v46, %v691_v43  ;;  %v2919_v43 = vld [vmem:[%s3170_s2] ss:$0 sm:$0xff] }
  0xa6   : > { %v813_v44 = vpop.permute.xlu1 %812 }
  0xa7   : > { %v883_v45 = vsel %vm869_vm7, %v848_v57, %v813_v44  ;;  %v811_v47 = vpop.permute.xlu0 %810 }
  0xa8   : > { %v881_v48 = vsel %vm869_vm7, %v846_v10, %v811_v47 }
  0xa9   : > { %2181 = vmatprep.mubr.msk.bf16.mxu1 %vm907_vm8, %v881_v48  ;;  %2216 = vmatmul.mubr.msk.bf16.gmra.mrb[8].mxu0 %vm907_vm8, %v881_v48 }
  0xaa   : > { %2182 = vmatmul.mubr.msk.bf16.gmra.mrb[8].mxu1 %vm907_vm8, %v883_v45  ;;  %2219 = vmatprep.mubr.msk.bf16.mxu0 %vm907_vm8, %v883_v45  ;;  %v697_v49 = vpop.permute.xlu1 %696 }
  0xab   : > { %v695_v50 = vpop.permute.xlu0 %694  ;;  %v852_v29 = vsel %vm834_vm6, %v2648_v4, %v697_v49 }
  0xac   : > { %v850_v46 = vsel %vm834_vm6, %v2661_v20, %v695_v50 }
  0xae   : > { %v817_v51 = vpop.permute.xlu1 %816 }
  0xaf   : > { %v887_v52 = vsel %vm869_vm7, %v852_v29, %v817_v51  ;;  %v815_v53 = vpop.permute.xlu0 %814 }
  0xb0   : > { %v885_v54 = vsel %vm869_vm7, %v850_v46, %v815_v53 }
  0xb1   : > { %2185 = vmatprep.mubr.msk.bf16.mxu1 %vm907_vm8, %v885_v54  ;;  %2220 = vmatmul.mubr.msk.bf16.gmra.mrb[12].mxu0 %vm907_vm8, %v885_v54 }
  0xb2   : > { %2186 = vmatmul.mubr.msk.bf16.gmra.mrb[12].mxu1 %vm907_vm8, %v887_v52  ;;  %2241 = vmatprep.mubr.msk.bf16.mxu0 %vm907_vm8, %v875_v28  ;;  %v701_v58 = vpop.permute.xlu1 %700 }
  0xb3   : > { %v699_v60 = vpop.permute.xlu0 %698  ;;  %v856_v4 = vsel %vm834_vm6, %v2676_v42, %v701_v58 }
  0xb4   : > { %v854_v20 = vsel %vm834_vm6, %v2689_v59, %v699_v60 }
  0xb6   : > { %v821_v61 = vpop.permute.xlu1 %820 }
  0xb7   : > { %v891_v62 = vsel %vm869_vm7, %v856_v4, %v821_v61  ;;  %v819_v63 = vpop.permute.xlu0 %818 }
  0xb8   : > { %v889_v0 = vsel %vm869_vm7, %v854_v20, %v819_v63 }
  0xb9   : > { %2189 = vmatprep.mubr.msk.bf16.mxu1 %vm907_vm8, %v889_v0  ;;  %2242 = vmatmul.mubr.msk.bf16.vlgmr.msra.gmra.mrb[0].mxu0 %vm907_vm8, %v877_v39 }
  0xba   : > { %2190 = vmatmul.mubr.msk.bf16.gmra.mrb[16].mxu1 %vm907_vm8, %v891_v62  ;;  %2245 = vmatprep.mubr.msk.bf16.mxu0 %vm907_vm8, %v879_v37  ;;  %v705_v2 = vpop.permute.xlu1 %704 }
  0xbb   : > { %v703_v1 = vpop.permute.xlu0 %702  ;;  %v860_v42 = vsel %vm834_vm6, %v2703_v16, %v705_v2 }
  0xbc   : > { %v858_v59 = vsel %vm834_vm6, %v2717_v36, %v703_v1 }
  0xbe   : > { %v825_v5 = vpop.permute.xlu1 %824 }
  0xbf   : > { %v895_v6 = vsel %vm869_vm7, %v860_v42, %v825_v5  ;;  %v823_v7 = vpop.permute.xlu0 %822 }
  0xc0   : > { %v893_v8 = vsel %vm869_vm7, %v858_v59, %v823_v7 }
  0xc1   : > { %2193 = vmatprep.mubr.msk.bf16.mxu1 %vm907_vm8, %v893_v8  ;;  %2246 = vmatmul.mubr.msk.bf16.gmra.mrb[4].mxu0 %vm907_vm8, %v881_v48 }
  0xc2   : > { %2194 = vmatmul.mubr.msk.bf16.gmra.mrb[20].mxu1 %vm907_vm8, %v895_v6  ;;  %2249 = vmatprep.mubr.msk.bf16.mxu0 %vm907_vm8, %v883_v45  ;;  %v709_v9 = vpop.permute.xlu1 %708 }
  0xc3   : > { %v707_v11 = vpop.permute.xlu0 %706  ;;  %v864_v16 = vsel %vm834_vm6, %v2731_v56, %v709_v9 }
  0xc4   : > { %v862_v36 = vsel %vm834_vm6, %v2745_v14, %v707_v11 }
  0xc6   : > { %v829_v12 = vpop.permute.xlu1 %828 }
  0xc7   : > { %v899_v13 = vsel %vm869_vm7, %v864_v16, %v829_v12  ;;  %v827_v15 = vpop.permute.xlu0 %826 }
  0xc8   : > { %v897_v17 = vsel %vm869_vm7, %v862_v36, %v827_v15 }
  0xc9   : > { %2197 = vmatprep.mubr.msk.bf16.mxu1 %vm907_vm8, %v897_v17  ;;  %2250 = vmatmul.mubr.msk.bf16.gmra.mrb[8].mxu0 %vm907_vm8, %v885_v54 }
  0xca   : > { %2198 = vmatmul.mubr.msk.bf16.gmra.mrb[24].mxu1 %vm907_vm8, %v899_v13  ;;  %2253 = vmatprep.mubr.msk.bf16.mxu0 %vm907_vm8, %v887_v52  ;;  %v713_v18 = vpop.permute.xlu1 %712 }
  0xcb   : > { %v711_v19 = vpop.permute.xlu0 %710  ;;  %v868_v56 = vsel %vm834_vm6, %v2757_v33, %v713_v18 }
  0xcc   : > { %v866_v14 = vsel %vm834_vm6, %v2780_v55, %v711_v19 }
  0xce   : > { %v833_v21 = vpop.permute.xlu1 %832 }
  0xcf   : > { %v903_v23 = vsel %vm869_vm7, %v868_v56, %v833_v21  ;;  %v831_v24 = vpop.permute.xlu0 %830 }
  0xd0   : > { %v901_v25 = vsel %vm869_vm7, %v866_v14, %v831_v24 }
  0xd1   : > { %2201 = vmatprep.mubr.msk.bf16.mxu1 %vm907_vm8, %v901_v25  ;;  %2254 = vmatmul.mubr.msk.bf16.gmra.mrb[12].mxu0 %vm907_vm8, %v889_v0 }
  0xd2   : > { %2202 = vmatmul.mubr.msk.bf16.gmra.mrb[28].mxu1 %vm907_vm8, %v903_v23  ;;  %2257 = vmatprep.mubr.msk.bf16.mxu0 %vm907_vm8, %v891_v62 }
  0xd3   : > { %2223 = vmatprep.mubr.msk.bf16.mxu1 %vm907_vm8, %v887_v52 }
  0xd9   : > { %2258 = vmatmul.mubr.msk.bf16.gmra.mrb[16].mxu0 %vm907_vm8, %v893_v8 }
  0xda   : > { %2224 = vmatmul.mubr.msk.bf16.vlgmr.msra.gmra.mrb[16].mxu1 %vm907_vm8, %v889_v0  ;;  %2261 = vmatprep.mubr.msk.bf16.mxu0 %vm907_vm8, %v895_v6 }
  0xdb   : > { %2227 = vmatprep.mubr.msk.bf16.mxu1 %vm907_vm8, %v891_v62 }
  0xe1   : > { %2262 = vmatmul.mubr.msk.bf16.gmra.mrb[20].mxu0 %vm907_vm8, %v897_v17 }
  0xe2   : > { %2228 = vmatmul.mubr.msk.bf16.gmra.mrb[20].mxu1 %vm907_vm8, %v893_v8  ;;  %2265 = vmatprep.mubr.msk.bf16.mxu0 %vm907_vm8, %v899_v13 }
  0xe3   : > { %2231 = vmatprep.mubr.msk.bf16.mxu1 %vm907_vm8, %v895_v6 }
  0xe9   : > { %2266 = vmatmul.mubr.msk.bf16.gmra.mrb[24].mxu0 %vm907_vm8, %v901_v25 }
  0xea   : > { %2232 = vmatmul.mubr.msk.bf16.gmra.mrb[24].mxu1 %vm907_vm8, %v897_v17  ;;  %2269 = vmatprep.mubr.msk.bf16.mxu0 %vm907_vm8, %v903_v23 }
  0xeb   : > { %2235 = vmatprep.mubr.msk.bf16.mxu1 %vm907_vm8, %v899_v13 }
  0xf1   : > { %2270 = vmatmul.mubr.msk.bf16.gmra.mrb[28].mxu0 %vm907_vm8, %v2806_v22 }
  0xf2   : > { %2236 = vmatmul.mubr.msk.bf16.gmra.mrb[28].mxu1 %vm907_vm8, %v901_v25 }
 0x16d   : > { %v2175_v33 = vpop.f32.mrb[0].mxu1 }
 0x16e   : > { %v978_v55 = vpop.f32.mrb[1].mxu1 }
 0x16f   : > { %v2176_v26 = vpop.f32.mrb[2].mxu1 }
 0x170   : > { %v981_v27 = vpop.f32.mrb[3].mxu1 }
 0x175   : > { %v2179_v28 = vpop.f32.mrb[4].mxu1 }
 0x176   : > { %v994_v30 = vpop.f32.mrb[5].mxu1 }
 0x177   : > { %v2180_v3 = vpop.f32.mrb[6].mxu1 }
 0x178   : > { %v997_v31 = vpop.f32.mrb[7].mxu1 }
 0x17d   : > { %v2183_v35 = vpop.f32.mrb[8].mxu1 }
 0x17e   : > { %v1010_v41 = vpop.f32.mrb[9].mxu1 }
 0x17f   : > { %v2184_v32 = vpop.f32.mrb[10].mxu1 }
 0x180   : > { %v2906_v34 = vpop.f32.mrb[11].mxu1 }
 0x185   : > { %v2908_v37 = vpop.f32.mrb[12].mxu1 }
 0x186   : > { %v2910_v38 = vpop.f32.mrb[13].mxu1 }
 0x187   : > { %v2912_v22 = vpop.f32.mrb[14].mxu1 }
 0x188   : > { %v2914_v39 = vpop.f32.mrb[15].mxu1 }
 0x18c   : > { %v2243_v40 = vpop.f32.mrb[0].mxu0 }
 0x18d   : > { %v2275_v57 = vadd.f32 %v2243_v40, %v2175_v33  ;;  %v1308_v44 = vpop.f32.mrb[1].mxu0 }
 0x18e   : > { %v2276_v10 = vadd.f32 %v1308_v44, %v978_v55  ;;  %v2244_v45 = vpop.f32.mrb[2].mxu0 }
 0x18f   : > { %v2922_v47 = vadd.f32 %v2275_v57, %v2919_v43  ;;  %v2277_v48 = vadd.f32 %v2244_v45, %v2176_v26  ;;  %v1311_v49 = vpop.f32.mrb[3].mxu0 }
 0x190   : > { %v2925_v50 = vadd.f32 %v2276_v10, %v2919_v43  ;;  %v2278_v29 = vadd.f32 %v1311_v49, %v981_v27 }
 0x191   : > { %v2023_v51 = vmul.f32 -1.442695, %v2922_v47  ;;  %v2929_v46 = vadd.f32 %v2277_v48, %v2919_v43 }
 0x192   : > { %v2021_v52 = vmul.f32 -1.442695, %v2925_v50  ;;  %v2933_v53 = vadd.f32 %v2278_v29, %v2919_v43 }
 0x193   : > { %2370 = vpow2.f32 %v2023_v51  ;;  %v2024_v54 = vmul.f32 -1.442695, %v2929_v46 }
 0x194   : > { %2372 = vpow2.f32 %v2021_v52  ;;  %v2022_v58 = vmul.f32 -1.442695, %v2933_v53  ;;  %v2247_v60 = vpop.f32.mrb[4].mxu0 }
 0x195   : > { %2374 = vpow2.f32 %v2024_v54  ;;  %v2279_v4 = vadd.f32 %v2247_v60, %v2179_v28  ;;  %v1324_v61 = vpop.f32.mrb[5].mxu0 }
 0x196   : > { %2376 = vpow2.f32 %v2022_v58  ;;  %v2280_v20 = vadd.f32 %v1324_v61, %v994_v30  ;;  %v2248_v62 = vpop.f32.mrb[6].mxu0 }
 0x197   : > { %v2938_v63 = vadd.f32 %v2279_v4, %v2919_v43  ;;  %v2281_v0 = vadd.f32 %v2248_v62, %v2180_v3  ;;  %v1327_v2 = vpop.f32.mrb[7].mxu0 }
 0x198   : > { %v2941_v1 = vadd.f32 %v2280_v20, %v2919_v43  ;;  %v2282_v42 = vadd.f32 %v1327_v2, %v997_v31 }
 0x199   : > { %v2027_v5 = vmul.f32 -1.442695, %v2938_v63  ;;  %v2945_v59 = vadd.f32 %v2281_v0, %v2919_v43 }
 0x19a   : > { %v2025_v6 = vmul.f32 -1.442695, %v2941_v1  ;;  %v2949_v7 = vadd.f32 %v2282_v42, %v2919_v43 }
 0x19b   : > { %2378 = vpow2.f32 %v2027_v5  ;;  %v2028_v8 = vmul.f32 -1.442695, %v2945_v59 }
 0x19c   : > { %2380 = vpow2.f32 %v2025_v6  ;;  %v2026_v9 = vmul.f32 -1.442695, %v2949_v7  ;;  %v2251_v11 = vpop.f32.mrb[8].mxu0 }
 0x19d   : > { %v2371_v16 = vpop.eup %2370  ;;  %2382 = vpow2.f32 %v2028_v8  ;;  %v2283_v12 = vadd.f32 %v2251_v11, %v2183_v35  ;;  %v1340_v36 = vpop.f32.mrb[9].mxu0 }
 0x19e   : > { %v2373_v13 = vpop.eup %2372  ;;  %v1604_v15 = vadd.f32 1.0, %v2371_v16  ;;  %2384 = vpow2.f32 %v2026_v9  ;;  %v2284_v17 = vadd.f32 %v1340_v36, %v1010_v41  ;;  %v2252_v18 = vpop.f32.mrb[10].mxu0 }
 0x19f   : > { %v2375_v19 = vpop.eup %2374  ;;  %v1602_v56 = vadd.f32 1.0, %v2373_v13  ;;  %v2955_v21 = vadd.f32 %v2283_v12, %v2919_v43  ;;  %v2285_v14 = vadd.f32 %v2252_v18, %v2184_v32  ;;  %v1343_v23 = vpop.f32.mrb[11].mxu0 }
 0x1a0   : > { %v2377_v24 = vpop.eup %2376  ;;  %2386 = vrcp.f32 %v1604_v15  ;;  %v1605_v25 = vadd.f32 1.0, %v2375_v19  ;;  %v2958_v33 = vadd.f32 %v2284_v17, %v2919_v43  ;;  %v2286_v55 = vadd.f32 %v1343_v23, %v2906_v34 }
 0x1a1   : > { %2388 = vrcp.f32 %v1602_v56  ;;  %v1603_v26 = vadd.f32 1.0, %v2377_v24  ;;  %v2031_v27 = vmul.f32 -1.442695, %v2955_v21  ;;  %v2967_v28 = vadd.f32 %v2285_v14, %v2919_v43 }
 0x1a2   : > { %2390 = vrcp.f32 %v1605_v25  ;;  %v2029_v30 = vmul.f32 -1.442695, %v2958_v33  ;;  %v2971_v3 = vadd.f32 %v2286_v55, %v2919_v43 }
 0x1a3   : > { %2392 = vrcp.f32 %v1603_v26  ;;  %v2032_v31 = vmul.f32 -1.442695, %v2967_v28 }
 0x1a4   : > { %2394 = vpow2.f32 %v2031_v27  ;;  %v2030_v35 = vmul.f32 -1.442695, %v2971_v3  ;;  %v2255_v41 = vpop.f32.mrb[12].mxu0 }
 0x1a5   : > { %v2379_v32 = vpop.eup %2378  ;;  %2396 = vpow2.f32 %v2029_v30  ;;  %v2287_v34 = vadd.f32 %v2255_v41, %v2908_v37  ;;  %v1356_v40 = vpop.f32.mrb[13].mxu0 }
 0x1a6   : > { %v2381_v57 = vpop.eup %2380  ;;  %v1608_v44 = vadd.f32 1.0, %v2379_v32  ;;  %2398 = vpow2.f32 %v2032_v31  ;;  %v2288_v10 = vadd.f32 %v1356_v40, %v2910_v38  ;;  %v2256_v45 = vpop.f32.mrb[14].mxu0 }
 0x1a7   : > { %v2383_v48 = vpop.eup %2382  ;;  %v1606_v49 = vadd.f32 1.0, %v2381_v57  ;;  %2400 = vpow2.f32 %v2030_v35  ;;  %v2982_v29 = vadd.f32 %v2287_v34, %v2919_v43  ;;  %v2289_v51 = vadd.f32 %v2256_v45, %v2912_v22  ;;  %v1359_v52 = vpop.f32.mrb[15].mxu0 }
 0x1a8   : > { %v2385_v54 = vpop.eup %2384  ;;  %2402 = vrcp.f32 %v1608_v44  ;;  %v1609_v37 = vadd.f32 1.0, %v2383_v48  ;;  %v2986_v58 = vadd.f32 %v2288_v10, %v2919_v43  ;;  %v2290_v60 = vadd.f32 %v1359_v52, %v2914_v39 }
 0x1a9   : > { %2404 = vrcp.f32 %v1606_v49  ;;  %v1607_v38 = vadd.f32 1.0, %v2385_v54  ;;  %v2035_v4 = vmul.f32 -1.442695, %v2982_v29  ;;  %v2992_v61 = vadd.f32 %v2289_v51, %v2919_v43 }
 0x1aa   : > { %v2387_v20 = vpop.eup %2386  ;;  %2406 = vrcp.f32 %v1609_v37  ;;  %v2033_v22 = vmul.f32 -1.442695, %v2986_v58  ;;  %v2996_v62 = vadd.f32 %v2290_v60, %v2919_v43 }
 0x1ab   : > { %v2389_v0 = vpop.eup %2388  ;;  %v1700_v2 = vmul.f32 %v2387_v20, %v2922_v47  ;;  %2408 = vrcp.f32 %v1607_v38  ;;  %v2036_v39 = vmul.f32 -1.442695, %v2992_v61 }
 0x1ac   : > { %v2391_v42 = vpop.eup %2390  ;;  %v1698_v5 = vmul.f32 %v2389_v0, %v2925_v50  ;;  %2410 = vpow2.f32 %v2035_v4  ;;  %v2034_v6 = vmul.f32 -1.442695, %v2996_v62  ;;  %v2259_v8 = vpop.f32.mrb[16].mxu0 }
 0x1ad   : > { %v2393_v9 = vpop.eup %2392  ;;  %v2090_v11 = vpack.c.bf16 %v1700_v2, %v1700_v2  ;;  %v1701_v47 = vmul.f32 %v2391_v42, %v2929_v46  ;;  %2412 = vpow2.f32 %v2033_v22  ;;  %v2225_v16 = vpop.f32.mrb[16].mxu1 }
 0x1ae   : > { %v1372_v12 = vpop.f32.mrb[17].mxu0  ;;  %v2395_v36 = vpop.eup %2394  ;;  %v2088_v13 = vpack.c.bf16 %v1698_v5, %v1698_v5  ;;  %v1699_v15 = vmul.f32 %v2393_v9, %v2933_v53  ;;  %2414 = vpow2.f32 %v2036_v39  ;;  %v2291_v17 = vadd.f32 %v2259_v8, %v2225_v16 }
 0x1af   : > { %v1208_v50 = vpop.f32.mrb[17].mxu1  ;;  %v2260_v18 = vpop.f32.mrb[18].mxu0  ;;  %1861 = vst.msk [vmem:[%s3003_s7 + $0x8] sm:$0xf] %vm1858_vm9, %v2090_v11  ;;  %v2091_v56 = vpack.c.bf16 %v1701_v47, %v1701_v47  ;;  %v1612_v14 = vadd.f32 1.0, %v2395_v36  ;;  %2416 = vpow2.f32 %v2034_v6 }
 0x1b0   : > { %v2397_v19 = vpop.eup %2396  ;;  %v2292_v46 = vadd.f32 %v1372_v12, %v1208_v50  ;;  %v2226_v23 = vpop.f32.mrb[18].mxu1  ;;  %1859 = vst.msk [vmem:[%s3003_s7] sm:$0xf] %vm1858_vm9, %v2088_v13  ;;  %v2089_v55 = vpack.c.bf16 %v1699_v15, %v1699_v15  ;;  %v3014_v26 = vadd.f32 %v2291_v17, %v2919_v43 }
 0x1b1   : > { %v1375_v24 = vpop.f32.mrb[19].mxu0  ;;  %v2399_v25 = vpop.eup %2398  ;;  %v1610_v53 = vadd.f32 1.0, %v2397_v19  ;;  %v2293_v27 = vadd.f32 %v2260_v18, %v2226_v23  ;;  %1862 = vst.msk [vmem:[%s3003_s7 + $0xc] sm:$0xf] %vm1858_vm9, %v2091_v56  ;;  %2418 = vrcp.f32 %v1612_v14 }
 0x1b2   : > { %v1211_v30 = vpop.f32.mrb[19].mxu1  ;;  %v2401_v31 = vpop.eup %2400  ;;  %v1613_v35 = vadd.f32 1.0, %v2399_v25  ;;  %v3019_v41 = vadd.f32 %v2292_v46, %v2919_v43  ;;  %1860 = vst.msk [vmem:[%s3003_s7 + $0x4] sm:$0xf] %vm1858_vm9, %v2089_v55  ;;  %v2039_v57 = vmul.f32 -1.442695, %v3014_v26 }
 0x1b3   : > { %v2294_v32 = vadd.f32 %v1375_v24, %v1211_v30  ;;  %v2403_v34 = vpop.eup %2402  ;;  %2420 = vrcp.f32 %v1610_v53  ;;  %v1611_v40 = vadd.f32 1.0, %v2401_v31  ;;  %v3025_v44 = vadd.f32 %v2293_v27, %v2919_v43 }
 0x1b4   : > { %v2405_v10 = vpop.eup %2404  ;;  %v1704_v45 = vmul.f32 %v2403_v34, %v2938_v63  ;;  %2422 = vrcp.f32 %v1613_v35  ;;  %v2037_v48 = vmul.f32 -1.442695, %v3019_v41  ;;  %v2263_v37 = vpop.f32.mrb[20].mxu0 }
 0x1b5   : > { %v3030_v49 = vadd.f32 %v2294_v32, %v2919_v43  ;;  %v2407_v51 = vpop.eup %2406  ;;  %v1702_v52 = vmul.f32 %v2405_v10, %v2941_v1  ;;  %2424 = vrcp.f32 %v1611_v40  ;;  %v2040_v54 = vmul.f32 -1.442695, %v3025_v44  ;;  %v2229_v20 = vpop.f32.mrb[20].mxu1 }
 0x1b6   : > { %v2409_v60 = vpop.eup %2408  ;;  %v2094_v38 = vpack.c.bf16 %v1704_v45, %v1704_v45  ;;  %v1705_v4 = vmul.f32 %v2407_v51, %v2945_v59  ;;  %2426 = vpow2.f32 %v2039_v57  ;;  %v1388_v22 = vpop.f32.mrb[21].mxu0  ;;  %v2295_v1 = vadd.f32 %v2263_v37, %v2229_v20 }
 0x1b7   : > { %v2038_v63 = vmul.f32 -1.442695, %v3030_v49  ;;  %v2411_v0 = vpop.eup %2410  ;;  %v2092_v2 = vpack.c.bf16 %v1702_v52, %v1702_v52  ;;  %v1703_v39 = vmul.f32 %v2409_v60, %v2949_v7  ;;  %2428 = vpow2.f32 %v2037_v48  ;;  %v1224_v42 = vpop.f32.mrb[21].mxu1 }
 0x1b8   : > { %v2264_v5 = vpop.f32.mrb[22].mxu0  ;;  %v2413_v6 = vpop.eup %2412  ;;  %1865 = vst.msk [vmem:[%s3003_s7 + $0x18] sm:$0xf] %vm1858_vm9, %v2094_v38  ;;  %v2095_v8 = vpack.c.bf16 %v1705_v4, %v1705_v4  ;;  %v1616_v59 = vadd.f32 1.0, %v2411_v0  ;;  %2430 = vpow2.f32 %v2040_v54  ;;  %v2296_v9 = vadd.f32 %v1388_v22, %v1224_v42 }
 0x1b9   : > { %v2230_v11 = vpop.f32.mrb[22].mxu1  ;;  %v1391_v47 = vpop.f32.mrb[23].mxu0  ;;  %1863 = vst.msk [vmem:[%s3003_s7 + $0x10] sm:$0xf] %vm1858_vm9, %v2092_v2  ;;  %v2093_v12 = vpack.c.bf16 %v1703_v39, %v1703_v39  ;;  %v1614_v7 = vadd.f32 1.0, %v2413_v6  ;;  %2432 = vpow2.f32 %v2038_v63  ;;  %v3042_v36 = vadd.f32 %v2295_v1, %v2919_v43 }
 0x1ba   : > { %v2415_v16 = vpop.eup %2414  ;;  %v1227_v13 = vpop.f32.mrb[23].mxu1  ;;  %1866 = vst.msk [vmem:[%s3003_s7 + $0x1c] sm:$0xf] %vm1858_vm9, %v2095_v8  ;;  %2434 = vrcp.f32 %v1616_v59  ;;  %v3047_v50 = vadd.f32 %v2296_v9, %v2919_v43  ;;  %v2297_v18 = vadd.f32 %v2264_v5, %v2230_v11 }
 0x1bb   : > { %v2417_v15 = vpop.eup %2416  ;;  %v1617_v17 = vadd.f32 1.0, %v2415_v16  ;;  %1864 = vst.msk [vmem:[%s3003_s7 + $0x14] sm:$0xf] %vm1858_vm9, %v2093_v12  ;;  %2436 = vrcp.f32 %v1614_v7  ;;  %v2043_v56 = vmul.f32 -1.442695, %v3042_v36  ;;  %v2298_v14 = vadd.f32 %v1391_v47, %v1227_v13 }
 0x1bc   : > { %v1615_v19 = vadd.f32 1.0, %v2417_v15  ;;  %v2419_v46 = vpop.eup %2418  ;;  %v2041_v23 = vmul.f32 -1.442695, %v3047_v50  ;;  %v3054_v24 = vadd.f32 %v2297_v18, %v2919_v43  ;;  %v2267_v27 = vpop.f32.mrb[24].mxu0 }
 0x1bd   : > { %2438 = vrcp.f32 %v1617_v17  ;;  %v2421_v25 = vpop.eup %2420  ;;  %v1708_v55 = vmul.f32 %v2419_v46, %v2955_v21  ;;  %v3058_v53 = vadd.f32 %v2298_v14, %v2919_v43  ;;  %v2233_v32 = vpop.f32.mrb[24].mxu1 }
 0x1be   : > { %2440 = vrcp.f32 %v1615_v19  ;;  %v2423_v30 = vpop.eup %2422  ;;  %v1706_v31 = vmul.f32 %v2421_v25, %v2958_v33  ;;  %v2044_v35 = vmul.f32 -1.442695, %v3054_v24  ;;  %v1404_v34 = vpop.f32.mrb[25].mxu0  ;;  %v2299_v54 = vadd.f32 %v2267_v27, %v2233_v32 }
 0x1bf   : > { %2442 = vpow2.f32 %v2043_v56  ;;  %v2425_v40 = vpop.eup %2424  ;;  %v2098_v57 = vpack.c.bf16 %v1708_v55, %v1708_v55  ;;  %v1709_v10 = vmul.f32 %v2423_v30, %v2967_v28  ;;  %v2042_v21 = vmul.f32 -1.442695, %v3058_v53  ;;  %v1240_v45 = vpop.f32.mrb[25].mxu1 }
 0x1c0   : > { %2444 = vpow2.f32 %v2041_v23  ;;  %v2268_v48 = vpop.f32.mrb[26].mxu0  ;;  %v2427_v51 = vpop.eup %2426  ;;  %v2096_v52 = vpack.c.bf16 %v1706_v31, %v1706_v31  ;;  %v1707_v33 = vmul.f32 %v2425_v40, %v2971_v3  ;;  %v2300_v63 = vadd.f32 %v1404_v34, %v1240_v45 }
 0x1c1   : > { %2446 = vpow2.f32 %v2044_v35  ;;  %v2234_v37 = vpop.f32.mrb[26].mxu1  ;;  %v1407_v60 = vpop.f32.mrb[27].mxu0  ;;  %1869 = vst.msk [vmem:[%s3003_s7 + $0x28] sm:$0xf] %vm1858_vm9, %v2098_v57  ;;  %v2099_v4 = vpack.c.bf16 %v1709_v10, %v1709_v10  ;;  %v1620_v28 = vadd.f32 1.0, %v2427_v51  ;;  %v3070_v3 = vadd.f32 %v2299_v54, %v2919_v43 }
 0x1c2   : > { %v2429_v38 = vpop.eup %2428  ;;  %2448 = vpow2.f32 %v2042_v21  ;;  %v1243_v20 = vpop.f32.mrb[27].mxu1  ;;  %1867 = vst.msk [vmem:[%s3003_s7 + $0x20] sm:$0xf] %vm1858_vm9, %v2096_v52  ;;  %v2097_v0 = vpack.c.bf16 %v1707_v33, %v1707_v33  ;;  %v2301_v39 = vadd.f32 %v2268_v48, %v2234_v37  ;;  %v3075_v5 = vadd.f32 %v2300_v63, %v2919_v43 }
 0x1c3   : > { %v2431_v22 = vpop.eup %2430  ;;  %v1618_v2 = vadd.f32 1.0, %v2429_v38  ;;  %1870 = vst.msk [vmem:[%s3003_s7 + $0x2c] sm:$0xf] %vm1858_vm9, %v2099_v4  ;;  %2450 = vrcp.f32 %v1620_v28  ;;  %v2302_v6 = vadd.f32 %v1407_v60, %v1243_v20  ;;  %v2047_v9 = vmul.f32 -1.442695, %v3070_v3 }
 0x1c4   : > { %v2433_v1 = vpop.eup %2432  ;;  %v1621_v42 = vadd.f32 1.0, %v2431_v22  ;;  %1868 = vst.msk [vmem:[%s3003_s7 + $0x24] sm:$0xf] %vm1858_vm9, %v2097_v0  ;;  %v3081_v11 = vadd.f32 %v2301_v39, %v2919_v43  ;;  %v2045_v12 = vmul.f32 -1.442695, %v3075_v5  ;;  %v2271_v13 = vpop.f32.mrb[28].mxu0 }
 0x1c5   : > { %v2435_v8 = vpop.eup %2434  ;;  %2452 = vrcp.f32 %v1618_v2  ;;  %v1619_v59 = vadd.f32 1.0, %v2433_v1  ;;  %v3086_v7 = vadd.f32 %v2302_v6, %v2919_v43  ;;  %v2237_v19 = vpop.f32.mrb[28].mxu1 }
 0x1c6   : > { %v2437_v47 = vpop.eup %2436  ;;  %v1712_v16 = vmul.f32 %v2435_v8, %v2982_v29  ;;  %2454 = vrcp.f32 %v1621_v42  ;;  %v2048_v18 = vmul.f32 -1.442695, %v3081_v11  ;;  %v1420_v56 = vpop.f32.mrb[29].mxu0  ;;  %v2303_v31 = vadd.f32 %v2271_v13, %v2237_v19 }
 0x1c7   : > { %v2439_v15 = vpop.eup %2438  ;;  %v1710_v17 = vmul.f32 %v2437_v47, %v2986_v58  ;;  %2456 = vrcp.f32 %v1619_v59  ;;  %v2046_v23 = vmul.f32 -1.442695, %v3086_v7  ;;  %v1256_v25 = vpop.f32.mrb[29].mxu1 }
 0x1c8   : > { %v2441_v14 = vpop.eup %2440  ;;  %v2102_v46 = vpack.c.bf16 %v1712_v16, %v1712_v16  ;;  %v1713_v29 = vmul.f32 %v2439_v15, %v2992_v61  ;;  %2458 = vpow2.f32 %v2047_v9  ;;  %v2272_v55 = vpop.f32.mrb[30].mxu0  ;;  %v2304_v57 = vadd.f32 %v1420_v56, %v1256_v25 }
 0x1c9   : > { %v2443_v27 = vpop.eup %2442  ;;  %v2100_v30 = vpack.c.bf16 %v1710_v17, %v1710_v17  ;;  %v1711_v58 = vmul.f32 %v2441_v14, %v2996_v62  ;;  %2460 = vpow2.f32 %v2045_v12  ;;  %v2238_v35 = vpop.f32.mrb[30].mxu1  ;;  %v3098_v62 = vadd.f32 %v2303_v31, %v2919_v43 }
 0x1ca   : > { %v1423_v32 = vpop.f32.mrb[31].mxu0  ;;  %v2445_v34 = vpop.eup %2444  ;;  %1873 = vst.msk [vmem:[%s3003_s7 + $0x38] sm:$0xf] %vm1858_vm9, %v2102_v46  ;;  %v2103_v40 = vpack.c.bf16 %v1713_v29, %v1713_v29  ;;  %v1624_v61 = vadd.f32 1.0, %v2443_v27  ;;  %2462 = vpow2.f32 %v2048_v18  ;;  %v3103_v33 = vadd.f32 %v2304_v57, %v2919_v43 }
 0x1cb   : > { %v1259_v10 = vpop.f32.mrb[31].mxu1  ;;  %v2447_v21 = vpop.eup %2446  ;;  %1871 = vst.msk [vmem:[%s3003_s7 + $0x30] sm:$0xf] %vm1858_vm9, %v2100_v30  ;;  %v2101_v45 = vpack.c.bf16 %v1711_v58, %v1711_v58  ;;  %v1622_v48 = vadd.f32 1.0, %v2445_v34  ;;  %2464 = vpow2.f32 %v2046_v23  ;;  %v2305_v54 = vadd.f32 %v2272_v55, %v2238_v35 }
 0x1cc   : > { %v2449_v51 = vpop.eup %2448  ;;  %1874 = vst.msk [vmem:[%s3003_s7 + $0x3c] sm:$0xf] %vm1858_vm9, %v2103_v40  ;;  %2466 = vrcp.f32 %v1624_v61  ;;  %v1625_v52 = vadd.f32 1.0, %v2447_v21  ;;  %v2051_v60 = vmul.f32 -1.442695, %v3098_v62  ;;  %v2306_v38 = vadd.f32 %v1423_v32, %v1259_v10 }
 0x1cd   : > { %1872 = vst.msk [vmem:[%s3003_s7 + $0x34] sm:$0xf] %vm1858_vm9, %v2101_v45  ;;  %2468 = vrcp.f32 %v1622_v48  ;;  %v1623_v37 = vadd.f32 1.0, %v2449_v51  ;;  %v2451_v4 = vpop.eup %2450  ;;  %v2049_v28 = vmul.f32 -1.442695, %v3103_v33  ;;  %v3110_v63 = vadd.f32 %v2305_v54, %v2919_v43 }
 0x1ce   : > { %2470 = vrcp.f32 %v1625_v52  ;;  %v1716_v22 = vmul.f32 %v2451_v4, %v3014_v26  ;;  %v3114_v0 = vadd.f32 %v2306_v38, %v2919_v43 }
 0x1cf   : > { %v2453_v20 = vpop.eup %2452  ;;  %2472 = vrcp.f32 %v1623_v37  ;;  %v2052_v1 = vmul.f32 -1.442695, %v3110_v63 }
 0x1d0   : > { %v2455_v2 = vpop.eup %2454  ;;  %v1714_v39 = vmul.f32 %v2453_v20, %v3019_v41  ;;  %2474 = vpow2.f32 %v2051_v60  ;;  %v2106_v6 = vpack.c.bf16 %v1716_v22, %v1716_v22  ;;  %v2050_v26 = vmul.f32 -1.442695, %v3114_v0 }
 0x1d1   : > { %v2457_v42 = vpop.eup %2456  ;;  %v1717_v8 = vmul.f32 %v2455_v2, %v3025_v44  ;;  %2476 = vpow2.f32 %v2049_v28 }
 0x1d2   : > { %v2459_v59 = vpop.eup %2458  ;;  %v2104_v9 = vpack.c.bf16 %v1714_v39, %v1714_v39  ;;  %v1715_v43 = vmul.f32 %v2457_v42, %v3030_v49  ;;  %2478 = vpow2.f32 %v2052_v1  ;;  %1877 = vst.msk [vmem:[%s3003_s7 + $0x48] sm:$0xf] %vm1858_vm9, %v2106_v6 }
 0x1d3   : > { %v2461_v47 = vpop.eup %2460  ;;  %v2107_v41 = vpack.c.bf16 %v1717_v8, %v1717_v8  ;;  %v1628_v16 = vadd.f32 1.0, %v2459_v59  ;;  %2480 = vpow2.f32 %v2050_v26 }
 0x1d4   : > { %v2463_v12 = vpop.eup %2462  ;;  %1875 = vst.msk [vmem:[%s3003_s7 + $0x40] sm:$0xf] %vm1858_vm9, %v2104_v9  ;;  %v2105_v44 = vpack.c.bf16 %v1715_v43, %v1715_v43  ;;  %v1626_v13 = vadd.f32 1.0, %v2461_v47 }
 0x1d5   : > { %v2465_v15 = vpop.eup %2464  ;;  %1878 = vst.msk [vmem:[%s3003_s7 + $0x4c] sm:$0xf] %vm1858_vm9, %v2107_v41  ;;  %2482 = vrcp.f32 %v1628_v16  ;;  %v1629_v17 = vadd.f32 1.0, %v2463_v12 }
 0x1d6   : > { %v2467_v18 = vpop.eup %2466  ;;  %1876 = vst.msk [vmem:[%s3003_s7 + $0x44] sm:$0xf] %vm1858_vm9, %v2105_v44  ;;  %2484 = vrcp.f32 %v1626_v13  ;;  %v1627_v49 = vadd.f32 1.0, %v2465_v15 }
 0x1d7   : > { %v2469_v19 = vpop.eup %2468  ;;  %v1720_v56 = vmul.f32 %v2467_v18, %v3042_v36  ;;  %2486 = vrcp.f32 %v1629_v17 }
 0x1d8   : > { %v2471_v14 = vpop.eup %2470  ;;  %v1718_v46 = vmul.f32 %v2469_v19, %v3047_v50  ;;  %2488 = vrcp.f32 %v1627_v49 }
 0x1d9   : > { %v2473_v29 = vpop.eup %2472  ;;  %v2110_v23 = vpack.c.bf16 %v1720_v56, %v1720_v56  ;;  %v1721_v25 = vmul.f32 %v2471_v14, %v3054_v24 }
 0x1da   : > { %v2475_v55 = vpop.eup %2474  ;;  %v2108_v27 = vpack.c.bf16 %v1718_v46, %v1718_v46  ;;  %v1719_v30 = vmul.f32 %v2473_v29, %v3058_v53 }
 0x1db   : > { %v2477_v58 = vpop.eup %2476  ;;  %1881 = vst.msk [vmem:[%s3003_s7 + $0x58] sm:$0xf] %vm1858_vm9, %v2110_v23  ;;  %v2111_v36 = vpack.c.bf16 %v1721_v25, %v1721_v25  ;;  %v1632_v31 = vadd.f32 1.0, %v2475_v55 }
 0x1dc   : > { %v2479_v35 = vpop.eup %2478  ;;  %1879 = vst.msk [vmem:[%s3003_s7 + $0x50] sm:$0xf] %vm1858_vm9, %v2108_v27  ;;  %v2109_v50 = vpack.c.bf16 %v1719_v30, %v1719_v30  ;;  %v1630_v32 = vadd.f32 1.0, %v2477_v58 }
 0x1dd   : > { %v2481_v34 = vpop.eup %2480  ;;  %1882 = vst.msk [vmem:[%s3003_s7 + $0x5c] sm:$0xf] %vm1858_vm9, %v2111_v36  ;;  %2490 = vrcp.f32 %v1632_v31  ;;  %v1633_v24 = vadd.f32 1.0, %v2479_v35 }
 0x1de   : > { %1880 = vst.msk [vmem:[%s3003_s7 + $0x54] sm:$0xf] %vm1858_vm9, %v2109_v50  ;;  %2492 = vrcp.f32 %v1630_v32  ;;  %v1631_v53 = vadd.f32 1.0, %v2481_v34 }
 0x1df   : > { %v2483_v40 = vpop.eup %2482  ;;  %2494 = vrcp.f32 %v1633_v24 }
 0x1e0   : > { %v2485_v61 = vpop.eup %2484  ;;  %v1724_v57 = vmul.f32 %v2483_v40, %v3070_v3  ;;  %2496 = vrcp.f32 %v1631_v53 }
 0x1e1   : > { %v2487_v10 = vpop.eup %2486  ;;  %v1722_v21 = vmul.f32 %v2485_v61, %v3075_v5 }
 0x1e2   : > { %v2489_v45 = vpop.eup %2488  ;;  %v2114_v48 = vpack.c.bf16 %v1724_v57, %v1724_v57  ;;  %v1725_v51 = vmul.f32 %v2487_v10, %v3081_v11 }
 0x1e3   : > { %v2112_v52 = vpack.c.bf16 %v1722_v21, %v1722_v21  ;;  %v1723_v54 = vmul.f32 %v2489_v45, %v3086_v7 }
 0x1e4   : > { %1885 = vst.msk [vmem:[%s3003_s7 + $0x68] sm:$0xf] %vm1858_vm9, %v2114_v48  ;;  %v2115_v37 = vpack.c.bf16 %v1725_v51, %v1725_v51 }
 0x1e5   : > { %1883 = vst.msk [vmem:[%s3003_s7 + $0x60] sm:$0xf] %vm1858_vm9, %v2112_v52  ;;  %v2113_v60 = vpack.c.bf16 %v1723_v54, %v1723_v54 }
 0x1e6   : > { %1886 = vst.msk [vmem:[%s3003_s7 + $0x6c] sm:$0xf] %vm1858_vm9, %v2115_v37 }
 0x1e7   : > { %v2491_v3 = vpop.eup %2490  ;;  %1884 = vst.msk [vmem:[%s3003_s7 + $0x64] sm:$0xf] %vm1858_vm9, %v2113_v60 }
 0x1e8   : > { %v2493_v5 = vpop.eup %2492  ;;  %v1728_v11 = vmul.f32 %v2491_v3, %v3098_v62 }
 0x1e9   : > { %v2495_v38 = vpop.eup %2494  ;;  %v1726_v7 = vmul.f32 %v2493_v5, %v3103_v33 }
 0x1ea   : > { %v2497_v4 = vpop.eup %2496  ;;  %v2118_v28 = vpack.c.bf16 %v1728_v11, %v1728_v11  ;;  %v1729_v20 = vmul.f32 %v2495_v38, %v3110_v63 }
 0x1eb   : > { %v2116_v22 = vpack.c.bf16 %v1726_v7, %v1726_v7  ;;  %v1727_v2 = vmul.f32 %v2497_v4, %v3114_v0 }
 0x1ec   : > { %1889 = vst.msk [vmem:[%s3003_s7 + $0x78] sm:$0xf] %vm1858_vm9, %v2118_v28  ;;  %v2119_v39 = vpack.c.bf16 %v1729_v20, %v1729_v20 }
 0x1ed   : > { %1887 = vst.msk [vmem:[%s3003_s7 + $0x70] sm:$0xf] %vm1858_vm9, %v2116_v22  ;;  %v2117_v1 = vpack.c.bf16 %v1727_v2, %v1727_v2 }
 0x1ee   : > { %1890 = vst.msk [vmem:[%s3003_s7 + $0x7c] sm:$0xf] %vm1858_vm9, %v2119_v39 }
 0x1ef   : > { %1888 = vst.msk [vmem:[%s3003_s7 + $0x74] sm:$0xf] %vm1858_vm9, %v2117_v1 }
 0x1f0 PF: > { %s13_s12 = sadd.s32 1, %s2504_s12  }
 0x1f1   : > { %p10_p5 = scmp.ge.s32.totalorder %s13_s12, 4  }
 0x1f3   :  { %12 = sbr.rel (!%p10_p5) target bundleno = 1 (0x1), region = 62 }

// kernel: sppcsp_forward.11
= control target key start
LH: loop header
LB: loop body
LE: loop exit
PB: predicated region body
PF: predicated region fallthrough
CT: control target
= control target key end

     0   :  { %s1721_s18 = smov 0   ;;  %s2050_s0 = inlined_call_operand.vmem [shape: bf16[512,2], index: 0, kind: input, shape index: {}]   ;;  %s2051_s1 = inlined_call_operand.vmem [shape: bf16[512,4], index: 1, kind: input, shape index: {}]   ;;  %s2052_s2 = inlined_call_operand.vmem [shape: bf16[2,8], index: 2, kind: input, shape index: {}]   ;;  %s2053_s3 = inlined_call_operand.vmem [shape: bf16[4,8], index: 3, kind: input, shape index: {}]   ;;  %s2054_s4 = inlined_call_operand.vmem [shape: f32[1,8], index: 4, kind: input, shape index: {}]   ;;  %s2055_s5 = inlined_call_operand.vmem [shape: f32[512,8], index: 5, kind: output, shape index: {}]  }
   0x1 LB: > { %s1269_s19 = sadd.s32 4294967295, %s1689_s18   ;;  %p1273_p0 = scmp.ge.s32.totalorder %s1689_s18, 1  ;;  %s1689_s18 = sphi %s1721_s18, %s15_s18  }
   0x2   : > { %p199_p1 = scmp.lt.s32.totalorder %s1689_s18, 3 }
   0x4   : > { %p200_p2 = pnand %p1273_p0, %p199_p1 }
   0x5   : > { %v316_v0 = vld [vmem:[%s2053_s3] sm:$0x3] (!%p200_p2)  ;;  %vm446_vm0 = vcmask (!%p200_p2), 1041408   ;;  %vm740_vm1 = vcmask (!%p200_p2), 1040384   ;;  %s1274_s24 = sshll.u32 (!%p200_p2), %s1269_s19, 5  ;;  %vm397_vm2 = vcmask (!%p200_p2), 31744  }
   0x6   : > { %203 = sbr.rel (%p200_p2) target bundleno = 328 (0x148), region = 40  ;;  %v283_v1 = vld [vmem:[%s2052_s2] sm:$0x1] (!%p200_p2)  ;;  %1513 = vmatprep.subr.msk.bf16.mxu1 (!%p200_p2), %vm446_vm0, %v316_v0  ;;  %v448_v2 = vsel (!%p200_p2), %vm446_vm0, %v316_v0, 0  ;;  %p233_p3 = scmp.lt.s32.totalorder (!%p200_p2), %s1274_s24, 63  ;;  %vm691_vm3 = vcmask (!%p200_p2), 15360  }
   0x7   : > { %1514 = vmatprep.subr.msk.bf16.mxu0 (!%p200_p2), %vm740_vm1, %v283_v1  ;;  %v742_v3 = vsel (!%p200_p2), %vm740_vm1, %v283_v1, 0  ;;  %1414 = vmatpush3.bf16.msra.mxu1 (!%p200_p2), %v448_v2  ;;  %v1815_v38 = vld [vmem:[%s2054_s4] ss:$0 sm:$0xff] (!%p200_p2)  ;;  %vm1168_vm4 = vcmask (!%p200_p2), 64512  }
   0x8   : > { %1448 = vmatpush3.bf16.msra.mxu0 (!%p200_p2), %v742_v3 }
   0xd   : > { %s2057_s24 = smov (!%p233_p3, %s1274_s24), 63 }
   0xe   : > { %s1275_s25 = sshll.u32 %s2057_s24, 2  ;;  %s1279_s9 = sshll.u32 %s2057_s24, 3 }
   0xf   : > { %s1741_s28 = scalar_lea.vmem %s2051_s1, %s1275_s25  ;;  %s1747_s6 = scalar_lea.vmem %s2050_s0, %s1275_s25 }
  0x10   : > { %v1523_v4 = vld [vmem:[%s1741_s28] sm:$0xff]   ;;  %v1525_v6 = vld [vmem:[%s1741_s28 + $0x8] sm:$0xff]   ;;  %v1527_v8 = vld [vmem:[%s1741_s28 + $0x10] sm:$0xff]   ;;  %s1879_s12 = scalar_lea.vmem %s2055_s5, %s1279_s9 }
  0x11   : > { %v1524_v5 = vld [vmem:[%s1747_s6] sm:$0xff]   ;;  %1415 = vmatprep.mubr.msk.bf16.mxu1 %vm397_vm2, %v1523_v4  ;;  %v1526_v7 = vld [vmem:[%s1747_s6 + $0x8] sm:$0xff]   ;;  %v1528_v9 = vld [vmem:[%s1747_s6 + $0x10] sm:$0xff]  }
  0x12   : > { %1449 = vmatprep.mubr.msk.bf16.mxu0 %vm691_vm3, %v1524_v5  ;;  %1416 = vmatmul.mubr.msk.bf16.vlgmr.msra.gmra.mrb[0].mxu1 %vm397_vm2, %v1525_v6  ;;  %v1529_v10 = vld [vmem:[%s1741_s28 + $0x18] sm:$0xff]   ;;  %v1531_v12 = vld [vmem:[%s1741_s28 + $0x20] sm:$0xff]   ;;  %v1533_v14 = vld [vmem:[%s1741_s28 + $0x28] sm:$0xff]  }
  0x13   : > { %1450 = vmatmul.mubr.msk.bf16.vlgmr.msra.gmra.mrb[0].mxu0 %vm691_vm3, %v1526_v7  ;;  %1419 = vmatprep.mubr.msk.bf16.mxu1 %vm397_vm2, %v1527_v8  ;;  %v1530_v11 = vld [vmem:[%s1747_s6 + $0x18] sm:$0xff]   ;;  %v1532_v13 = vld [vmem:[%s1747_s6 + $0x20] sm:$0xff]   ;;  %v1534_v15 = vld [vmem:[%s1747_s6 + $0x28] sm:$0xff]  }
  0x14   : > { %1453 = vmatprep.mubr.msk.bf16.mxu0 %vm691_vm3, %v1528_v9  ;;  %v1535_v16 = vld [vmem:[%s1741_s28 + $0x30] sm:$0xff]   ;;  %v1537_v18 = vld [vmem:[%s1741_s28 + $0x38] sm:$0xff]   ;;  %v1539_v20 = vld [vmem:[%s1741_s28 + $0x40] sm:$0xff]  }
  0x15   : > { %v1536_v17 = vld [vmem:[%s1747_s6 + $0x30] sm:$0xff]   ;;  %v1538_v19 = vld [vmem:[%s1747_s6 + $0x38] sm:$0xff]   ;;  %v1540_v21 = vld [vmem:[%s1747_s6 + $0x40] sm:$0xff]  }
  0x16   : > { %v1541_v22 = vld [vmem:[%s1741_s28 + $0x48] sm:$0xff]   ;;  %v1543_v24 = vld [vmem:[%s1741_s28 + $0x50] sm:$0xff]   ;;  %v1545_v26 = vld [vmem:[%s1741_s28 + $0x58] sm:$0xff]  }
  0x17   : > { %v1542_v23 = vld [vmem:[%s1747_s6 + $0x48] sm:$0xff]   ;;  %v1544_v25 = vld [vmem:[%s1747_s6 + $0x50] sm:$0xff]   ;;  %v1546_v27 = vld [vmem:[%s1747_s6 + $0x58] sm:$0xff]  }
  0x18   : > { %v1547_v28 = vld [vmem:[%s1741_s28 + $0x60] sm:$0xff]   ;;  %v1549_v30 = vld [vmem:[%s1741_s28 + $0x68] sm:$0xff]   ;;  %v1551_v32 = vld [vmem:[%s1741_s28 + $0x70] sm:$0xff]  }
  0x19   : > { %v1548_v29 = vld [vmem:[%s1747_s6 + $0x60] sm:$0xff]   ;;  %v1550_v31 = vld [vmem:[%s1747_s6 + $0x68] sm:$0xff]   ;;  %v1552_v33 = vld [vmem:[%s1747_s6 + $0x70] sm:$0xff]  }
  0x1a   : > { %1420 = vmatmul.mubr.msk.bf16.gmra.mrb[4].mxu1 %vm397_vm2, %v1529_v10  ;;  %v1553_v34 = vld [vmem:[%s1741_s28 + $0x78] sm:$0xff]  }
  0x1b   : > { %1454 = vmatmul.mubr.msk.bf16.gmra.mrb[4].mxu0 %vm691_vm3, %v1530_v11  ;;  %1423 = vmatprep.mubr.msk.bf16.mxu1 %vm397_vm2, %v1531_v12  ;;  %v1554_v35 = vld [vmem:[%s1747_s6 + $0x78] sm:$0xff]  }
  0x1c   : > { %1457 = vmatprep.mubr.msk.bf16.mxu0 %vm691_vm3, %v1532_v13 }
  0x22   : > { %1424 = vmatmul.mubr.msk.bf16.gmra.mrb[8].mxu1 %vm397_vm2, %v1533_v14 }
  0x23   : > { %1458 = vmatmul.mubr.msk.bf16.gmra.mrb[8].mxu0 %vm691_vm3, %v1534_v15  ;;  %1427 = vmatprep.mubr.msk.bf16.mxu1 %vm397_vm2, %v1535_v16 }
  0x24   : > { %1461 = vmatprep.mubr.msk.bf16.mxu0 %vm691_vm3, %v1536_v17 }
  0x2a   : > { %1428 = vmatmul.mubr.msk.bf16.gmra.mrb[12].mxu1 %vm397_vm2, %v1537_v18 }
  0x2b   : > { %1462 = vmatmul.mubr.msk.bf16.gmra.mrb[12].mxu0 %vm691_vm3, %v1538_v19  ;;  %1431 = vmatprep.mubr.msk.bf16.mxu1 %vm397_vm2, %v1539_v20 }
  0x2c   : > { %1465 = vmatprep.mubr.msk.bf16.mxu0 %vm691_vm3, %v1540_v21 }
  0x32   : > { %1432 = vmatmul.mubr.msk.bf16.gmra.mrb[16].mxu1 %vm397_vm2, %v1541_v22 }
  0x33   : > { %1466 = vmatmul.mubr.msk.bf16.gmra.mrb[16].mxu0 %vm691_vm3, %v1542_v23  ;;  %1435 = vmatprep.mubr.msk.bf16.mxu1 %vm397_vm2, %v1543_v24 }
  0x34   : > { %1469 = vmatprep.mubr.msk.bf16.mxu0 %vm691_vm3, %v1544_v25 }
  0x3a   : > { %1436 = vmatmul.mubr.msk.bf16.gmra.mrb[20].mxu1 %vm397_vm2, %v1545_v26 }
  0x3b   : > { %1470 = vmatmul.mubr.msk.bf16.gmra.mrb[20].mxu0 %vm691_vm3, %v1546_v27  ;;  %1439 = vmatprep.mubr.msk.bf16.mxu1 %vm397_vm2, %v1547_v28 }
  0x3c   : > { %1473 = vmatprep.mubr.msk.bf16.mxu0 %vm691_vm3, %v1548_v29 }
  0x42   : > { %1440 = vmatmul.mubr.msk.bf16.gmra.mrb[24].mxu1 %vm397_vm2, %v1549_v30 }
  0x43   : > { %1474 = vmatmul.mubr.msk.bf16.gmra.mrb[24].mxu0 %vm691_vm3, %v1550_v31  ;;  %1443 = vmatprep.mubr.msk.bf16.mxu1 %vm397_vm2, %v1551_v32 }
  0x44   : > { %1477 = vmatprep.mubr.msk.bf16.mxu0 %vm691_vm3, %v1552_v33 }
  0x4a   : > { %1444 = vmatmul.mubr.msk.bf16.gmra.mrb[28].mxu1 %vm397_vm2, %v1553_v34 }
  0x4b   : > { %1478 = vmatmul.mubr.msk.bf16.gmra.mrb[28].mxu0 %vm691_vm3, %v1554_v35 }
  0xe5   : > { %v1417_v36 = vpop.f32.mrb[0].mxu1 }
  0xe6   : > { %v1451_v37 = vpop.f32.mrb[0].mxu0  ;;  %v484_v39 = vpop.f32.mrb[1].mxu1 }
  0xe7   : > { %v787_v40 = vadd.f32 %v1451_v37, %v1417_v36  ;;  %v778_v41 = vpop.f32.mrb[1].mxu0  ;;  %v1418_v42 = vpop.f32.mrb[2].mxu1 }
  0xe8   : > { %v779_v43 = vadd.f32 %v778_v41, %v484_v39  ;;  %v1452_v44 = vpop.f32.mrb[2].mxu0  ;;  %v487_v45 = vpop.f32.mrb[3].mxu1 }
  0xe9   : > { %v1818_v46 = vadd.f32 %v1815_v38, %v787_v40  ;;  %v790_v47 = vadd.f32 %v1452_v44, %v1418_v42  ;;  %v781_v48 = vpop.f32.mrb[3].mxu0 }
  0xea   : > { %v1821_v49 = vadd.f32 %v1815_v38, %v779_v43  ;;  %v782_v50 = vadd.f32 %v781_v48, %v487_v45 }
  0xeb   : > { %v1347_v51 = vmul.f32 -1.442695, %v1818_v46  ;;  %v1825_v52 = vadd.f32 %v1815_v38, %v790_v47 }
  0xec   : > { %v1345_v53 = vmul.f32 -1.442695, %v1821_v49  ;;  %v1829_v54 = vadd.f32 %v1815_v38, %v782_v50 }
  0xed   : > { %1555 = vpow2.f32 %v1347_v51  ;;  %v1348_v55 = vmul.f32 -1.442695, %v1825_v52  ;;  %v1421_v56 = vpop.f32.mrb[4].mxu1 }
  0xee   : > { %1557 = vpow2.f32 %v1345_v53  ;;  %v1346_v57 = vmul.f32 -1.442695, %v1829_v54  ;;  %v1455_v58 = vpop.f32.mrb[4].mxu0  ;;  %v500_v59 = vpop.f32.mrb[5].mxu1 }
  0xef   : > { %1559 = vpow2.f32 %v1348_v55  ;;  %v803_v60 = vadd.f32 %v1455_v58, %v1421_v56  ;;  %v794_v61 = vpop.f32.mrb[5].mxu0  ;;  %v1422_v62 = vpop.f32.mrb[6].mxu1 }
  0xf0   : > { %1561 = vpow2.f32 %v1346_v57  ;;  %v795_v63 = vadd.f32 %v794_v61, %v500_v59  ;;  %v1456_v0 = vpop.f32.mrb[6].mxu0  ;;  %v503_v1 = vpop.f32.mrb[7].mxu1 }
  0xf1   : > { %v1834_v2 = vadd.f32 %v1815_v38, %v803_v60  ;;  %v806_v3 = vadd.f32 %v1456_v0, %v1422_v62  ;;  %v797_v4 = vpop.f32.mrb[7].mxu0 }
  0xf2   : > { %v1837_v5 = vadd.f32 %v1815_v38, %v795_v63  ;;  %v798_v6 = vadd.f32 %v797_v4, %v503_v1 }
  0xf3   : > { %v1351_v7 = vmul.f32 -1.442695, %v1834_v2  ;;  %v1841_v8 = vadd.f32 %v1815_v38, %v806_v3 }
  0xf4   : > { %v1349_v9 = vmul.f32 -1.442695, %v1837_v5  ;;  %v1845_v10 = vadd.f32 %v1815_v38, %v798_v6 }
  0xf5   : > { %1563 = vpow2.f32 %v1351_v7  ;;  %v1352_v11 = vmul.f32 -1.442695, %v1841_v8  ;;  %v1425_v12 = vpop.f32.mrb[8].mxu1 }
  0xf6   : > { %1565 = vpow2.f32 %v1349_v9  ;;  %v1350_v13 = vmul.f32 -1.442695, %v1845_v10  ;;  %v1459_v14 = vpop.f32.mrb[8].mxu0  ;;  %v516_v15 = vpop.f32.mrb[9].mxu1 }
  0xf7   : > { %v1556_v16 = vpop.eup %1555  ;;  %1567 = vpow2.f32 %v1352_v11  ;;  %v819_v17 = vadd.f32 %v1459_v14, %v1425_v12  ;;  %v810_v18 = vpop.f32.mrb[9].mxu0 }
  0xf8   : > { %v1426_v19 = vpop.f32.mrb[10].mxu1  ;;  %v1558_v20 = vpop.eup %1557  ;;  %v1042_v21 = vadd.f32 1.0, %v1556_v16  ;;  %1569 = vpow2.f32 %v1350_v13  ;;  %v811_v22 = vadd.f32 %v810_v18, %v516_v15 }
  0xf9   : > { %v1460_v23 = vpop.f32.mrb[10].mxu0  ;;  %v519_v24 = vpop.f32.mrb[11].mxu1  ;;  %v1040_v26 = vadd.f32 1.0, %v1558_v20  ;;  %v1850_v27 = vadd.f32 %v1815_v38, %v819_v17 }
  0xfa   : > { %v1560_v25 = vpop.eup %1559  ;;  %v822_v28 = vadd.f32 %v1460_v23, %v1426_v19  ;;  %v813_v29 = vpop.f32.mrb[11].mxu0  ;;  %1571 = vrcp.f32 %v1042_v21  ;;  %v1853_v32 = vadd.f32 %v1815_v38, %v811_v22 }
  0xfb   : > { %v1562_v30 = vpop.eup %1561  ;;  %v1043_v31 = vadd.f32 1.0, %v1560_v25  ;;  %v814_v33 = vadd.f32 %v813_v29, %v519_v24  ;;  %1573 = vrcp.f32 %v1040_v26  ;;  %v1355_v35 = vmul.f32 -1.442695, %v1850_v27 }
  0xfc   : > { %v1041_v34 = vadd.f32 1.0, %v1562_v30  ;;  %v1857_v36 = vadd.f32 %v1815_v38, %v822_v28  ;;  %v1353_v37 = vmul.f32 -1.442695, %v1853_v32 }
  0xfd   : > { %1575 = vrcp.f32 %v1043_v31  ;;  %v1861_v39 = vadd.f32 %v1815_v38, %v814_v33  ;;  %v1429_v41 = vpop.f32.mrb[12].mxu1 }
  0xfe   : > { %1577 = vrcp.f32 %v1041_v34  ;;  %v1356_v40 = vmul.f32 -1.442695, %v1857_v36  ;;  %v1463_v43 = vpop.f32.mrb[12].mxu0  ;;  %v532_v44 = vpop.f32.mrb[13].mxu1 }
  0xff   : > { %1579 = vpow2.f32 %v1355_v35  ;;  %v1354_v42 = vmul.f32 -1.442695, %v1861_v39  ;;  %v1564_v45 = vpop.eup %1563  ;;  %v835_v47 = vadd.f32 %v1463_v43, %v1429_v41  ;;  %v826_v48 = vpop.f32.mrb[13].mxu0 }
 0x100   : > { %1581 = vpow2.f32 %v1353_v37  ;;  %v1430_v50 = vpop.f32.mrb[14].mxu1  ;;  %v1566_v51 = vpop.eup %1565  ;;  %v1046_v53 = vadd.f32 1.0, %v1564_v45  ;;  %v827_v55 = vadd.f32 %v826_v48, %v532_v44 }
 0x101   : > { %1583 = vpow2.f32 %v1356_v40  ;;  %v1464_v56 = vpop.f32.mrb[14].mxu0  ;;  %v535_v57 = vpop.f32.mrb[15].mxu1  ;;  %v1044_v59 = vadd.f32 1.0, %v1566_v51  ;;  %v1867_v60 = vadd.f32 %v1815_v38, %v835_v47 }
 0x102   : > { %v1568_v58 = vpop.eup %1567  ;;  %1585 = vpow2.f32 %v1354_v42  ;;  %v838_v61 = vadd.f32 %v1464_v56, %v1430_v50  ;;  %v829_v62 = vpop.f32.mrb[15].mxu0  ;;  %v1870_v1 = vadd.f32 %v1815_v38, %v827_v55 }
 0x103   : > { %v1570_v63 = vpop.eup %1569  ;;  %1587 = vrcp.f32 %v1046_v53  ;;  %v1047_v0 = vadd.f32 1.0, %v1568_v58  ;;  %v830_v3 = vadd.f32 %v829_v62, %v535_v57  ;;  %v1359_v6 = vmul.f32 -1.442695, %v1867_v60 }
 0x104   : > { %1589 = vrcp.f32 %v1044_v59  ;;  %v1045_v4 = vadd.f32 1.0, %v1570_v63  ;;  %v1874_v7 = vadd.f32 %v1815_v38, %v838_v61  ;;  %v1572_v9 = vpop.eup %1571  ;;  %v1357_v11 = vmul.f32 -1.442695, %v1870_v1 }
 0x105   : > { %1591 = vrcp.f32 %v1047_v0  ;;  %v1883_v12 = vadd.f32 %v1815_v38, %v830_v3  ;;  %v1574_v13 = vpop.eup %1573  ;;  %v1138_v14 = vmul.f32 %v1572_v9, %v1818_v46  ;;  %v1433_v16 = vpop.f32.mrb[16].mxu1 }
 0x106   : > { %1593 = vrcp.f32 %v1045_v4  ;;  %v1360_v15 = vmul.f32 -1.442695, %v1874_v7  ;;  %v1136_v18 = vmul.f32 %v1574_v13, %v1821_v49  ;;  %v1467_v20 = vpop.f32.mrb[16].mxu0  ;;  %v548_v21 = vpop.f32.mrb[17].mxu1 }
 0x107   : > { %v1576_v17 = vpop.eup %1575  ;;  %1595 = vpow2.f32 %v1359_v6  ;;  %v1358_v19 = vmul.f32 -1.442695, %v1883_v12  ;;  %1171 = vst.msk [vmem:[%s1879_s12 + $0x10] sm:$0xff] %vm1168_vm4, %v1138_v14  ;;  %v851_v46 = vadd.f32 %v1467_v20, %v1433_v16  ;;  %v842_v24 = vpop.f32.mrb[17].mxu0 }
 0x108   : > { %v1578_v22 = vpop.eup %1577  ;;  %v1139_v23 = vmul.f32 %v1576_v17, %v1825_v52  ;;  %1597 = vpow2.f32 %v1357_v11  ;;  %v1434_v25 = vpop.f32.mrb[18].mxu1  ;;  %1169 = vst.msk [vmem:[%s1879_s12] sm:$0xff] %vm1168_vm4, %v1136_v18  ;;  %v843_v28 = vadd.f32 %v842_v24, %v548_v21 }
 0x109   : > { %v1580_v26 = vpop.eup %1579  ;;  %v1137_v49 = vmul.f32 %v1578_v22, %v1829_v54  ;;  %1599 = vpow2.f32 %v1360_v15  ;;  %v1468_v29 = vpop.f32.mrb[18].mxu0  ;;  %v1898_v52 = vadd.f32 %v1815_v38, %v851_v46 }
 0x10a   : > { %v551_v30 = vpop.f32.mrb[19].mxu1  ;;  %v1582_v31 = vpop.eup %1581  ;;  %1172 = vst.msk [vmem:[%s1879_s12 + $0x18] sm:$0xff] %vm1168_vm4, %v1139_v23  ;;  %v1050_v33 = vadd.f32 1.0, %v1580_v26  ;;  %1601 = vpow2.f32 %v1358_v19  ;;  %v854_v34 = vadd.f32 %v1468_v29, %v1434_v25  ;;  %v1903_v54 = vadd.f32 %v1815_v38, %v843_v28 }
 0x10b   : > { %v845_v35 = vpop.f32.mrb[19].mxu0  ;;  %v1584_v37 = vpop.eup %1583  ;;  %1170 = vst.msk [vmem:[%s1879_s12 + $0x8] sm:$0xff] %vm1168_vm4, %v1137_v49  ;;  %v1048_v40 = vadd.f32 1.0, %v1582_v31  ;;  %v1363_v44 = vmul.f32 -1.442695, %v1898_v52 }
 0x10c   : > { %v846_v41 = vadd.f32 %v845_v35, %v551_v30  ;;  %v1586_v42 = vpop.eup %1585  ;;  %1603 = vrcp.f32 %v1050_v33  ;;  %v1051_v43 = vadd.f32 1.0, %v1584_v37  ;;  %v1907_v45 = vadd.f32 %v1815_v38, %v854_v34 }
 0x10d   : > { %v1588_v47 = vpop.eup %1587  ;;  %1605 = vrcp.f32 %v1048_v40  ;;  %v1049_v48 = vadd.f32 1.0, %v1586_v42  ;;  %v1361_v50 = vmul.f32 -1.442695, %v1903_v54  ;;  %v1437_v57 = vpop.f32.mrb[20].mxu1 }
 0x10e   : > { %v1911_v51 = vadd.f32 %v1815_v38, %v846_v41  ;;  %v1590_v53 = vpop.eup %1589  ;;  %v1142_v55 = vmul.f32 %v1588_v47, %v1834_v2  ;;  %1607 = vrcp.f32 %v1051_v43  ;;  %v1364_v56 = vmul.f32 -1.442695, %v1907_v45  ;;  %v1471_v62 = vpop.f32.mrb[20].mxu0 }
 0x10f   : > { %v1592_v58 = vpop.eup %1591  ;;  %v1140_v59 = vmul.f32 %v1590_v53, %v1837_v5  ;;  %1609 = vrcp.f32 %v1049_v48  ;;  %v564_v63 = vpop.f32.mrb[21].mxu1  ;;  %v867_v2 = vadd.f32 %v1471_v62, %v1437_v57 }
 0x110   : > { %v1362_v61 = vmul.f32 -1.442695, %v1911_v51  ;;  %v1594_v0 = vpop.eup %1593  ;;  %1175 = vst.msk [vmem:[%s1879_s12 + $0x30] sm:$0xff] %vm1168_vm4, %v1142_v55  ;;  %v1143_v3 = vmul.f32 %v1592_v58, %v1841_v8  ;;  %1611 = vpow2.f32 %v1363_v44  ;;  %v858_v4 = vpop.f32.mrb[21].mxu0 }
 0x111   : > { %v1438_v6 = vpop.f32.mrb[22].mxu1  ;;  %v1596_v9 = vpop.eup %1595  ;;  %1173 = vst.msk [vmem:[%s1879_s12 + $0x20] sm:$0xff] %vm1168_vm4, %v1140_v59  ;;  %v1141_v5 = vmul.f32 %v1594_v0, %v1845_v10  ;;  %1613 = vpow2.f32 %v1361_v50  ;;  %v859_v11 = vadd.f32 %v858_v4, %v564_v63  ;;  %v1926_v8 = vadd.f32 %v1815_v38, %v867_v2 }
 0x112   : > { %v1472_v13 = vpop.f32.mrb[22].mxu0  ;;  %v567_v14 = vpop.f32.mrb[23].mxu1  ;;  %1176 = vst.msk [vmem:[%s1879_s12 + $0x38] sm:$0xff] %vm1168_vm4, %v1143_v3  ;;  %v1054_v16 = vadd.f32 1.0, %v1596_v9  ;;  %1615 = vpow2.f32 %v1364_v56 }
 0x113   : > { %v1598_v15 = vpop.eup %1597  ;;  %v870_v17 = vadd.f32 %v1472_v13, %v1438_v6  ;;  %v861_v18 = vpop.f32.mrb[23].mxu0  ;;  %1174 = vst.msk [vmem:[%s1879_s12 + $0x28] sm:$0xff] %vm1168_vm4, %v1141_v5  ;;  %1617 = vpow2.f32 %v1362_v61  ;;  %v1931_v10 = vadd.f32 %v1815_v38, %v859_v11  ;;  %v1367_v46 = vmul.f32 -1.442695, %v1926_v8 }
 0x114   : > { %v1600_v19 = vpop.eup %1599  ;;  %v1052_v20 = vadd.f32 1.0, %v1598_v15  ;;  %v862_v21 = vadd.f32 %v861_v18, %v567_v14  ;;  %1619 = vrcp.f32 %v1054_v16 }
 0x115   : > { %v1602_v22 = vpop.eup %1601  ;;  %v1055_v23 = vadd.f32 1.0, %v1600_v19  ;;  %v1935_v24 = vadd.f32 %v1815_v38, %v870_v17  ;;  %v1365_v26 = vmul.f32 -1.442695, %v1931_v10  ;;  %v1441_v30 = vpop.f32.mrb[24].mxu1 }
 0x116   : > { %1621 = vrcp.f32 %v1052_v20  ;;  %v1053_v25 = vadd.f32 1.0, %v1602_v22  ;;  %v1939_v49 = vadd.f32 %v1815_v38, %v862_v21  ;;  %v1604_v28 = vpop.eup %1603  ;;  %v1475_v35 = vpop.f32.mrb[24].mxu0 }
 0x117   : > { %1623 = vrcp.f32 %v1055_v23  ;;  %v1368_v29 = vmul.f32 -1.442695, %v1935_v24  ;;  %v1606_v31 = vpop.eup %1605  ;;  %v1146_v33 = vmul.f32 %v1604_v28, %v1850_v27  ;;  %v580_v37 = vpop.f32.mrb[25].mxu1  ;;  %v883_v42 = vadd.f32 %v1475_v35, %v1441_v30 }
 0x118   : > { %1625 = vrcp.f32 %v1053_v25  ;;  %v1366_v34 = vmul.f32 -1.442695, %v1939_v49  ;;  %v1608_v40 = vpop.eup %1607  ;;  %v1144_v41 = vmul.f32 %v1606_v31, %v1853_v32  ;;  %v874_v43 = vpop.f32.mrb[25].mxu0 }
 0x119   : > { %1627 = vpow2.f32 %v1367_v46  ;;  %v1442_v44 = vpop.f32.mrb[26].mxu1  ;;  %v1610_v47 = vpop.eup %1609  ;;  %1179 = vst.msk [vmem:[%s1879_s12 + $0x50] sm:$0xff] %vm1168_vm4, %v1146_v33  ;;  %v1147_v48 = vmul.f32 %v1608_v40, %v1857_v36  ;;  %v875_v27 = vadd.f32 %v874_v43, %v580_v37  ;;  %v1952_v56 = vadd.f32 %v1815_v38, %v883_v42 }
 0x11a   : > { %1629 = vpow2.f32 %v1365_v26  ;;  %v1476_v50 = vpop.f32.mrb[26].mxu0  ;;  %v583_v53 = vpop.f32.mrb[27].mxu1  ;;  %1177 = vst.msk [vmem:[%s1879_s12 + $0x40] sm:$0xff] %vm1168_vm4, %v1144_v41  ;;  %v1145_v32 = vmul.f32 %v1610_v47, %v1861_v39 }
 0x11b   : > { %v1612_v55 = vpop.eup %1611  ;;  %1631 = vpow2.f32 %v1368_v29  ;;  %v886_v57 = vadd.f32 %v1476_v50, %v1442_v44  ;;  %v877_v58 = vpop.f32.mrb[27].mxu0  ;;  %1180 = vst.msk [vmem:[%s1879_s12 + $0x58] sm:$0xff] %vm1168_vm4, %v1147_v48  ;;  %v1957_v61 = vadd.f32 %v1815_v38, %v875_v27  ;;  %v1371_v4 = vmul.f32 -1.442695, %v1952_v56 }
 0x11c   : > { %v1614_v59 = vpop.eup %1613  ;;  %v1058_v36 = vadd.f32 1.0, %v1612_v55  ;;  %1633 = vpow2.f32 %v1366_v34  ;;  %v878_v62 = vadd.f32 %v877_v58, %v583_v53  ;;  %1178 = vst.msk [vmem:[%s1879_s12 + $0x48] sm:$0xff] %vm1168_vm4, %v1145_v32 }
 0x11d   : > { %v1616_v63 = vpop.eup %1615  ;;  %v1056_v0 = vadd.f32 1.0, %v1614_v59  ;;  %v1962_v39 = vadd.f32 %v1815_v38, %v886_v57  ;;  %v1369_v11 = vmul.f32 -1.442695, %v1957_v61  ;;  %v1445_v13 = vpop.f32.mrb[28].mxu1 }
 0x11e   : > { %v1618_v3 = vpop.eup %1617  ;;  %1635 = vrcp.f32 %v1058_v36  ;;  %v1059_v2 = vadd.f32 1.0, %v1616_v63  ;;  %v1966_v6 = vadd.f32 %v1815_v38, %v878_v62  ;;  %v1479_v17 = vpop.f32.mrb[28].mxu0 }
 0x11f   : > { %v1620_v9 = vpop.eup %1619  ;;  %1637 = vrcp.f32 %v1056_v0  ;;  %v1057_v5 = vadd.f32 1.0, %v1618_v3  ;;  %v1372_v16 = vmul.f32 -1.442695, %v1962_v39  ;;  %v596_v18 = vpop.f32.mrb[29].mxu1  ;;  %v899_v22 = vadd.f32 %v1479_v17, %v1445_v13 }
 0x120   : > { %v1622_v14 = vpop.eup %1621  ;;  %v1150_v15 = vmul.f32 %v1620_v9, %v1867_v60  ;;  %1639 = vrcp.f32 %v1059_v2  ;;  %v1370_v21 = vmul.f32 -1.442695, %v1966_v6  ;;  %v890_v23 = vpop.f32.mrb[29].mxu0 }
 0x121   : > { %v1624_v19 = vpop.eup %1623  ;;  %v1148_v20 = vmul.f32 %v1622_v14, %v1870_v1  ;;  %1641 = vrcp.f32 %v1057_v5  ;;  %v1446_v46 = vpop.f32.mrb[30].mxu1  ;;  %v891_v26 = vadd.f32 %v890_v23, %v596_v18  ;;  %v1980_v31 = vadd.f32 %v1815_v38, %v899_v22 }
 0x122   : > { %v1626_v25 = vpop.eup %1625  ;;  %1183 = vst.msk [vmem:[%s1879_s12 + $0x70] sm:$0xff] %vm1168_vm4, %v1150_v15  ;;  %v1151_v60 = vmul.f32 %v1624_v19, %v1874_v7  ;;  %1643 = vpow2.f32 %v1371_v4  ;;  %v1480_v28 = vpop.f32.mrb[30].mxu0 }
 0x123   : > { %v599_v29 = vpop.f32.mrb[31].mxu1  ;;  %v1628_v30 = vpop.eup %1627  ;;  %1181 = vst.msk [vmem:[%s1879_s12 + $0x60] sm:$0xff] %vm1168_vm4, %v1148_v20  ;;  %v1149_v1 = vmul.f32 %v1626_v25, %v1883_v12  ;;  %1645 = vpow2.f32 %v1369_v11  ;;  %v902_v33 = vadd.f32 %v1480_v28, %v1446_v46  ;;  %v1985_v37 = vadd.f32 %v1815_v38, %v891_v26 }
 0x124   : > { %v893_v34 = vpop.f32.mrb[31].mxu0  ;;  %v1630_v35 = vpop.eup %1629  ;;  %1184 = vst.msk [vmem:[%s1879_s12 + $0x78] sm:$0xff] %vm1168_vm4, %v1151_v60  ;;  %v1062_v7 = vadd.f32 1.0, %v1628_v30  ;;  %1647 = vpow2.f32 %v1372_v16  ;;  %v1375_v47 = vmul.f32 -1.442695, %v1980_v31 }
 0x125   : > { %v894_v40 = vadd.f32 %v893_v34, %v599_v29  ;;  %v1632_v41 = vpop.eup %1631  ;;  %1182 = vst.msk [vmem:[%s1879_s12 + $0x68] sm:$0xff] %vm1168_vm4, %v1149_v1  ;;  %v1060_v42 = vadd.f32 1.0, %v1630_v35  ;;  %1649 = vpow2.f32 %v1370_v21  ;;  %v1990_v12 = vadd.f32 %v1815_v38, %v902_v33 }
 0x126   : > { %v1634_v43 = vpop.eup %1633  ;;  %1651 = vrcp.f32 %v1062_v7  ;;  %v1063_v44 = vadd.f32 1.0, %v1632_v41  ;;  %v1373_v50 = vmul.f32 -1.442695, %v1985_v37 }
 0x127   : > { %v1994_v48 = vadd.f32 %v1815_v38, %v894_v40  ;;  %1653 = vrcp.f32 %v1060_v42  ;;  %v1061_v27 = vadd.f32 1.0, %v1634_v43  ;;  %v1376_v55 = vmul.f32 -1.442695, %v1990_v12 }
 0x128   : > { %v1636_v53 = vpop.eup %1635  ;;  %1655 = vrcp.f32 %v1063_v44 }
 0x129   : > { %v1638_v32 = vpop.eup %1637  ;;  %v1154_v57 = vmul.f32 %v1636_v53, %v1898_v52  ;;  %1657 = vrcp.f32 %v1061_v27  ;;  %v1374_v58 = vmul.f32 -1.442695, %v1994_v48 }
 0x12a   : > { %v1640_v59 = vpop.eup %1639  ;;  %v1152_v38 = vmul.f32 %v1638_v32, %v1903_v54  ;;  %1659 = vpow2.f32 %v1375_v47 }
 0x12b   : > { %v1642_v36 = vpop.eup %1641  ;;  %1187 = vst.msk [vmem:[%s1879_s12 + $0x90] sm:$0xff] %vm1168_vm4, %v1154_v57  ;;  %v1155_v62 = vmul.f32 %v1640_v59, %v1907_v45  ;;  %1661 = vpow2.f32 %v1373_v50 }
 0x12c   : > { %v1644_v63 = vpop.eup %1643  ;;  %1185 = vst.msk [vmem:[%s1879_s12 + $0x80] sm:$0xff] %vm1168_vm4, %v1152_v38  ;;  %v1153_v0 = vmul.f32 %v1642_v36, %v1911_v51  ;;  %1663 = vpow2.f32 %v1376_v55 }
 0x12d   : > { %v1646_v52 = vpop.eup %1645  ;;  %1188 = vst.msk [vmem:[%s1879_s12 + $0x98] sm:$0xff] %vm1168_vm4, %v1155_v62  ;;  %v1066_v3 = vadd.f32 1.0, %v1644_v63  ;;  %1665 = vpow2.f32 %v1374_v58 }
 0x12e   : > { %v1648_v2 = vpop.eup %1647  ;;  %1186 = vst.msk [vmem:[%s1879_s12 + $0x88] sm:$0xff] %vm1168_vm4, %v1153_v0  ;;  %v1064_v54 = vadd.f32 1.0, %v1646_v52 }
 0x12f   : > { %v1650_v4 = vpop.eup %1649  ;;  %1667 = vrcp.f32 %v1066_v3  ;;  %v1067_v45 = vadd.f32 1.0, %v1648_v2 }
 0x130   : > { %v1652_v9 = vpop.eup %1651  ;;  %1669 = vrcp.f32 %v1064_v54  ;;  %v1065_v5 = vadd.f32 1.0, %v1650_v4 }
 0x131   : > { %v1654_v51 = vpop.eup %1653  ;;  %v1158_v11 = vmul.f32 %v1652_v9, %v1926_v8  ;;  %1671 = vrcp.f32 %v1067_v45 }
 0x132   : > { %v1656_v13 = vpop.eup %1655  ;;  %v1156_v14 = vmul.f32 %v1654_v51, %v1931_v10  ;;  %1673 = vrcp.f32 %v1065_v5 }
 0x133   : > { %v1658_v15 = vpop.eup %1657  ;;  %1191 = vst.msk [vmem:[%s1879_s12 + $0xb0] sm:$0xff] %vm1168_vm4, %v1158_v11  ;;  %v1159_v16 = vmul.f32 %v1656_v13, %v1935_v24 }
 0x134   : > { %v1660_v17 = vpop.eup %1659  ;;  %1189 = vst.msk [vmem:[%s1879_s12 + $0xa0] sm:$0xff] %vm1168_vm4, %v1156_v14  ;;  %v1157_v18 = vmul.f32 %v1658_v15, %v1939_v49 }
 0x135   : > { %v1662_v19 = vpop.eup %1661  ;;  %1192 = vst.msk [vmem:[%s1879_s12 + $0xb8] sm:$0xff] %vm1168_vm4, %v1159_v16  ;;  %v1070_v20 = vadd.f32 1.0, %v1660_v17 }
 0x136   : > { %v1664_v8 = vpop.eup %1663  ;;  %1190 = vst.msk [vmem:[%s1879_s12 + $0xa8] sm:$0xff] %vm1168_vm4, %v1157_v18  ;;  %v1068_v10 = vadd.f32 1.0, %v1662_v19 }
 0x137   : > { %v1666_v21 = vpop.eup %1665  ;;  %1675 = vrcp.f32 %v1070_v20  ;;  %v1071_v22 = vadd.f32 1.0, %v1664_v8 }
 0x138   : > { %1677 = vrcp.f32 %v1068_v10  ;;  %v1069_v24 = vadd.f32 1.0, %v1666_v21 }
 0x139   : > { %v1668_v23 = vpop.eup %1667  ;;  %1679 = vrcp.f32 %v1071_v22 }
 0x13a   : > { %v1670_v49 = vpop.eup %1669  ;;  %v1162_v46 = vmul.f32 %v1668_v23, %v1952_v56  ;;  %1681 = vrcp.f32 %v1069_v24 }
 0x13b   : > { %v1672_v25 = vpop.eup %1671  ;;  %v1160_v60 = vmul.f32 %v1670_v49, %v1957_v61 }
 0x13c   : > { %v1674_v26 = vpop.eup %1673  ;;  %1195 = vst.msk [vmem:[%s1879_s12 + $0xd0] sm:$0xff] %vm1168_vm4, %v1162_v46  ;;  %v1163_v28 = vmul.f32 %v1672_v25, %v1962_v39 }
 0x13d   : > { %1193 = vst.msk [vmem:[%s1879_s12 + $0xc0] sm:$0xff] %vm1168_vm4, %v1160_v60  ;;  %v1161_v29 = vmul.f32 %v1674_v26, %v1966_v6 }
 0x13e   : > { %1196 = vst.msk [vmem:[%s1879_s12 + $0xd8] sm:$0xff] %vm1168_vm4, %v1163_v28 }
 0x13f   : > { %1194 = vst.msk [vmem:[%s1879_s12 + $0xc8] sm:$0xff] %vm1168_vm4, %v1161_v29 }
 0x141   : > { %v1676_v56 = vpop.eup %1675 }
 0x142   : > { %v1678_v30 = vpop.eup %1677  ;;  %v1166_v61 = vmul.f32 %v1676_v56, %v1980_v31 }
 0x143   : > { %v1680_v1 = vpop.eup %1679  ;;  %v1164_v33 = vmul.f32 %v1678_v30, %v1985_v37 }
 0x144   : > { %v1682_v34 = vpop.eup %1681  ;;  %1199 = vst.msk [vmem:[%s1879_s12 + $0xf0] sm:$0xff] %vm1168_vm4, %v1166_v61  ;;  %v1167_v39 = vmul.f32 %v1680_v1, %v1990_v12 }
 0x145   : > { %1197 = vst.msk [vmem:[%s1879_s12 + $0xe0] sm:$0xff] %vm1168_vm4, %v1164_v33  ;;  %v1165_v6 = vmul.f32 %v1682_v34, %v1994_v48 }
 0x146   : > { %1200 = vst.msk [vmem:[%s1879_s12 + $0xf8] sm:$0xff] %vm1168_vm4, %v1167_v39 }
 0x147   : > { %1198 = vst.msk [vmem:[%s1879_s12 + $0xe8] sm:$0xff] %vm1168_vm4, %v1165_v6 }
 0x148 PF: > { %s15_s18 = sadd.s32 1, %s1689_s18  }
 0x149   : > { %p12_p4 = scmp.ge.s32.totalorder %s15_s18, 4  }
 0x14b   :  { %14 = sbr.rel (!%p12_p4) target bundleno = 1 (0x1), region = 73 }

// kernel: sppcsp_forward.9
= control target key start
LH: loop header
LB: loop body
LE: loop exit
PB: predicated region body
PF: predicated region fallthrough
CT: control target
= control target key end

     0   :  { %s4521_s12 = smov 0   ;;  %s6235_s0 = inlined_call_operand.vmem [shape: bf16[2,16,16,2], index: 0, kind: input, shape index: {}]   ;;  %s6236_s1 = inlined_call_operand.vmem [shape: bf16[4,2,2], index: 1, kind: input, shape index: {}]   ;;  %s6237_s2 = inlined_call_operand.vmem [shape: f32[1,2], index: 2, kind: input, shape index: {}]   ;;  %s6238_s3 = inlined_call_operand.vmem [shape: bf16[512,2], index: 3, kind: output, shape index: {}]  }
   0x1 LB: > { %s4527_s13 = sadd.s32 4294967295, %s4499_s12   ;;  %p3836_p0 = scmp.ge.s32.totalorder %s4499_s12, 1  ;;  %s4499_s12 = sphi %s4521_s12, %s13_s12  }
   0x2   : > { %p137_p1 = scmp.lt.s32.totalorder %s4499_s12, 3 }
   0x4   : > { %p138_p2 = pnand %p3836_p0, %p137_p1 }
   0x6   : > { %141 = sbr.rel (%p138_p2) target bundleno = 665 (0x299), region = 32 }
   0xd   : > { %vm387_vm0 = vcmask 1040384   ;;  %v2436_v0 = vld [vmem:[%s6236_s1 + $0x1] sm:$0x1]  ;;  %p161_p3 = scmp.lt.s32.totalorder %s4527_s13, 1  ;;  %v2437_v2 = vld [vmem:[%s6236_s1 + $0x2] sm:$0x1] }
   0xe   : > { %4321 = vmatprep.subr.msk.bf16.mxu1 %vm387_vm0, %v2436_v0  ;;  %v2489_v1 = vsel %vm387_vm0, %v2436_v0, 0  ;;  %v2435_v3 = vld [vmem:[%s6236_s1] sm:$0x1]  ;;  %4323 = vmatprep.subr.msk.bf16.mxu0 %vm387_vm0, %v2437_v2  ;;  %v2913_v4 = vsel %vm387_vm0, %v2437_v2, 0  ;;  %v4550_v5 = vld [vmem:[%s6236_s1 + $0x3] sm:$0x1] }
   0xf   : > { %4090 = vmatpush3.bf16.msra.mxu1 %v2489_v1  ;;  %s162_s16 = scalar_select %p161_p3, %s4527_s13, 1  ;;  %4158 = vmatpush3.bf16.msra.mxu0 %v2913_v4  ;;  %v4573_v19 = vsel %vm387_vm0, %v2435_v3, 0  ;;  %vm453_vm1 = vsmask.f32 7424  ;;  %vm678_vm2 = vcmask 1046528   ;;  %vm936_vm4 = vcmask 1045504  }
  0x10   : > { %4322 = vmatprep.subr.msk.bf16.mxu1 %vm387_vm0, %v2435_v3  ;;  %4324 = vmatprep.subr.msk.bf16.mxu0 %vm387_vm0, %v4550_v5  ;;  %vm759_vm3 = vsmask.f32 6400  ;;  %vm2439_vm5 = vcmask 15360   ;;  %s3839_s29 = sshll.u32 %s4527_s13, 5  ;;  %vm3743_vm6 = vcmask 11264  }
  0x11   : > { %s3988_s23 = sshll.u32 %s162_s16, 7  ;;  %p167_p4 = scmp.lt.s32.totalorder %s3839_s29, 63 }
  0x12   : > { %s4555_s26 = scalar_lea.vmem %s6235_s0, %s3988_s23 }
  0x13   : > { %v4333_v6 = vld [vmem:[%s4555_s26] sm:$0xff]   ;;  %v4334_v7 = vld [vmem:[%s4555_s26 + $0x8] sm:$0xff]   ;;  %v4335_v8 = vld [vmem:[%s4555_s26 + $0x10] sm:$0xff]   ;;  %s6317_s29 = smov (!%p167_p4, %s3839_s29), 63 }
  0x14   : > { %v4336_v9 = vld [vmem:[%s4555_s26 + $0x18] sm:$0xff]   ;;  %v4337_v10 = vld [vmem:[%s4555_s26 + $0x20] sm:$0xff]   ;;  %v4338_v11 = vld [vmem:[%s4555_s26 + $0x28] sm:$0xff]   ;;  %v302_v14 = vmax.bf16 %v4334_v7, %v4333_v6  ;;  %v303_v15 = vmax.bf16 %v4335_v8, %v4334_v7  ;;  %s3840_s30 = sshll.u32 %s6317_s29, 2 }
  0x15   : > { %v4339_v12 = vld [vmem:[%s4555_s26 + $0x30] sm:$0xff]   ;;  %v4567_v13 = vld [vmem:[%s4555_s26 + $0x38] sm:$0xff]   ;;  %v304_v16 = vmax.bf16 %v4336_v9, %v4335_v8  ;;  %v305_v17 = vmax.bf16 %v4337_v10, %v4336_v9  ;;  %v4570_v18 = vld [vmem:[%s4555_s26 + $0x40] sm:$0xff]   ;;  %v306_v21 = vmax.bf16 %v4338_v11, %v4337_v10  ;;  %s6018_s6 = scalar_lea.vmem %s6238_s3, %s3840_s30 }
  0x16   : > { %v316_v20 = vmax.bf16 %v4335_v8, %v302_v14  ;;  %v307_v22 = vmax.bf16 %v4339_v12, %v4338_v11  ;;  %v308_v23 = vmax.bf16 %v4567_v13, %v4339_v12  ;;  %v317_v24 = vmax.bf16 %v4336_v9, %v303_v15 }
  0x17   : > { %v318_v25 = vmax.bf16 %v4337_v10, %v304_v16  ;;  %v319_v26 = vmax.bf16 %v4338_v11, %v305_v17  ;;  %v4578_v30 = vmax.bf16 %v4339_v12, %v306_v21 }
  0x18   : > { %v330_v28 = vmax.bf16 %v4336_v9, %v316_v20  ;;  %v371_v29 = vrot.slane %v316_v20, 7  ;;  %v4581_v31 = vmax.bf16 %v4567_v13, %v307_v22  ;;  %v331_v32 = vmax.bf16 %v4337_v10, %v317_v24 }
  0x19   : > { %v332_v33 = vmax.bf16 %v4338_v11, %v318_v25  ;;  %v333_v34 = vmax.bf16 %v4339_v12, %v319_v26  ;;  %v4584_v35 = vmax.bf16 %v4570_v18, %v308_v23  ;;  %v334_v59 = vmax.bf16 %v4567_v13, %v4578_v30 }
  0x1a   : > { %v343_v36 = vmax.bf16 %v4337_v10, %v330_v28  ;;  %v372_v37 = vrot.slane %v330_v28, 7  ;;  %v4587_v38 = vsel %vm387_vm0, 4286644096, %v371_v29  ;;  %v4590_v39 = vsel %vm387_vm0, %v371_v29, 4286644096 }
  0x1b   : > { %v344_v40 = vmax.bf16 %v4338_v11, %v331_v32  ;;  %v345_v41 = vmax.bf16 %v4339_v12, %v332_v33  ;;  %v346_v42 = vmax.bf16 %v4567_v13, %v333_v34  ;;  %v454_v43 = vshrl.u32 %v4587_v38, 16 }
  0x1c   : > { %v373_v44 = vrot.slane %v343_v36, 7  ;;  %v4595_v45 = vsel %vm387_vm0, 4286644096, %v372_v37  ;;  %v4598_v46 = vsel %vm387_vm0, %v372_v37, 4286644096  ;;  %v456_v47 = vshll.u32 %v4587_v38, 16 }
  0x1d   : > { %v374_v48 = vrot.slane %v344_v40, 7  ;;  %v375_v49 = vrot.slane %v345_v41, 7  ;;  %v376_v50 = vrot.slane %v346_v42, 7  ;;  %v460_v51 = vshll.u32 %v4590_v39, 16 }
  0x1e   : > { %v4603_v52 = vsel %vm387_vm0, 4286644096, %v373_v44  ;;  %v4606_v53 = vsel %vm387_vm0, %v373_v44, 4286644096  ;;  %v458_v54 = vrot.slane %v456_v47, 1  ;;  %v464_v55 = vshrl.u32 %v4595_v45, 16 }
  0x1f   : > { %v4612_v56 = vsel %vm387_vm0, 4286644096, %v374_v48  ;;  %v4615_v57 = vsel %vm387_vm0, 4286644096, %v375_v49  ;;  %v4618_v58 = vsel %vm387_vm0, 4286644096, %v376_v50 }
  0x20   : > { %v4623_v60 = vsel %vm387_vm0, %v374_v48, 4286644096  ;;  %v4626_v61 = vsel %vm387_vm0, %v375_v49, 4286644096  ;;  %v4629_v62 = vsel %vm387_vm0, %v376_v50, 4286644096  ;;  %v459_v63 = vor.u32 %v458_v54, %v454_v43 }
  0x21   : > { %v462_v0 = vrot.slane %v460_v51, 1  ;;  %v466_v1 = vshll.u32 %v4595_v45, 16  ;;  %v470_v2 = vshll.u32 %v4598_v46, 16  ;;  %v474_v3 = vshrl.u32 %v4603_v52, 16 }
  0x22   : > { %v476_v4 = vshll.u32 %v4603_v52, 16  ;;  %v480_v6 = vshll.u32 %v4606_v53, 16  ;;  %v484_v7 = vshrl.u32 %v4612_v56, 16  ;;  %v486_v8 = vshll.u32 %v4612_v56, 16 }
  0x23   : > { %v463_v9 = vsel %vm453_vm1, %v459_v63, %v462_v0  ;;  %v468_v10 = vrot.slane %v466_v1, 1  ;;  %v472_v11 = vrot.slane %v470_v2, 1  ;;  %v490_v12 = vshll.u32 %v4623_v60, 16 }
  0x24   : > { %v478_v14 = vrot.slane %v476_v4, 1  ;;  %v482_v15 = vrot.slane %v480_v6, 1  ;;  %v488_v16 = vrot.slane %v486_v8, 1  ;;  %v494_v17 = vshrl.u32 %v4615_v57, 16 }
  0x25   : > { %v469_v20 = vor.u32 %v468_v10, %v464_v55  ;;  %v492_v21 = vrot.slane %v490_v12, 1  ;;  %v496_v22 = vshll.u32 %v4615_v57, 16  ;;  %v500_v23 = vshll.u32 %v4626_v61, 16 }
  0x26   : > { %v479_v24 = vor.u32 %v478_v14, %v474_v3  ;;  %v489_v25 = vor.u32 %v488_v16, %v484_v7  ;;  %v504_v26 = vshrl.u32 %v4618_v58, 16  ;;  %v506_v28 = vshll.u32 %v4618_v58, 16 }
  0x27   : > { %v473_v29 = vsel %vm453_vm1, %v469_v20, %v472_v11  ;;  %v498_v32 = vrot.slane %v496_v22, 1  ;;  %v502_v33 = vrot.slane %v500_v23, 1  ;;  %v510_v34 = vshll.u32 %v4629_v62, 16 }
  0x28   : > { %v483_v36 = vsel %vm453_vm1, %v479_v24, %v482_v15  ;;  %v493_v37 = vsel %vm453_vm1, %v489_v25, %v492_v21  ;;  %v508_v40 = vrot.slane %v506_v28, 1  ;;  %v630_v41 = vmax.bf16 %v463_v9, %v4587_v38 }
  0x29   : > { %v499_v42 = vor.u32 %v498_v32, %v494_v17  ;;  %v512_v44 = vrot.slane %v510_v34, 1  ;;  %v631_v48 = vmax.bf16 %v473_v29, %v4595_v45  ;;  %v632_v49 = vmax.bf16 %v483_v36, %v4603_v52 }
  0x2a   : > { %v509_v50 = vor.u32 %v508_v40, %v504_v26  ;;  %v633_v54 = vmax.bf16 %v493_v37, %v4612_v56  ;;  %v679_v63 = vrot.slane %v4587_v38, 1  ;;  %v680_v0 = vrot.slane %v4590_v39, 1 }
  0x2b   : > { %v503_v9 = vsel %vm453_vm1, %v499_v42, %v502_v33  ;;  %v682_v10 = vrot.slane %v4595_v45, 1  ;;  %v683_v11 = vrot.slane %v4598_v46, 1  ;;  %v685_v14 = vrot.slane %v4603_v52, 1 }
  0x2c   : > { %v513_v15 = vsel %vm453_vm1, %v509_v50, %v512_v44  ;;  %v634_v16 = vmax.bf16 %v503_v9, %v4615_v57  ;;  %v681_v20 = vsel %vm678_vm2, %v679_v63, %v680_v0  ;;  %v686_v21 = vrot.slane %v4606_v53, 1 }
  0x2d   : > { %v635_v24 = vmax.bf16 %v513_v15, %v4618_v58  ;;  %v684_v25 = vsel %vm678_vm2, %v682_v10, %v683_v11  ;;  %v688_v29 = vrot.slane %v4612_v56, 1  ;;  %v689_v32 = vrot.slane %v4623_v60, 1 }
  0x2e   : > { %v687_v33 = vsel %vm678_vm2, %v685_v14, %v686_v21  ;;  %v691_v36 = vrot.slane %v4615_v57, 1  ;;  %v692_v37 = vrot.slane %v4626_v61, 1  ;;  %v694_v40 = vrot.slane %v4618_v58, 1 }
  0x2f   : > { %v690_v42 = vsel %vm678_vm2, %v688_v29, %v689_v32  ;;  %v695_v44 = vrot.slane %v4629_v62, 1  ;;  %v4707_v50 = vmax.bf16 %v681_v20, %v630_v41  ;;  %v4709_v63 = vmax.bf16 %v684_v25, %v631_v48 }
  0x30   : > { %v693_v0 = vsel %vm678_vm2, %v691_v36, %v692_v37  ;;  %v4712_v9 = vmax.bf16 %v687_v33, %v632_v49  ;;  %v4714_v10 = vmax.bf16 %v690_v42, %v633_v54  ;;  %v760_v11 = vrot.slane %v454_v43, 1 }
  0x31   : > { %v696_v14 = vsel %vm678_vm2, %v694_v40, %v695_v44  ;;  %v4719_v15 = vmax.bf16 %v693_v0, %v634_v16  ;;  %v761_v21 = vrot.slane %v456_v47, 2  ;;  %v763_v41 = vshrl.u32 %v4590_v39, 16 }
  0x32   : > { %v4724_v48 = vmax.bf16 %v696_v14, %v635_v24  ;;  %v766_v49 = vrot.slane %v460_v51, 2  ;;  %v769_v54 = vrot.slane %v464_v55, 1  ;;  %v770_v43 = vrot.slane %v466_v1, 2 }
  0x33   : > { %v762_v20 = vor.u32 %v761_v21, %v760_v11  ;;  %v765_v25 = vrot.slane %v763_v41, 1  ;;  %v772_v16 = vshrl.u32 %v4598_v46, 16  ;;  %v775_v47 = vrot.slane %v470_v2, 2 }
  0x34   : > { %v771_v29 = vor.u32 %v770_v43, %v769_v54  ;;  %v778_v24 = vrot.slane %v474_v3, 1  ;;  %v779_v51 = vrot.slane %v476_v4, 2  ;;  %v781_v32 = vshrl.u32 %v4606_v53, 16 }
  0x35   : > { %v767_v55 = vor.u32 %v766_v49, %v765_v25  ;;  %v774_v33 = vrot.slane %v772_v16, 1  ;;  %v784_v1 = vrot.slane %v480_v6, 2  ;;  %v787_v36 = vrot.slane %v484_v7, 1 }
  0x36   : > { %v780_v37 = vor.u32 %v779_v51, %v778_v24  ;;  %v783_v2 = vrot.slane %v781_v32, 1  ;;  %v788_v40 = vrot.slane %v486_v8, 2  ;;  %v790_v3 = vshrl.u32 %v4623_v60, 16 }
  0x37   : > { %v768_v4 = vsel %vm759_vm3, %v762_v20, %v767_v55  ;;  %v776_v42 = vor.u32 %v775_v47, %v774_v33  ;;  %v793_v44 = vrot.slane %v490_v12, 2  ;;  %v796_v6 = vrot.slane %v494_v17, 1 }
  0x38   : > { %v785_v0 = vor.u32 %v784_v1, %v783_v2  ;;  %v789_v11 = vor.u32 %v788_v40, %v787_v36  ;;  %v792_v7 = vrot.slane %v790_v3, 1  ;;  %v797_v14 = vrot.slane %v496_v22, 2 }
  0x39   : > { %v777_v21 = vsel %vm759_vm3, %v771_v29, %v776_v42  ;;  %v799_v8 = vshrl.u32 %v4626_v61, 16  ;;  %v802_v41 = vrot.slane %v500_v23, 2  ;;  %v805_v49 = vrot.slane %v504_v26, 1 }
  0x3a   : > { %v786_v12 = vsel %vm759_vm3, %v780_v37, %v785_v0  ;;  %v794_v54 = vor.u32 %v793_v44, %v792_v7  ;;  %v798_v17 = vor.u32 %v797_v14, %v796_v6  ;;  %v806_v43 = vrot.slane %v506_v28, 2  ;;  %v4793_v44 = vld [vmem:[%s4555_s26 + $0x48] sm:$0xff]  }
  0x3b   : > { %v801_v20 = vrot.slane %v799_v8, 1  ;;  %v808_v22 = vshrl.u32 %v4629_v62, 16  ;;  %v811_v25 = vrot.slane %v510_v34, 2  ;;  %v920_v16 = vmax.bf16 %v768_v4, %v4707_v50 }
  0x3c   : > { %v795_v23 = vsel %vm759_vm3, %v789_v11, %v794_v54  ;;  %v807_v47 = vor.u32 %v806_v43, %v805_v49  ;;  %v921_v26 = vmax.bf16 %v777_v21, %v4709_v63  ;;  %v922_v29 = vmax.bf16 %v786_v12, %v4712_v9 }
  0x3d   : > { %v803_v24 = vor.u32 %v802_v41, %v801_v20  ;;  %v810_v51 = vrot.slane %v808_v22, 1  ;;  %v923_v28 = vmax.bf16 %v795_v23, %v4714_v10  ;;  %v937_v32 = vrot.slane %v4587_v38, 2 }
  0x3e   : > { %v938_v55 = vrot.slane %v4590_v39, 2  ;;  %v940_v33 = vrot.slane %v4595_v45, 2  ;;  %v941_v34 = vrot.slane %v4598_v46, 2  ;;  %v943_v50 = vrot.slane %v4603_v52, 2 }
  0x3f   : > { %v804_v1 = vsel %vm759_vm3, %v798_v17, %v803_v24  ;;  %v812_v36 = vor.u32 %v811_v25, %v810_v51  ;;  %v944_v63 = vrot.slane %v4606_v53, 2  ;;  %v946_v9 = vrot.slane %v4612_v56, 2 }
  0x40   : > { %v924_v37 = vmax.bf16 %v804_v1, %v4719_v15  ;;  %v939_v38 = vsel %vm936_vm4, %v937_v32, %v938_v55  ;;  %v942_v39 = vsel %vm936_vm4, %v940_v33, %v941_v34  ;;  %v947_v45 = vrot.slane %v4623_v60, 2 }
  0x41   : > { %v813_v46 = vsel %vm759_vm3, %v807_v47, %v812_v36  ;;  %v945_v52 = vsel %vm936_vm4, %v943_v50, %v944_v63  ;;  %v949_v10 = vrot.slane %v4615_v57, 2  ;;  %v950_v53 = vrot.slane %v4626_v61, 2 }
  0x42   : > { %v925_v56 = vmax.bf16 %v813_v46, %v4724_v48  ;;  %v948_v15 = vsel %vm936_vm4, %v946_v9, %v947_v45  ;;  %v952_v2 = vrot.slane %v4618_v58, 2  ;;  %v953_v40 = vrot.slane %v4629_v62, 2  ;;  %v4805_v48 = vld [vmem:[%s4555_s26 + $0x50] sm:$0xff]  }
  0x43   : > { %v951_v3 = vsel %vm936_vm4, %v949_v10, %v950_v53  ;;  %v1001_v60 = vmax.bf16 %v939_v38, %v920_v16  ;;  %v1002_v4 = vmax.bf16 %v942_v39, %v921_v26  ;;  %v1003_v42 = vmax.bf16 %v945_v52, %v922_v29 }
  0x44   : > { %v954_v6 = vsel %vm936_vm4, %v952_v2, %v953_v40  ;;  %v4796_v57 = vmax.bf16 %v948_v15, %v923_v28  ;;  %v4798_v61 = vmax.bf16 %v951_v3, %v924_v37  ;;  %v347_v58 = vmax.bf16 %v4570_v18, %v334_v59 }
  0x45   : > { %v4807_v62 = vmax.bf16 %v954_v6, %v925_v56  ;;  %v1017_v0 = vmax.bf16 %v1002_v4, %v1001_v60  ;;  %v1018_v11 = vmax.bf16 %v1003_v42, %v1002_v4  ;;  %4091 = vmatprep.mubr.msk.bf16.mxu1 %vm2439_vm5, %v1001_v60  ;;  %v335_v7 = vmax.bf16 %v4570_v18, %v4581_v31 }
  0x46   : > { %v1019_v14 = vmax.bf16 %v4796_v57, %v1003_v42  ;;  %4092 = vmatmul.mubr.msk.bf16.vlgmr.msra.gmra.mrb[0].mxu1 %vm2439_vm5, %v1002_v4  ;;  %v377_v30 = vrot.slane %v347_v58, 7  ;;  %v336_v59 = vmax.bf16 %v4793_v44, %v4584_v35  ;;  %v4826_v31 = vsel %vm387_vm0, %v4550_v5, 0 }
  0x47   : > { %v1031_v8 = vmax.bf16 %v1017_v0, %v1003_v42  ;;  %v1032_v41 = vmax.bf16 %v1018_v11, %v4796_v57  ;;  %4095 = vmatprep.mubr.msk.bf16.mxu1 %vm2439_vm5, %v1003_v42  ;;  %v4821_v49 = vmax.bf16 %v4793_v44, %v335_v7  ;;  %4124 = vmatpush3.bf16.msra.mxu1 %v4573_v19 }
  0x48   : > { %v4829_v12 = vmax.bf16 %v1019_v14, %v4798_v61  ;;  %v4832_v54 = vsel %vm387_vm0, 4286644096, %v377_v30  ;;  %v4835_v35 = vsel %vm387_vm0, %v377_v30, 4286644096  ;;  %v4838_v17 = vmax.bf16 %v4805_v48, %v336_v59 }
  0x49   : > { %v1045_v43 = vmax.bf16 %v1031_v8, %v4796_v57  ;;  %v1046_v19 = vmax.bf16 %v1032_v41, %v4798_v61  ;;  %v1086_v20 = vrot.slane %v1031_v8, 7  ;;  %v514_v5 = vshrl.u32 %v4832_v54, 16 }
  0x4a   : > { %v1047_v22 = vmax.bf16 %v4829_v12, %v4807_v62  ;;  %v516_v25 = vshll.u32 %v4832_v54, 16  ;;  %v520_v16 = vshll.u32 %v4835_v35, 16  ;;  %v697_v23 = vrot.slane %v4832_v54, 1 }
  0x4b   : > { %v1058_v47 = vmax.bf16 %v1045_v43, %v4798_v61  ;;  %v1059_v26 = vmax.bf16 %v1046_v19, %v4807_v62  ;;  %v1087_v29 = vrot.slane %v1045_v43, 7  ;;  %v4851_v24 = vsel %vm387_vm0, 4286644096, %v1086_v20 }
  0x4c   : > { %v4854_v51 = vsel %vm387_vm0, %v1086_v20, 4286644096  ;;  %v518_v28 = vrot.slane %v516_v25, 1  ;;  %v522_v32 = vrot.slane %v520_v16, 1  ;;  %v698_v55 = vrot.slane %v4835_v35, 1 }
  0x4d   : > { %v1088_v33 = vrot.slane %v1058_v47, 7  ;;  %v1089_v34 = vrot.slane %v1059_v26, 7  ;;  %v4862_v50 = vsel %vm387_vm0, 4286644096, %v1087_v29  ;;  %v4865_v1 = vsel %vm387_vm0, %v1087_v29, 4286644096 }
  0x4e   : > { %v1176_v36 = vshrl.u32 %v4862_v50, 16  ;;  %v1178_v63 = vshll.u32 %v4862_v50, 16  ;;  %v1182_v9 = vshll.u32 %v4865_v1, 16  ;;  %v1394_v37 = vrot.slane %v4865_v1, 1  ;;  %4096 = vmatmul.mubr.msk.bf16.gmra.mrb[4].mxu1 %vm2439_vm5, %v4796_v57 }
  0x4f   : > { %v4874_v38 = vsel %vm387_vm0, 4286644096, %v1088_v33  ;;  %v4877_v39 = vsel %vm387_vm0, 4286644096, %v1089_v34  ;;  %v4880_v45 = vsel %vm387_vm0, %v1088_v33, 4286644096  ;;  %4099 = vmatprep.mubr.msk.bf16.mxu1 %vm2439_vm5, %v4798_v61  ;;  %v519_v46 = vor.u32 %v518_v28, %v514_v5 }
  0x50   : > { %v4887_v52 = vsel %vm387_vm0, %v1089_v34, 4286644096  ;;  %v1180_v10 = vrot.slane %v1178_v63, 1  ;;  %v1184_v53 = vrot.slane %v1182_v9, 1  ;;  %v1186_v56 = vshrl.u32 %v4874_v38, 16 }
  0x51   : > { %v1188_v15 = vshll.u32 %v4874_v38, 16  ;;  %v1192_v2 = vshll.u32 %v4880_v45, 16  ;;  %v1196_v40 = vshrl.u32 %v4877_v39, 16  ;;  %v1198_v3 = vshll.u32 %v4877_v39, 16 }
  0x52   : > { %v1202_v60 = vshll.u32 %v4887_v52, 16  ;;  %v1396_v4 = vrot.slane %v4874_v38, 1  ;;  %v1397_v42 = vrot.slane %v4880_v45, 1  ;;  %v1399_v6 = vrot.slane %v4877_v39, 1 }
  0x53   : > { %v1190_v58 = vrot.slane %v1188_v15, 1  ;;  %v1194_v0 = vrot.slane %v1192_v2, 1  ;;  %v1200_v11 = vrot.slane %v1198_v3, 1  ;;  %v1400_v7 = vrot.slane %v4887_v52, 1 }
  0x54   : > { %v1204_v14 = vrot.slane %v1202_v60, 1  ;;  %v1482_v30 = vshrl.u32 %v4865_v1, 16  ;;  %v4904_v59 = vrot.slane %v1186_v56, 1  ;;  %v4906_v8 = vrot.slane %v1188_v15, 2 }
  0x55   : > { %v1191_v41 = vor.u32 %v1190_v58, %v1186_v56  ;;  %v1201_v43 = vor.u32 %v1200_v11, %v1196_v40  ;;  %v1491_v19 = vshrl.u32 %v4880_v45, 16  ;;  %v4909_v20 = vrot.slane %v1192_v2, 2 }
  0x56   : > { %v4911_v47 = vrot.slane %v1482_v30, 1  ;;  %v4913_v26 = vrot.slane %v1196_v40, 1  ;;  %v4915_v29 = vrot.slane %v1198_v3, 2  ;;  %v1500_v28 = vshrl.u32 %v4887_v52, 16  ;;  %4100 = vmatmul.mubr.msk.bf16.gmra.mrb[8].mxu1 %vm2439_vm5, %v4807_v62 }
  0x57   : > { %v1195_v33 = vsel %vm453_vm1, %v1191_v41, %v1194_v0  ;;  %v4921_v34 = vrot.slane %v1491_v19, 1  ;;  %v4923_v56 = vrot.slane %v1202_v60, 2  ;;  %v523_v30 = vsel %vm453_vm1, %v519_v46, %v522_v32 }
  0x58   : > { %v1344_v2 = vmax.bf16 %v1195_v33, %v4874_v38  ;;  %v4927_v58 = vrot.slane %v1500_v28, 1  ;;  %v699_v60 = vsel %vm678_vm2, %v697_v23, %v698_v55  ;;  %v814_v0 = vrot.slane %v514_v5, 1 }
  0x59   : > { %v1495_v11 = vor.u32 %v4909_v20, %v4921_v34  ;;  %v636_v41 = vmax.bf16 %v523_v30, %v4832_v54  ;;  %v815_v19 = vrot.slane %v516_v25, 2  ;;  %v817_v28 = vshrl.u32 %v4835_v35, 16 }
  0x5a   : > { %v820_v33 = vrot.slane %v520_v16, 2  ;;  %v955_v20 = vrot.slane %v4832_v54, 2  ;;  %v956_v32 = vrot.slane %v4835_v35, 2  ;;  %v1166_v46 = vshrl.u32 %v4851_v24, 16 }
  0x5b   : > { %v1168_v23 = vshll.u32 %v4851_v24, 16  ;;  %v749_v55 = vmax.bf16 %v699_v60, %v636_v41  ;;  %v816_v5 = vor.u32 %v815_v19, %v814_v0  ;;  %v819_v34 = vrot.slane %v817_v28, 1 }
  0x5c   : > { %v1172_v30 = vshll.u32 %v4854_v51, 16  ;;  %v957_v25 = vsel %vm936_vm4, %v955_v20, %v956_v32  ;;  %v1181_v27 = vor.u32 %v1180_v10, %v1176_v36  ;;  %v1205_v16 = vsel %vm453_vm1, %v1201_v43, %v1204_v14 }
  0x5d   : > { %v1170_v21 = vrot.slane %v1168_v23, 1  ;;  %v821_v54 = vor.u32 %v820_v33, %v819_v34  ;;  %v1345_v35 = vmax.bf16 %v1205_v16, %v4877_v39  ;;  %v1390_v15 = vrot.slane %v4851_v24, 1 }
  0x5e   : > { %v1174_v3 = vrot.slane %v1172_v30, 1  ;;  %v1185_v60 = vsel %vm453_vm1, %v1181_v27, %v1184_v53  ;;  %v1391_v0 = vrot.slane %v4854_v51, 1  ;;  %v1393_v41 = vrot.slane %v4862_v50, 1 }
  0x5f   : > { %v1171_v40 = vor.u32 %v1170_v21, %v1166_v46  ;;  %v822_v19 = vsel %vm759_vm3, %v816_v5, %v821_v54  ;;  %v1343_v28 = vmax.bf16 %v1185_v60, %v4862_v50  ;;  %v1398_v10 = vsel %vm678_vm2, %v1396_v4, %v1397_v42 }
  0x60   : > { %v1401_v14 = vsel %vm678_vm2, %v1399_v6, %v1400_v7  ;;  %v926_v43 = vmax.bf16 %v822_v19, %v749_v55  ;;  %v1392_v20 = vsel %vm678_vm2, %v1390_v15, %v1391_v0  ;;  %v1395_v27 = vsel %vm678_vm2, %v1393_v41, %v1394_v37 }
  0x61   : > { %v1175_v33 = vsel %vm453_vm1, %v1171_v40, %v1174_v3  ;;  %v4969_v53 = vmax.bf16 %v1395_v27, %v1343_v28  ;;  %v4971_v32 = vmax.bf16 %v1398_v10, %v1344_v2  ;;  %v4973_v5 = vmax.bf16 %v1401_v14, %v1345_v35 }
  0x62   : > { %v1342_v21 = vmax.bf16 %v1175_v33, %v4851_v24  ;;  %v4975_v4 = vmax.bf16 %v957_v25, %v926_v43  ;;  %v1470_v42 = vrot.slane %v1166_v46, 1  ;;  %v1471_v6 = vrot.slane %v1168_v23, 2 }
  0x63   : > { %v1473_v7 = vshrl.u32 %v4854_v51, 16  ;;  %v1476_v15 = vrot.slane %v1172_v30, 2  ;;  %v1479_v3 = vrot.slane %v1176_v36, 1  ;;  %v1480_v37 = vrot.slane %v1178_v63, 2 }
  0x64   : > { %v1454_v40 = vmax.bf16 %v1392_v20, %v1342_v21  ;;  %v1060_v2 = vmax.bf16 %v1047_v22, %v4975_v4  ;;  %4103 = vmatprep.mubr.msk.bf16.mxu1 %vm2439_vm5, %v4975_v4  ;;  %v1472_v46 = vor.u32 %v1471_v6, %v1470_v42  ;;  %v1485_v55 = vrot.slane %v1182_v9, 2 }
  0x65   : > { %v1475_v23 = vrot.slane %v1473_v7, 1  ;;  %v1481_v34 = vor.u32 %v1480_v37, %v1479_v3  ;;  %v1490_v36 = vor.u32 %v4906_v8, %v4904_v59  ;;  %v1499_v63 = vor.u32 %v4915_v29, %v4913_v26 }
  0x66   : > { %v1504_v30 = vor.u32 %v4923_v56, %v4927_v58  ;;  %v1090_v12 = vrot.slane %v1060_v2, 7  ;;  %v1486_v25 = vor.u32 %v1485_v55, %v4911_v47  ;;  %v1646_v16 = vrot.slane %v4851_v24, 2 }
  0x67   : > { %v1477_v22 = vor.u32 %v1476_v15, %v1475_v23  ;;  %v1496_v54 = vsel %vm759_vm3, %v1490_v36, %v1495_v11  ;;  %v1647_v35 = vrot.slane %v4854_v51, 2  ;;  %v1649_v59 = vrot.slane %v4862_v50, 2 }
  0x68   : > { %v1505_v9 = vsel %vm759_vm3, %v1499_v63, %v1504_v30  ;;  %v1115_v8 = vsel %vm387_vm0, 4286644096, %v1090_v12  ;;  %v1154_v26 = vsel %vm387_vm0, %v1090_v12, 4286644096  ;;  %v1487_v56 = vsel %vm759_vm3, %v1481_v34, %v1486_v25 }
  0x69   : > { %v1478_v29 = vsel %vm759_vm3, %v1472_v46, %v1477_v22  ;;  %v1206_v58 = vshrl.u32 %v1115_v8, 16  ;;  %v1208_v47 = vshll.u32 %v1115_v8, 16  ;;  %v1212_v60 = vshll.u32 %v1154_v26, 16 }
  0x6a   : > { %v1402_v24 = vrot.slane %v1115_v8, 1  ;;  %v1403_v0 = vrot.slane %v1154_v26, 1  ;;  %v1509_v11 = vshrl.u32 %v1154_v26, 16  ;;  %v1630_v41 = vmax.bf16 %v1478_v29, %v1454_v40 }
  0x6b   : > { %v1631_v19 = vmax.bf16 %v1487_v56, %v4969_v53  ;;  %v1210_v51 = vrot.slane %v1208_v47, 1  ;;  %v1214_v28 = vrot.slane %v1212_v60, 1  ;;  %v1506_v50 = vrot.slane %v1206_v58, 1 }
  0x6c   : > { %v1507_v10 = vrot.slane %v1208_v47, 2  ;;  %v1404_v14 = vsel %vm678_vm2, %v1402_v24, %v1403_v0  ;;  %v1511_v43 = vrot.slane %v1509_v11, 1  ;;  %v1512_v33 = vrot.slane %v1212_v60, 2 }
  0x6d   : > { %v1632_v20 = vmax.bf16 %v1496_v54, %v4971_v32  ;;  %v1211_v27 = vor.u32 %v1210_v51, %v1206_v58  ;;  %v1633_v42 = vmax.bf16 %v1505_v9, %v4973_v5  ;;  %v1648_v6 = vsel %vm936_vm4, %v1646_v16, %v1647_v35 }
  0x6e   : > { %v1508_v21 = vor.u32 %v1507_v10, %v1506_v50  ;;  %v1513_v7 = vor.u32 %v1512_v33, %v1511_v43  ;;  %v1650_v40 = vrot.slane %v4865_v1, 2  ;;  %v6262_v53 = vrot.slane %v4880_v45, 2 }
  0x6f   : > { %v6263_v15 = vrot.slane %v4874_v38, 2  ;;  %v1655_v37 = vrot.slane %v4877_v39, 2  ;;  %v1215_v2 = vsel %vm453_vm1, %v1211_v27, %v1214_v28  ;;  %v1658_v32 = vrot.slane %v1115_v8, 2 }
  0x70   : > { %v1659_v46 = vrot.slane %v1154_v26, 2  ;;  %v1710_v23 = vmax.bf16 %v1648_v6, %v1630_v41  ;;  %v1346_v55 = vmax.bf16 %v1215_v2, %v1115_v8  ;;  %v1514_v5 = vsel %vm759_vm3, %v1508_v21, %v1513_v7 }
  0x71   : > { %v1654_v3 = vsel %vm936_vm4, %v6263_v15, %v6262_v53  ;;  %v1651_v34 = vsel %vm936_vm4, %v1649_v59, %v1650_v40  ;;  %v6264_v1 = vrot.slane %v4887_v52, 2  ;;  %v378_v12 = vrot.slane %v4821_v49, 7 }
  0x72   : > { %v1660_v38 = vsel %vm936_vm4, %v1658_v32, %v1659_v46  ;;  %v1711_v36 = vmax.bf16 %v1651_v34, %v1631_v19  ;;  %v5025_v63 = vmax.bf16 %v1654_v3, %v1632_v20  ;;  %4159 = vmatprep.mubr.msk.bf16.mxu0 %vm2439_vm5, %v1710_v23  ;;  %v1458_v30 = vmax.bf16 %v1404_v14, %v1346_v55 }
  0x73   : > { %v1657_v45 = vsel %vm936_vm4, %v1655_v37, %v6264_v1  ;;  %v379_v22 = vrot.slane %v4838_v17, 7  ;;  %v6267_v25 = vmax.bf16 %v4570_v18, %v4567_v13  ;;  %v310_v35 = vmax.bf16 %v4793_v44, %v4570_v18 }
  0x74   : > { %6265 = vst [vmem:[#allocation2_spill] sm:$0xff] %v5025_v63  ;;  %v5027_v39 = vmax.bf16 %v1657_v45, %v1633_v42  ;;  %v1726_v16 = vmax.bf16 %v1711_v36, %v1710_v23  ;;  %v1727_v54 = vmax.bf16 %v5025_v63, %v1711_v36  ;;  %4160 = vmatmul.mubr.msk.bf16.vlgmr.msra.gmra.mrb[0].mxu0 %vm2439_vm5, %v1711_v36  ;;  %v5045_v59 = vsel %vm387_vm0, 4286644096, %v378_v12  ;;  %v5183_v45 = vld [vmem:[%s4555_s26 + $0x58] sm:$0xff]  }
  0x75   : > { %v5036_v52 = vmax.bf16 %v4793_v44, %v6267_v25  ;;  %v1634_v49 = vmax.bf16 %v1514_v5, %v1458_v30  ;;  %v5048_v13 = vsel %vm387_vm0, %v378_v12, 4286644096  ;;  %4192 = vmatpush3.bf16.msra.mxu0 %v4826_v31  ;;  %v5054_v8 = vsel %vm387_vm0, 4286644096, %v379_v22  ;;  %4163 = vmatprep.mubr.msk.bf16.mxu0 %vm2439_vm5, %v5025_v63 }
  0x76   : > { %6266 = vst [vmem:[#allocation3_spill] sm:$0xff] %v5027_v39  ;;  %v1740_v26 = vmax.bf16 %v1726_v16, %v5025_v63  ;;  %v5060_v29 = vmax.bf16 %v1727_v54, %v5027_v39  ;;  %v524_v56 = vshrl.u32 %v5045_v59, 16  ;;  %v526_v58 = vshll.u32 %v5045_v59, 16 }
  0x77   : > { %v5064_v47 = vmax.bf16 %v1660_v38, %v1634_v49  ;;  %v530_v31 = vshll.u32 %v5048_v13, 16  ;;  %v700_v60 = vrot.slane %v5045_v59, 1  ;;  %v701_v24 = vrot.slane %v5048_v13, 1 }
  0x78   : > { %6268 = vst [vmem:[#allocation4_spill] sm:$0xff] %v5060_v29  ;;  %v1754_v0 = vmax.bf16 %v1740_v26, %v5027_v39  ;;  %v1795_v11 = vrot.slane %v1740_v26, 7  ;;  %v528_v41 = vrot.slane %v526_v58, 1  ;;  %v5070_v19 = vrot.slane %v524_v56, 1 }
  0x79   : > { %6269 = vst [vmem:[#allocation5_spill] sm:$0xff] %v5064_v47  ;;  %v532_v28 = vrot.slane %v530_v31, 1  ;;  %v5077_v50 = vsel %vm678_vm2, %v700_v60, %v701_v24  ;;  %v5079_v10 = vrot.slane %v526_v58, 2  ;;  %v958_v51 = vrot.slane %v5045_v59, 2 }
  0x7a   : > { %v1767_v14 = vmax.bf16 %v1754_v0, %v5064_v47  ;;  %v1796_v43 = vrot.slane %v1754_v0, 7  ;;  %v5083_v33 = vsel %vm387_vm0, 4286644096, %v1795_v11  ;;  %v5086_v20 = vsel %vm387_vm0, %v1795_v11, 4286644096 }
  0x7b   : > { %v6242_v27 = vshrl.u32 %v5083_v33, 16  ;;  %v6241_v21 = vshll.u32 %v5083_v33, 16  ;;  %v1881_v42 = vshll.u32 %v5086_v20, 16  ;;  %v2182_v49 = vshrl.u32 %v5086_v20, 16 }
  0x7c   : > { %v1797_v7 = vrot.slane %v1767_v14, 7  ;;  %v5093_v40 = vsel %vm387_vm0, 4286644096, %v1796_v43  ;;  %v5096_v53 = vsel %vm387_vm0, %v1796_v43, 4286644096  ;;  %4164 = vmatmul.mubr.msk.bf16.gmra.mrb[4].mxu0 %vm2439_vm5, %v5027_v39 }
  0x7d   : > { %v1879_v3 = vrot.slane %v6241_v21, 1  ;;  %v5103_v37 = vrot.slane %v1881_v42, 1  ;;  %v1885_v2 = vshrl.u32 %v5093_v40, 16  ;;  %v1887_v32 = vshll.u32 %v5093_v40, 16  ;;  %4167 = vmatprep.mubr.msk.bf16.mxu0 %vm2439_vm5, %v5064_v47 }
  0x7e   : > { %v5110_v46 = vsel %vm387_vm0, 4286644096, %v1797_v7  ;;  %v5113_v23 = vsel %vm387_vm0, %v1797_v7, 4286644096  ;;  %v1891_v55 = vshll.u32 %v5096_v53, 16  ;;  %v2102_v5 = vrot.slane %v5093_v40, 1 }
  0x7f   : > { %v5119_v34 = vor.u32 %v1879_v3, %v6242_v27  ;;  %v1889_v1 = vrot.slane %v1887_v32, 1  ;;  %v6240_v38 = vshll.u32 %v5110_v46, 16  ;;  %v6239_v30 = vshll.u32 %v5113_v23, 16  ;;  %v5188_v3 = vld [vmem:[%s4555_s26 + $0x60] sm:$0xff]  }
  0x80   : > { %v1893_v36 = vrot.slane %v1891_v55, 1  ;;  %v2103_v12 = vrot.slane %v5096_v53, 1  ;;  %v5131_v26 = vrot.slane %v1881_v42, 2  ;;  %v5138_v24 = vrot.slane %v1885_v2, 1 }
  0x81   : > { %v1890_v16 = vor.u32 %v1889_v1, %v1885_v2  ;;  %v5128_v54 = vrot.slane %v6240_v38, 1  ;;  %v5135_v58 = vrot.slane %v6239_v30, 1  ;;  %v5140_v0 = vrot.slane %v1887_v32, 2 }
  0x82   : > { %v2104_v60 = vsel %vm678_vm2, %v2102_v5, %v2103_v12  ;;  %v5143_v14 = vrot.slane %v2182_v49, 1  ;;  %v2191_v43 = vshrl.u32 %v5096_v53, 16  ;;  %v5146_v7 = vrot.slane %v1891_v55, 2 }
  0x83   : > { %v1894_v11 = vsel %vm453_vm1, %v1890_v16, %v1893_v36  ;;  %v2200_v1 = vshrl.u32 %v5113_v23, 16  ;;  %v529_v36 = vor.u32 %v528_v41, %v524_v56  ;;  %v825_v12 = vor.u32 %v5079_v10, %v5070_v19 }
  0x84   : > { %v2052_v42 = vmax.bf16 %v1894_v11, %v5093_v40  ;;  %v5153_v5 = vrot.slane %v2191_v43, 1  ;;  %v826_v49 = vshrl.u32 %v5048_v13, 16  ;;  %v829_v11 = vrot.slane %v530_v31, 2 }
  0x85   : > { %v5160_v55 = vrot.slane %v2200_v1, 1  ;;  %v533_v43 = vsel %vm453_vm1, %v529_v36, %v532_v28  ;;  %v959_v56 = vrot.slane %v5048_v13, 2  ;;  %v445_v10 = vsel %vm387_vm0, %v379_v22, 4286644096 }
  0x86   : > { %v5158_v16 = vmax.bf16 %v2104_v60, %v2052_v42  ;;  %v637_v41 = vmax.bf16 %v533_v43, %v5045_v59  ;;  %v828_v19 = vrot.slane %v826_v49, 1  ;;  %v534_v60 = vshrl.u32 %v5054_v8, 16 }
  0x87   : > { %v960_v31 = vsel %vm936_vm4, %v958_v51, %v959_v56  ;;  %v536_v42 = vshll.u32 %v5054_v8, 16  ;;  %v540_v1 = vshll.u32 %v445_v10, 16  ;;  %v703_v28 = vrot.slane %v5054_v8, 1 }
  0x88   : > { %v750_v36 = vmax.bf16 %v5077_v50, %v637_v41  ;;  %v830_v13 = vor.u32 %v829_v11, %v828_v19  ;;  %v704_v30 = vrot.slane %v445_v10, 1  ;;  %v832_v59 = vrot.slane %v534_v60, 1 }
  0x89   : > { %v538_v49 = vrot.slane %v536_v42, 1  ;;  %v542_v17 = vrot.slane %v540_v1, 1  ;;  %v833_v43 = vrot.slane %v536_v42, 2  ;;  %v835_v22 = vshrl.u32 %v445_v10, 16 }
  0x8a   : > { %v831_v25 = vsel %vm759_vm3, %v825_v12, %v830_v13  ;;  %v705_v51 = vsel %vm678_vm2, %v703_v28, %v704_v30  ;;  %v838_v56 = vrot.slane %v540_v1, 2  ;;  %v961_v38 = vrot.slane %v5054_v8, 2 }
  0x8b   : > { %v927_v2 = vmax.bf16 %v831_v25, %v750_v36  ;;  %v539_v32 = vor.u32 %v538_v49, %v534_v60  ;;  %v834_v50 = vor.u32 %v833_v43, %v832_v59  ;;  %v837_v11 = vrot.slane %v835_v22, 1 }
  0x8c   : > { %v962_v41 = vrot.slane %v445_v10, 2  ;;  %v337_v19 = vmax.bf16 %v4805_v48, %v5036_v52  ;;  %v324_v30 = vmax.bf16 %v4805_v48, %v310_v35  ;;  %v311_v12 = vmax.bf16 %v4805_v48, %v4793_v44 }
  0x8d   : > { %v5196_v42 = vmax.bf16 %v960_v31, %v927_v2  ;;  %v543_v25 = vsel %vm453_vm1, %v539_v32, %v542_v17  ;;  %v839_v60 = vor.u32 %v838_v56, %v837_v11  ;;  %v6270_v10 = vmax.bf16 %v4798_v61, %v4796_v57 }
  0x8e   : > { %v638_v1 = vmax.bf16 %v543_v25, %v5054_v8  ;;  %v963_v28 = vsel %vm936_vm4, %v961_v38, %v962_v41  ;;  %v350_v18 = vmax.bf16 %v5183_v45, %v337_v19  ;;  %v338_v35 = vmax.bf16 %v5183_v45, %v324_v30 }
  0x8f   : > { %v1034_v52 = vmax.bf16 %v6270_v10, %v4807_v62  ;;  %4104 = vmatmul.mubr.msk.bf16.gmra.mrb[12].mxu1 %vm2439_vm5, %v5196_v42  ;;  %v840_v44 = vsel %vm759_vm3, %v834_v50, %v839_v60  ;;  %v325_v2 = vmax.bf16 %v5183_v45, %v311_v12  ;;  %v312_v57 = vmax.bf16 %v5183_v45, %v4805_v48 }
  0x90   : > { %v751_v31 = vmax.bf16 %v705_v51, %v638_v1  ;;  %v380_v8 = vrot.slane %v350_v18, 7  ;;  %v351_v38 = vmax.bf16 %v5188_v3, %v338_v35 }
  0x91   : > { %v1048_v32 = vmax.bf16 %v1034_v52, %v4975_v4  ;;  %v339_v13 = vmax.bf16 %v5188_v3, %v325_v2  ;;  %v5222_v49 = vmax.bf16 %v5188_v3, %v312_v57 }
  0x92   : > { %v928_v43 = vmax.bf16 %v840_v44, %v751_v31  ;;  %v417_v48 = vsel %vm387_vm0, 4286644096, %v380_v8  ;;  %v446_v22 = vsel %vm387_vm0, %v380_v8, 4286644096  ;;  %v381_v51 = vrot.slane %v351_v38, 7 }
  0x93   : > { %v5219_v59 = vmax.bf16 %v1048_v32, %v5196_v42  ;;  %v544_v56 = vshrl.u32 %v417_v48, 16  ;;  %v546_v50 = vshll.u32 %v417_v48, 16  ;;  %v550_v11 = vshll.u32 %v446_v22, 16 }
  0x94   : > { %v706_v41 = vrot.slane %v417_v48, 1  ;;  %v5228_v19 = vmax.bf16 %v963_v28, %v928_v43  ;;  %v707_v30 = vrot.slane %v446_v22, 1  ;;  %v844_v12 = vshrl.u32 %v446_v22, 16 }
  0x95   : > { %v964_v25 = vrot.slane %v417_v48, 2  ;;  %v548_v60 = vrot.slane %v546_v50, 1  ;;  %v552_v10 = vrot.slane %v550_v11, 1  ;;  %v841_v52 = vrot.slane %v544_v56, 1 }
  0x96   : > { %v842_v1 = vrot.slane %v546_v50, 2  ;;  %4107 = vmatprep.mubr.msk.bf16.mxu1 %vm2439_vm5, %v5228_v19  ;;  %v708_v18 = vsel %vm678_vm2, %v706_v41, %v707_v30  ;;  %v846_v35 = vrot.slane %v844_v12, 1  ;;  %v847_v44 = vrot.slane %v550_v11, 2  ;;  %v5238_v12 = vld [vmem:[%s4555_s26 + $0x68] sm:$0xff]  }
  0x97   : > { %v965_v2 = vrot.slane %v446_v22, 2  ;;  %v549_v32 = vor.u32 %v548_v60, %v544_v56  ;;  %v420_v28 = vsel %vm387_vm0, 4286644096, %v381_v51  ;;  %v447_v31 = vsel %vm387_vm0, %v381_v51, 4286644096 }
  0x98   : > { %v843_v57 = vor.u32 %v842_v1, %v841_v52  ;;  %v848_v8 = vor.u32 %v847_v44, %v846_v35  ;;  %v554_v43 = vshrl.u32 %v420_v28, 16  ;;  %v556_v50 = vshll.u32 %v420_v28, 16 }
  0x99   : > { %v966_v38 = vsel %vm936_vm4, %v964_v25, %v965_v2  ;;  %v553_v9 = vsel %vm453_vm1, %v549_v32, %v552_v10  ;;  %v560_v21 = vshll.u32 %v447_v31, 16  ;;  %v709_v41 = vrot.slane %v420_v28, 1  ;;  %v5243_v32 = vld [vmem:[%s4555_s26 + $0x70] sm:$0xff]  }
  0x9a   : > { %v710_v30 = vrot.slane %v447_v31, 1  ;;  %v639_v22 = vmax.bf16 %v553_v9, %v417_v48  ;;  %v849_v56 = vsel %vm759_vm3, %v843_v57, %v848_v8  ;;  %v558_v11 = vrot.slane %v556_v50, 1 }
  0x9b   : > { %v850_v60 = vrot.slane %v554_v43, 1  ;;  %v562_v52 = vrot.slane %v560_v21, 1  ;;  %v851_v1 = vrot.slane %v556_v50, 2  ;;  %v853_v25 = vshrl.u32 %v447_v31, 16 }
  0x9c   : > { %v711_v51 = vsel %vm678_vm2, %v709_v41, %v710_v30  ;;  %v752_v35 = vmax.bf16 %v708_v18, %v639_v22  ;;  %v559_v44 = vor.u32 %v558_v11, %v554_v43  ;;  %v856_v2 = vrot.slane %v560_v21, 2 }
  0x9d   : > { %v967_v10 = vrot.slane %v420_v28, 2  ;;  %v852_v27 = vor.u32 %v851_v1, %v850_v60  ;;  %v855_v6 = vrot.slane %v853_v25, 1  ;;  %v968_v15 = vrot.slane %v447_v31, 2 }
  0x9e   : > { %v352_v9 = vmax.bf16 %v5238_v12, %v339_v13  ;;  %v929_v48 = vmax.bf16 %v849_v56, %v752_v35  ;;  %v563_v57 = vsel %vm453_vm1, %v559_v44, %v562_v52  ;;  %v1091_v8 = vrot.slane %v5219_v59, 7 }
  0x9f   : > { %v340_v50 = vmax.bf16 %v5238_v12, %v5222_v49  ;;  %v640_v41 = vmax.bf16 %v563_v57, %v420_v28  ;;  %v857_v18 = vor.u32 %v856_v2, %v855_v6  ;;  %v969_v21 = vsel %vm936_vm4, %v967_v10, %v968_v15 }
  0xa0   : > { %v382_v43 = vrot.slane %v352_v9, 7  ;;  %v5251_v30 = vmax.bf16 %v966_v38, %v929_v48  ;;  %v5254_v22 = vsel %vm387_vm0, 4286644096, %v1091_v8  ;;  %v1155_v13 = vsel %vm387_vm0, %v1091_v8, 4286644096 }
  0xa1   : > { %v353_v31 = vmax.bf16 %v5243_v32, %v340_v50  ;;  %v753_v56 = vmax.bf16 %v711_v51, %v640_v41  ;;  %v858_v59 = vsel %vm759_vm3, %v852_v27, %v857_v18  ;;  %v1216_v41 = vshrl.u32 %v5254_v22, 16 }
  0xa2   : > { %v423_v11 = vsel %vm387_vm0, 4286644096, %v382_v43  ;;  %v448_v49 = vsel %vm387_vm0, %v382_v43, 4286644096  ;;  %4108 = vmatmul.mubr.msk.bf16.gmra.mrb[16].mxu1 %vm2439_vm5, %v5251_v30  ;;  %v1218_v43 = vshll.u32 %v5254_v22, 16  ;;  %v1661_v17 = vrot.slane %v5254_v22, 2 }
  0xa3   : > { %v564_v6 = vshrl.u32 %v423_v11, 16  ;;  %v566_v15 = vshll.u32 %v423_v11, 16  ;;  %v570_v28 = vshll.u32 %v448_v49, 16  ;;  %v712_v38 = vrot.slane %v423_v11, 1 }
  0xa4   : > { %v930_v60 = vmax.bf16 %v858_v59, %v753_v56  ;;  %v713_v52 = vrot.slane %v448_v49, 1  ;;  %v862_v1 = vshrl.u32 %v448_v49, 16  ;;  %v970_v25 = vrot.slane %v423_v11, 2 }
  0xa5   : > { %v568_v35 = vrot.slane %v566_v15, 1  ;;  %v572_v44 = vrot.slane %v570_v28, 1  ;;  %v859_v51 = vrot.slane %v564_v6, 1  ;;  %v860_v2 = vrot.slane %v566_v15, 2 }
  0xa6   : > { %v5263_v27 = vmax.bf16 %v969_v21, %v930_v60  ;;  %v714_v10 = vsel %vm678_vm2, %v712_v38, %v713_v52  ;;  %v864_v9 = vrot.slane %v862_v1, 1  ;;  %v865_v48 = vrot.slane %v570_v28, 2 }
  0xa7   : > { %v569_v57 = vor.u32 %v568_v35, %v564_v6  ;;  %v861_v8 = vor.u32 %v860_v2, %v859_v51  ;;  %v971_v50 = vrot.slane %v448_v49, 2  ;;  %v1222_v56 = vshll.u32 %v1155_v13, 16 }
  0xa8   : > { %4111 = vmatprep.mubr.msk.bf16.mxu1 %vm2439_vm5, %v5263_v27  ;;  %v866_v18 = vor.u32 %v865_v48, %v864_v9  ;;  %v1405_v59 = vrot.slane %v5254_v22, 1  ;;  %v1406_v38 = vrot.slane %v1155_v13, 1  ;;  %v1515_v28 = vrot.slane %v1216_v41, 1 }
  0xa9   : > { %v573_v21 = vsel %vm453_vm1, %v569_v57, %v572_v44  ;;  %v972_v15 = vsel %vm936_vm4, %v970_v25, %v971_v50  ;;  %v1220_v60 = vrot.slane %v1218_v43, 1  ;;  %v1224_v52 = vrot.slane %v1222_v56, 1 }
  0xaa   : > { %v641_v6 = vmax.bf16 %v573_v21, %v423_v11  ;;  %v867_v49 = vsel %vm759_vm3, %v861_v8, %v866_v18  ;;  %v1407_v1 = vsel %vm678_vm2, %v1405_v59, %v1406_v38  ;;  %v1516_v35 = vrot.slane %v1218_v43, 2 }
  0xab   : > { %v1518_v51 = vshrl.u32 %v1155_v13, 16  ;;  %v1521_v2 = vrot.slane %v1222_v56, 2  ;;  %v1221_v48 = vor.u32 %v1220_v60, %v1216_v41  ;;  %v1662_v36 = vrot.slane %v1155_v13, 2 }
  0xac   : > { %v754_v9 = vmax.bf16 %v714_v10, %v641_v6  ;;  %v1517_v44 = vor.u32 %v1516_v35, %v1515_v28  ;;  %v383_v25 = vrot.slane %v353_v31, 7  ;;  %v6271_v11 = vmax.bf16 %v4807_v62, %v4798_v61 }
  0xad   : > { %v1520_v57 = vrot.slane %v1518_v51, 1  ;;  %v1225_v18 = vsel %vm453_vm1, %v1221_v48, %v1224_v52  ;;  %v1663_v43 = vsel %vm936_vm4, %v1661_v17, %v1662_v36  ;;  %v6272_v10 = vmax.bf16 %v5188_v3, %v5183_v45 }
  0xae   : > { %v1035_v8 = vmax.bf16 %v6271_v11, %v4975_v4  ;;  %v931_v50 = vmax.bf16 %v867_v49, %v754_v9  ;;  %v1347_v13 = vmax.bf16 %v1225_v18, %v5254_v22  ;;  %v426_v31 = vsel %vm387_vm0, 4286644096, %v383_v25  ;;  %v5296_v9 = vld [vmem:[%s4555_s26 + $0x78] sm:$0xff]  }
  0xaf   : > { %v327_v41 = vmax.bf16 %v5238_v12, %v6272_v10  ;;  %v1522_v56 = vor.u32 %v1521_v2, %v1520_v57  ;;  %v449_v59 = vsel %vm387_vm0, %v383_v25, 4286644096  ;;  %v574_v61 = vshrl.u32 %v426_v31, 16 }
  0xb0   : > { %v5289_v21 = vmax.bf16 %v972_v15, %v931_v50  ;;  %v576_v38 = vshll.u32 %v426_v31, 16  ;;  %v580_v28 = vshll.u32 %v449_v59, 16  ;;  %v1459_v6 = vmax.bf16 %v1407_v1, %v1347_v13 }
  0xb1   : > { %v1523_v36 = vsel %vm759_vm3, %v1517_v44, %v1522_v56  ;;  %v715_v17 = vrot.slane %v426_v31, 1  ;;  %v716_v45 = vrot.slane %v449_v59, 1  ;;  %v868_v60 = vrot.slane %v574_v61, 1 }
  0xb2   : > { %4112 = vmatmul.mubr.msk.bf16.gmra.mrb[20].mxu1 %vm2439_vm5, %v5289_v21  ;;  %v578_v22 = vrot.slane %v576_v38, 1  ;;  %v582_v49 = vrot.slane %v580_v28, 1  ;;  %v869_v52 = vrot.slane %v576_v38, 2  ;;  %v1635_v35 = vmax.bf16 %v1523_v36, %v1459_v6 }
  0xb3   : > { %v717_v15 = vsel %vm678_vm2, %v715_v17, %v716_v45  ;;  %v871_v51 = vshrl.u32 %v449_v59, 16  ;;  %v874_v2 = vrot.slane %v580_v28, 2  ;;  %v973_v57 = vrot.slane %v426_v31, 2 }
  0xb4   : > { %v579_v48 = vor.u32 %v578_v22, %v574_v61  ;;  %v870_v1 = vor.u32 %v869_v52, %v868_v60  ;;  %v974_v44 = vrot.slane %v449_v59, 2  ;;  %v5298_v25 = vmax.bf16 %v1663_v43, %v1635_v35 }
  0xb5   : > { %v873_v11 = vrot.slane %v871_v51, 1  ;;  %v1049_v50 = vmax.bf16 %v1035_v8, %v5196_v42  ;;  %v341_v18 = vmax.bf16 %v5243_v32, %v327_v41  ;;  %v1022_v56 = vmax.bf16 %v4975_v4, %v4807_v62 }
  0xb6   : > { %6273 = vst [vmem:[#allocation6_spill] sm:$0xff] %v5298_v25  ;;  %v583_v10 = vsel %vm453_vm1, %v579_v48, %v582_v49  ;;  %v975_v13 = vsel %vm936_vm4, %v973_v57, %v974_v44  ;;  %v314_v61 = vmax.bf16 %v5238_v12, %v5188_v3  ;;  %4168 = vmatmul.mubr.msk.bf16.gmra.mrb[8].mxu0 %vm2439_vm5, %v5298_v25 }
  0xb7   : > { %v642_v43 = vmax.bf16 %v583_v10, %v426_v31  ;;  %v875_v59 = vor.u32 %v874_v2, %v873_v11  ;;  %v1062_v38 = vmax.bf16 %v1049_v50, %v5228_v19  ;;  %v354_v8 = vmax.bf16 %v5296_v9, %v341_v18 }
  0xb8   : > { %v1036_v41 = vmax.bf16 %v1022_v56, %v5196_v42  ;;  %v328_v28 = vmax.bf16 %v5243_v32, %v314_v61  ;;  %v1023_v62 = vmax.bf16 %v5196_v42, %v4975_v4 }
  0xb9   : > { %v755_v3 = vmax.bf16 %v717_v15, %v642_v43  ;;  %v876_v36 = vsel %vm759_vm3, %v870_v1, %v875_v59  ;;  %v1092_v17 = vrot.slane %v1062_v38, 7  ;;  %v384_v31 = vrot.slane %v354_v8, 7 }
  0xba   : > { %v1050_v45 = vmax.bf16 %v1036_v41, %v5228_v19  ;;  %v342_v22 = vmax.bf16 %v5296_v9, %v328_v28  ;;  %v5322_v49 = vmax.bf16 %v1023_v62, %v5228_v19 }
  0xbb   : > { %v932_v52 = vmax.bf16 %v876_v36, %v755_v3  ;;  %v1121_v35 = vsel %vm387_vm0, 4286644096, %v1092_v17  ;;  %v1156_v4 = vsel %vm387_vm0, %v1092_v17, 4286644096  ;;  %v429_v15 = vsel %vm387_vm0, 4286644096, %v384_v31 }
  0xbc   : > { %v1226_v51 = vshrl.u32 %v1121_v35, 16  ;;  %v1228_v2 = vshll.u32 %v1121_v35, 16  ;;  %v1232_v48 = vshll.u32 %v1156_v4, 16  ;;  %v1408_v1 = vrot.slane %v1121_v35, 1 }
  0xbd   : > { %v5329_v57 = vmax.bf16 %v975_v13, %v932_v52  ;;  %v1409_v44 = vrot.slane %v1156_v4, 1  ;;  %v1527_v11 = vshrl.u32 %v1156_v4, 16  ;;  %v1664_v50 = vrot.slane %v1121_v35, 2 }
  0xbe   : > { %v1230_v18 = vrot.slane %v1228_v2, 1  ;;  %v1234_v10 = vrot.slane %v1232_v48, 1  ;;  %v1524_v56 = vrot.slane %v1226_v51, 1  ;;  %v1525_v61 = vrot.slane %v1228_v2, 2 }
  0xbf   : > { %4115 = vmatprep.mubr.msk.bf16.mxu1 %vm2439_vm5, %v5329_v57  ;;  %v1410_v43 = vsel %vm678_vm2, %v1408_v1, %v1409_v44  ;;  %v1529_v59 = vrot.slane %v1527_v11, 1  ;;  %v1530_v38 = vrot.slane %v1232_v48, 2  ;;  %v1665_v8 = vrot.slane %v1156_v4, 2 }
  0xc0   : > { %v1231_v41 = vor.u32 %v1230_v18, %v1226_v51  ;;  %v1526_v28 = vor.u32 %v1525_v61, %v1524_v56  ;;  %v450_v13 = vsel %vm387_vm0, %v384_v31, 4286644096  ;;  %v584_v62 = vshrl.u32 %v429_v15, 16 }
  0xc1   : > { %v1531_v3 = vor.u32 %v1530_v38, %v1529_v59  ;;  %v1666_v36 = vsel %vm936_vm4, %v1664_v50, %v1665_v8  ;;  %v586_v17 = vshll.u32 %v429_v15, 16  ;;  %v590_v52 = vshll.u32 %v450_v13, 16 }
  0xc2   : > { %v1235_v2 = vsel %vm453_vm1, %v1231_v41, %v1234_v10  ;;  %v718_v60 = vrot.slane %v429_v15, 1  ;;  %v719_v6 = vrot.slane %v450_v13, 1  ;;  %v877_v63 = vrot.slane %v584_v62, 1 }
  0xc3   : > { %v1348_v39 = vmax.bf16 %v1235_v2, %v1121_v35  ;;  %v1532_v1 = vsel %vm759_vm3, %v1526_v28, %v1531_v3  ;;  %v588_v48 = vrot.slane %v586_v17, 1  ;;  %v592_v4 = vrot.slane %v590_v52, 1 }
  0xc4   : > { %v720_v51 = vsel %vm678_vm2, %v718_v60, %v719_v6  ;;  %v878_v44 = vrot.slane %v586_v17, 2  ;;  %v880_v31 = vshrl.u32 %v450_v13, 16  ;;  %v883_v11 = vrot.slane %v590_v52, 2 }
  0xc5   : > { %v1460_v18 = vmax.bf16 %v1410_v43, %v1348_v39  ;;  %v589_v56 = vor.u32 %v588_v48, %v584_v62  ;;  %v976_v50 = vrot.slane %v429_v15, 2  ;;  %v977_v61 = vrot.slane %v450_v13, 2 }
  0xc6   : > { %v879_v59 = vor.u32 %v878_v44, %v877_v63  ;;  %v882_v38 = vrot.slane %v880_v31, 1  ;;  %v1063_v10 = vmax.bf16 %v1050_v45, %v5251_v30  ;;  %v385_v8 = vrot.slane %v342_v22, 7 }
  0xc7   : > { %v1636_v41 = vmax.bf16 %v1532_v1, %v1460_v18  ;;  %v593_v35 = vsel %vm453_vm1, %v589_v56, %v592_v4  ;;  %v978_v28 = vsel %vm936_vm4, %v976_v50, %v977_v61  ;;  %v6274_v6 = vmax.bf16 %v5289_v21, %v5263_v27 }
  0xc8   : > { %v643_v39 = vmax.bf16 %v593_v35, %v429_v15  ;;  %v884_v43 = vor.u32 %v883_v11, %v882_v38  ;;  %v1093_v62 = vrot.slane %v1063_v10, 7  ;;  %v432_v63 = vsel %vm387_vm0, 4286644096, %v385_v8 }
  0xc9   : > { %v5346_v60 = vmax.bf16 %v6274_v6, %v5329_v57  ;;  %v5349_v13 = vmax.bf16 %v1666_v36, %v1636_v41  ;;  %v451_v45 = vsel %vm387_vm0, %v385_v8, 4286644096  ;;  %v594_v22 = vshrl.u32 %v432_v63, 16 }
  0xca   : > { %v596_v3 = vshll.u32 %v432_v63, 16  ;;  %v756_v17 = vmax.bf16 %v720_v51, %v643_v39  ;;  %v885_v52 = vsel %vm759_vm3, %v879_v59, %v884_v43  ;;  %v1124_v2 = vsel %vm387_vm0, 4286644096, %v1093_v62 }
  0xcb   : > { %6275 = vst [vmem:[#allocation7_spill] sm:$0xff] %v5349_v13  ;;  %v1157_v1 = vsel %vm387_vm0, %v1093_v62, 4286644096  ;;  %4171 = vmatprep.mubr.msk.bf16.mxu0 %vm2439_vm5, %v5349_v13  ;;  %v1236_v15 = vshrl.u32 %v1124_v2, 16  ;;  %v1238_v48 = vshll.u32 %v1124_v2, 16  ;;  %v1411_v44 = vrot.slane %v1124_v2, 1 }
  0xcc   : > { %v1242_v4 = vshll.u32 %v1157_v1, 16  ;;  %v933_v36 = vmax.bf16 %v885_v52, %v756_v17  ;;  %v1412_v31 = vrot.slane %v1157_v1, 1  ;;  %v1536_v11 = vshrl.u32 %v1157_v1, 16 }
  0xcd   : > { %v1667_v18 = vrot.slane %v1124_v2, 2  ;;  %v1240_v56 = vrot.slane %v1238_v48, 1  ;;  %v1533_v51 = vrot.slane %v1236_v15, 1  ;;  %v1534_v61 = vrot.slane %v1238_v48, 2 }
  0xce   : > { %v1244_v50 = vrot.slane %v1242_v4, 1  ;;  %v5357_v59 = vmax.bf16 %v978_v28, %v933_v36  ;;  %v1413_v38 = vsel %vm678_vm2, %v1411_v44, %v1412_v31  ;;  %v1538_v10 = vrot.slane %v1536_v11, 1 }
  0xcf   : > { %v1539_v8 = vrot.slane %v1242_v4, 2  ;;  %v1241_v41 = vor.u32 %v1240_v56, %v1236_v15  ;;  %v1535_v35 = vor.u32 %v1534_v61, %v1533_v51  ;;  %v1668_v6 = vrot.slane %v1157_v1, 2 }
  0xd0   : > { %v598_v39 = vrot.slane %v596_v3, 1  ;;  %4116 = vmatmul.mubr.msk.bf16.gmra.mrb[24].mxu1 %vm2439_vm5, %v5357_v59  ;;  %v600_v62 = vshll.u32 %v451_v45, 16  ;;  %v721_v17 = vrot.slane %v432_v63, 1  ;;  %v722_v52 = vrot.slane %v451_v45, 1 }
  0xd1   : > { %v1540_v43 = vor.u32 %v1539_v8, %v1538_v10  ;;  %v1245_v13 = vsel %vm453_vm1, %v1241_v41, %v1244_v50  ;;  %v1669_v28 = vsel %vm936_vm4, %v1667_v18, %v1668_v6  ;;  %v886_v36 = vrot.slane %v594_v22, 1 }
  0xd2   : > { %v599_v48 = vor.u32 %v598_v39, %v594_v22  ;;  %v1349_v44 = vmax.bf16 %v1245_v13, %v1124_v2  ;;  %v602_v15 = vrot.slane %v600_v62, 1  ;;  %v723_v1 = vsel %vm678_vm2, %v721_v17, %v722_v52 }
  0xd3   : > { %v1541_v4 = vsel %vm759_vm3, %v1535_v35, %v1540_v43  ;;  %v887_v31 = vrot.slane %v596_v3, 2  ;;  %v889_v11 = vshrl.u32 %v451_v45, 16  ;;  %v892_v56 = vrot.slane %v600_v62, 2 }
  0xd4   : > { %v979_v51 = vrot.slane %v432_v63, 2  ;;  %v1461_v61 = vmax.bf16 %v1413_v38, %v1349_v44  ;;  %v603_v10 = vsel %vm453_vm1, %v599_v48, %v602_v15  ;;  %v980_v8 = vrot.slane %v451_v45, 2 }
  0xd5   : > { %v1055_v50 = vmax.bf16 %v5346_v60, %v5357_v59  ;;  %v644_v18 = vmax.bf16 %v603_v10, %v432_v63  ;;  %v888_v41 = vor.u32 %v887_v31, %v886_v36  ;;  %v891_v22 = vrot.slane %v889_v11, 1 }
  0xd6   : > { %v1051_v13 = vmax.bf16 %v5322_v49, %v5251_v30  ;;  %v1637_v2 = vmax.bf16 %v1541_v4, %v1461_v61  ;;  %v981_v35 = vsel %vm936_vm4, %v979_v51, %v980_v8  ;;  %v6276_v3 = vmax.bf16 %v5243_v32, %v5238_v12 }
  0xd7   : > { %v1028_v45 = vmax.bf16 %v5329_v57, %v5289_v21  ;;  %v757_v6 = vmax.bf16 %v723_v1, %v644_v18  ;;  %v893_v39 = vor.u32 %v892_v56, %v891_v22  ;;  %v1024_v12 = vmax.bf16 %v5228_v19, %v5196_v42 }
  0xd8   : > { %v329_v38 = vmax.bf16 %v5296_v9, %v6276_v3  ;;  %v1064_v60 = vmax.bf16 %v1051_v13, %v5263_v27  ;;  %v5381_v43 = vmax.bf16 %v1669_v28, %v1637_v2 }
  0xd9   : > { %v5384_v62 = vmax.bf16 %v1028_v45, %v5357_v59  ;;  %v894_v32 = vsel %vm759_vm3, %v888_v41, %v893_v39  ;;  %v5398_v44 = vmax.bf16 %v1024_v12, %v5251_v30 }
  0xda   : > { %6277 = vst [vmem:[#allocation8_spill] sm:$0xff] %v5381_v43  ;;  %v386_v49 = vrot.slane %v329_v38, 7  ;;  %v1094_v9 = vrot.slane %v1064_v60, 7  ;;  %4172 = vmatmul.mubr.msk.bf16.gmra.mrb[12].mxu0 %vm2439_vm5, %v5381_v43  ;;  %v934_v28 = vmax.bf16 %v894_v32, %v757_v6 }
  0xdc   : > { %v435_v48 = vsel %vm387_vm0, 4286644096, %v386_v49  ;;  %v452_v36 = vsel %vm387_vm0, %v386_v49, 4286644096  ;;  %v1127_v42 = vsel %vm387_vm0, 4286644096, %v1094_v9  ;;  %v5402_v31 = vmax.bf16 %v981_v35, %v934_v28 }
  0xdd   : > { %v1158_v4 = vsel %vm387_vm0, %v1094_v9, 4286644096  ;;  %v604_v15 = vshrl.u32 %v435_v48, 16  ;;  %v606_v1 = vshll.u32 %v435_v48, 16  ;;  %v1246_v11 = vshrl.u32 %v1127_v42, 16 }
  0xde   : > { %v1248_v56 = vshll.u32 %v1127_v42, 16  ;;  %v1252_v51 = vshll.u32 %v1158_v4, 16  ;;  %v1414_v61 = vrot.slane %v1127_v42, 1  ;;  %v1415_v10 = vrot.slane %v1158_v4, 1  ;;  %4119 = vmatprep.mubr.msk.bf16.mxu1 %vm2439_vm5, %v5402_v31 }
  0xdf   : > { %v1545_v8 = vshrl.u32 %v1158_v4, 16  ;;  %v1670_v18 = vrot.slane %v1127_v42, 2  ;;  %v1068_v41 = vmax.bf16 %v1055_v50, %v5402_v31  ;;  %v1542_v2 = vrot.slane %v1246_v11, 1 }
  0xe0   : > { %v1250_v22 = vrot.slane %v1248_v56, 1  ;;  %v1254_v13 = vrot.slane %v1252_v51, 1  ;;  %v1416_v3 = vsel %vm678_vm2, %v1414_v61, %v1415_v10  ;;  %v1543_v38 = vrot.slane %v1248_v56, 2 }
  0xe1   : > { %v1547_v35 = vrot.slane %v1545_v8, 1  ;;  %v1548_v45 = vrot.slane %v1252_v51, 2  ;;  %v1098_v6 = vrot.slane %v1068_v41, 7  ;;  %v1671_v60 = vrot.slane %v1158_v4, 2 }
  0xe2   : > { %v1251_v39 = vor.u32 %v1250_v22, %v1246_v11  ;;  %v608_v49 = vrot.slane %v606_v1, 1  ;;  %v1544_v12 = vor.u32 %v1543_v38, %v1542_v2  ;;  %v610_v9 = vshll.u32 %v452_v36, 16 }
  0xe3   : > { %v1549_v32 = vor.u32 %v1548_v45, %v1547_v35  ;;  %v724_v28 = vrot.slane %v435_v48, 1  ;;  %v5409_v50 = vsel %vm387_vm0, 4286644096, %v1098_v6  ;;  %v1672_v17 = vsel %vm936_vm4, %v1670_v18, %v1671_v60 }
  0xe4   : > { %v1255_v52 = vsel %vm453_vm1, %v1251_v39, %v1254_v13  ;;  %v609_v63 = vor.u32 %v608_v49, %v604_v15  ;;  %v612_v51 = vrot.slane %v610_v9, 1  ;;  %v725_v10 = vrot.slane %v452_v36, 1 }
  0xe5   : > { %v1350_v61 = vmax.bf16 %v1255_v52, %v1127_v42  ;;  %v1550_v56 = vsel %vm759_vm3, %v1544_v12, %v1549_v32  ;;  %v895_v11 = vrot.slane %v604_v15, 1  ;;  %v896_v4 = vrot.slane %v606_v1, 2 }
  0xe6   : > { %v898_v8 = vshrl.u32 %v452_v36, 16  ;;  %v901_v41 = vrot.slane %v610_v9, 2  ;;  %v613_v2 = vsel %vm453_vm1, %v609_v63, %v612_v51  ;;  %v726_v38 = vsel %vm678_vm2, %v724_v28, %v725_v10 }
  0xe7   : > { %v1462_v22 = vmax.bf16 %v1416_v3, %v1350_v61  ;;  %v982_v35 = vrot.slane %v435_v48, 2  ;;  %v645_v45 = vmax.bf16 %v613_v2, %v435_v48  ;;  %v897_v13 = vor.u32 %v896_v4, %v895_v11 }
  0xe8   : > { %v900_v39 = vrot.slane %v898_v8, 1  ;;  %v983_v18 = vrot.slane %v452_v36, 2  ;;  %v1030_v52 = vmax.bf16 %v5402_v31, %v5357_v59  ;;  %v6278_v42 = vmax.bf16 %v5357_v59, %v5329_v57 }
  0xe9   : > { %v1638_v60 = vmax.bf16 %v1550_v56, %v1462_v22  ;;  %v1056_v1 = vmax.bf16 %v5384_v62, %v5402_v31  ;;  %v758_v63 = vmax.bf16 %v726_v38, %v645_v45  ;;  %v1052_v48 = vmax.bf16 %v5398_v44, %v5263_v27 }
  0xea   : > { %v1043_v15 = vmax.bf16 %v6278_v42, %v5402_v31  ;;  %v902_v3 = vor.u32 %v901_v41, %v900_v39  ;;  %v984_v49 = vsel %vm936_vm4, %v982_v35, %v983_v18  ;;  %v6280_v12 = vmax.bf16 %v5251_v30, %v5228_v19 }
  0xeb   : > { %v5427_v36 = vmax.bf16 %v1672_v17, %v1638_v60  ;;  %v6281_v9 = vmax.bf16 %v5263_v27, %v5251_v30  ;;  %v5438_v62 = vsel %vm387_vm0, %v1098_v6, 4286644096  ;;  %v1065_v61 = vmax.bf16 %v1052_v48, %v5289_v21 }
  0xec   : > { %v1039_v32 = vmax.bf16 %v6280_v12, %v5263_v27  ;;  %v903_v31 = vsel %vm759_vm3, %v897_v13, %v902_v3  ;;  %v1286_v17 = vshrl.u32 %v5409_v50, 16  ;;  %v6250_v44 = vshll.u32 %v5409_v50, 16 }
  0xed   : > { %6279 = vst [vmem:[#allocation9_spill] sm:$0xff] %v5427_v36  ;;  %v1040_v28 = vmax.bf16 %v6281_v9, %v5289_v21  ;;  %4175 = vmatprep.mubr.msk.bf16.mxu0 %vm2439_vm5, %v5427_v36  ;;  %v935_v19 = vmax.bf16 %v903_v31, %v758_v63  ;;  %v6249_v27 = vshll.u32 %v5438_v62, 16  ;;  %v1095_v6 = vrot.slane %v1065_v61, 7  ;;  %v4477_v63 = vld [vmem:[%s4555_s26] sm:$0xff]  }
  0xee   : > { %v1053_v56 = vmax.bf16 %v1039_v32, %v5289_v21  ;;  %v1290_v51 = vrot.slane %v6250_v44, 1  ;;  %v1426_v10 = vrot.slane %v5409_v50, 1  ;;  %v1427_v11 = vrot.slane %v5438_v62, 1  ;;  %v4481_v36 = vld [vmem:[%s4555_s26 + $0x20] sm:$0xff]  }
  0xef   : > { %v1054_v30 = vmax.bf16 %v1040_v28, %v5329_v57  ;;  %v1016_v4 = vmax.bf16 %v984_v49, %v935_v19  ;;  %v1294_v21 = vrot.slane %v6249_v27, 1  ;;  %v5462_v22 = vsel %vm387_vm0, 4286644096, %v1095_v6 }
  0xf0   : > { %v5454_v8 = vmax.bf16 %v1053_v56, %v5329_v57  ;;  %v1159_v2 = vsel %vm387_vm0, %v1095_v6, 4286644096  ;;  %v1291_v38 = vor.u32 %v1290_v51, %v1286_v17  ;;  %v5468_v35 = vsel %vm678_vm2, %v1426_v10, %v1427_v11 }
  0xf1   : > { %v5457_v41 = vmax.bf16 %v1054_v30, %v5357_v59  ;;  %v5470_v57 = vmax.bf16 %v1030_v52, %v1016_v4  ;;  %v1057_v45 = vmax.bf16 %v1043_v15, %v1016_v4  ;;  %v1069_v13 = vmax.bf16 %v1056_v1, %v1016_v4  ;;  %4120 = vmatmul.mubr.msk.bf16.gmra.mrb[28].mxu1 %vm2439_vm5, %v1016_v4 }
  0xf2   : > { %v1256_v59 = vshrl.u32 %v5462_v22, 16  ;;  %v1258_v39 = vshll.u32 %v5462_v22, 16  ;;  %v1262_v18 = vshll.u32 %v1159_v2, 16  ;;  %v1417_v60 = vrot.slane %v5462_v22, 1  ;;  %4125 = vmatprep.mubr.msk.bf16.mxu1 %vm2439_vm5, %v4477_v63 }
  0xf3   : > { %v1418_v42 = vrot.slane %v1159_v2, 1  ;;  %v1099_v3 = vrot.slane %v1069_v13, 7  ;;  %v1100_v49 = vrot.slane %v1057_v45, 7  ;;  %v6248_v52 = vrot.slane %v5470_v57, 7 }
  0xf4   : > { %v1551_v48 = vrot.slane %v1256_v59, 1  ;;  %v1260_v15 = vrot.slane %v1258_v39, 1  ;;  %v1264_v1 = vrot.slane %v1262_v18, 1  ;;  %v1552_v32 = vrot.slane %v1258_v39, 2 }
  0xf5   : > { %v1419_v12 = vsel %vm678_vm2, %v1417_v60, %v1418_v42  ;;  %v5481_v9 = vsel %vm387_vm0, 4286644096, %v1099_v3  ;;  %v5484_v28 = vsel %vm387_vm0, 4286644096, %v1100_v49  ;;  %v5489_v31 = vsel %vm387_vm0, 4286644096, %v6248_v52 }
  0xf6   : > { %v5492_v61 = vsel %vm453_vm1, %v1291_v38, %v1294_v21  ;;  %v5495_v19 = vsel %vm387_vm0, %v1099_v3, 4286644096  ;;  %v5498_v56 = vsel %vm387_vm0, %v1100_v49, 4286644096  ;;  %v1296_v30 = vshrl.u32 %v5481_v9, 16  ;;  %v4478_v3 = vld [vmem:[%s4555_s26 + $0x8] sm:$0xff]  }
  0xf7   : > { %v1298_v6 = vshll.u32 %v5481_v9, 16  ;;  %v1302_v51 = vshll.u32 %v5495_v19, 16  ;;  %v1590_v13 = vshrl.u32 %v5495_v19, 16  ;;  %v1261_v63 = vor.u32 %v1260_v15, %v1256_v59 }
  0xf8   : > { %v5506_v38 = vrot.slane %v1296_v30, 1  ;;  %v1553_v10 = vor.u32 %v1552_v32, %v1551_v48  ;;  %v1554_v11 = vshrl.u32 %v1159_v2, 16  ;;  %v1557_v27 = vrot.slane %v1262_v18, 2 }
  0xf9   : > { %v1300_v21 = vrot.slane %v1298_v6, 1  ;;  %v5508_v45 = vrot.slane %v1298_v6, 2  ;;  %v5511_v39 = vrot.slane %v1302_v51, 1  ;;  %v5513_v60 = vrot.slane %v1302_v51, 2  ;;  %4126 = vmatmul.mubr.msk.bf16.vlgmr.msra.gmra.mrb[0].mxu1 %vm2439_vm5, %v4478_v3  ;;  %v4479_v6 = vld [vmem:[%s4555_s26 + $0x10] sm:$0xff]  }
  0xfa   : > { %v5520_v52 = vrot.slane %v1590_v13, 1  ;;  %4129 = vmatprep.mubr.msk.bf16.mxu1 %vm2439_vm5, %v4479_v6  ;;  %v1265_v4 = vsel %vm453_vm1, %v1261_v63, %v1264_v1  ;;  %v1673_v51 = vrot.slane %v5462_v22, 2  ;;  %v1674_v44 = vrot.slane %v1159_v2, 2 }
  0xfb   : > { %v5518_v49 = vor.u32 %v1300_v21, %v1296_v30  ;;  %v1351_v15 = vmax.bf16 %v1265_v4, %v5462_v22  ;;  %v1556_v30 = vrot.slane %v1554_v11, 1  ;;  %v1096_v21 = vrot.slane %v5454_v8, 7 }
  0xfc   : > { %v1675_v48 = vsel %vm936_vm4, %v1673_v51, %v1674_v44  ;;  %v1097_v32 = vrot.slane %v5457_v41, 7  ;;  %v1354_v13 = vmax.bf16 %v5492_v61, %v5409_v50  ;;  %v5536_v18 = vrot.slane %v1286_v17, 1 }
  0xfd   : > { %v1463_v2 = vmax.bf16 %v1419_v12, %v1351_v15  ;;  %v1558_v1 = vor.u32 %v1557_v27, %v1556_v30  ;;  %v1133_v63 = vsel %vm387_vm0, 4286644096, %v1096_v21  ;;  %v1160_v22 = vsel %vm387_vm0, %v1096_v21, 4286644096  ;;  %v4480_v15 = vld [vmem:[%s4555_s26 + $0x18] sm:$0xff]  }
  0xfe   : > { %v1266_v11 = vshrl.u32 %v1133_v63, 16  ;;  %v1268_v8 = vshll.u32 %v1133_v63, 16  ;;  %v1272_v4 = vshll.u32 %v1160_v22, 16  ;;  %v1420_v44 = vrot.slane %v1133_v63, 1 }
  0xff   : > { %v1559_v41 = vsel %vm759_vm3, %v1553_v10, %v1558_v1  ;;  %v1421_v3 = vrot.slane %v1160_v22, 1  ;;  %v1563_v61 = vshrl.u32 %v1160_v22, 16  ;;  %v1676_v6 = vrot.slane %v1133_v63, 2 }
 0x100   : > { %v1639_v51 = vmax.bf16 %v1559_v41, %v1463_v2  ;;  %v1270_v17 = vrot.slane %v1268_v8, 1  ;;  %v1274_v42 = vrot.slane %v1272_v4, 1  ;;  %v1560_v12 = vrot.slane %v1266_v11, 1 }
 0x101   : > { %4130 = vmatmul.mubr.msk.bf16.gmra.mrb[4].mxu1 %vm2439_vm5, %v4480_v15  ;;  %v1422_v27 = vsel %vm678_vm2, %v1420_v44, %v1421_v3  ;;  %v1561_v30 = vrot.slane %v1268_v8, 2  ;;  %v1565_v21 = vrot.slane %v1563_v61, 1  ;;  %v1566_v59 = vrot.slane %v1272_v4, 2 }
 0x102   : > { %4133 = vmatprep.mubr.msk.bf16.mxu1 %vm2439_vm5, %v4481_v36  ;;  %v5546_v43 = vmax.bf16 %v1675_v48, %v1639_v51  ;;  %v1271_v10 = vor.u32 %v1270_v17, %v1266_v11  ;;  %v1677_v1 = vrot.slane %v1160_v22, 2  ;;  %v1136_v2 = vsel %vm387_vm0, 4286644096, %v1097_v32 }
 0x103   : > { %v1562_v41 = vor.u32 %v1561_v30, %v1560_v12  ;;  %v1567_v47 = vor.u32 %v1566_v59, %v1565_v21  ;;  %v1161_v29 = vsel %vm387_vm0, %v1097_v32, 4286644096  ;;  %v1276_v25 = vshrl.u32 %v1136_v2, 16 }
 0x104   : > { %6282 = vst [vmem:[#allocation10_spill] sm:$0xff] %v5546_v43  ;;  %4176 = vmatmul.mubr.msk.bf16.gmra.mrb[16].mxu0 %vm2439_vm5, %v5546_v43  ;;  %v1275_v8 = vsel %vm453_vm1, %v1271_v10, %v1274_v42  ;;  %v1678_v4 = vsel %vm936_vm4, %v1676_v6, %v1677_v1  ;;  %v1278_v44 = vshll.u32 %v1136_v2, 16  ;;  %v1282_v36 = vshll.u32 %v1161_v29, 16 }
 0x105   : > { %v1352_v48 = vmax.bf16 %v1275_v8, %v1133_v63  ;;  %v1568_v22 = vsel %vm759_vm3, %v1562_v41, %v1567_v47  ;;  %v1423_v11 = vrot.slane %v1136_v2, 1  ;;  %v1424_v3 = vrot.slane %v1161_v29, 1  ;;  %v4482_v63 = vld [vmem:[%s4555_s26 + $0x28] sm:$0xff]  }
 0x106   : > { %v1280_v61 = vrot.slane %v1278_v44, 1  ;;  %v1284_v59 = vrot.slane %v1282_v36, 1  ;;  %v1569_v51 = vrot.slane %v1276_v25, 1  ;;  %v1570_v32 = vrot.slane %v1278_v44, 2  ;;  %v4483_v44 = vld [vmem:[%s4555_s26 + $0x30] sm:$0xff]  }
 0x107   : > { %v1464_v17 = vmax.bf16 %v1422_v27, %v1352_v48  ;;  %v1425_v12 = vsel %vm678_vm2, %v1423_v11, %v1424_v3  ;;  %v1572_v15 = vshrl.u32 %v1161_v29, 16  ;;  %v1575_v42 = vrot.slane %v1282_v36, 2 }
 0x108   : > { %v1281_v30 = vor.u32 %v1280_v61, %v1276_v25  ;;  %v1571_v6 = vor.u32 %v1570_v32, %v1569_v51  ;;  %v1679_v21 = vrot.slane %v1136_v2, 2  ;;  %v1680_v10 = vrot.slane %v1161_v29, 2 }
 0x109   : > { %4134 = vmatmul.mubr.msk.bf16.gmra.mrb[8].mxu1 %vm2439_vm5, %v4482_v63  ;;  %v1640_v47 = vmax.bf16 %v1568_v22, %v1464_v17  ;;  %v1574_v1 = vrot.slane %v1572_v15, 1  ;;  %v1466_v41 = vmax.bf16 %v5468_v35, %v1354_v13  ;;  %v6283_v8 = vshll.u32 %v5409_v50, 16 }
 0x10a   : > { %4137 = vmatprep.mubr.msk.bf16.mxu1 %vm2439_vm5, %v4483_v44  ;;  %v1285_v27 = vsel %vm453_vm1, %v1281_v30, %v1284_v59  ;;  %v1681_v25 = vsel %vm936_vm4, %v1679_v21, %v1680_v10  ;;  %v1581_v36 = vshrl.u32 %v5438_v62, 16  ;;  %v6284_v29 = vshll.u32 %v5438_v62, 16 }
 0x10b   : > { %v1579_v43 = vrot.slane %v6283_v8, 2  ;;  %v5568_v11 = vmax.bf16 %v1678_v4, %v1640_v47  ;;  %v1353_v22 = vmax.bf16 %v1285_v27, %v1136_v2  ;;  %v1576_v3 = vor.u32 %v1575_v42, %v1574_v1  ;;  %v4484_v47 = vld [vmem:[%s4555_s26 + $0x38] sm:$0xff]  }
 0x10c   : > { %v1584_v48 = vrot.slane %v6284_v29, 2  ;;  %v1583_v13 = vrot.slane %v1581_v36, 1  ;;  %v1682_v61 = vrot.slane %v5409_v50, 2  ;;  %v1683_v51 = vrot.slane %v5438_v62, 2  ;;  %v4485_v36 = vld [vmem:[%s4555_s26 + $0x40] sm:$0xff]  }
 0x10d   : > { %v1580_v35 = vor.u32 %v1579_v43, %v5536_v18  ;;  %v1305_v59 = vsel %vm453_vm1, %v5518_v49, %v5511_v39  ;;  %4179 = vmatprep.mubr.msk.bf16.mxu0 %vm2439_vm5, %v5568_v11  ;;  %v1465_v32 = vmax.bf16 %v1425_v12, %v1353_v22  ;;  %v1577_v4 = vsel %vm759_vm3, %v1571_v6, %v1576_v3 }
 0x10e   : > { %v1355_v2 = vmax.bf16 %v1305_v59, %v5481_v9  ;;  %v6285_v43 = vrot.slane %v5495_v19, 1  ;;  %v6286_v18 = vrot.slane %v5481_v9, 1  ;;  %v1585_v62 = vor.u32 %v1584_v48, %v1583_v13 }
 0x10f   : > { %v1684_v17 = vsel %vm936_vm4, %v1682_v61, %v1683_v51  ;;  %v1589_v39 = vor.u32 %v5508_v45, %v5506_v38  ;;  %v1685_v49 = vrot.slane %v5481_v9, 2  ;;  %v1641_v12 = vmax.bf16 %v1577_v4, %v1465_v32 }
 0x110   : > { %v1431_v50 = vsel %vm678_vm2, %v6286_v18, %v6285_v43  ;;  %v1306_v42 = vshrl.u32 %v5484_v28, 16  ;;  %v1308_v30 = vshll.u32 %v5484_v28, 16  ;;  %v1586_v6 = vsel %vm759_vm3, %v1580_v35, %v1585_v62 }
 0x111   : > { %v1467_v15 = vmax.bf16 %v1431_v50, %v1355_v2  ;;  %v6287_v21 = vor.u32 %v5513_v60, %v5520_v52  ;;  %v6288_v63 = vrot.slane %v5495_v19, 2  ;;  %v6289_v45 = vshll.u32 %v5498_v56, 16  ;;  %4138 = vmatmul.mubr.msk.bf16.gmra.mrb[12].mxu1 %vm2439_vm5, %v4484_v47 }
 0x112   : > { %v5603_v1 = vmax.bf16 %v1681_v25, %v1641_v12  ;;  %v1642_v8 = vmax.bf16 %v1586_v6, %v1466_v41  ;;  %v1310_v27 = vrot.slane %v1308_v30, 1  ;;  %4141 = vmatprep.mubr.msk.bf16.mxu1 %vm2439_vm5, %v4485_v36  ;;  %v1432_v52 = vrot.slane %v5484_v28, 1  ;;  %v4486_v6 = vld [vmem:[%s4555_s26 + $0x48] sm:$0xff]  }
 0x113   : > { %v1595_v10 = vsel %vm759_vm3, %v1589_v39, %v6287_v21  ;;  %v1687_v38 = vsel %vm936_vm4, %v1685_v49, %v6288_v63  ;;  %v1314_v9 = vrot.slane %v6289_v45, 1  ;;  %v1433_v19 = vrot.slane %v5498_v56, 1 }
 0x114   : > { %v1643_v44 = vmax.bf16 %v1595_v10, %v1467_v15  ;;  %v1596_v60 = vrot.slane %v1306_v42, 1  ;;  %v1597_v29 = vrot.slane %v1308_v30, 2  ;;  %4180 = vmatmul.mubr.msk.bf16.gmra.mrb[20].mxu0 %vm2439_vm5, %v5603_v1  ;;  %v5611_v48 = vmax.bf16 %v1684_v17, %v1642_v8 }
 0x115   : > { %v1311_v25 = vor.u32 %v1310_v27, %v1306_v42  ;;  %v1599_v41 = vshrl.u32 %v5498_v56, 16  ;;  %v1434_v3 = vsel %vm678_vm2, %v1432_v52, %v1433_v19  ;;  %v6290_v13 = vmov %v6289_v45 }
 0x116   : > { %v5613_v22 = vmax.bf16 %v1687_v38, %v1643_v44  ;;  %v1598_v35 = vor.u32 %v1597_v29, %v1596_v60  ;;  %v1602_v61 = vrot.slane %v6290_v13, 2  ;;  %v1688_v51 = vrot.slane %v5484_v28, 2  ;;  %4183 = vmatprep.mubr.msk.bf16.mxu0 %vm2439_vm5, %v5611_v48  ;;  %v4487_v38 = vld [vmem:[%s4555_s26 + $0x50] sm:$0xff]  }
 0x117   : > { %v1315_v59 = vsel %vm453_vm1, %v1311_v25, %v1314_v9  ;;  %v1601_v32 = vrot.slane %v1599_v41, 1  ;;  %v1689_v4 = vrot.slane %v5498_v56, 2  ;;  %v6291_v2 = vrot.slane %v5470_v57, 7 }
 0x118   : > { %v1356_v18 = vmax.bf16 %v1315_v59, %v5484_v28  ;;  %v1316_v50 = vshrl.u32 %v5489_v31, 16  ;;  %v1318_v62 = vshll.u32 %v5489_v31, 16  ;;  %v1435_v12 = vrot.slane %v5489_v31, 1 }
 0x119   : > { %v1165_v43 = vsel %vm387_vm0, %v6291_v2, 4286644096  ;;  %v1603_v39 = vor.u32 %v1602_v61, %v1601_v32  ;;  %v1690_v49 = vsel %vm936_vm4, %v1688_v51, %v1689_v4  ;;  %4142 = vmatmul.mubr.msk.bf16.gmra.mrb[16].mxu1 %vm2439_vm5, %v4486_v6  ;;  %v1691_v8 = vrot.slane %v5489_v31, 2 }
 0x11a   : > { %v1322_v17 = vshll.u32 %v1165_v43, 16  ;;  %v1436_v15 = vrot.slane %v1165_v43, 1  ;;  %v1468_v42 = vmax.bf16 %v1434_v3, %v1356_v18  ;;  %v1320_v56 = vrot.slane %v1318_v62, 1  ;;  %4145 = vmatprep.mubr.msk.bf16.mxu1 %vm2439_vm5, %v4487_v38 }
 0x11b   : > { %v1605_v57 = vrot.slane %v1316_v50, 1  ;;  %v1604_v28 = vsel %vm759_vm3, %v1598_v35, %v1603_v39  ;;  %v1606_v10 = vrot.slane %v1318_v62, 2  ;;  %v1608_v63 = vshrl.u32 %v1165_v43, 16 }
 0x11c   : > { %v1324_v30 = vrot.slane %v1322_v17, 1  ;;  %v1437_v21 = vsel %vm678_vm2, %v1435_v12, %v1436_v15  ;;  %v1644_v45 = vmax.bf16 %v1604_v28, %v1468_v42  ;;  %v1321_v9 = vor.u32 %v1320_v56, %v1316_v50  ;;  %4184 = vmatmul.mubr.msk.bf16.gmra.mrb[24].mxu0 %vm2439_vm5, %v5613_v22  ;;  %v4488_v12 = vld [vmem:[%s4555_s26 + $0x58] sm:$0xff]  }
 0x11d   : > { %v1611_v47 = vrot.slane %v1322_v17, 2  ;;  %v1607_v44 = vor.u32 %v1606_v10, %v1605_v57  ;;  %v1610_v27 = vrot.slane %v1608_v63, 1  ;;  %v1692_v36 = vrot.slane %v1165_v43, 2 }
 0x11e   : > { %v1737_v52 = vmax.bf16 %v5611_v48, %v5603_v1  ;;  %v5643_v19 = vmax.bf16 %v1690_v49, %v1644_v45  ;;  %v1325_v60 = vsel %vm453_vm1, %v1321_v9, %v1324_v30  ;;  %v1738_v29 = vmax.bf16 %v5613_v22, %v5611_v48 }
 0x11f   : > { %v1884_v25 = vsel %vm453_vm1, %v5119_v34, %v5103_v37  ;;  %v1357_v41 = vmax.bf16 %v1325_v60, %v5489_v31  ;;  %v1612_v3 = vor.u32 %v1611_v47, %v1610_v27  ;;  %v1693_v35 = vsel %vm936_vm4, %v1691_v8, %v1692_v36 }
 0x120   : > { %v1751_v13 = vmax.bf16 %v1737_v52, %v5613_v22  ;;  %4187 = vmatprep.mubr.msk.bf16.mxu0 %vm2439_vm5, %v5643_v19  ;;  %v1739_v61 = vmax.bf16 %v5643_v19, %v5613_v22  ;;  %v1752_v51 = vmax.bf16 %v1738_v29, %v5643_v19  ;;  %v2051_v59 = vmax.bf16 %v1884_v25, %v5083_v33 }
 0x121   : > { %v6292_v37 = vrot.slane %v5086_v20, 1  ;;  %v6293_v34 = vrot.slane %v5083_v33, 1  ;;  %v1469_v32 = vmax.bf16 %v1437_v21, %v1357_v41  ;;  %v1613_v4 = vsel %vm759_vm3, %v1607_v44, %v1612_v3  ;;  %4146 = vmatmul.mubr.msk.bf16.gmra.mrb[20].mxu1 %vm2439_vm5, %v4488_v12 }
 0x122   : > { %v1765_v2 = vmax.bf16 %v1751_v13, %v5643_v19  ;;  %v6294_v43 = vshrl.u32 %v5083_v33, 16  ;;  %v6295_v62 = vshll.u32 %v5083_v33, 16  ;;  %v2186_v39 = vor.u32 %v5131_v26, %v5143_v14  ;;  %v4489_v14 = vld [vmem:[%s4555_s26 + $0x60] sm:$0xff]  }
 0x123   : > { %v2101_v31 = vsel %vm678_vm2, %v6293_v34, %v6292_v37  ;;  %v2355_v49 = vrot.slane %v5083_v33, 2  ;;  %v1645_v15 = vmax.bf16 %v1613_v4, %v1469_v32  ;;  %v2356_v42 = vrot.slane %v5086_v20, 2  ;;  %4149 = vmatprep.mubr.msk.bf16.mxu1 %vm2439_vm5, %v4489_v14  ;;  %v6306_v37 = vld [vmem:[#allocation4_spill] sm:$0xff]  ;;  %v6307_v34 = vld [vmem:[#allocation5_spill] sm:$0xff]  ;;  %v4490_v4 = vld [vmem:[%s4555_s26 + $0x68] sm:$0xff]  }
 0x124   : > { %v2179_v18 = vrot.slane %v6294_v43, 1  ;;  %v2163_v50 = vmax.bf16 %v2101_v31, %v2051_v59  ;;  %v2180_v17 = vrot.slane %v6295_v62, 2  ;;  %v6296_v56 = vor.u32 %v5146_v7, %v5153_v5  ;;  %v6305_v59 = vld [vmem:[#allocation6_spill] sm:$0xff]  ;;  %v4491_v62 = vld [vmem:[%s4555_s26 + $0x70] sm:$0xff]  }
 0x125   : > { %v6297_v30 = vor.u32 %v5140_v0, %v5138_v24  ;;  %v6298_v6 = vrot.slane %v5096_v53, 2  ;;  %v6299_v26 = vrot.slane %v5093_v40, 2  ;;  %v6300_v21 = vshrl.u32 %v5110_v46, 16  ;;  %v6310_v43 = vld [vmem:[#allocation2_spill] sm:$0xff]  ;;  %v6313_v14 = vld [vmem:[#allocation8_spill] sm:$0xff] }
 0x126   : > { %v2181_v28 = vor.u32 %v2180_v17, %v2179_v18  ;;  %v2105_v24 = vrot.slane %v5110_v46, 1  ;;  %v1725_v0 = vmax.bf16 %v1693_v35, %v1645_v15  ;;  %v2357_v5 = vsel %vm936_vm4, %v2355_v49, %v2356_v42 }
 0x127   : > { %v2196_v57 = vsel %vm759_vm3, %v6297_v30, %v6296_v56  ;;  %v2360_v33 = vsel %vm936_vm4, %v6299_v26, %v6298_v6  ;;  %v1900_v7 = vor.u32 %v5128_v54, %v6300_v21  ;;  %v6301_v53 = vmov %v6300_v21  ;;  %v6312_v30 = vld [vmem:[#allocation7_spill] sm:$0xff] }
 0x128   : > { %v2340_v20 = vmax.bf16 %v2196_v57, %v5158_v16  ;;  %v2197_v40 = vrot.slane %v6301_v53, 1  ;;  %v6302_v10 = vshll.u32 %v5110_v46, 16  ;;  %v2187_v38 = vsel %vm759_vm3, %v2181_v28, %v2186_v39  ;;  %4188 = vmatmul.mubr.msk.bf16.gmra.mrb[28].mxu0 %vm2439_vm5, %v1725_v0 }
 0x129   : > { %v1904_v16 = vsel %vm453_vm1, %v1900_v7, %v5135_v58  ;;  %v6303_v9 = vrot.slane %v5113_v23, 1  ;;  %v5707_v47 = vmax.bf16 %v1739_v61, %v1725_v0  ;;  %v1766_v8 = vmax.bf16 %v1752_v51, %v1725_v0  ;;  %4150 = vmatmul.mubr.msk.bf16.gmra.mrb[24].mxu1 %vm2439_vm5, %v4490_v4 }
 0x12a   : > { %v2198_v63 = vrot.slane %v6302_v10, 2  ;;  %v2420_v45 = vmax.bf16 %v2360_v33, %v2340_v20  ;;  %v5709_v44 = vmax.bf16 %v1765_v2, %v1725_v0  ;;  %v2339_v27 = vmax.bf16 %v2187_v38, %v2163_v50  ;;  %4153 = vmatprep.mubr.msk.bf16.mxu1 %vm2439_vm5, %v4491_v62 }
 0x12b   : > { %v2107_v54 = vsel %vm678_vm2, %v2105_v24, %v6303_v9  ;;  %v2053_v36 = vmax.bf16 %v1904_v16, %v5110_v46  ;;  %v6304_v60 = vshll.u32 %v5113_v23, 16  ;;  %v2361_v58 = vrot.slane %v5110_v46, 2 }
 0x12c   : > { %v2199_v52 = vor.u32 %v2198_v63, %v2197_v40  ;;  %v1808_v25 = vrot.slane %v5709_v44, 7  ;;  %v5717_v41 = vrot.slane %v1766_v8, 7  ;;  %v1810_v3 = vrot.slane %v5707_v47, 7 }
 0x12d   : > { %v2203_v29 = vrot.slane %v6304_v60, 2  ;;  %v2419_v35 = vmax.bf16 %v2357_v5, %v2339_v27  ;;  %v2165_v13 = vmax.bf16 %v2107_v54, %v2053_v36  ;;  %v2362_v51 = vrot.slane %v5113_v23, 2  ;;  %v4492_v27 = vld [vmem:[%s4555_s26 + $0x78] sm:$0xff]  }
 0x12e   : > { %v6308_v31 = vmax.bf16 %v6306_v37, %v6307_v34  ;;  %v5731_v46 = vsel %vm387_vm0, 4286644096, %v1808_v25  ;;  %v5735_v2 = vsel %vm387_vm0, 4286644096, %v5717_v41  ;;  %v5740_v23 = vsel %vm387_vm0, 4286644096, %v1810_v3 }
 0x12f   : > { %v2204_v61 = vor.u32 %v2203_v29, %v5160_v55  ;;  %4193 = vmatprep.mubr.msk.bf16.mxu0 %vm2439_vm5, %v2419_v35  ;;  %v6309_v55 = vld [vmem:[#allocation3_spill] sm:$0xff]  ;;  %v2363_v39 = vsel %vm936_vm4, %v2361_v58, %v2362_v51  ;;  %v1730_v56 = vmax.bf16 %v6305_v59, %v6307_v34  ;;  %v1731_v57 = vmax.bf16 %v6312_v30, %v6305_v59 }
 0x130   : > { %v1768_v32 = vmax.bf16 %v6308_v31, %v6305_v59  ;;  %v6311_v18 = vmax.bf16 %v6309_v55, %v6310_v43  ;;  %v1729_v12 = vmax.bf16 %v6307_v34, %v6309_v55  ;;  %v1732_v28 = vmax.bf16 %v6313_v14, %v6312_v30  ;;  %4194 = vmatmul.mubr.msk.bf16.vlgmr.msra.gmra.mrb[0].mxu0 %vm2439_vm5, %v2420_v45 }
 0x131   : > { %v2205_v17 = vsel %vm759_vm3, %v2199_v52, %v2204_v61  ;;  %4154 = vmatmul.mubr.msk.bf16.gmra.mrb[28].mxu1 %vm2439_vm5, %v4492_v27  ;;  %v1745_v61 = vmax.bf16 %v1731_v57, %v6313_v14  ;;  %v2138_v44 = vrot.slane %v5731_v46, 1 }
 0x132   : > { %v1742_v50 = vmax.bf16 %v6311_v18, %v6307_v34  ;;  %v1798_v49 = vrot.slane %v1768_v32, 7  ;;  %v2341_v15 = vmax.bf16 %v2205_v17, %v2165_v13  ;;  %v1743_v33 = vmax.bf16 %v1729_v12, %v6305_v59  ;;  %v6314_v34 = vld [vmem:[#allocation9_spill] sm:$0xff]  ;;  %v6315_v17 = vld [vmem:[#allocation10_spill] sm:$0xff] }
 0x133   : > { %v1744_v13 = vmax.bf16 %v1730_v56, %v6312_v30  ;;  %v1746_v31 = vmax.bf16 %v1732_v28, %v6314_v34  ;;  %v1759_v43 = vmax.bf16 %v1745_v61, %v6314_v34 }
 0x134   : > { %v1756_v42 = vmax.bf16 %v1742_v50, %v6305_v59  ;;  %v1821_v6 = vsel %vm387_vm0, 4286644096, %v1798_v49  ;;  %v1862_v26 = vsel %vm387_vm0, %v1798_v49, 4286644096  ;;  %v2421_v20 = vmax.bf16 %v2363_v39, %v2341_v15 }
 0x135   : > { %v1905_v21 = vshrl.u32 %v1821_v6, 16  ;;  %v1907_v7 = vshll.u32 %v1821_v6, 16  ;;  %v1911_v24 = vshll.u32 %v1862_v26, 16  ;;  %v2108_v0 = vrot.slane %v1821_v6, 1 }
 0x136   : > { %v2109_v5 = vrot.slane %v1862_v26, 1  ;;  %v2209_v53 = vshrl.u32 %v1862_v26, 16  ;;  %v2364_v40 = vrot.slane %v1821_v6, 2  ;;  %4197 = vmatprep.mubr.msk.bf16.mxu0 %vm2439_vm5, %v2421_v20  ;;  %v2365_v45 = vrot.slane %v1862_v26, 2 }
 0x137   : > { %v1909_v10 = vrot.slane %v1907_v7, 1  ;;  %v1913_v63 = vrot.slane %v1911_v24, 1  ;;  %v2206_v38 = vrot.slane %v1905_v21, 1  ;;  %v2207_v16 = vrot.slane %v1907_v7, 2 }
 0x138   : > { %v2110_v9 = vsel %vm678_vm2, %v2108_v0, %v2109_v5  ;;  %v2211_v54 = vrot.slane %v2209_v53, 1  ;;  %v2212_v8 = vrot.slane %v1911_v24, 2  ;;  %v1769_v60 = vmax.bf16 %v1756_v42, %v6312_v30 }
 0x139   : > { %v1910_v36 = vor.u32 %v1909_v10, %v1905_v21  ;;  %v2208_v52 = vor.u32 %v2207_v16, %v2206_v38  ;;  %v1757_v29 = vmax.bf16 %v1743_v33, %v6312_v30  ;;  %v2366_v35 = vsel %vm936_vm4, %v2364_v40, %v2365_v45 }
 0x13a   : > { %v2213_v58 = vor.u32 %v2212_v8, %v2211_v54  ;;  %v1799_v59 = vrot.slane %v1769_v60, 7  ;;  %v1758_v55 = vmax.bf16 %v1744_v13, %v6313_v14  ;;  %v1760_v39 = vmax.bf16 %v1746_v31, %v6315_v17 }
 0x13b   : > { %v1914_v51 = vsel %vm453_vm1, %v1910_v36, %v1913_v63  ;;  %v1770_v37 = vmax.bf16 %v1757_v29, %v6313_v14 }
 0x13c   : > { %v2054_v32 = vmax.bf16 %v1914_v51, %v1821_v6  ;;  %v2214_v4 = vsel %vm759_vm3, %v2208_v52, %v2213_v58  ;;  %v1824_v18 = vsel %vm387_vm0, 4286644096, %v1799_v59  ;;  %v1863_v50 = vsel %vm387_vm0, %v1799_v59, 4286644096 }
 0x13d   : > { %v1800_v62 = vrot.slane %v1770_v37, 7  ;;  %v1915_v12 = vshrl.u32 %v1824_v18, 16  ;;  %v1917_v15 = vshll.u32 %v1824_v18, 16  ;;  %v1921_v42 = vshll.u32 %v1863_v50, 16 }
 0x13e   : > { %v2166_v49 = vmax.bf16 %v2110_v9, %v2054_v32  ;;  %v2111_v56 = vrot.slane %v1824_v18, 1  ;;  %v2112_v30 = vrot.slane %v1863_v50, 1  ;;  %v2218_v57 = vshrl.u32 %v1863_v50, 16 }
 0x13f   : > { %v2367_v6 = vrot.slane %v1824_v18, 2  ;;  %v1919_v33 = vrot.slane %v1917_v15, 1  ;;  %v1923_v28 = vrot.slane %v1921_v42, 1  ;;  %v2215_v20 = vrot.slane %v1915_v12, 1 }
 0x140   : > { %v2342_v26 = vmax.bf16 %v2214_v4, %v2166_v49  ;;  %v2113_v21 = vsel %vm678_vm2, %v2111_v56, %v2112_v30  ;;  %v2216_v7 = vrot.slane %v1917_v15, 2  ;;  %v2220_v24 = vrot.slane %v2218_v57, 1 }
 0x141   : > { %v2221_v0 = vrot.slane %v1921_v42, 2  ;;  %v1920_v53 = vor.u32 %v1919_v33, %v1915_v12  ;;  %v2368_v40 = vrot.slane %v1863_v50, 2  ;;  %v1827_v10 = vsel %vm387_vm0, 4286644096, %v1800_v62 }
 0x142   : > { %v2422_v5 = vmax.bf16 %v2366_v35, %v2342_v26  ;;  %v2217_v63 = vor.u32 %v2216_v7, %v2215_v20  ;;  %v1864_v16 = vsel %vm387_vm0, %v1800_v62, 4286644096  ;;  %v1925_v9 = vshrl.u32 %v1827_v10, 16 }
 0x143   : > { %v2222_v38 = vor.u32 %v2221_v0, %v2220_v24  ;;  %v1924_v54 = vsel %vm453_vm1, %v1920_v53, %v1923_v28  ;;  %v2369_v8 = vsel %vm936_vm4, %v2367_v6, %v2368_v40  ;;  %v1927_v45 = vshll.u32 %v1827_v10, 16 }
 0x144   : > { %4198 = vmatmul.mubr.msk.bf16.gmra.mrb[4].mxu0 %vm2439_vm5, %v2422_v5  ;;  %v1931_v27 = vshll.u32 %v1864_v16, 16  ;;  %v2055_v36 = vmax.bf16 %v1924_v54, %v1824_v18  ;;  %v2114_v60 = vrot.slane %v1827_v10, 1  ;;  %v2115_v29 = vrot.slane %v1864_v16, 1 }
 0x145   : > { %v2223_v52 = vsel %vm759_vm3, %v2217_v63, %v2222_v38  ;;  %v1929_v58 = vrot.slane %v1927_v45, 1  ;;  %v2224_v13 = vrot.slane %v1925_v9, 1  ;;  %v2225_v61 = vrot.slane %v1927_v45, 2 }
 0x146   : > { %v1933_v35 = vrot.slane %v1931_v27, 1  ;;  %v2167_v51 = vmax.bf16 %v2113_v21, %v2055_v36  ;;  %v2116_v59 = vsel %vm678_vm2, %v2114_v60, %v2115_v29  ;;  %v2227_v37 = vshrl.u32 %v1864_v16, 16 }
 0x147   : > { %v2230_v31 = vrot.slane %v1931_v27, 2  ;;  %v1930_v32 = vor.u32 %v1929_v58, %v1925_v9  ;;  %v2226_v4 = vor.u32 %v2225_v61, %v2224_v13  ;;  %v2370_v50 = vrot.slane %v1827_v10, 2 }
 0x148   : > { %v2371_v62 = vrot.slane %v1864_v16, 2  ;;  %v2343_v49 = vmax.bf16 %v2223_v52, %v2167_v51  ;;  %v2229_v12 = vrot.slane %v2227_v37, 1  ;;  %v1771_v18 = vmax.bf16 %v1758_v55, %v6314_v34 }
 0x149   : > { %v1772_v15 = vmax.bf16 %v1759_v43, %v6315_v17  ;;  %v1934_v42 = vsel %vm453_vm1, %v1930_v32, %v1933_v35  ;;  %v5795_v30 = vmax.bf16 %v1760_v39, %v5568_v11  ;;  %v1733_v57 = vmax.bf16 %v6314_v34, %v6313_v14 }
 0x14a   : > { %v2372_v56 = vsel %vm936_vm4, %v2370_v50, %v2371_v62  ;;  %v2423_v6 = vmax.bf16 %v2369_v8, %v2343_v49  ;;  %v2056_v26 = vmax.bf16 %v1934_v42, %v1827_v10  ;;  %v2231_v33 = vor.u32 %v2230_v31, %v2229_v12 }
 0x14b   : > { %v1801_v28 = vrot.slane %v1771_v18, 7  ;;  %v1802_v20 = vrot.slane %v1772_v15, 7  ;;  %v1803_v21 = vrot.slane %v5795_v30, 7  ;;  %v5801_v55 = vmax.bf16 %v1733_v57, %v6315_v17 }
 0x14c   : > { %v1734_v43 = vmax.bf16 %v6315_v17, %v6314_v34  ;;  %4201 = vmatprep.mubr.msk.bf16.mxu0 %vm2439_vm5, %v2423_v6  ;;  %v2168_v39 = vmax.bf16 %v2116_v59, %v2056_v26  ;;  %v2232_v7 = vsel %vm759_vm3, %v2226_v4, %v2231_v33 }
 0x14d   : > { %v1830_v14 = vsel %vm387_vm0, 4286644096, %v1801_v28  ;;  %v1865_v24 = vsel %vm387_vm0, %v1801_v28, 4286644096  ;;  %v1833_v13 = vsel %vm387_vm0, 4286644096, %v1802_v20 }
 0x14e   : > { %v1935_v0 = vshrl.u32 %v1830_v14, 16  ;;  %v1937_v5 = vshll.u32 %v1830_v14, 16  ;;  %v1941_v53 = vshll.u32 %v1865_v24, 16  ;;  %v2117_v40 = vrot.slane %v1830_v14, 1 }
 0x14f   : > { %v2344_v10 = vmax.bf16 %v2232_v7, %v2168_v39  ;;  %v2118_v63 = vrot.slane %v1865_v24, 1  ;;  %v2236_v38 = vshrl.u32 %v1865_v24, 16  ;;  %v2373_v16 = vrot.slane %v1830_v14, 2 }
 0x150   : > { %v1939_v9 = vrot.slane %v1937_v5, 1  ;;  %v1943_v54 = vrot.slane %v1941_v53, 1  ;;  %v2233_v8 = vrot.slane %v1935_v0, 1  ;;  %v2234_v45 = vrot.slane %v1937_v5, 2 }
 0x151   : > { %v2424_v27 = vmax.bf16 %v2372_v56, %v2344_v10  ;;  %v2119_v36 = vsel %vm678_vm2, %v2117_v40, %v2118_v63  ;;  %v2238_v52 = vrot.slane %v2236_v38, 1  ;;  %v2239_v60 = vrot.slane %v1941_v53, 2 }
 0x152   : > { %v1940_v29 = vor.u32 %v1939_v9, %v1935_v0  ;;  %v2235_v58 = vor.u32 %v2234_v45, %v2233_v8  ;;  %v2374_v35 = vrot.slane %v1865_v24, 2  ;;  %v1866_v51 = vsel %vm387_vm0, %v1802_v20, 4286644096 }
 0x153   : > { %4202 = vmatmul.mubr.msk.bf16.gmra.mrb[8].mxu0 %vm2439_vm5, %v2424_v27  ;;  %v2240_v61 = vor.u32 %v2239_v60, %v2238_v52  ;;  %v1945_v59 = vshrl.u32 %v1833_v13, 16  ;;  %v1947_v37 = vshll.u32 %v1833_v13, 16  ;;  %v1951_v4 = vshll.u32 %v1866_v51, 16 }
 0x154   : > { %v1944_v31 = vsel %vm453_vm1, %v1940_v29, %v1943_v54  ;;  %v2375_v32 = vsel %vm936_vm4, %v2373_v16, %v2374_v35  ;;  %v2120_v50 = vrot.slane %v1833_v13, 1  ;;  %v2121_v18 = vrot.slane %v1866_v51, 1 }
 0x155   : > { %v2057_v62 = vmax.bf16 %v1944_v31, %v1830_v14  ;;  %v2241_v49 = vsel %vm759_vm3, %v2235_v58, %v2240_v61  ;;  %v1949_v12 = vrot.slane %v1947_v37, 1  ;;  %v1953_v15 = vrot.slane %v1951_v4, 1 }
 0x156   : > { %v2242_v42 = vrot.slane %v1945_v59, 1  ;;  %v2243_v56 = vrot.slane %v1947_v37, 2  ;;  %v2245_v30 = vshrl.u32 %v1866_v51, 16  ;;  %v2122_v26 = vsel %vm678_vm2, %v2120_v50, %v2121_v18 }
 0x157   : > { %v2169_v57 = vmax.bf16 %v2119_v36, %v2057_v62  ;;  %v1950_v6 = vor.u32 %v1949_v12, %v1945_v59  ;;  %v2248_v33 = vrot.slane %v1951_v4, 2  ;;  %v2376_v39 = vrot.slane %v1833_v13, 2 }
 0x158   : > { %v2244_v28 = vor.u32 %v2243_v56, %v2242_v42  ;;  %v2247_v20 = vrot.slane %v2245_v30, 1  ;;  %v2377_v7 = vrot.slane %v1866_v51, 2  ;;  %v1836_v0 = vsel %vm387_vm0, 4286644096, %v1803_v21 }
 0x159   : > { %v2345_v24 = vmax.bf16 %v2241_v49, %v2169_v57  ;;  %v1954_v14 = vsel %vm453_vm1, %v1950_v6, %v1953_v15  ;;  %v1867_v5 = vsel %vm387_vm0, %v1803_v21, 4286644096  ;;  %v1955_v63 = vshrl.u32 %v1836_v0, 16 }
 0x15a   : > { %v2058_v53 = vmax.bf16 %v1954_v14, %v1833_v13  ;;  %v2249_v40 = vor.u32 %v2248_v33, %v2247_v20  ;;  %v2378_v10 = vsel %vm936_vm4, %v2376_v39, %v2377_v7  ;;  %v1957_v16 = vshll.u32 %v1836_v0, 16 }
 0x15b   : > { %v2425_v38 = vmax.bf16 %v2375_v32, %v2345_v24  ;;  %v1961_v9 = vshll.u32 %v1867_v5, 16  ;;  %v2123_v54 = vrot.slane %v1836_v0, 1  ;;  %v2124_v27 = vrot.slane %v1867_v5, 1 }
 0x15c   : > { %v2170_v8 = vmax.bf16 %v2122_v26, %v2058_v53  ;;  %v2250_v45 = vsel %vm759_vm3, %v2244_v28, %v2249_v40  ;;  %v2251_v36 = vrot.slane %v1955_v63, 1  ;;  %v1959_v52 = vrot.slane %v1957_v16, 1 }
 0x15d   : > { %4205 = vmatprep.mubr.msk.bf16.mxu0 %vm2439_vm5, %v2425_v38  ;;  %v1963_v60 = vrot.slane %v1961_v9, 1  ;;  %v2252_v29 = vrot.slane %v1957_v16, 2  ;;  %v2254_v21 = vshrl.u32 %v1867_v5, 16  ;;  %v2125_v35 = vsel %vm678_vm2, %v2123_v54, %v2124_v27 }
 0x15e   : > { %v2346_v58 = vmax.bf16 %v2250_v45, %v2170_v8  ;;  %v2257_v13 = vrot.slane %v1961_v9, 2  ;;  %v2379_v61 = vrot.slane %v1836_v0, 2  ;;  %v1960_v51 = vor.u32 %v1959_v52, %v1955_v63 }
 0x15f   : > { %v2253_v59 = vor.u32 %v2252_v29, %v2251_v36  ;;  %v2256_v37 = vrot.slane %v2254_v21, 1  ;;  %v2380_v31 = vrot.slane %v1867_v5, 2  ;;  %v1761_v4 = vmax.bf16 %v5801_v55, %v5568_v11 }
 0x160   : > { %v2426_v32 = vmax.bf16 %v2378_v10, %v2346_v58  ;;  %v1748_v50 = vmax.bf16 %v1734_v43, %v5568_v11  ;;  %v1735_v62 = vmax.bf16 %v5568_v11, %v6315_v17  ;;  %v1964_v49 = vsel %vm453_vm1, %v1960_v51, %v1963_v60 }
 0x161   : > { %v2258_v12 = vor.u32 %v2257_v13, %v2256_v37  ;;  %v2381_v18 = vsel %vm936_vm4, %v2379_v61, %v2380_v31  ;;  %v1736_v15 = vmax.bf16 %v5603_v1, %v5568_v11  ;;  %v2059_v42 = vmax.bf16 %v1964_v49, %v1836_v0 }
 0x162   : > { %4206 = vmatmul.mubr.msk.bf16.gmra.mrb[12].mxu0 %vm2439_vm5, %v2426_v32  ;;  %v1774_v55 = vmax.bf16 %v1761_v4, %v5603_v1  ;;  %v1762_v56 = vmax.bf16 %v1748_v50, %v5603_v1  ;;  %v1749_v34 = vmax.bf16 %v1735_v62, %v5603_v1  ;;  %v5847_v30 = vsel %vm387_vm0, %v1808_v25, 4286644096 }
 0x163   : > { %v2259_v43 = vsel %vm759_vm3, %v2253_v59, %v2258_v12  ;;  %v5842_v17 = vmax.bf16 %v1736_v15, %v5611_v48  ;;  %v2005_v11 = vshrl.u32 %v5731_v46, 16  ;;  %v2171_v57 = vmax.bf16 %v2125_v35, %v2059_v42 }
 0x164   : > { %v1804_v6 = vrot.slane %v1774_v55, 7  ;;  %v1775_v26 = vmax.bf16 %v1762_v56, %v5611_v48  ;;  %v1763_v33 = vmax.bf16 %v1749_v34, %v5611_v48  ;;  %v2007_v28 = vshll.u32 %v5731_v46, 16 }
 0x165   : > { %v1764_v1 = vmax.bf16 %v5842_v17, %v5613_v22  ;;  %v2011_v20 = vshll.u32 %v5847_v30, 16  ;;  %v2347_v39 = vmax.bf16 %v2259_v43, %v2171_v57 }
 0x166   : > { %v1839_v25 = vsel %vm387_vm0, 4286644096, %v1804_v6  ;;  %v1868_v7 = vsel %vm387_vm0, %v1804_v6, 4286644096  ;;  %v1805_v24 = vrot.slane %v1775_v26, 7  ;;  %v1776_v6 = vmax.bf16 %v1763_v33, %v5613_v22 }
 0x167   : > { %v1965_v14 = vshrl.u32 %v1839_v25, 16  ;;  %v1967_v0 = vshll.u32 %v1839_v25, 16  ;;  %v1971_v5 = vshll.u32 %v1868_v7, 16  ;;  %v2126_v53 = vrot.slane %v1839_v25, 1 }
 0x168   : > { %v2427_v48 = vmax.bf16 %v2381_v18, %v2347_v39  ;;  %v2127_v40 = vrot.slane %v1868_v7, 1  ;;  %v2263_v10 = vshrl.u32 %v1868_v7, 16  ;;  %v2382_v63 = vrot.slane %v1839_v25, 2 }
 0x169   : > { %v1969_v38 = vrot.slane %v1967_v0, 1  ;;  %v1973_v16 = vrot.slane %v1971_v5, 1  ;;  %v2260_v9 = vrot.slane %v1965_v14, 1  ;;  %v2261_v54 = vrot.slane %v1967_v0, 2 }
 0x16a   : > { %4209 = vmatprep.mubr.msk.bf16.mxu0 %vm2439_vm5, %v2427_v48  ;;  %v2128_v8 = vsel %vm678_vm2, %v2126_v53, %v2127_v40  ;;  %v2265_v45 = vrot.slane %v2263_v10, 1  ;;  %v2266_v27 = vrot.slane %v1971_v5, 2  ;;  %v2383_v36 = vrot.slane %v1868_v7, 2 }
 0x16b   : > { %v1970_v52 = vor.u32 %v1969_v38, %v1965_v14  ;;  %v2262_v60 = vor.u32 %v2261_v54, %v2260_v9  ;;  %v1842_v29 = vsel %vm387_vm0, 4286644096, %v1805_v24  ;;  %v1869_v21 = vsel %vm387_vm0, %v1805_v24, 4286644096 }
 0x16c   : > { %v2267_v58 = vor.u32 %v2266_v27, %v2265_v45  ;;  %v2384_v35 = vsel %vm936_vm4, %v2382_v63, %v2383_v36  ;;  %v1975_v13 = vshrl.u32 %v1842_v29, 16  ;;  %v1977_v61 = vshll.u32 %v1842_v29, 16 }
 0x16d   : > { %v1974_v51 = vsel %vm453_vm1, %v1970_v52, %v1973_v16  ;;  %v1981_v59 = vshll.u32 %v1869_v21, 16  ;;  %v2129_v37 = vrot.slane %v1842_v29, 1  ;;  %v2130_v31 = vrot.slane %v1869_v21, 1 }
 0x16e   : > { %v2060_v32 = vmax.bf16 %v1974_v51, %v1839_v25  ;;  %v2268_v4 = vsel %vm759_vm3, %v2262_v60, %v2267_v58  ;;  %v1979_v50 = vrot.slane %v1977_v61, 1  ;;  %v2269_v62 = vrot.slane %v1975_v13, 1 }
 0x16f   : > { %v1983_v49 = vrot.slane %v1981_v59, 1  ;;  %v2131_v12 = vsel %vm678_vm2, %v2129_v37, %v2130_v31  ;;  %v2270_v18 = vrot.slane %v1977_v61, 2  ;;  %v2272_v15 = vshrl.u32 %v1869_v21, 16 }
 0x170   : > { %v2172_v42 = vmax.bf16 %v2128_v8, %v2060_v32  ;;  %v1980_v55 = vor.u32 %v1979_v50, %v1975_v13  ;;  %v2275_v56 = vrot.slane %v1981_v59, 2  ;;  %v2385_v34 = vrot.slane %v1842_v29, 2 }
 0x171   : > { %v2271_v43 = vor.u32 %v2270_v18, %v2269_v62  ;;  %v2274_v17 = vrot.slane %v2272_v15, 1  ;;  %v2386_v57 = vrot.slane %v1869_v21, 2  ;;  %v1777_v25 = vmax.bf16 %v1764_v1, %v5643_v19 }
 0x172   : > { %v2348_v26 = vmax.bf16 %v2268_v4, %v2172_v42  ;;  %v1984_v39 = vsel %vm453_vm1, %v1980_v55, %v1983_v49  ;;  %v2009_v7 = vrot.slane %v2007_v28, 1  ;;  %v1806_v5 = vrot.slane %v1776_v6, 7 }
 0x173   : > { %v2061_v24 = vmax.bf16 %v1984_v39, %v1842_v29  ;;  %v2276_v14 = vor.u32 %v2275_v56, %v2274_v17  ;;  %v2387_v0 = vsel %vm936_vm4, %v2385_v34, %v2386_v57  ;;  %v1807_v48 = vrot.slane %v1777_v25, 7 }
 0x174   : > { %v2428_v53 = vmax.bf16 %v2384_v35, %v2348_v26  ;;  %v2010_v40 = vor.u32 %v2009_v7, %v2005_v11  ;;  %v2013_v22 = vrot.slane %v2011_v20, 1  ;;  %v1845_v19 = vsel %vm387_vm0, 4286644096, %v1806_v5 }
 0x175   : > { %v2173_v33 = vmax.bf16 %v2131_v12, %v2061_v24  ;;  %v2277_v10 = vsel %vm759_vm3, %v2271_v43, %v2276_v14  ;;  %v1870_v1 = vsel %vm387_vm0, %v1806_v5, 4286644096  ;;  %v1985_v63 = vshrl.u32 %v1845_v19, 16 }
 0x176   : > { %4210 = vmatmul.mubr.msk.bf16.gmra.mrb[16].mxu0 %vm2439_vm5, %v2428_v53  ;;  %v1987_v38 = vshll.u32 %v1845_v19, 16  ;;  %v1991_v16 = vshll.u32 %v1870_v1, 16  ;;  %v2132_v9 = vrot.slane %v1845_v19, 1  ;;  %v2133_v8 = vrot.slane %v1870_v1, 1 }
 0x177   : > { %v2349_v54 = vmax.bf16 %v2277_v10, %v2173_v33  ;;  %v2281_v45 = vshrl.u32 %v1870_v1, 16  ;;  %v2388_v27 = vrot.slane %v1845_v19, 2  ;;  %v2278_v60 = vrot.slane %v1985_v63, 1 }
 0x178   : > { %v1989_v36 = vrot.slane %v1987_v38, 1  ;;  %v1993_v52 = vrot.slane %v1991_v16, 1  ;;  %v2279_v29 = vrot.slane %v1987_v38, 2  ;;  %v2134_v58 = vsel %vm678_vm2, %v2132_v9, %v2133_v8 }
 0x179   : > { %v2429_v21 = vmax.bf16 %v2387_v0, %v2349_v54  ;;  %v2283_v35 = vrot.slane %v2281_v45, 1  ;;  %v2284_v13 = vrot.slane %v1991_v16, 2  ;;  %v2389_v59 = vrot.slane %v1870_v1, 2 }
 0x17a   : > { %v1990_v61 = vor.u32 %v1989_v36, %v1985_v63  ;;  %v2280_v51 = vor.u32 %v2279_v29, %v2278_v60  ;;  %v1848_v37 = vsel %vm387_vm0, 4286644096, %v1807_v48  ;;  %v1871_v32 = vsel %vm387_vm0, %v1807_v48, 4286644096 }
 0x17b   : > { %4213 = vmatprep.mubr.msk.bf16.mxu0 %vm2439_vm5, %v2429_v21  ;;  %v2285_v31 = vor.u32 %v2284_v13, %v2283_v35  ;;  %v1995_v4 = vshrl.u32 %v1848_v37, 16  ;;  %v1997_v50 = vshll.u32 %v1848_v37, 16  ;;  %v2390_v49 = vsel %vm936_vm4, %v2388_v27, %v2389_v59 }
 0x17c   : > { %v1994_v62 = vsel %vm453_vm1, %v1990_v61, %v1993_v52  ;;  %v2001_v12 = vshll.u32 %v1871_v32, 16  ;;  %v2135_v18 = vrot.slane %v1848_v37, 1  ;;  %v2136_v56 = vrot.slane %v1871_v32, 1 }
 0x17d   : > { %v2062_v15 = vmax.bf16 %v1994_v62, %v1845_v19  ;;  %v2286_v42 = vsel %vm759_vm3, %v2280_v51, %v2285_v31  ;;  %v1999_v55 = vrot.slane %v1997_v50, 1  ;;  %v2287_v43 = vrot.slane %v1995_v4, 1 }
 0x17e   : > { %v2003_v34 = vrot.slane %v2001_v12, 1  ;;  %v2288_v17 = vrot.slane %v1997_v50, 2  ;;  %v2290_v57 = vshrl.u32 %v1871_v32, 16  ;;  %v2137_v39 = vsel %vm678_vm2, %v2135_v18, %v2136_v56 }
 0x17f   : > { %v2174_v6 = vmax.bf16 %v2134_v58, %v2062_v15  ;;  %v2000_v26 = vor.u32 %v1999_v55, %v1995_v4  ;;  %v2293_v25 = vrot.slane %v2001_v12, 2  ;;  %v2391_v14 = vrot.slane %v1848_v37, 2 }
 0x180   : > { %v2289_v7 = vor.u32 %v2288_v17, %v2287_v43  ;;  %v2292_v24 = vrot.slane %v2290_v57, 1  ;;  %v2392_v0 = vrot.slane %v1871_v32, 2  ;;  %v2014_v48 = vsel %vm453_vm1, %v2010_v40, %v2013_v22 }
 0x181   : > { %v2350_v5 = vmax.bf16 %v2286_v42, %v2174_v6  ;;  %v2004_v53 = vsel %vm453_vm1, %v2000_v26, %v2003_v34  ;;  %v2139_v33 = vrot.slane %v5847_v30, 1  ;;  %v2064_v63 = vmax.bf16 %v2014_v48, %v5731_v46 }
 0x182   : > { %v2063_v10 = vmax.bf16 %v2004_v53, %v1848_v37  ;;  %v2294_v19 = vor.u32 %v2293_v25, %v2292_v24  ;;  %v2393_v1 = vsel %vm936_vm4, %v2391_v14, %v2392_v0  ;;  %v2296_v9 = vrot.slane %v2005_v11, 1 }
 0x183   : > { %v2430_v38 = vmax.bf16 %v2390_v49, %v2350_v5  ;;  %v2140_v16 = vsel %vm678_vm2, %v2138_v44, %v2139_v33  ;;  %v2297_v54 = vrot.slane %v2007_v28, 2  ;;  %v2299_v45 = vshrl.u32 %v5847_v30, 16 }
 0x184   : > { %v2175_v40 = vmax.bf16 %v2137_v39, %v2063_v10  ;;  %v2295_v22 = vsel %vm759_vm3, %v2289_v7, %v2294_v19  ;;  %v2176_v8 = vmax.bf16 %v2140_v16, %v2064_v63  ;;  %v2302_v36 = vrot.slane %v2011_v20, 2 }
 0x185   : > { %4214 = vmatmul.mubr.msk.bf16.gmra.mrb[20].mxu0 %vm2439_vm5, %v2430_v38  ;;  %v2298_v27 = vor.u32 %v2297_v54, %v2296_v9  ;;  %v2394_v44 = vrot.slane %v5731_v46, 2  ;;  %v2395_v52 = vrot.slane %v5847_v30, 2  ;;  %v2301_v60 = vrot.slane %v2299_v45, 1 }
 0x186   : > { %v2351_v11 = vmax.bf16 %v2295_v22, %v2175_v40  ;;  %v1873_v28 = vsel %vm387_vm0, %v5717_v41, 4286644096  ;;  %v2015_v29 = vshrl.u32 %v5735_v2, 16  ;;  %v2017_v58 = vshll.u32 %v5735_v2, 16 }
 0x187   : > { %v2396_v21 = vsel %vm936_vm4, %v2394_v44, %v2395_v52  ;;  %v2021_v35 = vshll.u32 %v1873_v28, 16  ;;  %v2141_v13 = vrot.slane %v5735_v2, 1  ;;  %v2303_v20 = vor.u32 %v2302_v36, %v2301_v60 }
 0x188   : > { %v2431_v61 = vmax.bf16 %v2393_v1, %v2351_v11  ;;  %v2142_v51 = vrot.slane %v1873_v28, 1  ;;  %v2305_v46 = vrot.slane %v2015_v29, 1  ;;  %v2019_v59 = vrot.slane %v2017_v58, 1 }
 0x189   : > { %v2023_v30 = vrot.slane %v2021_v35, 1  ;;  %v2306_v37 = vrot.slane %v2017_v58, 2  ;;  %v2308_v31 = vshrl.u32 %v1873_v28, 16  ;;  %v2304_v41 = vsel %vm759_vm3, %v2298_v27, %v2303_v20 }
 0x18a   : > { %4217 = vmatprep.mubr.msk.bf16.mxu0 %vm2439_vm5, %v2431_v61  ;;  %v2143_v32 = vsel %vm678_vm2, %v2141_v13, %v2142_v51  ;;  %v2311_v4 = vrot.slane %v2021_v35, 2  ;;  %v2397_v50 = vrot.slane %v5735_v2, 2  ;;  %v2352_v62 = vmax.bf16 %v2304_v41, %v2176_v8 }
 0x18b   : > { %v2020_v49 = vor.u32 %v2019_v59, %v2015_v29  ;;  %v2307_v12 = vor.u32 %v2306_v37, %v2305_v46  ;;  %v2310_v18 = vrot.slane %v2308_v31, 1  ;;  %v2398_v15 = vrot.slane %v1873_v28, 2 }
 0x18c   : > { %v1874_v42 = vsel %vm387_vm0, %v1810_v3, 4286644096  ;;  %v2025_v55 = vshrl.u32 %v5740_v23, 16  ;;  %v2027_v56 = vshll.u32 %v5740_v23, 16  ;;  %v2432_v34 = vmax.bf16 %v2396_v21, %v2352_v62 }
 0x18d   : > { %v2024_v43 = vsel %vm453_vm1, %v2020_v49, %v2023_v30  ;;  %v2312_v17 = vor.u32 %v2311_v4, %v2310_v18  ;;  %v2031_v57 = vshll.u32 %v1874_v42, 16  ;;  %v2399_v26 = vsel %vm936_vm4, %v2397_v50, %v2398_v15 }
 0x18e   : > { %v2065_v6 = vmax.bf16 %v2024_v43, %v5735_v2  ;;  %v2029_v39 = vrot.slane %v2027_v56, 1  ;;  %v2144_v25 = vrot.slane %v5740_v23, 1  ;;  %4218 = vmatmul.mubr.msk.bf16.gmra.mrb[24].mxu0 %vm2439_vm5, %v2432_v34  ;;  %v2145_v7 = vrot.slane %v1874_v42, 1 }
 0x18f   : > { %v2313_v47 = vsel %vm759_vm3, %v2307_v12, %v2312_v17  ;;  %v2033_v3 = vrot.slane %v2031_v57, 1  ;;  %v2314_v24 = vrot.slane %v2025_v55, 1  ;;  %v2315_v5 = vrot.slane %v2027_v56, 2 }
 0x190   : > { %v2177_v14 = vmax.bf16 %v2143_v32, %v2065_v6  ;;  %v2030_v0 = vor.u32 %v2029_v39, %v2025_v55  ;;  %v2317_v53 = vshrl.u32 %v1874_v42, 16  ;;  %v2146_v48 = vsel %vm678_vm2, %v2144_v25, %v2145_v7 }
 0x191   : > { %v2320_v33 = vrot.slane %v2031_v57, 2  ;;  %v2400_v2 = vrot.slane %v5740_v23, 2  ;;  %v2401_v10 = vrot.slane %v1874_v42, 2  ;;  %v2316_v63 = vor.u32 %v2315_v5, %v2314_v24  ;;  %v5980_v42 = vld [vmem:[%s6237_s2] ss:$0 sm:$0xff] }
 0x192   : > { %v2353_v19 = vmax.bf16 %v2313_v47, %v2177_v14  ;;  %v2034_v1 = vsel %vm453_vm1, %v2030_v0, %v2033_v3  ;;  %v2319_v38 = vrot.slane %v2317_v53, 1 }
 0x193   : > { %v2066_v16 = vmax.bf16 %v2034_v1, %v5740_v23  ;;  %v2402_v8 = vsel %vm936_vm4, %v2400_v2, %v2401_v10 }
 0x194   : > { %v2433_v9 = vmax.bf16 %v2399_v26, %v2353_v19  ;;  %v2321_v54 = vor.u32 %v2320_v33, %v2319_v38 }
 0x195   : > { %v2178_v40 = vmax.bf16 %v2146_v48, %v2066_v16 }
 0x196   : > { %4221 = vmatprep.mubr.msk.bf16.mxu0 %vm2439_vm5, %v2433_v9  ;;  %v2322_v22 = vsel %vm759_vm3, %v2316_v63, %v2321_v54 }
 0x197   : > { %v2354_v45 = vmax.bf16 %v2322_v22, %v2178_v40 }
 0x199   : > { %v2434_v27 = vmax.bf16 %v2402_v8, %v2354_v45 }
 0x19b   : > { %4222 = vmatmul.mubr.msk.bf16.gmra.mrb[28].mxu0 %vm2439_vm5, %v2434_v27 }
 0x1cc   : > { %v4127_v36 = vpop.f32.mrb[0].mxu1 }
 0x1cd   : > { %v2737_v44 = vpop.f32.mrb[1].mxu1 }
 0x1ce   : > { %v4128_v52 = vpop.f32.mrb[2].mxu1 }
 0x1cf   : > { %v2740_v11 = vpop.f32.mrb[3].mxu1 }
 0x1d4   : > { %v4131_v60 = vpop.f32.mrb[4].mxu1 }
 0x1d5   : > { %v2753_v28 = vpop.f32.mrb[5].mxu1 }
 0x1d6   : > { %v4132_v23 = vpop.f32.mrb[6].mxu1 }
 0x1d7   : > { %v2756_v29 = vpop.f32.mrb[7].mxu1 }
 0x1dc   : > { %v5937_v21 = vpop.f32.mrb[8].mxu1 }
 0x1dd   : > { %v5939_v58 = vpop.f32.mrb[9].mxu1 }
 0x1de   : > { %v5941_v35 = vpop.f32.mrb[10].mxu1 }
 0x1df   : > { %v5943_v13 = vpop.f32.mrb[11].mxu1 }
 0x1e4   : > { %v5945_v61 = vpop.f32.mrb[12].mxu1 }
 0x1e5   : > { %v5947_v20 = vpop.f32.mrb[13].mxu1 }
 0x1e6   : > { %v5949_v51 = vpop.f32.mrb[14].mxu1 }
 0x1e7   : > { %v5951_v46 = vpop.f32.mrb[15].mxu1 }
 0x1ec   : > { %v5953_v59 = vpop.f32.mrb[16].mxu1 }
 0x1ed   : > { %v5955_v30 = vpop.f32.mrb[17].mxu1 }
 0x1ee   : > { %v5957_v37 = vpop.f32.mrb[18].mxu1 }
 0x1ef   : > { %v5959_v31 = vpop.f32.mrb[19].mxu1 }
 0x1f4   : > { %v5961_v41 = vpop.f32.mrb[20].mxu1 }
 0x1f5   : > { %v5963_v32 = vpop.f32.mrb[21].mxu1 }
 0x1f6   : > { %v5965_v4 = vpop.f32.mrb[22].mxu1 }
 0x1f7   : > { %v5967_v50 = vpop.f32.mrb[23].mxu1 }
 0x1fc   : > { %v5969_v62 = vpop.f32.mrb[24].mxu1 }
 0x1fd   : > { %v5971_v49 = vpop.f32.mrb[25].mxu1 }
 0x1fe   : > { %v5973_v12 = vpop.f32.mrb[26].mxu1 }
 0x1ff   : > { %v5975_v18 = vpop.f32.mrb[27].mxu1 }
 0x203   : > { %v4195_v15 = vpop.f32.mrb[0].mxu0 }
 0x204   : > { %v4225_v55 = vadd.f32 %v4195_v15, %v4127_v36  ;;  %v3193_v56 = vpop.f32.mrb[1].mxu0  ;;  %v5983_v26 = vpop.f32.mrb[28].mxu1 }
 0x205   : > { %v4226_v34 = vadd.f32 %v3193_v56, %v2737_v44  ;;  %v4196_v43 = vpop.f32.mrb[2].mxu0  ;;  %v5986_v47 = vpop.f32.mrb[29].mxu1 }
 0x206   : > { %v3361_v17 = vadd.f32 %v4225_v55, %v5980_v42  ;;  %v4227_v57 = vadd.f32 %v4196_v43, %v4128_v52  ;;  %v3196_v6 = vpop.f32.mrb[3].mxu0  ;;  %v5989_v24 = vpop.f32.mrb[30].mxu1 }
 0x207   : > { %v3359_v39 = vadd.f32 %v4226_v34, %v5980_v42  ;;  %v4228_v25 = vadd.f32 %v3196_v6, %v2740_v11  ;;  %v5994_v5 = vpop.f32.mrb[31].mxu1 }
 0x208   : > { %v3924_v3 = vmul.f32 -1.442695, %v3361_v17  ;;  %v3362_v7 = vadd.f32 %v4227_v57, %v5980_v42 }
 0x209   : > { %v3922_v14 = vmul.f32 -1.442695, %v3359_v39  ;;  %v5992_v0 = vadd.f32 %v4228_v25, %v5980_v42 }
 0x20a   : > { %4349 = vpow2.f32 %v3924_v3  ;;  %v3925_v53 = vmul.f32 -1.442695, %v3362_v7 }
 0x20b   : > { %4351 = vpow2.f32 %v3922_v14  ;;  %v3923_v48 = vmul.f32 -1.442695, %v5992_v0 }
 0x20c   : > { %4353 = vpow2.f32 %v3925_v53 }
 0x20d   : > { %4355 = vpow2.f32 %v3923_v48 }
 0x214   : > { %v4350_v19 = vpop.eup %4349 }
 0x215   : > { %v4352_v38 = vpop.eup %4351  ;;  %v3489_v16 = vadd.f32 1.0, %v4350_v19 }
 0x216   : > { %v4354_v22 = vpop.eup %4353  ;;  %v3487_v8 = vadd.f32 1.0, %v4352_v38 }
 0x217   : > { %v4199_v33 = vpop.f32.mrb[4].mxu0  ;;  %v4356_v36 = vpop.eup %4355  ;;  %4357 = vrcp.f32 %v3489_v16  ;;  %v3490_v44 = vadd.f32 1.0, %v4354_v22 }
 0x218   : > { %v4229_v2 = vadd.f32 %v4199_v33, %v4131_v60  ;;  %v3209_v10 = vpop.f32.mrb[5].mxu0  ;;  %4359 = vrcp.f32 %v3487_v8  ;;  %v3488_v60 = vadd.f32 1.0, %v4356_v36 }
 0x219   : > { %v4230_v1 = vadd.f32 %v3209_v10, %v2753_v28  ;;  %v4200_v63 = vpop.f32.mrb[6].mxu0  ;;  %4361 = vrcp.f32 %v3490_v44 }
 0x21a   : > { %v5999_v9 = vadd.f32 %v4229_v2, %v5980_v42  ;;  %v4231_v54 = vadd.f32 %v4200_v63, %v4132_v23  ;;  %v3212_v40 = vpop.f32.mrb[7].mxu0  ;;  %4363 = vrcp.f32 %v3488_v60 }
 0x21b   : > { %v6002_v45 = vadd.f32 %v4230_v1, %v5980_v42  ;;  %v4232_v27 = vadd.f32 %v3212_v40, %v2756_v29 }
 0x21c   : > { %v3928_v52 = vmul.f32 -1.442695, %v5999_v9  ;;  %v6006_v11 = vadd.f32 %v4231_v54, %v5980_v42 }
 0x21d   : > { %v3926_v28 = vmul.f32 -1.442695, %v6002_v45  ;;  %v6010_v23 = vadd.f32 %v4232_v27, %v5980_v42 }
 0x21e   : > { %v3929_v15 = vmul.f32 -1.442695, %v6006_v11  ;;  %4365 = vpow2.f32 %v3928_v52 }
 0x21f   : > { %v3927_v29 = vmul.f32 -1.442695, %v6010_v23  ;;  %4367 = vpow2.f32 %v3926_v28 }
 0x220   : > { %4369 = vpow2.f32 %v3929_v15 }
 0x221   : > { %4371 = vpow2.f32 %v3927_v29  ;;  %v4358_v55 = vpop.eup %4357 }
 0x222   : > { %v4360_v34 = vpop.eup %4359  ;;  %v3585_v43 = vmul.f32 %v4358_v55, %v3361_v17 }
 0x223   : > { %v4362_v25 = vpop.eup %4361  ;;  %v3583_v3 = vmul.f32 %v4360_v34, %v3359_v39 }
 0x224   : > { %v4364_v48 = vpop.eup %4363  ;;  %v3991_v33 = vpack.c.bf16 %v3585_v43, %v3585_v43  ;;  %v3586_v2 = vmul.f32 %v4362_v25, %v3362_v7 }
 0x225   : > { %v3989_v1 = vpack.c.bf16 %v3583_v3, %v3583_v3  ;;  %v3584_v63 = vmul.f32 %v4364_v48, %v5992_v0 }
 0x226   : > { %v4203_v56 = vpop.f32.mrb[8].mxu0  ;;  %3746 = vst.msk [vmem:[%s6018_s6 + $0x8] sm:$0xf] %vm3743_vm6, %v3991_v33  ;;  %v3992_v7 = vpack.c.bf16 %v3586_v2, %v3586_v2 }
 0x227   : > { %v4233_v57 = vadd.f32 %v4203_v56, %v5937_v21  ;;  %v3225_v6 = vpop.f32.mrb[9].mxu0  ;;  %3744 = vst.msk [vmem:[%s6018_s6] sm:$0xf] %vm3743_vm6, %v3989_v1  ;;  %v3990_v40 = vpack.c.bf16 %v3584_v63, %v3584_v63 }
 0x228   : > { %v4234_v14 = vadd.f32 %v3225_v6, %v5939_v58  ;;  %v4204_v53 = vpop.f32.mrb[10].mxu0  ;;  %v4366_v19 = vpop.eup %4365  ;;  %3747 = vst.msk [vmem:[%s6018_s6 + $0xc] sm:$0xf] %vm3743_vm6, %v3992_v7 }
 0x229   : > { %v6022_v17 = vadd.f32 %v4233_v57, %v5980_v42  ;;  %v4235_v21 = vadd.f32 %v4204_v53, %v5941_v35  ;;  %v3228_v10 = vpop.f32.mrb[11].mxu0  ;;  %v4368_v38 = vpop.eup %4367  ;;  %v3493_v16 = vadd.f32 1.0, %v4366_v19  ;;  %3745 = vst.msk [vmem:[%s6018_s6 + $0x4] sm:$0xf] %vm3743_vm6, %v3990_v40 }
 0x22a   : > { %v6027_v39 = vadd.f32 %v4234_v14, %v5980_v42  ;;  %v4236_v58 = vadd.f32 %v3228_v10, %v5943_v13  ;;  %v4370_v35 = vpop.eup %4369  ;;  %v3491_v22 = vadd.f32 1.0, %v4368_v38 }
 0x22b   : > { %v6033_v54 = vadd.f32 %v4235_v21, %v5980_v42  ;;  %v4372_v8 = vpop.eup %4371  ;;  %4373 = vrcp.f32 %v3493_v16  ;;  %v3494_v13 = vadd.f32 1.0, %v4370_v35  ;;  %v3932_v27 = vmul.f32 -1.442695, %v6022_v17 }
 0x22c   : > { %v6038_v0 = vadd.f32 %v4236_v58, %v5980_v42  ;;  %4375 = vrcp.f32 %v3491_v22  ;;  %v3492_v36 = vadd.f32 1.0, %v4372_v8  ;;  %v3930_v44 = vmul.f32 -1.442695, %v6027_v39 }
 0x22d   : > { %4377 = vrcp.f32 %v3494_v13  ;;  %v3933_v52 = vmul.f32 -1.442695, %v6033_v54 }
 0x22e   : > { %4379 = vrcp.f32 %v3492_v36  ;;  %v3931_v60 = vmul.f32 -1.442695, %v6038_v0 }
 0x22f   : > { %4381 = vpow2.f32 %v3932_v27 }
 0x230   : > { %4383 = vpow2.f32 %v3930_v44 }
 0x231   : > { %4385 = vpow2.f32 %v3933_v52 }
 0x232   : > { %4387 = vpow2.f32 %v3931_v60 }
 0x235   : > { %v4207_v28 = vpop.f32.mrb[12].mxu0  ;;  %v4374_v55 = vpop.eup %4373 }
 0x236   : > { %v4237_v15 = vadd.f32 %v4207_v28, %v5945_v61  ;;  %v3241_v29 = vpop.f32.mrb[13].mxu0  ;;  %v4376_v43 = vpop.eup %4375  ;;  %v3589_v57 = vmul.f32 %v4374_v55, %v5999_v9 }
 0x237   : > { %v4238_v56 = vadd.f32 %v3241_v29, %v5947_v20  ;;  %v4208_v34 = vpop.f32.mrb[14].mxu0  ;;  %v4378_v14 = vpop.eup %4377  ;;  %v3587_v53 = vmul.f32 %v4376_v43, %v6002_v45 }
 0x238   : > { %v6052_v6 = vadd.f32 %v4237_v15, %v5980_v42  ;;  %v4239_v25 = vadd.f32 %v4208_v34, %v5949_v51  ;;  %v3244_v3 = vpop.f32.mrb[15].mxu0  ;;  %v4380_v20 = vpop.eup %4379  ;;  %v3995_v33 = vpack.c.bf16 %v3589_v57, %v3589_v57  ;;  %v3590_v9 = vmul.f32 %v4378_v14, %v6006_v11 }
 0x239   : > { %v6057_v61 = vadd.f32 %v4238_v56, %v5980_v42  ;;  %v4240_v48 = vadd.f32 %v3244_v3, %v5951_v46  ;;  %v4382_v51 = vpop.eup %4381  ;;  %v3993_v10 = vpack.c.bf16 %v3587_v53, %v3587_v53  ;;  %v3588_v45 = vmul.f32 %v4380_v20, %v6010_v23 }
 0x23a   : > { %v3936_v2 = vmul.f32 -1.442695, %v6052_v6  ;;  %v6063_v21 = vadd.f32 %v4239_v25, %v5980_v42  ;;  %v4384_v46 = vpop.eup %4383  ;;  %3750 = vst.msk [vmem:[%s6018_s6 + $0x18] sm:$0xf] %vm3743_vm6, %v3995_v33  ;;  %v3996_v11 = vpack.c.bf16 %v3590_v9, %v3590_v9  ;;  %v3497_v63 = vadd.f32 1.0, %v4382_v51 }
 0x23b   : > { %v3934_v19 = vmul.f32 -1.442695, %v6057_v61  ;;  %v6068_v1 = vadd.f32 %v4240_v48, %v5980_v42  ;;  %v4386_v58 = vpop.eup %4385  ;;  %3748 = vst.msk [vmem:[%s6018_s6 + $0x10] sm:$0xf] %vm3743_vm6, %v3993_v10  ;;  %v3994_v38 = vpack.c.bf16 %v3588_v45, %v3588_v45  ;;  %v3495_v7 = vadd.f32 1.0, %v4384_v46 }
 0x23c   : > { %4389 = vpow2.f32 %v3936_v2  ;;  %v4388_v16 = vpop.eup %4387  ;;  %3751 = vst.msk [vmem:[%s6018_s6 + $0x1c] sm:$0xf] %vm3743_vm6, %v3996_v11  ;;  %v3498_v23 = vadd.f32 1.0, %v4386_v58  ;;  %v3937_v35 = vmul.f32 -1.442695, %v6063_v21 }
 0x23d   : > { %4391 = vpow2.f32 %v3934_v19  ;;  %3749 = vst.msk [vmem:[%s6018_s6 + $0x14] sm:$0xf] %vm3743_vm6, %v3994_v38  ;;  %v3496_v40 = vadd.f32 1.0, %v4388_v16  ;;  %v3935_v22 = vmul.f32 -1.442695, %v6068_v1 }
 0x23e   : > { %4393 = vrcp.f32 %v3497_v63 }
 0x23f   : > { %4395 = vrcp.f32 %v3495_v7 }
 0x240   : > { %4397 = vrcp.f32 %v3498_v23 }
 0x241   : > { %4399 = vrcp.f32 %v3496_v40 }
 0x242   : > { %4401 = vpow2.f32 %v3937_v35 }
 0x243   : > { %4403 = vpow2.f32 %v3935_v22 }
 0x246   : > { %v4390_v8 = vpop.eup %4389 }
 0x247   : > { %v4392_v13 = vpop.eup %4391  ;;  %v3501_v27 = vadd.f32 1.0, %v4390_v8 }
 0x248   : > { %v4394_v36 = vpop.eup %4393  ;;  %v3499_v44 = vadd.f32 1.0, %v4392_v13 }
 0x249   : > { %v4396_v52 = vpop.eup %4395  ;;  %v3593_v60 = vmul.f32 %v4394_v36, %v6022_v17  ;;  %4405 = vrcp.f32 %v3501_v27  ;;  %v4211_v28 = vpop.f32.mrb[16].mxu0 }
 0x24a   : > { %v4398_v15 = vpop.eup %4397  ;;  %v3591_v29 = vmul.f32 %v4396_v52, %v6027_v39  ;;  %4407 = vrcp.f32 %v3499_v44  ;;  %v4241_v55 = vadd.f32 %v4211_v28, %v5953_v59  ;;  %v3257_v56 = vpop.f32.mrb[17].mxu0 }
 0x24b   : > { %v4400_v34 = vpop.eup %4399  ;;  %v3999_v43 = vpack.c.bf16 %v3593_v60, %v3593_v60  ;;  %v3594_v57 = vmul.f32 %v4398_v15, %v6033_v54  ;;  %v4242_v25 = vadd.f32 %v3257_v56, %v5955_v30  ;;  %v4212_v3 = vpop.f32.mrb[18].mxu0 }
 0x24c   : > { %v4402_v14 = vpop.eup %4401  ;;  %v3997_v17 = vpack.c.bf16 %v3591_v29, %v3591_v29  ;;  %v3592_v53 = vmul.f32 %v4400_v34, %v6038_v0  ;;  %v6087_v39 = vadd.f32 %v4241_v55, %v5980_v42  ;;  %v4243_v48 = vadd.f32 %v4212_v3, %v5957_v37  ;;  %v3260_v59 = vpop.f32.mrb[19].mxu0 }
 0x24d   : > { %v4404_v20 = vpop.eup %4403  ;;  %3754 = vst.msk [vmem:[%s6018_s6 + $0x28] sm:$0xf] %vm3743_vm6, %v3999_v43  ;;  %v4000_v33 = vpack.c.bf16 %v3594_v57, %v3594_v57  ;;  %v3502_v54 = vadd.f32 1.0, %v4402_v14  ;;  %v6093_v30 = vadd.f32 %v4242_v25, %v5980_v42  ;;  %v4244_v9 = vadd.f32 %v3260_v59, %v5959_v31 }
 0x24e   : > { %3752 = vst.msk [vmem:[%s6018_s6 + $0x20] sm:$0xf] %vm3743_vm6, %v3997_v17  ;;  %v3998_v0 = vpack.c.bf16 %v3592_v53, %v3592_v53  ;;  %v3500_v2 = vadd.f32 1.0, %v4404_v20  ;;  %v3940_v51 = vmul.f32 -1.442695, %v6087_v39  ;;  %v6100_v37 = vadd.f32 %v4243_v48, %v5980_v42 }
 0x24f   : > { %3755 = vst.msk [vmem:[%s6018_s6 + $0x2c] sm:$0xf] %vm3743_vm6, %v4000_v33  ;;  %4409 = vrcp.f32 %v3502_v54  ;;  %v3938_v10 = vmul.f32 -1.442695, %v6093_v30  ;;  %v6106_v45 = vadd.f32 %v4244_v9, %v5980_v42 }
 0x250   : > { %3753 = vst.msk [vmem:[%s6018_s6 + $0x24] sm:$0xf] %vm3743_vm6, %v3998_v0  ;;  %4411 = vrcp.f32 %v3500_v2  ;;  %v3941_v31 = vmul.f32 -1.442695, %v6100_v37 }
 0x251   : > { %4413 = vpow2.f32 %v3940_v51  ;;  %v3939_v19 = vmul.f32 -1.442695, %v6106_v45 }
 0x252   : > { %4415 = vpow2.f32 %v3938_v10 }
 0x253   : > { %v4406_v46 = vpop.eup %4405  ;;  %4417 = vpow2.f32 %v3941_v31 }
 0x254   : > { %v4408_v11 = vpop.eup %4407  ;;  %v3597_v63 = vmul.f32 %v4406_v46, %v6052_v6  ;;  %4419 = vpow2.f32 %v3939_v19 }
 0x255   : > { %v3595_v58 = vmul.f32 %v4408_v11, %v6057_v61 }
 0x256   : > { %v4003_v38 = vpack.c.bf16 %v3597_v63, %v3597_v63 }
 0x257   : > { %v4001_v7 = vpack.c.bf16 %v3595_v58, %v3595_v58 }
 0x258   : > { %3758 = vst.msk [vmem:[%s6018_s6 + $0x38] sm:$0xf] %vm3743_vm6, %v4003_v38  ;;  %v4215_v16 = vpop.f32.mrb[20].mxu0 }
 0x259   : > { %v4410_v23 = vpop.eup %4409  ;;  %3756 = vst.msk [vmem:[%s6018_s6 + $0x30] sm:$0xf] %vm3743_vm6, %v4001_v7  ;;  %v4245_v35 = vadd.f32 %v4215_v16, %v5961_v41  ;;  %v3273_v40 = vpop.f32.mrb[21].mxu0 }
 0x25a   : > { %v4412_v22 = vpop.eup %4411  ;;  %v3598_v8 = vmul.f32 %v4410_v23, %v6063_v21  ;;  %v4246_v13 = vadd.f32 %v3273_v40, %v5963_v32  ;;  %v4216_v6 = vpop.f32.mrb[22].mxu0 }
 0x25b   : > { %v4414_v27 = vpop.eup %4413  ;;  %v3596_v61 = vmul.f32 %v4412_v22, %v6068_v1  ;;  %v6123_v36 = vadd.f32 %v4245_v35, %v5980_v42  ;;  %v4247_v44 = vadd.f32 %v4216_v6, %v5965_v4  ;;  %v3276_v52 = vpop.f32.mrb[23].mxu0 }
 0x25c   : > { %v4416_v60 = vpop.eup %4415  ;;  %v4004_v41 = vpack.c.bf16 %v3598_v8, %v3598_v8  ;;  %v3505_v28 = vadd.f32 1.0, %v4414_v27  ;;  %v6127_v15 = vadd.f32 %v4246_v13, %v5980_v42  ;;  %v4248_v32 = vadd.f32 %v3276_v52, %v5967_v50 }
 0x25d   : > { %v4418_v21 = vpop.eup %4417  ;;  %v4002_v29 = vpack.c.bf16 %v3596_v61, %v3596_v61  ;;  %v3503_v55 = vadd.f32 1.0, %v4416_v60  ;;  %v6131_v1 = vadd.f32 %v4247_v44, %v5980_v42  ;;  %v3944_v34 = vmul.f32 -1.442695, %v6123_v36 }
 0x25e   : > { %v4420_v56 = vpop.eup %4419  ;;  %3759 = vst.msk [vmem:[%s6018_s6 + $0x3c] sm:$0xf] %vm3743_vm6, %v4004_v41  ;;  %4421 = vrcp.f32 %v3505_v28  ;;  %v3506_v4 = vadd.f32 1.0, %v4418_v21  ;;  %v6137_v43 = vadd.f32 %v4248_v32, %v5980_v42  ;;  %v3942_v57 = vmul.f32 -1.442695, %v6127_v15 }
 0x25f   : > { %3757 = vst.msk [vmem:[%s6018_s6 + $0x34] sm:$0xf] %vm3743_vm6, %v4002_v29  ;;  %4423 = vrcp.f32 %v3503_v55  ;;  %v3504_v50 = vadd.f32 1.0, %v4420_v56  ;;  %v3945_v25 = vmul.f32 -1.442695, %v6131_v1 }
 0x260   : > { %4425 = vrcp.f32 %v3506_v4  ;;  %v3943_v3 = vmul.f32 -1.442695, %v6137_v43 }
 0x261   : > { %4427 = vrcp.f32 %v3504_v50  ;;  %v4219_v14 = vpop.f32.mrb[24].mxu0 }
 0x262   : > { %4429 = vpow2.f32 %v3944_v34  ;;  %v4249_v17 = vadd.f32 %v4219_v14, %v5969_v62  ;;  %v3289_v53 = vpop.f32.mrb[25].mxu0 }
 0x263   : > { %4431 = vpow2.f32 %v3942_v57  ;;  %v4250_v48 = vadd.f32 %v3289_v53, %v5971_v49  ;;  %v4220_v59 = vpop.f32.mrb[26].mxu0 }
 0x264   : > { %4433 = vpow2.f32 %v3945_v25  ;;  %v6147_v20 = vadd.f32 %v4249_v17, %v5980_v42  ;;  %v4251_v33 = vadd.f32 %v4220_v59, %v5973_v12  ;;  %v3292_v54 = vpop.f32.mrb[27].mxu0 }
 0x265   : > { %4435 = vpow2.f32 %v3943_v3  ;;  %v6151_v9 = vadd.f32 %v4250_v48, %v5980_v42  ;;  %v4252_v0 = vadd.f32 %v3292_v54, %v5975_v18 }
 0x266   : > { %v3948_v2 = vmul.f32 -1.442695, %v6147_v20  ;;  %v6156_v62 = vadd.f32 %v4251_v33, %v5980_v42 }
 0x267   : > { %v3946_v49 = vmul.f32 -1.442695, %v6151_v9  ;;  %v6160_v10 = vadd.f32 %v4252_v0, %v5980_v42 }
 0x268   : > { %v4422_v51 = vpop.eup %4421  ;;  %4437 = vpow2.f32 %v3948_v2  ;;  %v3949_v19 = vmul.f32 -1.442695, %v6156_v62 }
 0x269   : > { %v4424_v31 = vpop.eup %4423  ;;  %v3601_v12 = vmul.f32 %v4422_v51, %v6087_v39  ;;  %4439 = vpow2.f32 %v3946_v49  ;;  %v3947_v11 = vmul.f32 -1.442695, %v6160_v10 }
 0x26a   : > { %v4426_v46 = vpop.eup %4425  ;;  %v3599_v18 = vmul.f32 %v4424_v31, %v6093_v30  ;;  %4441 = vpow2.f32 %v3949_v19 }
 0x26b   : > { %v4428_v63 = vpop.eup %4427  ;;  %v4007_v58 = vpack.c.bf16 %v3601_v12, %v3601_v12  ;;  %v3602_v38 = vmul.f32 %v4426_v46, %v6100_v37  ;;  %4443 = vpow2.f32 %v3947_v11 }
 0x26c   : > { %v4430_v7 = vpop.eup %4429  ;;  %v4005_v16 = vpack.c.bf16 %v3599_v18, %v3599_v18  ;;  %v3600_v39 = vmul.f32 %v4428_v63, %v6106_v45 }
 0x26d   : > { %v4432_v23 = vpop.eup %4431  ;;  %3762 = vst.msk [vmem:[%s6018_s6 + $0x48] sm:$0xf] %vm3743_vm6, %v4007_v58  ;;  %v4008_v30 = vpack.c.bf16 %v3602_v38, %v3602_v38  ;;  %v3509_v35 = vadd.f32 1.0, %v4430_v7 }
 0x26e   : > { %v4434_v40 = vpop.eup %4433  ;;  %3760 = vst.msk [vmem:[%s6018_s6 + $0x40] sm:$0xf] %vm3743_vm6, %v4005_v16  ;;  %v4006_v22 = vpack.c.bf16 %v3600_v39, %v3600_v39  ;;  %v3507_v8 = vadd.f32 1.0, %v4432_v23  ;;  %v4223_v13 = vpop.f32.mrb[28].mxu0 }
 0x26f   : > { %v4436_v37 = vpop.eup %4435  ;;  %3763 = vst.msk [vmem:[%s6018_s6 + $0x4c] sm:$0xf] %vm3743_vm6, %v4008_v30  ;;  %4445 = vrcp.f32 %v3509_v35  ;;  %v3510_v6 = vadd.f32 1.0, %v4434_v40  ;;  %v4253_v45 = vadd.f32 %v4223_v13, %v5983_v26  ;;  %v3305_v27 = vpop.f32.mrb[29].mxu0 }
 0x270   : > { %3761 = vst.msk [vmem:[%s6018_s6 + $0x44] sm:$0xf] %vm3743_vm6, %v4006_v22  ;;  %4447 = vrcp.f32 %v3507_v8  ;;  %v3508_v61 = vadd.f32 1.0, %v4436_v37  ;;  %v4254_v44 = vadd.f32 %v3305_v27, %v5986_v47  ;;  %v4224_v52 = vpop.f32.mrb[30].mxu0 }
 0x271   : > { %4449 = vrcp.f32 %v3510_v6  ;;  %v6179_v60 = vadd.f32 %v4253_v45, %v5980_v42  ;;  %v4255_v41 = vadd.f32 %v4224_v52, %v5989_v24  ;;  %v3308_v28 = vpop.f32.mrb[31].mxu0 }
 0x272   : > { %4451 = vrcp.f32 %v3508_v61  ;;  %v6183_v32 = vadd.f32 %v4254_v44, %v5980_v42  ;;  %v4256_v26 = vadd.f32 %v3308_v28, %v5994_v5  ;;  %v4438_v21 = vpop.eup %4437 }
 0x273   : > { %v3952_v29 = vmul.f32 -1.442695, %v6179_v60  ;;  %v6188_v55 = vadd.f32 %v4255_v41, %v5980_v42  ;;  %v4440_v47 = vpop.eup %4439  ;;  %v3513_v56 = vadd.f32 1.0, %v4438_v21 }
 0x274   : > { %v6191_v4 = vadd.f32 %v4256_v26, %v5980_v42  ;;  %v4442_v34 = vpop.eup %4441  ;;  %v3511_v24 = vadd.f32 1.0, %v4440_v47  ;;  %v3950_v25 = vmul.f32 -1.442695, %v6183_v32 }
 0x275   : > { %4453 = vpow2.f32 %v3952_v29  ;;  %v4444_v50 = vpop.eup %4443  ;;  %v3514_v57 = vadd.f32 1.0, %v4442_v34  ;;  %v3953_v3 = vmul.f32 -1.442695, %v6188_v55 }
 0x276   : > { %4455 = vrcp.f32 %v3513_v56  ;;  %v3512_v5 = vadd.f32 1.0, %v4444_v50  ;;  %v3951_v14 = vmul.f32 -1.442695, %v6191_v4 }
 0x277   : > { %4457 = vrcp.f32 %v3511_v24 }
 0x278   : > { %4459 = vrcp.f32 %v3514_v57 }
 0x279   : > { %v4446_v17 = vpop.eup %4445  ;;  %4461 = vrcp.f32 %v3512_v5 }
 0x27a   : > { %v4448_v42 = vpop.eup %4447  ;;  %v3605_v53 = vmul.f32 %v4446_v17, %v6123_v36  ;;  %4463 = vpow2.f32 %v3950_v25 }
 0x27b   : > { %v4450_v48 = vpop.eup %4449  ;;  %v3603_v59 = vmul.f32 %v4448_v42, %v6127_v15  ;;  %4465 = vpow2.f32 %v3953_v3 }
 0x27c   : > { %v4452_v33 = vpop.eup %4451  ;;  %v4011_v54 = vpack.c.bf16 %v3605_v53, %v3605_v53  ;;  %v3606_v0 = vmul.f32 %v4450_v48, %v6131_v1  ;;  %4467 = vpow2.f32 %v3951_v14 }
 0x27d   : > { %v4009_v2 = vpack.c.bf16 %v3603_v59, %v3603_v59  ;;  %v3604_v51 = vmul.f32 %v4452_v33, %v6137_v43 }
 0x27e   : > { %3766 = vst.msk [vmem:[%s6018_s6 + $0x58] sm:$0xf] %vm3743_vm6, %v4011_v54  ;;  %v4012_v49 = vpack.c.bf16 %v3606_v0, %v3606_v0 }
 0x27f   : > { %v4454_v31 = vpop.eup %4453  ;;  %3764 = vst.msk [vmem:[%s6018_s6 + $0x50] sm:$0xf] %vm3743_vm6, %v4009_v2  ;;  %v4010_v36 = vpack.c.bf16 %v3604_v51, %v3604_v51 }
 0x280   : > { %v4456_v12 = vpop.eup %4455  ;;  %3767 = vst.msk [vmem:[%s6018_s6 + $0x5c] sm:$0xf] %vm3743_vm6, %v4012_v49  ;;  %v3517_v15 = vadd.f32 1.0, %v4454_v31 }
 0x281   : > { %v4458_v19 = vpop.eup %4457  ;;  %3765 = vst.msk [vmem:[%s6018_s6 + $0x54] sm:$0xf] %vm3743_vm6, %v4010_v36  ;;  %v3609_v1 = vmul.f32 %v4456_v12, %v6147_v20 }
 0x282   : > { %v4460_v46 = vpop.eup %4459  ;;  %v3607_v43 = vmul.f32 %v4458_v19, %v6151_v9  ;;  %4469 = vrcp.f32 %v3517_v15 }
 0x283   : > { %v4462_v18 = vpop.eup %4461  ;;  %v4015_v11 = vpack.c.bf16 %v3609_v1, %v3609_v1  ;;  %v3610_v63 = vmul.f32 %v4460_v46, %v6156_v62 }
 0x284   : > { %v4464_v58 = vpop.eup %4463  ;;  %v4013_v38 = vpack.c.bf16 %v3607_v43, %v3607_v43  ;;  %v3608_v7 = vmul.f32 %v4462_v18, %v6160_v10 }
 0x285   : > { %v4466_v16 = vpop.eup %4465  ;;  %3770 = vst.msk [vmem:[%s6018_s6 + $0x68] sm:$0xf] %vm3743_vm6, %v4015_v11  ;;  %v4016_v39 = vpack.c.bf16 %v3610_v63, %v3610_v63  ;;  %v3515_v20 = vadd.f32 1.0, %v4464_v58 }
 0x286   : > { %v4468_v23 = vpop.eup %4467  ;;  %3768 = vst.msk [vmem:[%s6018_s6 + $0x60] sm:$0xf] %vm3743_vm6, %v4013_v38  ;;  %v4014_v9 = vpack.c.bf16 %v3608_v7, %v3608_v7  ;;  %v3518_v30 = vadd.f32 1.0, %v4466_v16 }
 0x287   : > { %3771 = vst.msk [vmem:[%s6018_s6 + $0x6c] sm:$0xf] %vm3743_vm6, %v4016_v39  ;;  %4471 = vrcp.f32 %v3515_v20  ;;  %v3516_v35 = vadd.f32 1.0, %v4468_v23 }
 0x288   : > { %3769 = vst.msk [vmem:[%s6018_s6 + $0x64] sm:$0xf] %vm3743_vm6, %v4014_v9  ;;  %4473 = vrcp.f32 %v3518_v30 }
 0x289   : > { %4475 = vrcp.f32 %v3516_v35 }
 0x28c   : > { %v4470_v62 = vpop.eup %4469 }
 0x28d   : > { %v3613_v10 = vmul.f32 %v4470_v62, %v6179_v60 }
 0x28f   : > { %v4019_v40 = vpack.c.bf16 %v3613_v10, %v3613_v10 }
 0x291   : > { %v4472_v22 = vpop.eup %4471  ;;  %3774 = vst.msk [vmem:[%s6018_s6 + $0x78] sm:$0xf] %vm3743_vm6, %v4019_v40 }
 0x292   : > { %v4474_v8 = vpop.eup %4473  ;;  %v3611_v13 = vmul.f32 %v4472_v22, %v6183_v32 }
 0x293   : > { %v4476_v37 = vpop.eup %4475  ;;  %v3614_v6 = vmul.f32 %v4474_v8, %v6188_v55 }
 0x294   : > { %v4017_v45 = vpack.c.bf16 %v3611_v13, %v3611_v13  ;;  %v3612_v27 = vmul.f32 %v4476_v37, %v6191_v4 }
 0x295   : > { %v4020_v61 = vpack.c.bf16 %v3614_v6, %v3614_v6 }
 0x296   : > { %3772 = vst.msk [vmem:[%s6018_s6 + $0x70] sm:$0xf] %vm3743_vm6, %v4017_v45  ;;  %v4018_v44 = vpack.c.bf16 %v3612_v27, %v3612_v27 }
 0x297   : > { %3775 = vst.msk [vmem:[%s6018_s6 + $0x7c] sm:$0xf] %vm3743_vm6, %v4020_v61 }
 0x298   : > { %3773 = vst.msk [vmem:[%s6018_s6 + $0x74] sm:$0xf] %vm3743_vm6, %v4018_v44 }
 0x299 PF: > { %s13_s12 = sadd.s32 1, %s4499_s12  }
 0x29a   : > { %p10_p5 = scmp.ge.s32.totalorder %s13_s12, 4  }
 0x29c   :  { %12 = sbr.rel (!%p10_p5) target bundleno = 1 (0x1), region = 62 }

</bundles_post_ra>
